<compile_context>
chip_gen: v7x
topology: tpu7x:2x2x1
jax: 0.10.0
libtpu: 0.0.40
codegen_flags: <defaults>
</compile_context>

<pallas_src>
import functools

import jax
import jax.numpy as jnp
from jax import lax
from jax.experimental import pallas as pl
from jax.experimental.pallas import tpu as pltpu

# ------------------------- module hyper-parameters ---------------------------
KERNEL = (9, 9, 9)                                  # torch: self.kernel / self.filt
RADIUS = (KERNEL[0] - 1) // 2                       # 4 -> "same" padding
KSIZE = float(KERNEL[0] * KERNEL[1] * KERNEL[2])    # 729
EPS = 1e-5


# ------------------------------ helpers --------------------------------------
def _band_matrix(size, radius, dtype):
    """size x size matrix with B[i, j] = 1 iff |i - j| <= radius.

    Right-multiplying a (rows, size) slab by B computes the 9-wide sliding
    window sum along the trailing axis with implicit zero padding (out-of-range
    taps simply have no row), i.e. a 'same' box conv along that axis.
    """
    i = lax.broadcasted_iota(jnp.int32, (size, size), 0)
    j = lax.broadcasted_iota(jnp.int32, (size, size), 1)
    return (jnp.abs(i - j) <= radius).astype(dtype)


def _vmem_limit_bytes():
    # Raise the scoped-VMEM cap (defaults: 16 MiB v5e / 32 MiB v6e,v7x) so
    # whole volumes per grid step do not force spills, while staying safely
    # under the physical capacity of the current chip.
    try:
        cap = pltpu.get_tpu_info().vmem_capacity_bytes
    except Exception:
        cap = 64 * 1024 * 1024
    return int(min(100 * 1024 * 1024, cap * 3 // 4))


# ------------------------------ Pallas kernel --------------------------------
def _ncc3d_kernel(x_ref, y_ref, out_ref, dpad_ref, *, d, h, w, ks):
    """One (batch*channel) volume per grid step.

    x_ref, y_ref : (1, D*H, W)      unpadded input / target volume (caller dtype)
    out_ref      : (1, 1, 1)        per-volume sum of cc
    dpad_ref     : (5, D+8, H, W)   f32 scratch for the depth-padded box pass
    """
    f32 = jnp.float32
    r = RADIUS

    # Cast after the DMA (keeps HBM traffic at the caller's dtype width).
    x = x_ref[0].astype(f32)                                   # (D*H, W)
    y = y_ref[0].astype(f32)

    # --- five fields fused into one stack -> a single box-sum pipeline -------
    s = jnp.concatenate([x, y, x * x, y * y, x * y], axis=0)   # (5*D*H, W)

    # --- W (lane) pass on the MXU: banded-ones matmul -------------------------
    bw = _band_matrix(w, r, f32)                               # (W, W)
    s = jnp.dot(s, bw, preferred_element_type=f32)             # (5*D*H, W)
    s = s.reshape(5 * d, h, w)                                 # leading split (free)

    # --- H (sublane) pass on the MXU: batched banded matmul -------------------
    # out[n, k, w'] = sum_h Bh[k, h] * s[n, h, w']  (Bh is symmetric).
    bh = _band_matrix(h, r, f32)                               # (H, H)
    bh_b = jnp.broadcast_to(bh, (5 * d, h, h))
    s = jnp.einsum('nkh,nhw->nkw', bh_b, s,
                   preferred_element_type=f32)                 # (5*D, H, W)

    # --- D (depth) pass: in-kernel zero pad + log-doubling shift adds ---------
    # (leading-axis slices are cheap; 4 adds/voxel/field instead of 8)
    zeros_band = jnp.zeros((5, r, h, w), f32)
    dpad_ref[:, :r, :, :] = zeros_band                         # zero the halo bands
    dpad_ref[:, r + d:, :, :] = zeros_band
    dpad_ref[:, r:r + d, :, :] = s.reshape(5, d, h, w)
    t = dpad_ref[...]                                          # (5, D+8, H, W)
    t1 = t[:, :-1] + t[:, 1:]                                  # window 2
    t2 = t1[:, :-2] + t1[:, 2:]                                # window 4
    t4 = t2[:, :-4] + t2[:, 4:]                                # window 8
    s = t4[:, :d] + t[:, 2 * r:]                               # window 9 -> (5, D, H, W)

    i_sum, t_sum = s[0], s[1]
    ii_sum, tt_sum, it_sum = s[2], s[3], s[4]

    # --- cc formula (identical to the torch reference) ------------------------
    inv_ks = 1.0 / ks                                          # constant reciprocal
    ihat = i_sum * inv_ks
    that = t_sum * inv_ks
    cross = it_sum - ihat * t_sum - that * i_sum + that * ihat * ks
    t_var = tt_sum - 2.0 * that * t_sum + that * that * ks
    i_var = ii_sum - 2.0 * ihat * i_sum + ihat * ihat * ks

    den = t_var * i_var + EPS
    r_inv = pl.reciprocal(den, approx=True)                    # EUP slot (nearly free)
    r_inv = r_inv * (2.0 - den * r_inv)                        # one Newton step -> f32 accuracy
    cc = cross * cross * r_inv

    out_ref[...] = jnp.sum(cc).reshape(1, 1, 1)


# --------------------------------- wrapper -----------------------------------
def cross_correlation_3d_loss(inp, tgt):
    """Forward pass of crossCorrelation3D: loss = -mean(local NCC over 9x9x9 windows)."""
    b, c, d, h, w = inp.shape
    # The torch module's ones[1,1,9,9,9] filter implies C == 1; for C > 1 we
    # treat channels like batch (per-channel box sums), same as before.
    n = b * c

    # (n, D*H, W): one long contiguous DMA region per volume, no padded copies.
    x = inp.reshape(n, d * h, w)
    y = tgt.reshape(n, d * h, w)

    kernel = functools.partial(_ncc3d_kernel, d=d, h=h, w=w, ks=KSIZE)

    partial_sums = pl.pallas_call(
        kernel,
        out_shape=jax.ShapeDtypeStruct((n, 1, 1), jnp.float32),
        grid_spec=pltpu.PrefetchScalarGridSpec(
            num_scalar_prefetch=0,
            grid=(n,),
            in_specs=[
                pl.BlockSpec((1, d * h, w), lambda i: (i, 0, 0)),
                pl.BlockSpec((1, d * h, w), lambda i: (i, 0, 0)),
            ],
            out_specs=pl.BlockSpec((1, 1, 1), lambda i: (i, 0, 0)),
            scratch_shapes=[pltpu.VMEM((5, d + 2 * RADIUS, h, w), jnp.float32)],
        ),
        compiler_params=pltpu.CompilerParams(
            dimension_semantics=("parallel",),
            vmem_limit_bytes=_vmem_limit_bytes(),
        ),
    )(x, y)

    total = jnp.sum(partial_sums)
    return -total / (n * d * h * w)


# ----------------------------- pure-JAX reference ----------------------------
def _reference(inp, tgt):
    inp = inp.astype(jnp.float32)
    tgt = tgt.astype(jnp.float32)
    b, c, d, h, w = inp.shape
    filt = jnp.ones((1, 1) + KERNEL, jnp.float32)

    def box(v):
        return lax.conv_general_dilated(
            v.reshape(b * c, 1, d, h, w), filt,
            window_strides=(1, 1, 1),
            padding=((RADIUS, RADIUS),) * 3,
            dimension_numbers=("NCDHW", "OIDHW", "NCDHW"))

    i_sum = box(inp)
    t_sum = box(tgt)
    ii_sum = box(inp * inp)
    tt_sum = box(tgt * tgt)
    it_sum = box(inp * tgt)

    ihat = i_sum / KSIZE
    that = t_sum / KSIZE
    cross = it_sum - ihat * t_sum - that * i_sum + that * ihat * KSIZE
    t_var = tt_sum - 2 * that * t_sum + that * that * KSIZE
    i_var = ii_sum - 2 * ihat * i_sum + ihat * ihat * KSIZE
    cc = cross * cross / (t_var * i_var + EPS)
    return -jnp.mean(cc)


# ----------------------------------- main -------------------------------------
if __name__ == "__main__":
    key = jax.random.PRNGKey(0)
    k1, k2 = jax.random.split(key)
    # (B, C=1, D, H, W) — the torch module's ones[1,1,9,9,9] filter implies C=1.
    shape = (2, 1, 16, 16, 16)
    inp = jax.random.uniform(k1, shape, dtype=jnp.float32)
    tgt = jax.random.uniform(k2, shape, dtype=jnp.float32)

    loss_fn = jax.jit(cross_correlation_3d_loss)
    out = jax.block_until_ready(loss_fn(inp, tgt))
    ref = jax.block_until_ready(_reference(inp, tgt))

    assert jnp.isfinite(out), "kernel produced non-finite output"
    assert jnp.allclose(out, ref, rtol=1e-3, atol=1e-5), (out, ref)
    print("KERNEL_OK")
</pallas_src>

<mosaic_0001>
module attributes {stable_mosaic.version = 11 : i64} {
  func.func @_ncc3d_kernel(%arg0: i32, %arg1: memref<1x256x16xf32, #tpu.memory_space<vmem>>, %arg2: memref<1x256x16xf32, #tpu.memory_space<vmem>>, %arg3: memref<1x1x1xf32, #tpu.memory_space<vmem>>, %arg4: memref<5x24x16x16xf32, #tpu.memory_space<vmem>>) attributes {dimension_semantics = [#tpu.dimension_semantics<parallel>], iteration_bounds = array<i64: 2>, scalar_prefetch = 0 : i64, scratch_operands = 1 : i64, tpu.core_type = #tpu.core_type<tc>, window_params = [{transform_indices = @transform_0, window_bounds = array<i64: 1, 256, 16>}, {transform_indices = @transform_1, window_bounds = array<i64: 1, 256, 16>}, {transform_indices = @transform_2, window_bounds = array<i64: 1, 1, 1>}]} {
    %c0 = arith.constant 0 : index
    %c0_0 = arith.constant 0 : index
    %c0_1 = arith.constant 0 : index
    %0 = vector.load %arg1[%c0, %c0_0, %c0_1] : memref<1x256x16xf32, #tpu.memory_space<vmem>>, vector<1x256x16xf32>
    %1 = vector.shape_cast %0 : vector<1x256x16xf32> to vector<256x16xf32>
    %c0_2 = arith.constant 0 : index
    %c0_3 = arith.constant 0 : index
    %c0_4 = arith.constant 0 : index
    %2 = vector.load %arg2[%c0_2, %c0_3, %c0_4] : memref<1x256x16xf32, #tpu.memory_space<vmem>>, vector<1x256x16xf32>
    %3 = vector.shape_cast %2 : vector<1x256x16xf32> to vector<256x16xf32>
    %4 = arith.mulf %1, %1 : vector<256x16xf32>
    %5 = arith.mulf %3, %3 : vector<256x16xf32>
    %6 = arith.mulf %1, %3 : vector<256x16xf32>
    %7 = tpu.concatenate %1, %3, %4, %5, %6 in 0 : vector<256x16xf32>, vector<256x16xf32>, vector<256x16xf32>, vector<256x16xf32>, vector<256x16xf32> -> vector<1280x16xf32>
    %8 = tpu.iota {dimensions = array<i32: 0>} : vector<16x16xi32>
    %9 = tpu.iota {dimensions = array<i32: 1>} : vector<16x16xi32>
    %10 = arith.subi %8, %9 : vector<16x16xi32>
    %11 = math.absi %10 : vector<16x16xi32>
    %c4_i32 = arith.constant 4 : i32
    %12 = vector.broadcast %c4_i32 : i32 to vector<16x16xi32>
    %13 = arith.cmpi sle, %11, %12 : vector<16x16xi32>
    %14 = arith.extui %13 : vector<16x16xi1> to vector<16x16xi32>
    %15 = arith.sitofp %14 : vector<16x16xi32> to vector<16x16xf32>
    %cst = arith.constant dense<0.000000e+00> : vector<1280x16xf32>
    %16 = tpu.matmul %7, %15, %cst {dimension_numbers = #tpu.dot_dimension_numbers<[1], [0], [0], [1], [0, 0, 1, 1], [], []>} : vector<1280x16xf32>, vector<16x16xf32>, vector<1280x16xf32> -> vector<1280x16xf32>
    %17 = vector.shape_cast %16 : vector<1280x16xf32> to vector<80x16x16xf32>
    %18 = tpu.iota {dimensions = array<i32: 0>} : vector<16x16xi32>
    %19 = tpu.iota {dimensions = array<i32: 1>} : vector<16x16xi32>
    %20 = arith.subi %18, %19 : vector<16x16xi32>
    %21 = math.absi %20 : vector<16x16xi32>
    %c4_i32_5 = arith.constant 4 : i32
    %22 = vector.broadcast %c4_i32_5 : i32 to vector<16x16xi32>
    %23 = arith.cmpi sle, %21, %22 : vector<16x16xi32>
    %24 = arith.extui %23 : vector<16x16xi1> to vector<16x16xi32>
    %25 = arith.sitofp %24 : vector<16x16xi32> to vector<16x16xf32>
    %26 = vector.shape_cast %25 : vector<16x16xf32> to vector<1x16x16xf32>
    %27 = vector.broadcast %26 : vector<1x16x16xf32> to vector<80x16x16xf32>
    "tpu.trace_start"() <{level = 10 : i32, message = "nkh,nhw->nkw"}> : () -> ()
    %cst_6 = arith.constant dense<0.000000e+00> : vector<80x16x16xf32>
    %28 = tpu.matmul %27, %17, %cst_6 {dimension_numbers = #tpu.dot_dimension_numbers<[2], [1], [1], [2], [0, 0, 0, 1, 1, 2], [0], [0]>} : vector<80x16x16xf32>, vector<80x16x16xf32>, vector<80x16x16xf32> -> vector<80x16x16xf32>
    %cst_7 = arith.constant 0.000000e+00 : f32
    "tpu.trace_stop"() : () -> ()
    %29 = vector.broadcast %cst_7 : f32 to vector<5x4x16x16xf32>
    %c0_8 = arith.constant 0 : index
    %c0_9 = arith.constant 0 : index
    %c0_10 = arith.constant 0 : index
    %c0_11 = arith.constant 0 : index
    %30 = vector.load %arg4[%c0_8, %c0_9, %c0_10, %c0_11] : memref<5x24x16x16xf32, #tpu.memory_space<vmem>>, vector<5x4x16x16xf32>
    tpu.vector_store %arg4[%c0_8, %c0_9, %c0_10, %c0_11], %29 {strides = array<i32>} : memref<5x24x16x16xf32, #tpu.memory_space<vmem>>, vector<5x4x16x16xf32>,
    %c0_12 = arith.constant 0 : index
    %c20 = arith.constant 20 : index
    %c0_13 = arith.constant 0 : index
    %c0_14 = arith.constant 0 : index
    %31 = vector.load %arg4[%c0_12, %c20, %c0_13, %c0_14] : memref<5x24x16x16xf32, #tpu.memory_space<vmem>>, vector<5x4x16x16xf32>
    tpu.vector_store %arg4[%c0_12, %c20, %c0_13, %c0_14], %29 {strides = array<i32>} : memref<5x24x16x16xf32, #tpu.memory_space<vmem>>, vector<5x4x16x16xf32>,
    %32 = vector.shape_cast %28 : vector<80x16x16xf32> to vector<5x16x16x16xf32>
    %c0_15 = arith.constant 0 : index
    %c4 = arith.constant 4 : index
    %c0_16 = arith.constant 0 : index
    %c0_17 = arith.constant 0 : index
    %33 = vector.load %arg4[%c0_15, %c4, %c0_16, %c0_17] : memref<5x24x16x16xf32, #tpu.memory_space<vmem>>, vector<5x16x16x16xf32>
    tpu.vector_store %arg4[%c0_15, %c4, %c0_16, %c0_17], %32 {strides = array<i32>} : memref<5x24x16x16xf32, #tpu.memory_space<vmem>>, vector<5x16x16x16xf32>,
    %c0_18 = arith.constant 0 : index
    %c0_19 = arith.constant 0 : index
    %c0_20 = arith.constant 0 : index
    %c0_21 = arith.constant 0 : index
    %34 = vector.load %arg4[%c0_18, %c0_19, %c0_20, %c0_21] : memref<5x24x16x16xf32, #tpu.memory_space<vmem>>, vector<5x24x16x16xf32>
    %35 = vector.extract_strided_slice %34 {offsets = [0, 0, 0, 0], sizes = [5, 23, 16, 16], strides = [1, 1, 1, 1]} : vector<5x24x16x16xf32> to vector<5x23x16x16xf32>
    %36 = vector.extract_strided_slice %34 {offsets = [0, 1, 0, 0], sizes = [5, 23, 16, 16], strides = [1, 1, 1, 1]} : vector<5x24x16x16xf32> to vector<5x23x16x16xf32>
    %37 = arith.addf %35, %36 : vector<5x23x16x16xf32>
    %38 = vector.extract_strided_slice %37 {offsets = [0, 0, 0, 0], sizes = [5, 21, 16, 16], strides = [1, 1, 1, 1]} : vector<5x23x16x16xf32> to vector<5x21x16x16xf32>
    %39 = vector.extract_strided_slice %37 {offsets = [0, 2, 0, 0], sizes = [5, 21, 16, 16], strides = [1, 1, 1, 1]} : vector<5x23x16x16xf32> to vector<5x21x16x16xf32>
    %40 = arith.addf %38, %39 : vector<5x21x16x16xf32>
    %41 = vector.extract_strided_slice %40 {offsets = [0, 0, 0, 0], sizes = [5, 17, 16, 16], strides = [1, 1, 1, 1]} : vector<5x21x16x16xf32> to vector<5x17x16x16xf32>
    %42 = vector.extract_strided_slice %40 {offsets = [0, 4, 0, 0], sizes = [5, 17, 16, 16], strides = [1, 1, 1, 1]} : vector<5x21x16x16xf32> to vector<5x17x16x16xf32>
    %43 = arith.addf %41, %42 : vector<5x17x16x16xf32>
    %44 = vector.extract_strided_slice %43 {offsets = [0, 0, 0, 0], sizes = [5, 16, 16, 16], strides = [1, 1, 1, 1]} : vector<5x17x16x16xf32> to vector<5x16x16x16xf32>
    %45 = vector.extract_strided_slice %34 {offsets = [0, 8, 0, 0], sizes = [5, 16, 16, 16], strides = [1, 1, 1, 1]} : vector<5x24x16x16xf32> to vector<5x16x16x16xf32>
    %46 = arith.addf %44, %45 : vector<5x16x16x16xf32>
    %47 = vector.extract_strided_slice %46 {offsets = [0, 0, 0, 0], sizes = [1, 16, 16, 16], strides = [1, 1, 1, 1]} : vector<5x16x16x16xf32> to vector<1x16x16x16xf32>
    %48 = vector.shape_cast %47 : vector<1x16x16x16xf32> to vector<16x16x16xf32>
    %49 = vector.extract_strided_slice %46 {offsets = [1, 0, 0, 0], sizes = [1, 16, 16, 16], strides = [1, 1, 1, 1]} : vector<5x16x16x16xf32> to vector<1x16x16x16xf32>
    %50 = vector.shape_cast %49 : vector<1x16x16x16xf32> to vector<16x16x16xf32>
    %51 = vector.extract_strided_slice %46 {offsets = [2, 0, 0, 0], sizes = [1, 16, 16, 16], strides = [1, 1, 1, 1]} : vector<5x16x16x16xf32> to vector<1x16x16x16xf32>
    %52 = vector.shape_cast %51 : vector<1x16x16x16xf32> to vector<16x16x16xf32>
    %53 = vector.extract_strided_slice %46 {offsets = [3, 0, 0, 0], sizes = [1, 16, 16, 16], strides = [1, 1, 1, 1]} : vector<5x16x16x16xf32> to vector<1x16x16x16xf32>
    %54 = vector.shape_cast %53 : vector<1x16x16x16xf32> to vector<16x16x16xf32>
    %55 = vector.extract_strided_slice %46 {offsets = [4, 0, 0, 0], sizes = [1, 16, 16, 16], strides = [1, 1, 1, 1]} : vector<5x16x16x16xf32> to vector<1x16x16x16xf32>
    %56 = vector.shape_cast %55 : vector<1x16x16x16xf32> to vector<16x16x16xf32>
    %cst_22 = arith.constant 0.00137174211 : f32
    %57 = vector.broadcast %cst_22 : f32 to vector<16x16x16xf32>
    %58 = arith.mulf %48, %57 : vector<16x16x16xf32>
    %cst_23 = arith.constant 0.00137174211 : f32
    %59 = vector.broadcast %cst_23 : f32 to vector<16x16x16xf32>
    %60 = arith.mulf %50, %59 : vector<16x16x16xf32>
    %61 = arith.mulf %58, %50 : vector<16x16x16xf32>
    %62 = arith.subf %56, %61 : vector<16x16x16xf32>
    %63 = arith.mulf %60, %48 : vector<16x16x16xf32>
    %64 = arith.subf %62, %63 : vector<16x16x16xf32>
    %65 = arith.mulf %60, %58 : vector<16x16x16xf32>
    %cst_24 = arith.constant 7.290000e+02 : f32
    %66 = vector.broadcast %cst_24 : f32 to vector<16x16x16xf32>
    %67 = arith.mulf %65, %66 : vector<16x16x16xf32>
    %68 = arith.addf %64, %67 : vector<16x16x16xf32>
    %cst_25 = arith.constant 2.000000e+00 : f32
    %69 = vector.broadcast %cst_25 : f32 to vector<16x16x16xf32>
    %70 = arith.mulf %69, %60 : vector<16x16x16xf32>
    %71 = arith.mulf %70, %50 : vector<16x16x16xf32>
    %72 = arith.subf %54, %71 : vector<16x16x16xf32>
    %73 = arith.mulf %60, %60 : vector<16x16x16xf32>
    %cst_26 = arith.constant 7.290000e+02 : f32
    %74 = vector.broadcast %cst_26 : f32 to vector<16x16x16xf32>
    %75 = arith.mulf %73, %74 : vector<16x16x16xf32>
    %76 = arith.addf %72, %75 : vector<16x16x16xf32>
    %cst_27 = arith.constant 2.000000e+00 : f32
    %77 = vector.broadcast %cst_27 : f32 to vector<16x16x16xf32>
    %78 = arith.mulf %77, %58 : vector<16x16x16xf32>
    %79 = arith.mulf %78, %48 : vector<16x16x16xf32>
    %80 = arith.subf %52, %79 : vector<16x16x16xf32>
    %81 = arith.mulf %58, %58 : vector<16x16x16xf32>
    %cst_28 = arith.constant 7.290000e+02 : f32
    %82 = vector.broadcast %cst_28 : f32 to vector<16x16x16xf32>
    %83 = arith.mulf %81, %82 : vector<16x16x16xf32>
    %84 = arith.addf %80, %83 : vector<16x16x16xf32>
    %85 = arith.mulf %76, %84 : vector<16x16x16xf32>
    %cst_29 = arith.constant 9.99999974E-6 : f32
    %86 = vector.broadcast %cst_29 : f32 to vector<16x16x16xf32>
    %87 = arith.addf %85, %86 : vector<16x16x16xf32>
    %88 = tpu.reciprocal %87 {approx = true} : vector<16x16x16xf32> -> vector<16x16x16xf32>
    %89 = arith.mulf %87, %88 : vector<16x16x16xf32>
    %cst_30 = arith.constant 2.000000e+00 : f32
    %90 = vector.broadcast %cst_30 : f32 to vector<16x16x16xf32>
    %91 = arith.subf %90, %89 : vector<16x16x16xf32>
    %92 = arith.mulf %88, %91 : vector<16x16x16xf32>
    %93 = arith.mulf %68, %68 : vector<16x16x16xf32>
    %94 = arith.mulf %93, %92 : vector<16x16x16xf32>
    %95 = vector.shape_cast %94 : vector<16x16x16xf32> to vector<1x16x16x16xf32>
    %cst_31 = arith.constant dense<0.000000e+00> : vector<1xf32>
    %96 = vector.multi_reduction <add>, %95, %cst_31 [1, 2, 3] : vector<1x16x16x16xf32> to vector<1xf32>
    %97 = vector.shape_cast %96 : vector<1xf32> to vector<1x1x1x1xf32>
    %98 = vector.extract %97[0, 0, 0, 0] : f32 from vector<1x1x1x1xf32>
    %99 = vector.broadcast %98 : f32 to vector<1x1x1xf32>
    %c0_32 = arith.constant 0 : index
    %c0_33 = arith.constant 0 : index
    %c0_34 = arith.constant 0 : index
    %100 = vector.load %arg3[%c0_32, %c0_33, %c0_34] : memref<1x1x1xf32, #tpu.memory_space<vmem>>, vector<1x1x1xf32>
    tpu.vector_store %arg3[%c0_32, %c0_33, %c0_34], %99 {strides = array<i32>} : memref<1x1x1xf32, #tpu.memory_space<vmem>>, vector<1x1x1xf32>,
    return
  }
  func.func @transform_0(%arg0: i32) -> (i32, i32, i32) {
    %c0_i32 = arith.constant 0 : i32
    %c0_i32_0 = arith.constant 0 : i32
    %c0_i32_1 = arith.constant 0 : i32
    return %arg0, %c0_i32, %c0_i32_0 : i32, i32, i32
  }
  func.func @transform_1(%arg0: i32) -> (i32, i32, i32) {
    %c0_i32 = arith.constant 0 : i32
    %c0_i32_0 = arith.constant 0 : i32
    %c0_i32_1 = arith.constant 0 : i32
    return %arg0, %c0_i32, %c0_i32_0 : i32, i32, i32
  }
  func.func @transform_2(%arg0: i32) -> (i32, i32, i32) {
    %c0_i32 = arith.constant 0 : i32
    %c0_i32_0 = arith.constant 0 : i32
    %c0_i32_1 = arith.constant 0 : i32
    return %arg0, %c0_i32, %c0_i32_0 : i32, i32, i32
  }
}

</mosaic_0001>

<bundles_post_ra>
// kernel: cross_correlation_3d_loss.1
= control target key start
LH: loop header
LB: loop body
LE: loop exit
PB: predicated region body
PF: predicated region fallthrough
CT: control target
= control target key end

     0   :  { %7 = vsyncpa [#allocation4], 0  ;;  %s17588_s0 = inlined_call_operand.hbm [shape: f32[2,256,16], index: 0, kind: input, shape index: {}]   ;;  %s17589_s1 = inlined_call_operand.hbm [shape: f32[2,256,16], index: 1, kind: input, shape index: {}]   ;;  %s17590_s2 = inlined_call_operand.vmem [shape: f32[2,1,1], index: 2, kind: output, shape index: {}]  }
   0x1   :  { %9 = vsyncpa [#allocation4 + $0x1], 0 }
   0x2   :  { %10 = vsyncpa [#allocation6], 0 }
   0x3   :  { %12 = vsyncpa [#allocation6 + $0x1], 0  ;;  %s12255_s9 = smov 0   ;;  %s12257_s10 = smov 0  }
   0x4   :  { %s12259_s11 = smov 0   ;;  %s12261_s12 = smov 0  }
   0x5 LB: > { %s12274_s13 = sadd.s32 4294967295, %s12232_s12   ;;  %s12277_s14 = sadd.s32 1, %s12232_s12   ;;  %s12232_s12 = sphi %s12261_s12, %s19184_s12   ;;  %s12228_s11 = sphi %s12259_s11, %s19183_s11   ;;  %s12224_s10 = sphi %s12257_s10, %s19182_s10   ;;  %s12220_s9 = sphi %s12255_s9, %s19181_s9  }
   0x6   : > { %s22_s15 = ssub.s32 %s12232_s12, %s12277_s14  ;;  %s25_s16 = sadd.s32 1, %s12228_s11 }
   0x7   : > { %p23_p0 = scmp.eq.s32.totalorder %s22_s15, 0  ;;  %p32_p1 = scmp.ne.s32.totalorder %s12228_s11, %s12224_s10 }
   0x8   : > { %p33_p2 = scmp.eq.s32.totalorder %s12232_s12, 0  ;;  %p38_p3 = scmp.ne.s32.totalorder %s12224_s10, %s12220_s9 }
   0x9   : > { %s12287_s17 = scalar_select %p23_p0, %s12228_s11, %s25_s16  }
   0xa   : > { %p34_p4 = por %p33_p2, %p32_p1  ;;  %p39_p5 = scmp.eq.s32.totalorder %s12274_s13, 0 }
   0xb   : > { %p12003_p6 = scmp.lt.s32.totalorder %s12232_s12, 2  ;;  %s12296_s19 = sand.u32 1, %s12228_s11  }
   0xc   : > { %p12291_p7 = por %p39_p5, %p38_p3  ;;  %s10041_s20 = sshll.u32 %s12296_s19, 8 }
   0xd   : > { %s10378_s21 = sshll.u32 %s12232_s12, 12  ;;  %s118_s25 = scalar_lea.vmem [#allocation3], %s10041_s20 }
   0xe   : > { %s17936_s18 = scalar_select %p12291_p7, 1, 0 }
   0xf   : > { %s12305_s24 = scalar_lea.hbm %s17588_s0, %s10378_s21  ;;  %s125_s26 = sshll.u32 %s118_s25, 4  ;;  %s12309_s26 = int_to_ptr.vmem [resolvable:$true] %s125_s26 }
  0x10   : > { %p12311_p8 = pnand %p12003_p6, %p34_p4  ;;  %s115_s28 = scalar_lea.sflag [#allocation4], %s12296_s19 }
  0x11   : > { %s12134_s29 = scalar_lea.hbm %s12305_s24, 4096  ;;  %s12139_s4 = scalar_lea.hbm %s17588_s0, 8192 }
  0x12   : > { %p12135_p10 = scmp.ne.s32.totalorder %s12305_s24, %s12134_s29  ;;  %p12136_p11 = pneg %p12311_p8 }
  0x13   : > { %p12140_p0 = scmp.lt.u32.totalorder %s12305_s24, %s17588_s0  ;;  %p12141_p1 = scmp.lt.u32.totalorder %s12139_s4, %s12134_s29 }
  0x14   : > { %p12137_p12 = pnand %p12136_p11, %p12135_p10  ;;  %p12143_p3 = scmp.lt.u32.totalorder %s12134_s29, %s12305_s24 }
  0x15   : > { %p12142_p2 = por %p12141_p1, %p12140_p0 }
  0x16   : > { %p12138_p13 = pneg %p12137_p12 }
  0x17   : > { %p12144_p4 = por %p12143_p3, %p12142_p2 }
  0x19   : > { %p12145_p5 = pnand %p12144_p4, %p12138_p13 }
  0x1b   : > { %12148 = shalt.err (!%p12145_p5)
}
  0x1c   : > { %s12149_s7 = scalar_lea.vmem %s12309_s26, 4096  ;;  %s12234_s8 = smov [#allocation3]  }
  0x1d   : > { %p12150_p6 = scmp.ne.s32.totalorder %s12309_s26, %s12149_s7  ;;  %s12154_s9 = sshll.u32 %s12234_s8, 4  ;;  %s12155_s9 = int_to_ptr.vmem [resolvable:$false] %s12154_s9 }
  0x1e   : > { %s12156_s15 = scalar_lea.vmem %s12155_s9, 8192  ;;  %p12157_p9 = scmp.lt.s32.totalorder %s12309_s26, %s12155_s9 }
  0x1f   : > { %p12152_p10 = pnand %p12150_p6, %p12136_p11  ;;  %p12158_p0 = scmp.lt.s32.totalorder %s12156_s15, %s12149_s7 }
  0x21   : > { %p12153_p12 = pneg %p12152_p10  ;;  %p12159_p1 = por %p12158_p0, %p12157_p9 }
  0x23   : > { %p12160_p2 = pnand %p12159_p1, %p12153_p12 }
  0x25   : > { %12163 = shalt.err (!%p12160_p2)
}
  0x26   : > { %s12235_s16 = smov 128   ;;  %s12236_s22 = smov 8  }
  0x27   : > { %11999 = dma.hbm_to_vmem [thread:$0]  (!%p12311_p8), %s12305_s24, 4096, %s12309_s26, %s115_s28, %s12235_s16, %s12235_s16, %s12236_s22  }
  0x28   : > { %p154_p9 = scmp.lt.s32.totalorder %s12232_s12, 3  ;;  %s12353_s29 = scalar_lea.hbm %s17589_s1, %s10378_s21 }
  0x29   : > { %p17938_p13 = scmp.ge.s32.totalorder %s12232_s12, 1  ;;  %s139_s3 = scalar_lea.vmem [#allocation5], %s10041_s20 }
  0x2a   : > { %s146_s4 = sshll.u32 %s139_s3, 4  ;;  %s136_s24 = scalar_lea.sflag [#allocation6], %s12296_s19  ;;  %s12363_s4 = int_to_ptr.vmem [resolvable:$true] %s146_s4 }
  0x2b   : > { %p12357_p3 = pnand %p17938_p13, %p154_p9  ;;  %s12164_s26 = scalar_lea.hbm %s12353_s29, 4096 }
  0x2c   : > { %p12165_p4 = scmp.ne.s32.totalorder %s12353_s29, %s12164_s26  ;;  %s12169_s28 = scalar_lea.hbm %s17589_s1, 8192 }
  0x2d   : > { %p12170_p10 = scmp.lt.u32.totalorder %s12353_s29, %s17589_s1  ;;  %p12171_p12 = scmp.lt.u32.totalorder %s12169_s28, %s12164_s26 }
  0x2e   : > { %p12167_p5 = pnand %p12165_p4, %p12136_p11  ;;  %p12173_p1 = scmp.lt.u32.totalorder %s12164_s26, %s12353_s29 }
  0x2f   : > { %p12172_p0 = por %p12171_p12, %p12170_p10 }
  0x30   : > { %p12168_p6 = pneg %p12167_p5 }
  0x31   : > { %p12174_p2 = por %p12173_p1, %p12172_p0 }
  0x33   : > { %p12175_p9 = pnand %p12174_p2, %p12168_p6 }
  0x35   : > { %12178 = shalt.err (!%p12175_p9)
}
  0x36   : > { %s12179_s20 = scalar_lea.vmem %s12363_s4, 4096  ;;  %s12237_s7 = smov [#allocation5]  }
  0x37   : > { %p12180_p13 = scmp.ne.s32.totalorder %s12363_s4, %s12179_s20  ;;  %s12184_s8 = sshll.u32 %s12237_s7, 4  ;;  %s12185_s8 = int_to_ptr.vmem [resolvable:$false] %s12184_s8 }
  0x38   : > { %s12186_s9 = scalar_lea.vmem %s12185_s8, 8192  ;;  %p12187_p7 = scmp.lt.s32.totalorder %s12363_s4, %s12185_s8 }
  0x39   : > { %p12182_p4 = pnand %p12180_p13, %p12136_p11  ;;  %p12188_p10 = scmp.lt.s32.totalorder %s12186_s9, %s12179_s20 }
  0x3b   : > { %p12183_p5 = pneg %p12182_p4  ;;  %p12189_p12 = por %p12188_p10, %p12187_p7 }
  0x3d   : > { %p12190_p0 = pnand %p12189_p12, %p12183_p5 }
  0x3f   : > { %12193 = shalt.err (!%p12190_p0)
}
  0x40   : > { %12002 = dma.hbm_to_vmem [thread:$0]  (!%p12311_p8), %s12353_s29, 4096, %s12363_s4, %s136_s24, %s12235_s16, %s12235_s16, %s12236_s22  }
  0x41   : > { %158 = sbr.rel (%p12357_p3) target bundleno = 1358 (0x54e), region = 28 }
  0x48   : > { %s160_s15 = sand.u32 1, %s12224_s10   ;;  %p17940_p7 = scmp.ne.s32.totalorder %s17936_s18, 0 }
  0x49   : > { %s10048_s23 = sshll.u32 %s160_s15, 8  ;;  %s161_s25 = scalar_lea.sflag [#allocation4], %s160_s15 }
  0x4a   : > { %s12397_s3 = scalar_lea.vmem [#allocation3], %s10048_s23 }
  0x4b   : > { %12211 = dma.done.wait (%p17940_p7), %s161_s25, 4096  }
  0x4c   : > { %12213 = vsyncadd (%p17940_p7), %s161_s25, 4294963200  ;;  %s170_s19 = scalar_lea.sflag [#allocation6], %s160_s15  ;;  %s12403_s27 = scalar_lea.vmem [#allocation5], %s10048_s23 }
  0x4d   : > { %12215 = dma.done.wait (%p17940_p7), %s170_s19, 4096  }
  0x4e   : > { %12217 = vsyncadd (%p17940_p7), %s170_s19, 4294963200  ;;  %v360_v0 = vlaneseq  ;;  %vm379_vm0 = vcmask 130048   ;;  %v12238_v1 = vmov 0.0   ;;  %v12572_v8 = vld [vmem:[%s12397_s3] sm:$0xff]  ;;  %v12239_v14 = vmov 1.0|1.0  }
  0x4f   : > { %7731 = vst.msk [vmem:[#allocation2] sm:$0xff] %vm379_vm0, %v12238_v1  ;;  %7732 = vst.msk [vmem:[#allocation2 + $0x8] sm:$0xff] %vm379_vm0, %v12238_v1  ;;  %10866 = vmatprep.mubr.msk.f32.mxu0 %vm379_vm0, %v12572_v8  ;;  %v12585_v15 = vld [vmem:[%s12397_s3 + $0x8] sm:$0xff]  ;;  %v12588_v16 = vld [vmem:[%s12397_s3 + $0x10] sm:$0xff]  ;;  %p197_p8 = scmp.lt.s32.totalorder %s12274_s13, 1  ;;  %vm9954_vm4 = vcmask 0  }
  0x50   : > { %7733 = vst.msk [vmem:[#allocation2 + $0x10] sm:$0xff] %vm379_vm0, %v12238_v1  ;;  %7734 = vst.msk [vmem:[#allocation2 + $0x18] sm:$0xff] %vm379_vm0, %v12238_v1  ;;  %v361_v2 = vshrl.u32 %v360_v0, 7  ;;  %v364_v3 = vand.u32 127, %v360_v0  ;;  %v12593_v17 = vld [vmem:[%s12403_s27] sm:$0xff]  ;;  %v12596_v18 = vld [vmem:[%s12403_s27 + $0x8] sm:$0xff] }
  0x51   : > { %7735 = vst.msk [vmem:[#allocation2 + $0x20] sm:$0xff] %vm379_vm0, %v12238_v1  ;;  %7736 = vst.msk [vmem:[#allocation2 + $0x28] sm:$0xff] %vm379_vm0, %v12238_v1  ;;  %v12601_v19 = vld [vmem:[%s12397_s3 + $0x18] sm:$0xff]  ;;  %v12605_v20 = vmul.f32 %v12593_v17, %v12572_v8  ;;  %v12609_v21 = vmul.f32 %v12596_v18, %v12585_v15  ;;  %v12612_v22 = vld [vmem:[%s12403_s27 + $0x10] sm:$0xff]  ;;  %s19186_s13 = smov (!%p197_p8, %s12274_s13), 1 }
  0x52   : > { %7737 = vst.msk [vmem:[#allocation2 + $0x30] sm:$0xff] %vm379_vm0, %v12238_v1  ;;  %7738 = vst.msk [vmem:[#allocation2 + $0x38] sm:$0xff] %vm379_vm0, %v12238_v1  ;;  %v362_v4 = vadd.s32 8, %v361_v2  ;;  %v365_v5 = vsub.s32 %v361_v2, %v364_v3  ;;  %v12615_v23 = vld [vmem:[%s12397_s3 + $0x20] sm:$0xff]  ;;  %v12619_v24 = vmul.f32 %v12612_v22, %v12588_v16  ;;  %v12626_v25 = vld [vmem:[%s12397_s3 + $0x28] sm:$0xff]  ;;  %s199_s22 = scalar_lea.vmem %s17590_s2, %s19186_s13 }
  0x53   : > { %7739 = vst.msk [vmem:[#allocation2 + $0x180] sm:$0xff] %vm379_vm0, %v12238_v1  ;;  %7740 = vst.msk [vmem:[#allocation2 + $0x188] sm:$0xff] %vm379_vm0, %v12238_v1  ;;  %v12629_v26 = vld [vmem:[%s12397_s3 + $0x30] sm:$0xff]  ;;  %v12636_v27 = vld [vmem:[%s12397_s3 + $0x38] sm:$0xff] }
  0x54   : > { %7741 = vst.msk [vmem:[#allocation2 + $0x190] sm:$0xff] %vm379_vm0, %v12238_v1  ;;  %7742 = vst.msk [vmem:[#allocation2 + $0x198] sm:$0xff] %vm379_vm0, %v12238_v1  ;;  %v366_v6 = vsub.s32 %v362_v4, %v364_v3  ;;  %v368_v7 = vsub.s32 0, %v365_v5  ;;  %v12639_v28 = vld [vmem:[%s12397_s3 + $0x40] sm:$0xff]  ;;  %v12646_v29 = vld [vmem:[%s12397_s3 + $0x48] sm:$0xff] }
  0x55   : > { %7743 = vst.msk [vmem:[#allocation2 + $0x1a0] sm:$0xff] %vm379_vm0, %v12238_v1  ;;  %7744 = vst.msk [vmem:[#allocation2 + $0x1a8] sm:$0xff] %vm379_vm0, %v12238_v1  ;;  %v12649_v30 = vld [vmem:[%s12397_s3 + $0x50] sm:$0xff]  ;;  %v12656_v31 = vld [vmem:[%s12397_s3 + $0x58] sm:$0xff] }
  0x56   : > { %7745 = vst.msk [vmem:[#allocation2 + $0x1b0] sm:$0xff] %vm379_vm0, %v12238_v1  ;;  %7746 = vst.msk [vmem:[#allocation2 + $0x1b8] sm:$0xff] %vm379_vm0, %v12238_v1  ;;  %v10050_v9 = vmin.u32 %v368_v7, %v365_v5  ;;  %v371_v10 = vsub.s32 0, %v366_v6  ;;  %v12659_v32 = vld [vmem:[%s12397_s3 + $0x60] sm:$0xff]  ;;  %v12666_v33 = vld [vmem:[%s12397_s3 + $0x68] sm:$0xff] }
  0x57   : > { %7747 = vst.msk [vmem:[#allocation2 + $0x300] sm:$0xff] %vm379_vm0, %v12238_v1  ;;  %7748 = vst.msk [vmem:[#allocation2 + $0x308] sm:$0xff] %vm379_vm0, %v12238_v1  ;;  %v12669_v34 = vld [vmem:[%s12397_s3 + $0x70] sm:$0xff]  ;;  %v12676_v35 = vld [vmem:[%s12397_s3 + $0x78] sm:$0xff] }
  0x58   : > { %7749 = vst.msk [vmem:[#allocation2 + $0x310] sm:$0xff] %vm379_vm0, %v12238_v1  ;;  %7750 = vst.msk [vmem:[#allocation2 + $0x318] sm:$0xff] %vm379_vm0, %v12238_v1  ;;  %v10051_v11 = vmin.u32 %v371_v10, %v366_v6  ;;  %vm373_vm1 = vcmp.le.s32.totalorder %v10050_v9, 4  ;;  %v12679_v36 = vld [vmem:[%s12397_s3 + $0x80] sm:$0xff]  ;;  %v12686_v37 = vld [vmem:[%s12397_s3 + $0x88] sm:$0xff] }
  0x59   : > { %7751 = vst.msk [vmem:[#allocation2 + $0x320] sm:$0xff] %vm379_vm0, %v12238_v1  ;;  %7752 = vst.msk [vmem:[#allocation2 + $0x328] sm:$0xff] %vm379_vm0, %v12238_v1  ;;  %v12577_v12 = vsel %vm373_vm1, 1.0, %v12238_v1  ;;  %v12689_v38 = vld [vmem:[%s12397_s3 + $0x90] sm:$0xff]  ;;  %v12696_v39 = vld [vmem:[%s12397_s3 + $0x98] sm:$0xff] }
  0x5a   : > { %7753 = vst.msk [vmem:[#allocation2 + $0x330] sm:$0xff] %vm379_vm0, %v12238_v1  ;;  %7754 = vst.msk [vmem:[#allocation2 + $0x338] sm:$0xff] %vm379_vm0, %v12238_v1  ;;  %vm374_vm2 = vcmp.le.s32.totalorder %v10051_v11, 4  ;;  %11110 = vmatprep.mubr.msk.f32.mxu1 %vm379_vm0, %v12577_v12  ;;  %v12699_v40 = vld [vmem:[%s12397_s3 + $0xa0] sm:$0xff]  ;;  %v12706_v41 = vld [vmem:[%s12397_s3 + $0xa8] sm:$0xff] }
  0x5b   : > { %7755 = vst.msk [vmem:[#allocation2 + $0x480] sm:$0xff] %vm379_vm0, %v12238_v1  ;;  %7756 = vst.msk [vmem:[#allocation2 + $0x488] sm:$0xff] %vm379_vm0, %v12238_v1  ;;  %v12582_v13 = vsel %vm374_vm2, 1.0, %v12238_v1  ;;  %v12709_v42 = vld [vmem:[%s12397_s3 + $0xb0] sm:$0xff]  ;;  %v12716_v43 = vld [vmem:[%s12397_s3 + $0xb8] sm:$0xff] }
  0x5c   : > { %7757 = vst.msk [vmem:[#allocation2 + $0x490] sm:$0xff] %vm379_vm0, %v12238_v1  ;;  %7758 = vst.msk [vmem:[#allocation2 + $0x498] sm:$0xff] %vm379_vm0, %v12238_v1  ;;  %v12719_v44 = vld [vmem:[%s12397_s3 + $0xc0] sm:$0xff]  ;;  %v12726_v45 = vld [vmem:[%s12397_s3 + $0xc8] sm:$0xff] }
  0x5d   : > { %7759 = vst.msk [vmem:[#allocation2 + $0x4a0] sm:$0xff] %vm379_vm0, %v12238_v1  ;;  %7760 = vst.msk [vmem:[#allocation2 + $0x4a8] sm:$0xff] %vm379_vm0, %v12238_v1  ;;  %v12729_v46 = vld [vmem:[%s12397_s3 + $0xd0] sm:$0xff]  ;;  %v12736_v47 = vld [vmem:[%s12397_s3 + $0xd8] sm:$0xff] }
  0x5e   : > { %7761 = vst.msk [vmem:[#allocation2 + $0x4b0] sm:$0xff] %vm379_vm0, %v12238_v1  ;;  %7762 = vst.msk [vmem:[#allocation2 + $0x4b8] sm:$0xff] %vm379_vm0, %v12238_v1  ;;  %v12739_v48 = vld [vmem:[%s12397_s3 + $0xe0] sm:$0xff]  ;;  %v12746_v49 = vld [vmem:[%s12397_s3 + $0xe8] sm:$0xff] }
  0x5f   : > { %7763 = vst.msk [vmem:[#allocation2 + $0x600] sm:$0xff] %vm379_vm0, %v12238_v1  ;;  %7764 = vst.msk [vmem:[#allocation2 + $0x608] sm:$0xff] %vm379_vm0, %v12238_v1  ;;  %v12749_v50 = vld [vmem:[%s12397_s3 + $0xf0] sm:$0xff]  ;;  %v12756_v51 = vld [vmem:[%s12397_s3 + $0xf8] sm:$0xff] }
  0x60   : > { %7765 = vst.msk [vmem:[#allocation2 + $0x610] sm:$0xff] %vm379_vm0, %v12238_v1  ;;  %7766 = vst.msk [vmem:[#allocation2 + $0x618] sm:$0xff] %vm379_vm0, %v12238_v1  ;;  %v12767_v52 = vld [vmem:[%s12403_s27 + $0x18] sm:$0xff]  ;;  %v12770_v53 = vld [vmem:[%s12403_s27 + $0x20] sm:$0xff] }
  0x61   : > { %7767 = vst.msk [vmem:[#allocation2 + $0x620] sm:$0xff] %vm379_vm0, %v12238_v1  ;;  %7768 = vst.msk [vmem:[#allocation2 + $0x628] sm:$0xff] %vm379_vm0, %v12238_v1  ;;  %v12777_v54 = vld [vmem:[%s12403_s27 + $0x28] sm:$0xff]  ;;  %v12780_v55 = vld [vmem:[%s12403_s27 + $0x30] sm:$0xff] }
  0x62   : > { %7769 = vst.msk [vmem:[#allocation2 + $0x630] sm:$0xff] %vm379_vm0, %v12238_v1  ;;  %7770 = vst.msk [vmem:[#allocation2 + $0x638] sm:$0xff] %vm379_vm0, %v12238_v1  ;;  %v12787_v56 = vld [vmem:[%s12403_s27 + $0x38] sm:$0xff]  ;;  %v12790_v57 = vld [vmem:[%s12403_s27 + $0x40] sm:$0xff] }
  0x63   : > { %7772 = vst.msk [vmem:[#allocation2 + $0x140] sm:$0xff] %vm379_vm0, %v12238_v1  ;;  %7773 = vst.msk [vmem:[#allocation2 + $0x148] sm:$0xff] %vm379_vm0, %v12238_v1  ;;  %v12797_v58 = vld [vmem:[%s12403_s27 + $0x48] sm:$0xff]  ;;  %v12800_v59 = vld [vmem:[%s12403_s27 + $0x50] sm:$0xff] }
  0x64   : > { %7774 = vst.msk [vmem:[#allocation2 + $0x150] sm:$0xff] %vm379_vm0, %v12238_v1  ;;  %7775 = vst.msk [vmem:[#allocation2 + $0x158] sm:$0xff] %vm379_vm0, %v12238_v1  ;;  %v12807_v60 = vld [vmem:[%s12403_s27 + $0x58] sm:$0xff]  ;;  %v12810_v61 = vld [vmem:[%s12403_s27 + $0x60] sm:$0xff] }
  0x65   : > { %7776 = vst.msk [vmem:[#allocation2 + $0x160] sm:$0xff] %vm379_vm0, %v12238_v1  ;;  %7777 = vst.msk [vmem:[#allocation2 + $0x168] sm:$0xff] %vm379_vm0, %v12238_v1  ;;  %v12817_v62 = vld [vmem:[%s12403_s27 + $0x68] sm:$0xff]  ;;  %v12820_v63 = vld [vmem:[%s12403_s27 + $0x70] sm:$0xff] }
  0x66   : > { %7778 = vst.msk [vmem:[#allocation2 + $0x170] sm:$0xff] %vm379_vm0, %v12238_v1  ;;  %7779 = vst.msk [vmem:[#allocation2 + $0x178] sm:$0xff] %vm379_vm0, %v12238_v1  ;;  %v12827_v0 = vld [vmem:[%s12403_s27 + $0x78] sm:$0xff]  ;;  %v12837_v2 = vld [vmem:[%s12403_s27 + $0x88] sm:$0xff] }
  0x67   : > { %7780 = vst.msk [vmem:[#allocation2 + $0x2c0] sm:$0xff] %vm379_vm0, %v12238_v1  ;;  %7781 = vst.msk [vmem:[#allocation2 + $0x2c8] sm:$0xff] %vm379_vm0, %v12238_v1  ;;  %v12840_v3 = vld [vmem:[%s12403_s27 + $0x90] sm:$0xff]  ;;  %v12847_v4 = vld [vmem:[%s12403_s27 + $0x98] sm:$0xff] }
  0x68   : > { %7782 = vst.msk [vmem:[#allocation2 + $0x2d0] sm:$0xff] %vm379_vm0, %v12238_v1  ;;  %7783 = vst.msk [vmem:[#allocation2 + $0x2d8] sm:$0xff] %vm379_vm0, %v12238_v1  ;;  %v12850_v5 = vld [vmem:[%s12403_s27 + $0xa0] sm:$0xff]  ;;  %v12857_v6 = vld [vmem:[%s12403_s27 + $0xa8] sm:$0xff] }
  0x69   : > { %7784 = vst.msk [vmem:[#allocation2 + $0x2e0] sm:$0xff] %vm379_vm0, %v12238_v1  ;;  %7785 = vst.msk [vmem:[#allocation2 + $0x2e8] sm:$0xff] %vm379_vm0, %v12238_v1  ;;  %v12860_v7 = vld [vmem:[%s12403_s27 + $0xb0] sm:$0xff]  ;;  %v12867_v9 = vld [vmem:[%s12403_s27 + $0xb8] sm:$0xff] }
  0x6a   : > { %7786 = vst.msk [vmem:[#allocation2 + $0x2f0] sm:$0xff] %vm379_vm0, %v12238_v1  ;;  %7787 = vst.msk [vmem:[#allocation2 + $0x2f8] sm:$0xff] %vm379_vm0, %v12238_v1  ;;  %v12870_v10 = vld [vmem:[%s12403_s27 + $0xc0] sm:$0xff]  ;;  %v12877_v11 = vld [vmem:[%s12403_s27 + $0xc8] sm:$0xff] }
  0x6b   : > { %7788 = vst.msk [vmem:[#allocation2 + $0x440] sm:$0xff] %vm379_vm0, %v12238_v1  ;;  %7789 = vst.msk [vmem:[#allocation2 + $0x448] sm:$0xff] %vm379_vm0, %v12238_v1 }
  0x6c   : > { %7790 = vst.msk [vmem:[#allocation2 + $0x450] sm:$0xff] %vm379_vm0, %v12238_v1  ;;  %7791 = vst.msk [vmem:[#allocation2 + $0x458] sm:$0xff] %vm379_vm0, %v12238_v1 }
  0x6d   : > { %7792 = vst.msk [vmem:[#allocation2 + $0x460] sm:$0xff] %vm379_vm0, %v12238_v1  ;;  %7793 = vst.msk [vmem:[#allocation2 + $0x468] sm:$0xff] %vm379_vm0, %v12238_v1 }
  0x6e   : > { %7794 = vst.msk [vmem:[#allocation2 + $0x470] sm:$0xff] %vm379_vm0, %v12238_v1  ;;  %7795 = vst.msk [vmem:[#allocation2 + $0x478] sm:$0xff] %vm379_vm0, %v12238_v1 }
  0x6f   : > { %7796 = vst.msk [vmem:[#allocation2 + $0x5c0] sm:$0xff] %vm379_vm0, %v12238_v1  ;;  %7797 = vst.msk [vmem:[#allocation2 + $0x5c8] sm:$0xff] %vm379_vm0, %v12238_v1 }
  0x70   : > { %7798 = vst.msk [vmem:[#allocation2 + $0x5d0] sm:$0xff] %vm379_vm0, %v12238_v1  ;;  %7799 = vst.msk [vmem:[#allocation2 + $0x5d8] sm:$0xff] %vm379_vm0, %v12238_v1 }
  0x71   : > { %7800 = vst.msk [vmem:[#allocation2 + $0x5e0] sm:$0xff] %vm379_vm0, %v12238_v1  ;;  %7801 = vst.msk [vmem:[#allocation2 + $0x5e8] sm:$0xff] %vm379_vm0, %v12238_v1 }
  0x72   : > { %7802 = vst.msk [vmem:[#allocation2 + $0x5f0] sm:$0xff] %vm379_vm0, %v12238_v1  ;;  %7803 = vst.msk [vmem:[#allocation2 + $0x5f8] sm:$0xff] %vm379_vm0, %v12238_v1 }
  0x73   : > { %7804 = vst.msk [vmem:[#allocation2 + $0x740] sm:$0xff] %vm379_vm0, %v12238_v1  ;;  %7805 = vst.msk [vmem:[#allocation2 + $0x748] sm:$0xff] %vm379_vm0, %v12238_v1 }
  0x74   : > { %7806 = vst.msk [vmem:[#allocation2 + $0x750] sm:$0xff] %vm379_vm0, %v12238_v1  ;;  %7807 = vst.msk [vmem:[#allocation2 + $0x758] sm:$0xff] %vm379_vm0, %v12238_v1 }
  0x75   : > { %7808 = vst.msk [vmem:[#allocation2 + $0x760] sm:$0xff] %vm379_vm0, %v12238_v1  ;;  %7809 = vst.msk [vmem:[#allocation2 + $0x768] sm:$0xff] %vm379_vm0, %v12238_v1 }
  0x76   : > { %7810 = vst.msk [vmem:[#allocation2 + $0x770] sm:$0xff] %vm379_vm0, %v12238_v1  ;;  %7811 = vst.msk [vmem:[#allocation2 + $0x778] sm:$0xff] %vm379_vm0, %v12238_v1  ;;  %v12830_v1 = vld [vmem:[%s12403_s27 + $0x80] sm:$0xff] }
  0x77   : > { %vm11666_vm3 = vmpackc.low %vm374_vm2, %vm373_vm1  ;;  %17941 = vst [vmem:[#allocation9_spill] sm:$0xff] %v12605_v20  ;;  %v12897_v20 = vld [vmem:[%s12403_s27 + $0xe8] sm:$0xff] }
  0x78   : > { %11667 = vmatprep.subr.msk.bf16.mxu0 %vm11666_vm3, %v12239_v14  ;;  %17942 = vst [vmem:[#allocation10_spill] sm:$0xff] %v12609_v21  ;;  %17943 = vst [vmem:[#allocation11_spill] sm:$0xff] %v12619_v24  ;;  %v12887_v24 = vld [vmem:[%s12403_s27 + $0xd8] sm:$0xff]  ;;  %v12890_v21 = vld [vmem:[%s12403_s27 + $0xe0] sm:$0xff] }
  0x79   : > { %11669 = vmatpush3.bf16.msk.msra.mxu0 %vm11666_vm3, %v12239_v14  ;;  %17944 = vst [vmem:[#allocation12_spill] sm:$0xff] %v12736_v47  ;;  %17945 = vst [vmem:[#allocation13_spill] sm:$0xff] %v12739_v48  ;;  %v12880_v14 = vld [vmem:[%s12403_s27 + $0xd0] sm:$0xff] }
  0x7a   : > { %17946 = vst [vmem:[#allocation14_spill] sm:$0xff] %v12746_v49  ;;  %17947 = vst [vmem:[#allocation15_spill] sm:$0xff] %v12749_v50 }
  0x7b   : > { %17948 = vst [vmem:[#allocation16_spill] sm:$0xff] %v12756_v51  ;;  %17949 = vst [vmem:[#allocation17_spill] sm:$0xff] %v12870_v10 }
  0x7c   : > { %10867 = vmatmul.mubr.msk.f32.vlgmr.msra.gmra.mrb[0].mxu0 %vm379_vm0, %v12585_v15  ;;  %17950 = vst [vmem:[#allocation18_spill] sm:$0xff] %v12877_v11  ;;  %17951 = vst [vmem:[#allocation19_spill] sm:$0xff] %v12880_v14 }
  0x7d   : > { %10869 = vmatprep.mubr.msk.f32.mxu0 %vm379_vm0, %v12588_v16  ;;  %17952 = vst [vmem:[#allocation20_spill] sm:$0xff] %v12887_v24  ;;  %17953 = vst [vmem:[#allocation21_spill] sm:$0xff] %v12890_v21 }
  0x7e   : > { %17954 = vst [vmem:[#allocation22_spill] sm:$0xff] %v12897_v20 }
  0x80   : > { %10870 = vmatmul.mubr.msk.f32.gmra.mrb[2].mxu0 %vm379_vm0, %v12601_v19 }
  0x81   : > { %10872 = vmatprep.mubr.msk.f32.mxu0 %vm379_vm0, %v12615_v23 }
  0x84   : > { %10873 = vmatmul.mubr.msk.f32.gmra.mrb[4].mxu0 %vm379_vm0, %v12626_v25 }
  0x85   : > { %10875 = vmatprep.mubr.msk.f32.mxu0 %vm379_vm0, %v12629_v26 }
  0x88   : > { %10876 = vmatmul.mubr.msk.f32.gmra.mrb[6].mxu0 %vm379_vm0, %v12636_v27 }
  0x89   : > { %10878 = vmatprep.mubr.msk.f32.mxu0 %vm379_vm0, %v12639_v28 }
  0x8c   : > { %10879 = vmatmul.mubr.msk.f32.gmra.mrb[8].mxu0 %vm379_vm0, %v12646_v29 }
  0x8d   : > { %10881 = vmatprep.mubr.msk.f32.mxu0 %vm379_vm0, %v12649_v30 }
  0x90   : > { %10882 = vmatmul.mubr.msk.f32.gmra.mrb[10].mxu0 %vm379_vm0, %v12656_v31 }
  0x91   : > { %10884 = vmatprep.mubr.msk.f32.mxu0 %vm379_vm0, %v12659_v32 }
  0x94   : > { %10885 = vmatmul.mubr.msk.f32.gmra.mrb[12].mxu0 %vm379_vm0, %v12666_v33 }
  0x95   : > { %10887 = vmatprep.mubr.msk.f32.mxu0 %vm379_vm0, %v12669_v34 }
  0x98   : > { %10888 = vmatmul.mubr.msk.f32.gmra.mrb[14].mxu0 %vm379_vm0, %v12676_v35 }
  0x99   : > { %10890 = vmatprep.mubr.msk.f32.mxu0 %vm379_vm0, %v12679_v36 }
  0x9c   : > { %10891 = vmatmul.mubr.msk.f32.gmra.mrb[16].mxu0 %vm379_vm0, %v12686_v37 }
  0x9d   : > { %10893 = vmatprep.mubr.msk.f32.mxu0 %vm379_vm0, %v12689_v38 }
  0xa0   : > { %10894 = vmatmul.mubr.msk.f32.gmra.mrb[18].mxu0 %vm379_vm0, %v12696_v39 }
  0xa1   : > { %10896 = vmatprep.mubr.msk.f32.mxu0 %vm379_vm0, %v12699_v40 }
  0xa4   : > { %10897 = vmatmul.mubr.msk.f32.gmra.mrb[20].mxu0 %vm379_vm0, %v12706_v41 }
  0xa5   : > { %10899 = vmatprep.mubr.msk.f32.mxu0 %vm379_vm0, %v12709_v42 }
  0xa8   : > { %10900 = vmatmul.mubr.msk.f32.gmra.mrb[22].mxu0 %vm379_vm0, %v12716_v43 }
  0xa9   : > { %10902 = vmatprep.mubr.msk.f32.mxu0 %vm379_vm0, %v12719_v44 }
  0xac   : > { %10903 = vmatmul.mubr.msk.f32.gmra.mrb[24].mxu0 %vm379_vm0, %v12726_v45 }
  0xad   : > { %10905 = vmatprep.mubr.msk.f32.mxu0 %vm379_vm0, %v12729_v46 }
  0xb0   : > { %10906 = vmatmul.mubr.msk.f32.gmra.mrb[26].mxu0 %vm379_vm0, %v12736_v47 }
  0xb1   : > { %10908 = vmatprep.mubr.msk.f32.mxu0 %vm379_vm0, %v12739_v48 }
  0xb4   : > { %10909 = vmatmul.mubr.msk.f32.gmra.mrb[28].mxu0 %vm379_vm0, %v12746_v49 }
  0xb5   : > { %10911 = vmatprep.mubr.msk.f32.mxu0 %vm379_vm0, %v12749_v50 }
  0xb8   : > { %10912 = vmatmul.mubr.msk.f32.gmra.mrb[30].mxu0 %vm379_vm0, %v12756_v51 }
  0xb9   : > { %10914 = vmatprep.mubr.msk.f32.mxu0 %vm379_vm0, %v12593_v17 }
  0xbc   : > { %10915 = vmatmul.mubr.msk.f32.gmra.mrb[32].mxu0 %vm379_vm0, %v12596_v18 }
  0xbd   : > { %10917 = vmatprep.mubr.msk.f32.mxu0 %vm379_vm0, %v12612_v22 }
  0xc0   : > { %10918 = vmatmul.mubr.msk.f32.gmra.mrb[34].mxu0 %vm379_vm0, %v12767_v52 }
  0xc1   : > { %10920 = vmatprep.mubr.msk.f32.mxu0 %vm379_vm0, %v12770_v53 }
  0xc4   : > { %10921 = vmatmul.mubr.msk.f32.gmra.mrb[36].mxu0 %vm379_vm0, %v12777_v54 }
  0xc5   : > { %10923 = vmatprep.mubr.msk.f32.mxu0 %vm379_vm0, %v12780_v55 }
  0xc8   : > { %10924 = vmatmul.mubr.msk.f32.gmra.mrb[38].mxu0 %vm379_vm0, %v12787_v56 }
  0xc9   : > { %10926 = vmatprep.mubr.msk.f32.mxu0 %vm379_vm0, %v12790_v57 }
  0xcc   : > { %10927 = vmatmul.mubr.msk.f32.gmra.mrb[40].mxu0 %vm379_vm0, %v12797_v58 }
  0xcd   : > { %10929 = vmatprep.mubr.msk.f32.mxu0 %vm379_vm0, %v12800_v59 }
  0xd0   : > { %10930 = vmatmul.mubr.msk.f32.gmra.mrb[42].mxu0 %vm379_vm0, %v12807_v60 }
  0xd1   : > { %10932 = vmatprep.mubr.msk.f32.mxu0 %vm379_vm0, %v12810_v61 }
  0xd4   : > { %10933 = vmatmul.mubr.msk.f32.gmra.mrb[44].mxu0 %vm379_vm0, %v12817_v62 }
  0xd5   : > { %10935 = vmatprep.mubr.msk.f32.mxu0 %vm379_vm0, %v12820_v63 }
  0xd8   : > { %10936 = vmatmul.mubr.msk.f32.gmra.mrb[46].mxu0 %vm379_vm0, %v12827_v0 }
  0xd9   : > { %10938 = vmatprep.mubr.msk.f32.mxu0 %vm379_vm0, %v12830_v1 }
  0xdc   : > { %10939 = vmatmul.mubr.msk.f32.gmra.mrb[48].mxu0 %vm379_vm0, %v12837_v2 }
  0xdd   : > { %10941 = vmatprep.mubr.msk.f32.mxu0 %vm379_vm0, %v12840_v3 }
  0xe0   : > { %10942 = vmatmul.mubr.msk.f32.gmra.mrb[50].mxu0 %vm379_vm0, %v12847_v4 }
  0xe1   : > { %10944 = vmatprep.mubr.msk.f32.mxu0 %vm379_vm0, %v12850_v5 }
  0xe4   : > { %10945 = vmatmul.mubr.msk.f32.gmra.mrb[52].mxu0 %vm379_vm0, %v12857_v6 }
  0xe5   : > { %10947 = vmatprep.mubr.msk.f32.mxu0 %vm379_vm0, %v12860_v7 }
  0xe8   : > { %10948 = vmatmul.mubr.msk.f32.gmra.mrb[54].mxu0 %vm379_vm0, %v12867_v9 }
  0xe9   : > { %10950 = vmatprep.mubr.msk.f32.mxu0 %vm379_vm0, %v12870_v10  ;;  %v12900_v10 = vld [vmem:[%s12403_s27 + $0xf0] sm:$0xff] }
  0xec   : > { %10951 = vmatmul.mubr.msk.f32.gmra.mrb[56].mxu0 %vm379_vm0, %v12877_v11  ;;  %v12909_v11 = vld [vmem:[%s12403_s27 + $0xf8] sm:$0xff] }
  0xed   : > { %10953 = vmatprep.mubr.msk.f32.mxu0 %vm379_vm0, %v12880_v14  ;;  %v264_v14 = vmul.f32 %v12572_v8, %v12572_v8  ;;  %v268_v8 = vmul.f32 %v12615_v23, %v12615_v23 }
  0xf0   : > { %10954 = vmatmul.mubr.msk.f32.gmra.mrb[58].mxu0 %vm379_vm0, %v12887_v24  ;;  %v265_v24 = vmul.f32 %v12585_v15, %v12585_v15  ;;  %v269_v15 = vmul.f32 %v12626_v25, %v12626_v25 }
  0xf1   : > { %10956 = vmatprep.mubr.msk.f32.mxu0 %vm379_vm0, %v12890_v21  ;;  %v266_v21 = vmul.f32 %v12588_v16, %v12588_v16  ;;  %v270_v16 = vmul.f32 %v12629_v26, %v12629_v26 }
  0xf4   : > { %10957 = vmatmul.mubr.msk.f32.gmra.mrb[60].mxu0 %vm379_vm0, %v12897_v20  ;;  %v267_v20 = vmul.f32 %v12601_v19, %v12601_v19 }
  0xf5   : > { %10959 = vmatprep.mubr.msk.f32.mxu0 %vm379_vm0, %v12900_v10 }
  0xf8   : > { %10960 = vmatmul.mubr.msk.f32.gmra.mrb[62].mxu0 %vm379_vm0, %v12909_v11 }
  0xf9   : > { %10962 = vmatprep.mubr.msk.f32.mxu0 %vm379_vm0, %v264_v14  ;;  %v271_v14 = vmul.f32 %v12636_v27, %v12636_v27 }
  0xfc   : > { %10963 = vmatmul.mubr.msk.f32.gmra.mrb[64].mxu0 %vm379_vm0, %v265_v24  ;;  %v272_v24 = vmul.f32 %v12639_v28, %v12639_v28 }
  0xfd   : > { %10965 = vmatprep.mubr.msk.f32.mxu0 %vm379_vm0, %v266_v21  ;;  %v273_v21 = vmul.f32 %v12646_v29, %v12646_v29 }
 0x100   : > { %10966 = vmatmul.mubr.msk.f32.gmra.mrb[66].mxu0 %vm379_vm0, %v267_v20  ;;  %v274_v20 = vmul.f32 %v12649_v30, %v12649_v30 }
 0x101   : > { %10968 = vmatprep.mubr.msk.f32.mxu0 %vm379_vm0, %v268_v8  ;;  %v275_v8 = vmul.f32 %v12656_v31, %v12656_v31 }
 0x104   : > { %10969 = vmatmul.mubr.msk.f32.gmra.mrb[68].mxu0 %vm379_vm0, %v269_v15  ;;  %v276_v15 = vmul.f32 %v12659_v32, %v12659_v32 }
 0x105   : > { %10971 = vmatprep.mubr.msk.f32.mxu0 %vm379_vm0, %v270_v16  ;;  %v277_v16 = vmul.f32 %v12666_v33, %v12666_v33 }
 0x108   : > { %10972 = vmatmul.mubr.msk.f32.gmra.mrb[70].mxu0 %vm379_vm0, %v271_v14  ;;  %v278_v14 = vmul.f32 %v12669_v34, %v12669_v34 }
 0x109   : > { %10974 = vmatprep.mubr.msk.f32.mxu0 %vm379_vm0, %v272_v24  ;;  %v279_v24 = vmul.f32 %v12676_v35, %v12676_v35 }
 0x10c   : > { %10975 = vmatmul.mubr.msk.f32.gmra.mrb[72].mxu0 %vm379_vm0, %v273_v21  ;;  %v280_v21 = vmul.f32 %v12679_v36, %v12679_v36 }
 0x10d   : > { %10977 = vmatprep.mubr.msk.f32.mxu0 %vm379_vm0, %v274_v20  ;;  %v281_v20 = vmul.f32 %v12686_v37, %v12686_v37 }
 0x110   : > { %10978 = vmatmul.mubr.msk.f32.gmra.mrb[74].mxu0 %vm379_vm0, %v275_v8  ;;  %v282_v8 = vmul.f32 %v12689_v38, %v12689_v38 }
 0x111   : > { %10980 = vmatprep.mubr.msk.f32.mxu0 %vm379_vm0, %v276_v15  ;;  %v283_v15 = vmul.f32 %v12696_v39, %v12696_v39 }
 0x114   : > { %10981 = vmatmul.mubr.msk.f32.gmra.mrb[76].mxu0 %vm379_vm0, %v277_v16  ;;  %v284_v16 = vmul.f32 %v12699_v40, %v12699_v40 }
 0x115   : > { %10983 = vmatprep.mubr.msk.f32.mxu0 %vm379_vm0, %v278_v14  ;;  %v285_v14 = vmul.f32 %v12706_v41, %v12706_v41 }
 0x118   : > { %10984 = vmatmul.mubr.msk.f32.gmra.mrb[78].mxu0 %vm379_vm0, %v279_v24  ;;  %v286_v24 = vmul.f32 %v12709_v42, %v12709_v42 }
 0x119   : > { %10986 = vmatprep.mubr.msk.f32.mxu0 %vm379_vm0, %v280_v21  ;;  %v287_v21 = vmul.f32 %v12716_v43, %v12716_v43 }
 0x11c   : > { %10987 = vmatmul.mubr.msk.f32.gmra.mrb[80].mxu0 %vm379_vm0, %v281_v20  ;;  %v288_v20 = vmul.f32 %v12719_v44, %v12719_v44 }
 0x11d   : > { %10989 = vmatprep.mubr.msk.f32.mxu0 %vm379_vm0, %v282_v8  ;;  %v289_v8 = vmul.f32 %v12726_v45, %v12726_v45 }
 0x120   : > { %10990 = vmatmul.mubr.msk.f32.gmra.mrb[82].mxu0 %vm379_vm0, %v283_v15  ;;  %v290_v15 = vmul.f32 %v12729_v46, %v12729_v46 }
 0x121   : > { %10992 = vmatprep.mubr.msk.f32.mxu0 %vm379_vm0, %v284_v16  ;;  %v291_v16 = vmul.f32 %v12736_v47, %v12736_v47 }
 0x124   : > { %10993 = vmatmul.mubr.msk.f32.gmra.mrb[84].mxu0 %vm379_vm0, %v285_v14  ;;  %v292_v14 = vmul.f32 %v12739_v48, %v12739_v48 }
 0x125   : > { %10995 = vmatprep.mubr.msk.f32.mxu0 %vm379_vm0, %v286_v24  ;;  %v293_v24 = vmul.f32 %v12746_v49, %v12746_v49 }
 0x128   : > { %10996 = vmatmul.mubr.msk.f32.gmra.mrb[86].mxu0 %vm379_vm0, %v287_v21  ;;  %v294_v21 = vmul.f32 %v12749_v50, %v12749_v50 }
 0x129   : > { %10998 = vmatprep.mubr.msk.f32.mxu0 %vm379_vm0, %v288_v20  ;;  %v295_v20 = vmul.f32 %v12756_v51, %v12756_v51 }
 0x12c   : > { %10999 = vmatmul.mubr.msk.f32.gmra.mrb[88].mxu0 %vm379_vm0, %v289_v8  ;;  %v296_v8 = vmul.f32 %v12593_v17, %v12593_v17  ;;  %v300_v17 = vmul.f32 %v12770_v53, %v12770_v53 }
 0x12d   : > { %11001 = vmatprep.mubr.msk.f32.mxu0 %vm379_vm0, %v290_v15  ;;  %v297_v15 = vmul.f32 %v12596_v18, %v12596_v18  ;;  %v301_v18 = vmul.f32 %v12777_v54, %v12777_v54 }
 0x130   : > { %11002 = vmatmul.mubr.msk.f32.gmra.mrb[90].mxu0 %vm379_vm0, %v291_v16  ;;  %v298_v16 = vmul.f32 %v12612_v22, %v12612_v22  ;;  %v302_v22 = vmul.f32 %v12780_v55, %v12780_v55 }
 0x131   : > { %11004 = vmatprep.mubr.msk.f32.mxu0 %vm379_vm0, %v292_v14  ;;  %v299_v14 = vmul.f32 %v12767_v52, %v12767_v52 }
 0x134   : > { %11005 = vmatmul.mubr.msk.f32.gmra.mrb[92].mxu0 %vm379_vm0, %v293_v24  ;;  %v303_v24 = vmul.f32 %v12787_v56, %v12787_v56 }
 0x135   : > { %11007 = vmatprep.mubr.msk.f32.mxu0 %vm379_vm0, %v294_v21  ;;  %v304_v21 = vmul.f32 %v12790_v57, %v12790_v57 }
 0x138   : > { %11008 = vmatmul.mubr.msk.f32.gmra.mrb[94].mxu0 %vm379_vm0, %v295_v20  ;;  %v305_v20 = vmul.f32 %v12797_v58, %v12797_v58 }
 0x139   : > { %11010 = vmatprep.mubr.msk.f32.mxu0 %vm379_vm0, %v296_v8  ;;  %v306_v8 = vmul.f32 %v12800_v59, %v12800_v59 }
 0x13c   : > { %11011 = vmatmul.mubr.msk.f32.gmra.mrb[96].mxu0 %vm379_vm0, %v297_v15  ;;  %v307_v15 = vmul.f32 %v12807_v60, %v12807_v60 }
 0x13d   : > { %11013 = vmatprep.mubr.msk.f32.mxu0 %vm379_vm0, %v298_v16  ;;  %v308_v16 = vmul.f32 %v12810_v61, %v12810_v61 }
 0x140   : > { %11014 = vmatmul.mubr.msk.f32.gmra.mrb[98].mxu0 %vm379_vm0, %v299_v14 }
 0x141   : > { %11016 = vmatprep.mubr.msk.f32.mxu0 %vm379_vm0, %v300_v17  ;;  %v309_v17 = vmul.f32 %v12817_v62, %v12817_v62 }
 0x144   : > { %11017 = vmatmul.mubr.msk.f32.gmra.mrb[100].mxu0 %vm379_vm0, %v301_v18 }
 0x145   : > { %11019 = vmatprep.mubr.msk.f32.mxu0 %vm379_vm0, %v302_v22  ;;  %v310_v22 = vmul.f32 %v12820_v63, %v12820_v63 }
 0x148   : > { %11020 = vmatmul.mubr.msk.f32.gmra.mrb[102].mxu0 %vm379_vm0, %v303_v24 }
 0x149   : > { %11022 = vmatprep.mubr.msk.f32.mxu0 %vm379_vm0, %v304_v21 }
 0x14c   : > { %11023 = vmatmul.mubr.msk.f32.gmra.mrb[104].mxu0 %vm379_vm0, %v305_v20  ;;  %v311_v20 = vmul.f32 %v12827_v0, %v12827_v0 }
 0x14d   : > { %11025 = vmatprep.mubr.msk.f32.mxu0 %vm379_vm0, %v306_v8  ;;  %v312_v8 = vmul.f32 %v12830_v1, %v12830_v1 }
 0x14f   : > { %v10868_v14 = vpop.f32.mrb[0].mxu0 }
 0x150   : > { %v926_v18 = vpop.f32.mrb[1].mxu0  ;;  %11026 = vmatmul.mubr.msk.f32.gmra.mrb[106].mxu0 %vm379_vm0, %v307_v15 }
 0x151   : > { %v11670_v24 = vpack.c.bf16 %v10868_v14, %v926_v18  ;;  %11028 = vmatprep.mubr.msk.f32.mxu0 %vm379_vm0, %v308_v16  ;;  %v313_v16 = vmul.f32 %v12837_v2, %v12837_v2 }
 0x153   : > { %v10871_v21 = vpop.f32.mrb[2].mxu0  ;;  %11671 = vmatprep.subr.bf16.mxu1 %v11670_v24 }
 0x154   : > { %v936_v51 = vpop.f32.mrb[3].mxu0  ;;  %11029 = vmatmul.mubr.msk.f32.gmra.mrb[108].mxu0 %vm379_vm0, %v309_v17  ;;  %11673 = vmatpush3.bf16.msra.mxu1 %v11670_v24  ;;  %v314_v17 = vmul.f32 %v12840_v3, %v12840_v3 }
 0x155   : > { %v11674_v50 = vpack.c.bf16 %v10871_v21, %v936_v51  ;;  %11031 = vmatprep.mubr.msk.f32.mxu0 %vm379_vm0, %v310_v22  ;;  %v315_v22 = vmul.f32 %v12847_v4, %v12847_v4 }
 0x157   : > { %v10874_v15 = vpop.f32.mrb[4].mxu0  ;;  %11111 = vmatmul.mubr.msk.f32.vlgmr.msra.gmra.mrb[0].mxu1 %vm379_vm0, %v12582_v13  ;;  %11675 = vmatprep.subr.bf16.mxu1 %v11674_v50 }
 0x158   : > { %v946_v14 = vpop.f32.mrb[5].mxu0  ;;  %11032 = vmatmul.mubr.msk.f32.gmra.mrb[110].mxu0 %vm379_vm0, %v311_v20  ;;  %11677 = vmatpush3.bf16.msra.mxu1 %v11674_v50  ;;  %v316_v50 = vmul.f32 %v12850_v5, %v12850_v5 }
 0x159   : > { %v11678_v18 = vpack.c.bf16 %v10874_v15, %v946_v14  ;;  %11117 = vmatprep.mubr.msk.f32.mxu1 %vm379_vm0, %v12577_v12  ;;  %11034 = vmatprep.mubr.msk.f32.mxu0 %vm379_vm0, %v312_v8  ;;  %v317_v8 = vmul.f32 %v12857_v6, %v12857_v6 }
 0x15b   : > { %v10877_v51 = vpop.f32.mrb[6].mxu0  ;;  %11118 = vmatmul.mubr.msk.f32.vlgmr.msra.gmra.mrb[2].mxu1 %vm379_vm0, %v12582_v13  ;;  %11679 = vmatprep.subr.bf16.mxu1 %v11678_v18 }
 0x15c   : > { %v956_v24 = vpop.f32.mrb[7].mxu0  ;;  %11035 = vmatmul.mubr.msk.f32.gmra.mrb[112].mxu0 %vm379_vm0, %v313_v16  ;;  %11681 = vmatpush3.bf16.msra.mxu1 %v11678_v18  ;;  %v318_v16 = vmul.f32 %v12860_v7, %v12860_v7  ;;  %v319_v18 = vmul.f32 %v12867_v9, %v12867_v9 }
 0x15d   : > { %v11682_v21 = vpack.c.bf16 %v10877_v51, %v956_v24  ;;  %11124 = vmatprep.mubr.msk.f32.mxu1 %vm379_vm0, %v12577_v12  ;;  %11037 = vmatprep.mubr.msk.f32.mxu0 %vm379_vm0, %v314_v17 }
 0x15f   : > { %v10880_v20 = vpop.f32.mrb[8].mxu0  ;;  %11125 = vmatmul.mubr.msk.f32.vlgmr.msra.gmra.mrb[4].mxu1 %vm379_vm0, %v12582_v13  ;;  %11683 = vmatprep.subr.bf16.mxu1 %v11682_v21 }
 0x160   : > { %v966_v15 = vpop.f32.mrb[9].mxu0  ;;  %11038 = vmatmul.mubr.msk.f32.gmra.mrb[114].mxu0 %vm379_vm0, %v315_v22  ;;  %11685 = vmatpush3.bf16.msra.mxu1 %v11682_v21  ;;  %v17955_v22 = vld [vmem:[#allocation17_spill] sm:$0xff] }
 0x161   : > { %v11686_v14 = vpack.c.bf16 %v10880_v20, %v966_v15  ;;  %11131 = vmatprep.mubr.msk.f32.mxu1 %vm379_vm0, %v12577_v12  ;;  %11040 = vmatprep.mubr.msk.f32.mxu0 %vm379_vm0, %v316_v50  ;;  %v320_v24 = vmul.f32 %v17955_v22, %v17955_v22  ;;  %v17956_v20 = vld [vmem:[#allocation18_spill] sm:$0xff] }
 0x162   : > { %v321_v15 = vmul.f32 %v17956_v20, %v17956_v20 }
 0x163   : > { %v10883_v17 = vpop.f32.mrb[10].mxu0  ;;  %11132 = vmatmul.mubr.msk.f32.vlgmr.msra.gmra.mrb[6].mxu1 %vm379_vm0, %v12582_v13  ;;  %11687 = vmatprep.subr.bf16.mxu1 %v11686_v14 }
 0x164   : > { %v976_v51 = vpop.f32.mrb[11].mxu0  ;;  %11041 = vmatmul.mubr.msk.f32.gmra.mrb[116].mxu0 %vm379_vm0, %v317_v8  ;;  %11689 = vmatpush3.bf16.msra.mxu1 %v11686_v14  ;;  %v17957_v8 = vld [vmem:[#allocation19_spill] sm:$0xff] }
 0x165   : > { %v11690_v21 = vpack.c.bf16 %v10883_v17, %v976_v51  ;;  %11138 = vmatprep.mubr.msk.f32.mxu1 %vm379_vm0, %v12577_v12  ;;  %11043 = vmatprep.mubr.msk.f32.mxu0 %vm379_vm0, %v318_v16  ;;  %v322_v14 = vmul.f32 %v17957_v8, %v17957_v8  ;;  %v17958_v51 = vld [vmem:[#allocation20_spill] sm:$0xff] }
 0x166   : > { %v323_v48 = vmul.f32 %v17958_v51, %v17958_v51 }
 0x167   : > { %v10886_v50 = vpop.f32.mrb[12].mxu0  ;;  %11139 = vmatmul.mubr.msk.f32.vlgmr.msra.gmra.mrb[8].mxu1 %vm379_vm0, %v12582_v13  ;;  %11691 = vmatprep.subr.bf16.mxu1 %v11690_v21 }
 0x168   : > { %v986_v49 = vpop.f32.mrb[13].mxu0  ;;  %11044 = vmatmul.mubr.msk.f32.gmra.mrb[118].mxu0 %vm379_vm0, %v319_v18  ;;  %11693 = vmatpush3.bf16.msra.mxu1 %v11690_v21  ;;  %v17959_v18 = vld [vmem:[#allocation21_spill] sm:$0xff] }
 0x169   : > { %v11694_v17 = vpack.c.bf16 %v10886_v50, %v986_v49  ;;  %11145 = vmatprep.mubr.msk.f32.mxu1 %vm379_vm0, %v12577_v12  ;;  %11046 = vmatprep.mubr.msk.f32.mxu0 %vm379_vm0, %v320_v24  ;;  %v324_v49 = vmul.f32 %v17959_v18, %v17959_v18  ;;  %v17960_v50 = vld [vmem:[#allocation22_spill] sm:$0xff] }
 0x16a   : > { %v325_v51 = vmul.f32 %v17960_v50, %v17960_v50 }
 0x16b   : > { %v10889_v16 = vpop.f32.mrb[14].mxu0  ;;  %11146 = vmatmul.mubr.msk.f32.vlgmr.msra.gmra.mrb[10].mxu1 %vm379_vm0, %v12582_v13  ;;  %11695 = vmatprep.subr.bf16.mxu1 %v11694_v17 }
 0x16c   : > { %v996_v47 = vpop.f32.mrb[15].mxu0  ;;  %11047 = vmatmul.mubr.msk.f32.gmra.mrb[120].mxu0 %vm379_vm0, %v321_v15  ;;  %11697 = vmatpush3.bf16.msra.mxu1 %v11694_v17  ;;  %v327_v17 = vmul.f32 %v12909_v11, %v12909_v11 }
 0x16d   : > { %v11698_v21 = vpack.c.bf16 %v10889_v16, %v996_v47  ;;  %11152 = vmatprep.mubr.msk.f32.mxu1 %vm379_vm0, %v12577_v12  ;;  %11049 = vmatprep.mubr.msk.f32.mxu0 %vm379_vm0, %v322_v14  ;;  %v326_v47 = vmul.f32 %v12900_v10, %v12900_v10 }
 0x16f   : > { %v10892_v24 = vpop.f32.mrb[16].mxu0  ;;  %11153 = vmatmul.mubr.msk.f32.vlgmr.msra.gmra.mrb[12].mxu1 %vm379_vm0, %v12582_v13  ;;  %11699 = vmatprep.subr.bf16.mxu1 %v11698_v21 }
 0x170   : > { %v1006_v8 = vpop.f32.mrb[17].mxu0  ;;  %11050 = vmatmul.mubr.msk.f32.gmra.mrb[122].mxu0 %vm379_vm0, %v323_v48  ;;  %11701 = vmatpush3.bf16.msra.mxu1 %v11698_v21 }
 0x171   : > { %v11702_v15 = vpack.c.bf16 %v10892_v24, %v1006_v8  ;;  %11159 = vmatprep.mubr.msk.f32.mxu1 %vm379_vm0, %v12577_v12  ;;  %11052 = vmatprep.mubr.msk.f32.mxu0 %vm379_vm0, %v324_v49 }
 0x173   : > { %v10895_v14 = vpop.f32.mrb[18].mxu0  ;;  %11160 = vmatmul.mubr.msk.f32.vlgmr.msra.gmra.mrb[14].mxu1 %vm379_vm0, %v12582_v13  ;;  %11703 = vmatprep.subr.bf16.mxu1 %v11702_v15 }
 0x174   : > { %v1016_v16 = vpop.f32.mrb[19].mxu0  ;;  %11053 = vmatmul.mubr.msk.f32.gmra.mrb[124].mxu0 %vm379_vm0, %v325_v51  ;;  %11705 = vmatpush3.bf16.msra.mxu1 %v11702_v15  ;;  %v17961_v51 = vld [vmem:[#allocation9_spill] sm:$0xff] }
 0x175   : > { %v11706_v48 = vpack.c.bf16 %v10895_v14, %v1016_v16  ;;  %11166 = vmatprep.mubr.msk.f32.mxu1 %vm379_vm0, %v12577_v12  ;;  %11055 = vmatprep.mubr.msk.f32.mxu0 %vm379_vm0, %v326_v47  ;;  %v331_v47 = vmul.f32 %v12767_v52, %v12601_v19  ;;  %v17962_v14 = vld [vmem:[#allocation10_spill] sm:$0xff]  ;;  %v333_v19 = vmul.f32 %v12777_v54, %v12626_v25 }
 0x176   : > { %v335_v25 = vmul.f32 %v12787_v56, %v12636_v27  ;;  %v337_v27 = vmul.f32 %v12797_v58, %v12646_v29  ;;  %v339_v29 = vmul.f32 %v12807_v60, %v12656_v31  ;;  %v341_v31 = vmul.f32 %v12817_v62, %v12666_v33 }
 0x177   : > { %v10898_v8 = vpop.f32.mrb[20].mxu0  ;;  %11167 = vmatmul.mubr.msk.f32.vlgmr.msra.gmra.mrb[16].mxu1 %vm379_vm0, %v12582_v13  ;;  %11707 = vmatprep.subr.bf16.mxu1 %v11706_v48  ;;  %v343_v33 = vmul.f32 %v12827_v0, %v12676_v35  ;;  %v345_v35 = vmul.f32 %v12837_v2, %v12686_v37  ;;  %v347_v37 = vmul.f32 %v12847_v4, %v12696_v39 }
 0x178   : > { %v1026_v49 = vpop.f32.mrb[21].mxu0  ;;  %11056 = vmatmul.mubr.msk.f32.gmra.mrb[126].mxu0 %vm379_vm0, %v327_v17  ;;  %11709 = vmatpush3.bf16.msra.mxu1 %v11706_v48  ;;  %v332_v17 = vmul.f32 %v12770_v53, %v12615_v23  ;;  %v17963_v48 = vld [vmem:[#allocation11_spill] sm:$0xff]  ;;  %v334_v23 = vmul.f32 %v12780_v55, %v12629_v26  ;;  %v336_v26 = vmul.f32 %v12790_v57, %v12639_v28 }
 0x179   : > { %v11710_v21 = vpack.c.bf16 %v10898_v8, %v1026_v49  ;;  %11173 = vmatprep.mubr.msk.f32.mxu1 %vm379_vm0, %v12577_v12  ;;  %11058 = vmatprep.mubr.msk.f32.mxu0 %vm379_vm0, %v17961_v51  ;;  %v338_v28 = vmul.f32 %v12800_v59, %v12649_v30  ;;  %v340_v30 = vmul.f32 %v12810_v61, %v12659_v32 }
 0x17a   : > { %v342_v32 = vmul.f32 %v12820_v63, %v12669_v34  ;;  %v344_v34 = vmul.f32 %v12830_v1, %v12679_v36  ;;  %v346_v36 = vmul.f32 %v12840_v3, %v12689_v38  ;;  %v348_v38 = vmul.f32 %v12850_v5, %v12699_v40 }
 0x17b   : > { %v10901_v24 = vpop.f32.mrb[22].mxu0  ;;  %11174 = vmatmul.mubr.msk.f32.vlgmr.msra.gmra.mrb[18].mxu1 %vm379_vm0, %v12582_v13  ;;  %11711 = vmatprep.subr.bf16.mxu1 %v11710_v21  ;;  %v349_v39 = vmul.f32 %v12857_v6, %v12706_v41  ;;  %v350_v40 = vmul.f32 %v12860_v7, %v12709_v42  ;;  %v351_v41 = vmul.f32 %v12867_v9, %v12716_v43 }
 0x17c   : > { %v1036_v15 = vpop.f32.mrb[23].mxu0  ;;  %11059 = vmatmul.mubr.msk.f32.gmra.mrb[128].mxu0 %vm379_vm0, %v17962_v14  ;;  %11713 = vmatpush3.bf16.msra.mxu1 %v11710_v21  ;;  %v352_v42 = vmul.f32 %v17955_v22, %v12719_v44  ;;  %v353_v43 = vmul.f32 %v17956_v20, %v12726_v45  ;;  %v17964_v44 = vld [vmem:[#allocation19_spill] sm:$0xff]  ;;  %v17966_v45 = vld [vmem:[#allocation20_spill] sm:$0xff] }
 0x17d   : > { %v11714_v16 = vpack.c.bf16 %v10901_v24, %v1036_v15  ;;  %11180 = vmatprep.mubr.msk.f32.mxu1 %vm379_vm0, %v12577_v12  ;;  %11061 = vmatprep.mubr.msk.f32.mxu0 %vm379_vm0, %v17963_v48  ;;  %v354_v22 = vmul.f32 %v17964_v44, %v12729_v46 }
 0x17f   : > { %v10904_v8 = vpop.f32.mrb[24].mxu0  ;;  %11181 = vmatmul.mubr.msk.f32.vlgmr.msra.gmra.mrb[20].mxu1 %vm379_vm0, %v12582_v13  ;;  %11715 = vmatprep.subr.bf16.mxu1 %v11714_v16 }
 0x180   : > { %v1046_v52 = vpop.f32.mrb[25].mxu0  ;;  %11062 = vmatmul.mubr.msk.f32.gmra.mrb[130].mxu0 %vm379_vm0, %v331_v47  ;;  %11717 = vmatpush3.bf16.msra.mxu1 %v11714_v16 }
 0x181   : > { %v11718_v53 = vpack.c.bf16 %v10904_v8, %v1046_v52  ;;  %11187 = vmatprep.mubr.msk.f32.mxu1 %vm379_vm0, %v12577_v12  ;;  %11064 = vmatprep.mubr.msk.f32.mxu0 %vm379_vm0, %v332_v17  ;;  %v17965_v52 = vld [vmem:[#allocation12_spill] sm:$0xff] }
 0x182   : > { %v355_v20 = vmul.f32 %v17966_v45, %v17965_v52 }
 0x183   : > { %v10907_v49 = vpop.f32.mrb[26].mxu0  ;;  %11188 = vmatmul.mubr.msk.f32.vlgmr.msra.gmra.mrb[22].mxu1 %vm379_vm0, %v12582_v13  ;;  %11719 = vmatprep.subr.bf16.mxu1 %v11718_v53 }
 0x184   : > { %v1056_v54 = vpop.f32.mrb[27].mxu0  ;;  %11065 = vmatmul.mubr.msk.f32.gmra.mrb[132].mxu0 %vm379_vm0, %v333_v19  ;;  %11721 = vmatpush3.bf16.msra.mxu1 %v11718_v53  ;;  %v17967_v53 = vld [vmem:[#allocation13_spill] sm:$0xff] }
 0x185   : > { %v11722_v55 = vpack.c.bf16 %v10907_v49, %v1056_v54  ;;  %11194 = vmatprep.mubr.msk.f32.mxu1 %vm379_vm0, %v12577_v12  ;;  %11067 = vmatprep.mubr.msk.f32.mxu0 %vm379_vm0, %v334_v23  ;;  %v356_v46 = vmul.f32 %v17959_v18, %v17967_v53  ;;  %v17968_v54 = vld [vmem:[#allocation14_spill] sm:$0xff] }
 0x187   : > { %v10910_v21 = vpop.f32.mrb[28].mxu0  ;;  %11195 = vmatmul.mubr.msk.f32.vlgmr.msra.gmra.mrb[24].mxu1 %vm379_vm0, %v12582_v13  ;;  %11723 = vmatprep.subr.bf16.mxu1 %v11722_v55 }
 0x188   : > { %v1066_v56 = vpop.f32.mrb[29].mxu0  ;;  %11068 = vmatmul.mubr.msk.f32.gmra.mrb[134].mxu0 %vm379_vm0, %v335_v25  ;;  %11725 = vmatpush3.bf16.msra.mxu1 %v11722_v55 }
 0x189   : > { %v11726_v57 = vpack.c.bf16 %v10910_v21, %v1066_v56  ;;  %11201 = vmatprep.mubr.msk.f32.mxu1 %vm379_vm0, %v12577_v12  ;;  %11070 = vmatprep.mubr.msk.f32.mxu0 %vm379_vm0, %v336_v26  ;;  %v357_v26 = vmul.f32 %v17960_v50, %v17968_v54  ;;  %v17969_v21 = vld [vmem:[#allocation15_spill] sm:$0xff] }
 0x18a   : > { %v358_v18 = vmul.f32 %v12900_v10, %v17969_v21 }
 0x18b   : > { %v10913_v51 = vpop.f32.mrb[30].mxu0  ;;  %11202 = vmatmul.mubr.msk.f32.vlgmr.msra.gmra.mrb[26].mxu1 %vm379_vm0, %v12582_v13  ;;  %11727 = vmatprep.subr.bf16.mxu1 %v11726_v57 }
 0x18c   : > { %v1076_v58 = vpop.f32.mrb[31].mxu0  ;;  %11071 = vmatmul.mubr.msk.f32.gmra.mrb[136].mxu0 %vm379_vm0, %v337_v27  ;;  %11729 = vmatpush3.bf16.msra.mxu1 %v11726_v57 }
 0x18d   : > { %v11730_v59 = vpack.c.bf16 %v10913_v51, %v1076_v58  ;;  %11208 = vmatprep.mubr.msk.f32.mxu1 %vm379_vm0, %v12577_v12  ;;  %11073 = vmatprep.mubr.msk.f32.mxu0 %vm379_vm0, %v338_v28  ;;  %v17970_v28 = vld [vmem:[#allocation16_spill] sm:$0xff] }
 0x18e   : > { %v359_v50 = vmul.f32 %v12909_v11, %v17970_v28 }
 0x18f   : > { %v10916_v24 = vpop.f32.mrb[32].mxu0  ;;  %11209 = vmatmul.mubr.msk.f32.vlgmr.msra.gmra.mrb[28].mxu1 %vm379_vm0, %v12582_v13  ;;  %11731 = vmatprep.subr.bf16.mxu1 %v11730_v59 }
 0x190   : > { %v1086_v60 = vpop.f32.mrb[33].mxu0  ;;  %11074 = vmatmul.mubr.msk.f32.gmra.mrb[138].mxu0 %vm379_vm0, %v339_v29  ;;  %11733 = vmatpush3.bf16.msra.mxu1 %v11730_v59 }
 0x191   : > { %v11734_v61 = vpack.c.bf16 %v10916_v24, %v1086_v60  ;;  %11215 = vmatprep.mubr.msk.f32.mxu1 %vm379_vm0, %v12577_v12  ;;  %11076 = vmatprep.mubr.msk.f32.mxu0 %vm379_vm0, %v340_v30 }
 0x193   : > { %v10919_v47 = vpop.f32.mrb[34].mxu0  ;;  %11216 = vmatmul.mubr.msk.f32.vlgmr.msra.gmra.mrb[30].mxu1 %vm379_vm0, %v12582_v13  ;;  %11735 = vmatprep.subr.bf16.mxu1 %v11734_v61 }
 0x194   : > { %v1096_v62 = vpop.f32.mrb[35].mxu0  ;;  %11077 = vmatmul.mubr.msk.f32.gmra.mrb[140].mxu0 %vm379_vm0, %v341_v31  ;;  %11737 = vmatpush3.bf16.msra.mxu1 %v11734_v61 }
 0x195   : > { %v11738_v63 = vpack.c.bf16 %v10919_v47, %v1096_v62  ;;  %11222 = vmatprep.mubr.msk.f32.mxu1 %vm379_vm0, %v12577_v12  ;;  %11079 = vmatprep.mubr.msk.f32.mxu0 %vm379_vm0, %v342_v32 }
 0x197   : > { %v10922_v15 = vpop.f32.mrb[36].mxu0  ;;  %11223 = vmatmul.mubr.msk.f32.vlgmr.msra.gmra.mrb[32].mxu1 %vm379_vm0, %v12582_v13  ;;  %11739 = vmatprep.subr.bf16.mxu1 %v11738_v63 }
 0x198   : > { %v1106_v0 = vpop.f32.mrb[37].mxu0  ;;  %11080 = vmatmul.mubr.msk.f32.gmra.mrb[142].mxu0 %vm379_vm0, %v343_v33  ;;  %11741 = vmatpush3.bf16.msra.mxu1 %v11738_v63 }
 0x199   : > { %v11742_v1 = vpack.c.bf16 %v10922_v15, %v1106_v0  ;;  %11229 = vmatprep.mubr.msk.f32.mxu1 %vm379_vm0, %v12577_v12  ;;  %11082 = vmatprep.mubr.msk.f32.mxu0 %vm379_vm0, %v344_v34 }
 0x19b   : > { %v10925_v14 = vpop.f32.mrb[38].mxu0  ;;  %11230 = vmatmul.mubr.msk.f32.vlgmr.msra.gmra.mrb[34].mxu1 %vm379_vm0, %v12582_v13  ;;  %11743 = vmatprep.subr.bf16.mxu1 %v11742_v1 }
 0x19c   : > { %v1116_v2 = vpop.f32.mrb[39].mxu0  ;;  %11083 = vmatmul.mubr.msk.f32.gmra.mrb[144].mxu0 %vm379_vm0, %v345_v35  ;;  %11745 = vmatpush3.bf16.msra.mxu1 %v11742_v1 }
 0x19d   : > { %v11746_v3 = vpack.c.bf16 %v10925_v14, %v1116_v2  ;;  %11236 = vmatprep.mubr.msk.f32.mxu1 %vm379_vm0, %v12577_v12  ;;  %11085 = vmatprep.mubr.msk.f32.mxu0 %vm379_vm0, %v346_v36 }
 0x19f   : > { %v10928_v17 = vpop.f32.mrb[40].mxu0  ;;  %11237 = vmatmul.mubr.msk.f32.vlgmr.msra.gmra.mrb[36].mxu1 %vm379_vm0, %v12582_v13  ;;  %11747 = vmatprep.subr.bf16.mxu1 %v11746_v3 }
 0x1a0   : > { %v1126_v4 = vpop.f32.mrb[41].mxu0  ;;  %11086 = vmatmul.mubr.msk.f32.gmra.mrb[146].mxu0 %vm379_vm0, %v347_v37  ;;  %11749 = vmatpush3.bf16.msra.mxu1 %v11746_v3 }
 0x1a1   : > { %v11750_v5 = vpack.c.bf16 %v10928_v17, %v1126_v4  ;;  %11243 = vmatprep.mubr.msk.f32.mxu1 %vm379_vm0, %v12577_v12  ;;  %11088 = vmatprep.mubr.msk.f32.mxu0 %vm379_vm0, %v348_v38 }
 0x1a3   : > { %v10931_v16 = vpop.f32.mrb[42].mxu0  ;;  %11244 = vmatmul.mubr.msk.f32.vlgmr.msra.gmra.mrb[38].mxu1 %vm379_vm0, %v12582_v13  ;;  %11751 = vmatprep.subr.bf16.mxu1 %v11750_v5 }
 0x1a4   : > { %v1136_v6 = vpop.f32.mrb[43].mxu0  ;;  %11089 = vmatmul.mubr.msk.f32.gmra.mrb[148].mxu0 %vm379_vm0, %v349_v39  ;;  %11753 = vmatpush3.bf16.msra.mxu1 %v11750_v5 }
 0x1a5   : > { %v11754_v7 = vpack.c.bf16 %v10931_v16, %v1136_v6  ;;  %11250 = vmatprep.mubr.msk.f32.mxu1 %vm379_vm0, %v12577_v12  ;;  %11091 = vmatprep.mubr.msk.f32.mxu0 %vm379_vm0, %v350_v40 }
 0x1a7   : > { %v10934_v48 = vpop.f32.mrb[44].mxu0  ;;  %11251 = vmatmul.mubr.msk.f32.vlgmr.msra.gmra.mrb[40].mxu1 %vm379_vm0, %v12582_v13  ;;  %11755 = vmatprep.subr.bf16.mxu1 %v11754_v7 }
 0x1a8   : > { %v1146_v9 = vpop.f32.mrb[45].mxu0  ;;  %11092 = vmatmul.mubr.msk.f32.gmra.mrb[150].mxu0 %vm379_vm0, %v351_v41  ;;  %11757 = vmatpush3.bf16.msra.mxu1 %v11754_v7 }
 0x1a9   : > { %v11758_v8 = vpack.c.bf16 %v10934_v48, %v1146_v9  ;;  %11257 = vmatprep.mubr.msk.f32.mxu1 %vm379_vm0, %v12577_v12  ;;  %11094 = vmatprep.mubr.msk.f32.mxu0 %vm379_vm0, %v352_v42 }
 0x1ab   : > { %v10937_v19 = vpop.f32.mrb[46].mxu0  ;;  %11258 = vmatmul.mubr.msk.f32.vlgmr.msra.gmra.mrb[42].mxu1 %vm379_vm0, %v12582_v13  ;;  %11759 = vmatprep.subr.bf16.mxu1 %v11758_v8 }
 0x1ac   : > { %v1156_v23 = vpop.f32.mrb[47].mxu0  ;;  %11095 = vmatmul.mubr.msk.f32.gmra.mrb[152].mxu0 %vm379_vm0, %v353_v43  ;;  %11761 = vmatpush3.bf16.msra.mxu1 %v11758_v8 }
 0x1ad   : > { %v11762_v49 = vpack.c.bf16 %v10937_v19, %v1156_v23  ;;  %11264 = vmatprep.mubr.msk.f32.mxu1 %vm379_vm0, %v12577_v12  ;;  %11097 = vmatprep.mubr.msk.f32.mxu0 %vm379_vm0, %v354_v22 }
 0x1af   : > { %v10940_v25 = vpop.f32.mrb[48].mxu0  ;;  %11265 = vmatmul.mubr.msk.f32.vlgmr.msra.gmra.mrb[44].mxu1 %vm379_vm0, %v12582_v13  ;;  %11763 = vmatprep.subr.bf16.mxu1 %v11762_v49 }
 0x1b0   : > { %v1166_v55 = vpop.f32.mrb[49].mxu0  ;;  %11098 = vmatmul.mubr.msk.f32.gmra.mrb[154].mxu0 %vm379_vm0, %v355_v20  ;;  %11765 = vmatpush3.bf16.msra.mxu1 %v11762_v49 }
 0x1b1   : > { %v11766_v27 = vpack.c.bf16 %v10940_v25, %v1166_v55  ;;  %11271 = vmatprep.mubr.msk.f32.mxu1 %vm379_vm0, %v12577_v12  ;;  %11100 = vmatprep.mubr.msk.f32.mxu0 %vm379_vm0, %v356_v46 }
 0x1b3   : > { %v10943_v56 = vpop.f32.mrb[50].mxu0  ;;  %11272 = vmatmul.mubr.msk.f32.vlgmr.msra.gmra.mrb[46].mxu1 %vm379_vm0, %v12582_v13  ;;  %11767 = vmatprep.subr.bf16.mxu1 %v11766_v27 }
 0x1b4   : > { %v1176_v57 = vpop.f32.mrb[51].mxu0  ;;  %11101 = vmatmul.mubr.msk.f32.gmra.mrb[156].mxu0 %vm379_vm0, %v357_v26  ;;  %11769 = vmatpush3.bf16.msra.mxu1 %v11766_v27 }
 0x1b5   : > { %v11770_v51 = vpack.c.bf16 %v10943_v56, %v1176_v57  ;;  %11278 = vmatprep.mubr.msk.f32.mxu1 %vm379_vm0, %v12577_v12  ;;  %11103 = vmatprep.mubr.msk.f32.mxu0 %vm379_vm0, %v358_v18 }
 0x1b7   : > { %v10946_v10 = vpop.f32.mrb[52].mxu0  ;;  %11279 = vmatmul.mubr.msk.f32.vlgmr.msra.gmra.mrb[48].mxu1 %vm379_vm0, %v12582_v13  ;;  %11771 = vmatprep.subr.bf16.mxu1 %v11770_v51 }
 0x1b8   : > { %v1186_v29 = vpop.f32.mrb[53].mxu0  ;;  %11104 = vmatmul.mubr.msk.f32.gmra.mrb[158].mxu0 %vm379_vm0, %v359_v50  ;;  %11773 = vmatpush3.bf16.msra.mxu1 %v11770_v51 }
 0x1b9   : > { %v11774_v11 = vpack.c.bf16 %v10946_v10, %v1186_v29  ;;  %11285 = vmatprep.mubr.msk.f32.mxu1 %vm379_vm0, %v12577_v12 }
 0x1bb   : > { %v10949_v58 = vpop.f32.mrb[54].mxu0  ;;  %11286 = vmatmul.mubr.msk.f32.vlgmr.msra.gmra.mrb[50].mxu1 %vm379_vm0, %v12582_v13  ;;  %11775 = vmatprep.subr.bf16.mxu1 %v11774_v11 }
 0x1bc   : > { %v1196_v30 = vpop.f32.mrb[55].mxu0  ;;  %11777 = vmatpush3.bf16.msra.mxu1 %v11774_v11  ;;  %11292 = vmatprep.mubr.msk.f32.mxu1 %vm379_vm0, %v12577_v12 }
 0x1bd   : > { %v11778_v59 = vpack.c.bf16 %v10949_v58, %v1196_v30 }
 0x1bf   : > { %v10952_v24 = vpop.f32.mrb[56].mxu0  ;;  %11293 = vmatmul.mubr.msk.f32.vlgmr.msra.gmra.mrb[52].mxu1 %vm379_vm0, %v12582_v13  ;;  %11779 = vmatprep.subr.bf16.mxu1 %v11778_v59 }
 0x1c0   : > { %v1206_v31 = vpop.f32.mrb[57].mxu0  ;;  %11781 = vmatpush3.bf16.msra.mxu1 %v11778_v59  ;;  %11299 = vmatprep.mubr.msk.f32.mxu1 %vm379_vm0, %v12577_v12 }
 0x1c1   : > { %v11782_v60 = vpack.c.bf16 %v10952_v24, %v1206_v31 }
 0x1c3   : > { %v10955_v32 = vpop.f32.mrb[58].mxu0  ;;  %11300 = vmatmul.mubr.msk.f32.vlgmr.msra.gmra.mrb[54].mxu1 %vm379_vm0, %v12582_v13  ;;  %11783 = vmatprep.subr.bf16.mxu1 %v11782_v60 }
 0x1c4   : > { %v1216_v61 = vpop.f32.mrb[59].mxu0  ;;  %11785 = vmatpush3.bf16.msra.mxu1 %v11782_v60  ;;  %11306 = vmatprep.mubr.msk.f32.mxu1 %vm379_vm0, %v12577_v12 }
 0x1c5   : > { %v11786_v47 = vpack.c.bf16 %v10955_v32, %v1216_v61 }
 0x1c7   : > { %v10958_v33 = vpop.f32.mrb[60].mxu0  ;;  %11307 = vmatmul.mubr.msk.f32.vlgmr.msra.gmra.mrb[56].mxu1 %vm379_vm0, %v12582_v13  ;;  %11787 = vmatprep.subr.bf16.mxu1 %v11786_v47 }
 0x1c8   : > { %v1226_v62 = vpop.f32.mrb[61].mxu0  ;;  %11789 = vmatpush3.bf16.msra.mxu1 %v11786_v47  ;;  %11313 = vmatprep.mubr.msk.f32.mxu1 %vm379_vm0, %v12577_v12 }
 0x1c9   : > { %v11790_v34 = vpack.c.bf16 %v10958_v33, %v1226_v62 }
 0x1cb   : > { %v10961_v63 = vpop.f32.mrb[62].mxu0  ;;  %11314 = vmatmul.mubr.msk.f32.vlgmr.msra.gmra.mrb[58].mxu1 %vm379_vm0, %v12582_v13  ;;  %11791 = vmatprep.subr.bf16.mxu1 %v11790_v34 }
 0x1cc   : > { %v1236_v15 = vpop.f32.mrb[63].mxu0  ;;  %11793 = vmatpush3.bf16.msra.mxu1 %v11790_v34  ;;  %11320 = vmatprep.mubr.msk.f32.mxu1 %vm379_vm0, %v12577_v12 }
 0x1cd   : > { %v11794_v35 = vpack.c.bf16 %v10961_v63, %v1236_v15 }
 0x1cf   : > { %v10964_v0 = vpop.f32.mrb[64].mxu0  ;;  %11321 = vmatmul.mubr.msk.f32.vlgmr.msra.gmra.mrb[60].mxu1 %vm379_vm0, %v12582_v13  ;;  %11795 = vmatprep.subr.bf16.mxu1 %v11794_v35 }
 0x1d0   : > { %v1246_v36 = vpop.f32.mrb[65].mxu0  ;;  %11797 = vmatpush3.bf16.msra.mxu1 %v11794_v35  ;;  %11327 = vmatprep.mubr.msk.f32.mxu1 %vm379_vm0, %v12577_v12 }
 0x1d1   : > { %v11798_v1 = vpack.c.bf16 %v10964_v0, %v1246_v36 }
 0x1d3   : > { %v10967_v14 = vpop.f32.mrb[66].mxu0  ;;  %11328 = vmatmul.mubr.msk.f32.vlgmr.msra.gmra.mrb[62].mxu1 %vm379_vm0, %v12582_v13  ;;  %11799 = vmatprep.subr.bf16.mxu1 %v11798_v1 }
 0x1d4   : > { %v1256_v37 = vpop.f32.mrb[67].mxu0  ;;  %11801 = vmatpush3.bf16.msra.mxu1 %v11798_v1  ;;  %11334 = vmatprep.mubr.msk.f32.mxu1 %vm379_vm0, %v12577_v12 }
 0x1d5   : > { %v11802_v2 = vpack.c.bf16 %v10967_v14, %v1256_v37 }
 0x1d7   : > { %v10970_v38 = vpop.f32.mrb[68].mxu0  ;;  %11335 = vmatmul.mubr.msk.f32.vlgmr.msra.gmra.mrb[64].mxu1 %vm379_vm0, %v12582_v13  ;;  %11803 = vmatprep.subr.bf16.mxu1 %v11802_v2 }
 0x1d8   : > { %v1266_v3 = vpop.f32.mrb[69].mxu0  ;;  %11805 = vmatpush3.bf16.msra.mxu1 %v11802_v2  ;;  %11341 = vmatprep.mubr.msk.f32.mxu1 %vm379_vm0, %v12577_v12 }
 0x1d9   : > { %v11806_v17 = vpack.c.bf16 %v10970_v38, %v1266_v3 }
 0x1db   : > { %v10973_v39 = vpop.f32.mrb[70].mxu0  ;;  %11342 = vmatmul.mubr.msk.f32.vlgmr.msra.gmra.mrb[66].mxu1 %vm379_vm0, %v12582_v13  ;;  %11807 = vmatprep.subr.bf16.mxu1 %v11806_v17 }
 0x1dc   : > { %v1276_v4 = vpop.f32.mrb[71].mxu0  ;;  %11809 = vmatpush3.bf16.msra.mxu1 %v11806_v17  ;;  %11348 = vmatprep.mubr.msk.f32.mxu1 %vm379_vm0, %v12577_v12 }
 0x1dd   : > { %v11810_v40 = vpack.c.bf16 %v10973_v39, %v1276_v4 }
 0x1df   : > { %v10976_v5 = vpop.f32.mrb[72].mxu0  ;;  %11349 = vmatmul.mubr.msk.f32.vlgmr.msra.gmra.mrb[68].mxu1 %vm379_vm0, %v12582_v13  ;;  %11811 = vmatprep.subr.bf16.mxu1 %v11810_v40 }
 0x1e0   : > { %v1286_v16 = vpop.f32.mrb[73].mxu0  ;;  %11813 = vmatpush3.bf16.msra.mxu1 %v11810_v40  ;;  %11355 = vmatprep.mubr.msk.f32.mxu1 %vm379_vm0, %v12577_v12 }
 0x1e1   : > { %v11814_v41 = vpack.c.bf16 %v10976_v5, %v1286_v16 }
 0x1e3   : > { %v10979_v6 = vpop.f32.mrb[74].mxu0  ;;  %11356 = vmatmul.mubr.msk.f32.vlgmr.msra.gmra.mrb[70].mxu1 %vm379_vm0, %v12582_v13  ;;  %11815 = vmatprep.subr.bf16.mxu1 %v11814_v41 }
 0x1e4   : > { %v1296_v42 = vpop.f32.mrb[75].mxu0  ;;  %11817 = vmatpush3.bf16.msra.mxu1 %v11814_v41  ;;  %11362 = vmatprep.mubr.msk.f32.mxu1 %vm379_vm0, %v12577_v12 }
 0x1e5   : > { %v11818_v7 = vpack.c.bf16 %v10979_v6, %v1296_v42 }
 0x1e7   : > { %v10982_v48 = vpop.f32.mrb[76].mxu0  ;;  %11363 = vmatmul.mubr.msk.f32.vlgmr.msra.gmra.mrb[72].mxu1 %vm379_vm0, %v12582_v13  ;;  %11819 = vmatprep.subr.bf16.mxu1 %v11818_v7 }
 0x1e8   : > { %v1306_v43 = vpop.f32.mrb[77].mxu0  ;;  %11821 = vmatpush3.bf16.msra.mxu1 %v11818_v7  ;;  %11369 = vmatprep.mubr.msk.f32.mxu1 %vm379_vm0, %v12577_v12 }
 0x1e9   : > { %v11822_v9 = vpack.c.bf16 %v10982_v48, %v1306_v43 }
 0x1eb   : > { %v10985_v44 = vpop.f32.mrb[78].mxu0  ;;  %11370 = vmatmul.mubr.msk.f32.vlgmr.msra.gmra.mrb[74].mxu1 %vm379_vm0, %v12582_v13  ;;  %11823 = vmatprep.subr.bf16.mxu1 %v11822_v9 }
 0x1ec   : > { %v1316_v22 = vpop.f32.mrb[79].mxu0  ;;  %11825 = vmatpush3.bf16.msra.mxu1 %v11822_v9  ;;  %11376 = vmatprep.mubr.msk.f32.mxu1 %vm379_vm0, %v12577_v12 }
 0x1ed   : > { %v11826_v8 = vpack.c.bf16 %v10985_v44, %v1316_v22 }
 0x1ef   : > { %v10988_v19 = vpop.f32.mrb[80].mxu0  ;;  %11377 = vmatmul.mubr.msk.f32.vlgmr.msra.gmra.mrb[76].mxu1 %vm379_vm0, %v12582_v13  ;;  %11827 = vmatprep.subr.bf16.mxu1 %v11826_v8 }
 0x1f0   : > { %v1326_v52 = vpop.f32.mrb[81].mxu0  ;;  %11829 = vmatpush3.bf16.msra.mxu1 %v11826_v8  ;;  %11383 = vmatprep.mubr.msk.f32.mxu1 %vm379_vm0, %v12577_v12 }
 0x1f1   : > { %v11830_v45 = vpack.c.bf16 %v10988_v19, %v1326_v52 }
 0x1f3   : > { %v10991_v20 = vpop.f32.mrb[82].mxu0  ;;  %11384 = vmatmul.mubr.msk.f32.vlgmr.msra.gmra.mrb[78].mxu1 %vm379_vm0, %v12582_v13  ;;  %11831 = vmatprep.subr.bf16.mxu1 %v11830_v45 }
 0x1f4   : > { %v1336_v23 = vpop.f32.mrb[83].mxu0  ;;  %11833 = vmatpush3.bf16.msra.mxu1 %v11830_v45  ;;  %11390 = vmatprep.mubr.msk.f32.mxu1 %vm379_vm0, %v12577_v12 }
 0x1f5   : > { %v11834_v53 = vpack.c.bf16 %v10991_v20, %v1336_v23 }
 0x1f7   : > { %v10994_v46 = vpop.f32.mrb[84].mxu0  ;;  %11391 = vmatmul.mubr.msk.f32.vlgmr.msra.gmra.mrb[80].mxu1 %vm379_vm0, %v12582_v13  ;;  %11835 = vmatprep.subr.bf16.mxu1 %v11834_v53 }
 0x1f8   : > { %v1346_v49 = vpop.f32.mrb[85].mxu0  ;;  %11837 = vmatpush3.bf16.msra.mxu1 %v11834_v53  ;;  %11397 = vmatprep.mubr.msk.f32.mxu1 %vm379_vm0, %v12577_v12 }
 0x1f9   : > { %v11838_v25 = vpack.c.bf16 %v10994_v46, %v1346_v49 }
 0x1fb   : > { %v10997_v54 = vpop.f32.mrb[86].mxu0  ;;  %11398 = vmatmul.mubr.msk.f32.vlgmr.msra.gmra.mrb[82].mxu1 %vm379_vm0, %v12582_v13  ;;  %11839 = vmatprep.subr.bf16.mxu1 %v11838_v25 }
 0x1fc   : > { %v1356_v26 = vpop.f32.mrb[87].mxu0  ;;  %11841 = vmatpush3.bf16.msra.mxu1 %v11838_v25  ;;  %11404 = vmatprep.mubr.msk.f32.mxu1 %vm379_vm0, %v12577_v12 }
 0x1fd   : > { %v11842_v55 = vpack.c.bf16 %v10997_v54, %v1356_v26 }
 0x1ff   : > { %v11000_v21 = vpop.f32.mrb[88].mxu0  ;;  %11405 = vmatmul.mubr.msk.f32.vlgmr.msra.gmra.mrb[84].mxu1 %vm379_vm0, %v12582_v13  ;;  %11843 = vmatprep.subr.bf16.mxu1 %v11842_v55 }
 0x200   : > { %v1366_v18 = vpop.f32.mrb[89].mxu0  ;;  %11845 = vmatpush3.bf16.msra.mxu1 %v11842_v55  ;;  %11411 = vmatprep.mubr.msk.f32.mxu1 %vm379_vm0, %v12577_v12 }
 0x201   : > { %v11846_v27 = vpack.c.bf16 %v11000_v21, %v1366_v18 }
 0x203   : > { %v11003_v56 = vpop.f32.mrb[90].mxu0  ;;  %11412 = vmatmul.mubr.msk.f32.vlgmr.msra.gmra.mrb[86].mxu1 %vm379_vm0, %v12582_v13  ;;  %11847 = vmatprep.subr.bf16.mxu1 %v11846_v27 }
 0x204   : > { %v1376_v28 = vpop.f32.mrb[91].mxu0  ;;  %11849 = vmatpush3.bf16.msra.mxu1 %v11846_v27  ;;  %11418 = vmatprep.mubr.msk.f32.mxu1 %vm379_vm0, %v12577_v12 }
 0x205   : > { %v11850_v50 = vpack.c.bf16 %v11003_v56, %v1376_v28 }
 0x207   : > { %v11006_v57 = vpop.f32.mrb[92].mxu0  ;;  %11419 = vmatmul.mubr.msk.f32.vlgmr.msra.gmra.mrb[88].mxu1 %vm379_vm0, %v12582_v13  ;;  %11851 = vmatprep.subr.bf16.mxu1 %v11850_v50 }
 0x208   : > { %v1386_v51 = vpop.f32.mrb[93].mxu0  ;;  %11853 = vmatpush3.bf16.msra.mxu1 %v11850_v50  ;;  %11425 = vmatprep.mubr.msk.f32.mxu1 %vm379_vm0, %v12577_v12 }
 0x209   : > { %v11854_v10 = vpack.c.bf16 %v11006_v57, %v1386_v51 }
 0x20b   : > { %v11009_v29 = vpop.f32.mrb[94].mxu0  ;;  %11426 = vmatmul.mubr.msk.f32.vlgmr.msra.gmra.mrb[90].mxu1 %vm379_vm0, %v12582_v13  ;;  %11855 = vmatprep.subr.bf16.mxu1 %v11854_v10 }
 0x20c   : > { %v1396_v11 = vpop.f32.mrb[95].mxu0  ;;  %11857 = vmatpush3.bf16.msra.mxu1 %v11854_v10  ;;  %11432 = vmatprep.mubr.msk.f32.mxu1 %vm379_vm0, %v12577_v12 }
 0x20d   : > { %v11858_v58 = vpack.c.bf16 %v11009_v29, %v1396_v11 }
 0x20f   : > { %v11012_v30 = vpop.f32.mrb[96].mxu0  ;;  %11433 = vmatmul.mubr.msk.f32.vlgmr.msra.gmra.mrb[92].mxu1 %vm379_vm0, %v12582_v13  ;;  %11859 = vmatprep.subr.bf16.mxu1 %v11858_v58 }
 0x210   : > { %v1406_v59 = vpop.f32.mrb[97].mxu0  ;;  %11861 = vmatpush3.bf16.msra.mxu1 %v11858_v58  ;;  %11439 = vmatprep.mubr.msk.f32.mxu1 %vm379_vm0, %v12577_v12 }
 0x211   : > { %v11862_v24 = vpack.c.bf16 %v11012_v30, %v1406_v59 }
 0x213   : > { %v11015_v31 = vpop.f32.mrb[98].mxu0  ;;  %11440 = vmatmul.mubr.msk.f32.vlgmr.msra.gmra.mrb[94].mxu1 %vm379_vm0, %v12582_v13  ;;  %11863 = vmatprep.subr.bf16.mxu1 %v11862_v24 }
 0x214   : > { %v1416_v60 = vpop.f32.mrb[99].mxu0  ;;  %11865 = vmatpush3.bf16.msra.mxu1 %v11862_v24  ;;  %11446 = vmatprep.mubr.msk.f32.mxu1 %vm379_vm0, %v12577_v12 }
 0x215   : > { %v11866_v32 = vpack.c.bf16 %v11015_v31, %v1416_v60 }
 0x217   : > { %v11018_v61 = vpop.f32.mrb[100].mxu0  ;;  %11447 = vmatmul.mubr.msk.f32.vlgmr.msra.gmra.mrb[96].mxu1 %vm379_vm0, %v12582_v13  ;;  %11867 = vmatprep.subr.bf16.mxu1 %v11866_v32 }
 0x218   : > { %v1426_v47 = vpop.f32.mrb[101].mxu0  ;;  %11869 = vmatpush3.bf16.msra.mxu1 %v11866_v32  ;;  %11453 = vmatprep.mubr.msk.f32.mxu1 %vm379_vm0, %v12577_v12 }
 0x219   : > { %v11870_v33 = vpack.c.bf16 %v11018_v61, %v1426_v47 }
 0x21b   : > { %v11021_v62 = vpop.f32.mrb[102].mxu0  ;;  %11454 = vmatmul.mubr.msk.f32.vlgmr.msra.gmra.mrb[98].mxu1 %vm379_vm0, %v12582_v13  ;;  %11871 = vmatprep.subr.bf16.mxu1 %v11870_v33 }
 0x21c   : > { %v1436_v34 = vpop.f32.mrb[103].mxu0  ;;  %11873 = vmatpush3.bf16.msra.mxu1 %v11870_v33  ;;  %11460 = vmatprep.mubr.msk.f32.mxu1 %vm379_vm0, %v12577_v12 }
 0x21d   : > { %v11874_v63 = vpack.c.bf16 %v11021_v62, %v1436_v34 }
 0x21f   : > { %v11024_v15 = vpop.f32.mrb[104].mxu0  ;;  %11461 = vmatmul.mubr.msk.f32.vlgmr.msra.gmra.mrb[100].mxu1 %vm379_vm0, %v12582_v13  ;;  %11875 = vmatprep.subr.bf16.mxu1 %v11874_v63 }
 0x220   : > { %v1446_v35 = vpop.f32.mrb[105].mxu0  ;;  %11877 = vmatpush3.bf16.msra.mxu1 %v11874_v63  ;;  %11467 = vmatprep.mubr.msk.f32.mxu1 %vm379_vm0, %v12577_v12 }
 0x221   : > { %v11878_v0 = vpack.c.bf16 %v11024_v15, %v1446_v35 }
 0x223   : > { %v11027_v36 = vpop.f32.mrb[106].mxu0  ;;  %11468 = vmatmul.mubr.msk.f32.vlgmr.msra.gmra.mrb[102].mxu1 %vm379_vm0, %v12582_v13  ;;  %11879 = vmatprep.subr.bf16.mxu1 %v11878_v0 }
 0x224   : > { %v1456_v1 = vpop.f32.mrb[107].mxu0  ;;  %11881 = vmatpush3.bf16.msra.mxu1 %v11878_v0  ;;  %11474 = vmatprep.mubr.msk.f32.mxu1 %vm379_vm0, %v12577_v12 }
 0x225   : > { %v11882_v14 = vpack.c.bf16 %v11027_v36, %v1456_v1 }
 0x227   : > { %v11030_v37 = vpop.f32.mrb[108].mxu0  ;;  %11475 = vmatmul.mubr.msk.f32.vlgmr.msra.gmra.mrb[104].mxu1 %vm379_vm0, %v12582_v13  ;;  %11883 = vmatprep.subr.bf16.mxu1 %v11882_v14 }
 0x228   : > { %v1466_v2 = vpop.f32.mrb[109].mxu0  ;;  %11885 = vmatpush3.bf16.msra.mxu1 %v11882_v14  ;;  %11481 = vmatprep.mubr.msk.f32.mxu1 %vm379_vm0, %v12577_v12 }
 0x229   : > { %v11886_v38 = vpack.c.bf16 %v11030_v37, %v1466_v2 }
 0x22a   : > { %v11112_v3 = vpop.f32.mrb[0].mxu1 }
 0x22b   : > { %7814 = vst.msk [vmem:[#allocation2 + $0x48] sm:$0xff] %vm379_vm0, %v11112_v3  ;;  %v11033_v17 = vpop.f32.mrb[110].mxu0  ;;  %v1797_v39 = vpop.f32.mrb[1].mxu1  ;;  %11482 = vmatmul.mubr.msk.f32.vlgmr.msra.gmra.mrb[106].mxu1 %vm379_vm0, %v12582_v13  ;;  %11887 = vmatprep.subr.bf16.mxu1 %v11886_v38 }
 0x22c   : > { %7813 = vst.msk [vmem:[#allocation2 + $0x40] sm:$0xff] %vm379_vm0, %v1797_v39  ;;  %v1476_v4 = vpop.f32.mrb[111].mxu0  ;;  %11889 = vmatpush3.bf16.msra.mxu1 %v11886_v38  ;;  %11488 = vmatprep.mubr.msk.f32.mxu1 %vm379_vm0, %v12577_v12 }
 0x22d   : > { %v11890_v40 = vpack.c.bf16 %v11033_v17, %v1476_v4 }
 0x22e   : > { %v11119_v5 = vpop.f32.mrb[2].mxu1 }
 0x22f   : > { %7816 = vst.msk [vmem:[#allocation2 + $0x58] sm:$0xff] %vm379_vm0, %v11119_v5  ;;  %v11036_v16 = vpop.f32.mrb[112].mxu0  ;;  %v1872_v41 = vpop.f32.mrb[3].mxu1  ;;  %11489 = vmatmul.mubr.msk.f32.vlgmr.msra.gmra.mrb[108].mxu1 %vm379_vm0, %v12582_v13  ;;  %11891 = vmatprep.subr.bf16.mxu1 %v11890_v40 }
 0x230   : > { %7815 = vst.msk [vmem:[#allocation2 + $0x50] sm:$0xff] %vm379_vm0, %v1872_v41  ;;  %v1486_v6 = vpop.f32.mrb[113].mxu0  ;;  %11893 = vmatpush3.bf16.msra.mxu1 %v11890_v40  ;;  %11495 = vmatprep.mubr.msk.f32.mxu1 %vm379_vm0, %v12577_v12 }
 0x231   : > { %v11894_v42 = vpack.c.bf16 %v11036_v16, %v1486_v6 }
 0x232   : > { %v11126_v7 = vpop.f32.mrb[4].mxu1 }
 0x233   : > { %7818 = vst.msk [vmem:[#allocation2 + $0x68] sm:$0xff] %vm379_vm0, %v11126_v7  ;;  %v11039_v48 = vpop.f32.mrb[114].mxu0  ;;  %v1947_v43 = vpop.f32.mrb[5].mxu1  ;;  %11496 = vmatmul.mubr.msk.f32.vlgmr.msra.gmra.mrb[110].mxu1 %vm379_vm0, %v12582_v13  ;;  %11895 = vmatprep.subr.bf16.mxu1 %v11894_v42 }
 0x234   : > { %7817 = vst.msk [vmem:[#allocation2 + $0x60] sm:$0xff] %vm379_vm0, %v1947_v43  ;;  %v1496_v9 = vpop.f32.mrb[115].mxu0  ;;  %11897 = vmatpush3.bf16.msra.mxu1 %v11894_v42  ;;  %11502 = vmatprep.mubr.msk.f32.mxu1 %vm379_vm0, %v12577_v12  ;;  %v7974_v43 = vld [vmem:[#allocation2 + $0x8] sm:$0xff] }
 0x235   : > { %v11898_v44 = vpack.c.bf16 %v11039_v48, %v1496_v9 }
 0x236   : > { %v11133_v22 = vpop.f32.mrb[6].mxu1 }
 0x237   : > { %7820 = vst.msk [vmem:[#allocation2 + $0x78] sm:$0xff] %vm379_vm0, %v11133_v22  ;;  %v11042_v8 = vpop.f32.mrb[116].mxu0  ;;  %v2022_v19 = vpop.f32.mrb[7].mxu1  ;;  %11503 = vmatmul.mubr.msk.f32.vlgmr.msra.gmra.mrb[112].mxu1 %vm379_vm0, %v12582_v13  ;;  %11899 = vmatprep.subr.bf16.mxu1 %v11898_v44 }
 0x238   : > { %7819 = vst.msk [vmem:[#allocation2 + $0x70] sm:$0xff] %vm379_vm0, %v2022_v19  ;;  %v1506_v52 = vpop.f32.mrb[117].mxu0  ;;  %11901 = vmatpush3.bf16.msra.mxu1 %v11898_v44  ;;  %11509 = vmatprep.mubr.msk.f32.mxu1 %vm379_vm0, %v12577_v12  ;;  %v7973_v44 = vld [vmem:[#allocation2] sm:$0xff]  ;;  %v7978_v19 = vld [vmem:[#allocation2 + $0x28] sm:$0xff] }
 0x239   : > { %v11902_v45 = vpack.c.bf16 %v11042_v8, %v1506_v52  ;;  %v7976_v8 = vld [vmem:[#allocation2 + $0x18] sm:$0xff] }
 0x23a   : > { %v11140_v20 = vpop.f32.mrb[8].mxu1  ;;  %v13498_v52 = vld [vmem:[#allocation2 + $0x38] sm:$0xff] }
 0x23b   : > { %7822 = vst.msk [vmem:[#allocation2 + $0x88] sm:$0xff] %vm379_vm0, %v11140_v20  ;;  %v11045_v23 = vpop.f32.mrb[118].mxu0  ;;  %v2097_v53 = vpop.f32.mrb[9].mxu1  ;;  %11510 = vmatmul.mubr.msk.f32.vlgmr.msra.gmra.mrb[114].mxu1 %vm379_vm0, %v12582_v13  ;;  %11903 = vmatprep.subr.bf16.mxu1 %v11902_v45 }
 0x23c   : > { %7821 = vst.msk [vmem:[#allocation2 + $0x80] sm:$0xff] %vm379_vm0, %v2097_v53  ;;  %v1516_v46 = vpop.f32.mrb[119].mxu0  ;;  %11905 = vmatpush3.bf16.msra.mxu1 %v11902_v45  ;;  %11516 = vmatprep.mubr.msk.f32.mxu1 %vm379_vm0, %v12577_v12  ;;  %v7977_v53 = vld [vmem:[#allocation2 + $0x20] sm:$0xff] }
 0x23d   : > { %v11906_v49 = vpack.c.bf16 %v11045_v23, %v1516_v46  ;;  %v7975_v23 = vld [vmem:[#allocation2 + $0x10] sm:$0xff] }
 0x23e   : > { %v11147_v25 = vpop.f32.mrb[10].mxu1  ;;  %v13503_v46 = vld [vmem:[#allocation2 + $0x30] sm:$0xff] }
 0x23f   : > { %7824 = vst.msk [vmem:[#allocation2 + $0x98] sm:$0xff] %vm379_vm0, %v11147_v25  ;;  %v11048_v54 = vpop.f32.mrb[120].mxu0  ;;  %v2172_v26 = vpop.f32.mrb[11].mxu1  ;;  %11517 = vmatmul.mubr.msk.f32.vlgmr.msra.gmra.mrb[116].mxu1 %vm379_vm0, %v12582_v13  ;;  %11907 = vmatprep.subr.bf16.mxu1 %v11906_v49 }
 0x240   : > { %7823 = vst.msk [vmem:[#allocation2 + $0x90] sm:$0xff] %vm379_vm0, %v2172_v26  ;;  %v1526_v55 = vpop.f32.mrb[121].mxu0  ;;  %11909 = vmatpush3.bf16.msra.mxu1 %v11906_v49  ;;  %11523 = vmatprep.mubr.msk.f32.mxu1 %vm379_vm0, %v12577_v12  ;;  %v8214_v49 = vadd.f32 %v7976_v8, %v7974_v43  ;;  %v13510_v26 = vld [vmem:[#allocation2 + $0x148] sm:$0xff] }
 0x241   : > { %v11910_v21 = vpack.c.bf16 %v11048_v54, %v1526_v55  ;;  %v13508_v54 = vld [vmem:[#allocation2 + $0x140] sm:$0xff]  ;;  %v13512_v55 = vld [vmem:[#allocation2 + $0x158] sm:$0xff] }
 0x242   : > { %v11154_v18 = vpop.f32.mrb[12].mxu1  ;;  %17971 = vst [vmem:[#allocation17_spill] sm:$0xff] %v13512_v55 }
 0x243   : > { %7826 = vst.msk [vmem:[#allocation2 + $0xa8] sm:$0xff] %vm379_vm0, %v11154_v18  ;;  %v11051_v27 = vpop.f32.mrb[122].mxu0  ;;  %v2247_v56 = vpop.f32.mrb[13].mxu1  ;;  %11524 = vmatmul.mubr.msk.f32.vlgmr.msra.gmra.mrb[118].mxu1 %vm379_vm0, %v12582_v13  ;;  %11911 = vmatprep.subr.bf16.mxu1 %v11910_v21  ;;  %v8213_v18 = vadd.f32 %v7975_v23, %v7973_v44  ;;  %v8061_v44 = vld [vmem:[#allocation2 + $0x2c0] sm:$0xff] }
 0x244   : > { %7825 = vst.msk [vmem:[#allocation2 + $0xa0] sm:$0xff] %vm379_vm0, %v2247_v56  ;;  %v1536_v28 = vpop.f32.mrb[123].mxu0  ;;  %11913 = vmatpush3.bf16.msra.mxu1 %v11910_v21  ;;  %11530 = vmatprep.mubr.msk.f32.mxu1 %vm379_vm0, %v12577_v12  ;;  %v13514_v21 = vld [vmem:[#allocation2 + $0x168] sm:$0xff]  ;;  %v8021_v56 = vld [vmem:[#allocation2 + $0x180] sm:$0xff] }
 0x245   : > { %v11914_v50 = vpack.c.bf16 %v11051_v27, %v1536_v28  ;;  %17972 = vst [vmem:[#allocation18_spill] sm:$0xff] %v13514_v21  ;;  %v13516_v28 = vld [vmem:[#allocation2 + $0x150] sm:$0xff] }
 0x246   : > { %v11161_v57 = vpop.f32.mrb[14].mxu1  ;;  %17973 = vst [vmem:[#allocation21_spill] sm:$0xff] %v13516_v28 }
 0x247   : > { %7828 = vst.msk [vmem:[#allocation2 + $0xb8] sm:$0xff] %vm379_vm0, %v11161_v57  ;;  %v11054_v51 = vpop.f32.mrb[124].mxu0  ;;  %v2322_v10 = vpop.f32.mrb[15].mxu1  ;;  %11531 = vmatmul.mubr.msk.f32.vlgmr.msra.gmra.mrb[120].mxu1 %vm379_vm0, %v12582_v13  ;;  %11915 = vmatprep.subr.bf16.mxu1 %v11914_v50  ;;  %v13519_v57 = vadd.f32 %v13498_v52, %v7978_v19 }
 0x248   : > { %7827 = vst.msk [vmem:[#allocation2 + $0xb0] sm:$0xff] %vm379_vm0, %v2322_v10  ;;  %v1546_v29 = vpop.f32.mrb[125].mxu0  ;;  %11917 = vmatpush3.bf16.msra.mxu1 %v11914_v50  ;;  %11537 = vmatprep.mubr.msk.f32.mxu1 %vm379_vm0, %v12577_v12  ;;  %v8022_v50 = vld [vmem:[#allocation2 + $0x188] sm:$0xff]  ;;  %v8023_v10 = vld [vmem:[#allocation2 + $0x190] sm:$0xff] }
 0x249   : > { %v11918_v11 = vpack.c.bf16 %v11054_v51, %v1546_v29  ;;  %v8025_v29 = vld [vmem:[#allocation2 + $0x1a0] sm:$0xff] }
 0x24a   : > { %v11168_v58 = vpop.f32.mrb[16].mxu1 }
 0x24b   : > { %7830 = vst.msk [vmem:[#allocation2 + $0xc8] sm:$0xff] %vm379_vm0, %v11168_v58  ;;  %v11057_v30 = vpop.f32.mrb[126].mxu0  ;;  %v2397_v59 = vpop.f32.mrb[17].mxu1  ;;  %11538 = vmatmul.mubr.msk.f32.vlgmr.msra.gmra.mrb[122].mxu1 %vm379_vm0, %v12582_v13  ;;  %11919 = vmatprep.subr.bf16.mxu1 %v11918_v11  ;;  %v13524_v58 = vadd.f32 %v13503_v46, %v7977_v53 }
 0x24c   : > { %7829 = vst.msk [vmem:[#allocation2 + $0xc0] sm:$0xff] %vm379_vm0, %v2397_v59  ;;  %v1556_v24 = vpop.f32.mrb[127].mxu0  ;;  %11921 = vmatpush3.bf16.msra.mxu1 %v11918_v11  ;;  %11544 = vmatprep.mubr.msk.f32.mxu1 %vm379_vm0, %v12577_v12  ;;  %v13521_v11 = vld [vmem:[#allocation2 + $0x160] sm:$0xff] }
 0x24d   : > { %v11922_v31 = vpack.c.bf16 %v11057_v30, %v1556_v24  ;;  %17974 = vst [vmem:[#allocation22_spill] sm:$0xff] %v13521_v11  ;;  %v13527_v24 = vld [vmem:[#allocation2 + $0x1b0] sm:$0xff] }
 0x24e   : > { %v11175_v60 = vpop.f32.mrb[18].mxu1 }
 0x24f   : > { %7832 = vst.msk [vmem:[#allocation2 + $0xd8] sm:$0xff] %vm379_vm0, %v11175_v60  ;;  %v11060_v32 = vpop.f32.mrb[128].mxu0  ;;  %v2472_v61 = vpop.f32.mrb[19].mxu1  ;;  %11545 = vmatmul.mubr.msk.f32.vlgmr.msra.gmra.mrb[124].mxu1 %vm379_vm0, %v12582_v13  ;;  %11923 = vmatprep.subr.bf16.mxu1 %v11922_v31  ;;  %v8026_v60 = vld [vmem:[#allocation2 + $0x1a8] sm:$0xff] }
 0x250   : > { %7831 = vst.msk [vmem:[#allocation2 + $0xd0] sm:$0xff] %vm379_vm0, %v2472_v61  ;;  %v1566_v47 = vpop.f32.mrb[129].mxu0  ;;  %11925 = vmatpush3.bf16.msra.mxu1 %v11922_v31  ;;  %11551 = vmatprep.mubr.msk.f32.mxu1 %vm379_vm0, %v12577_v12  ;;  %v8024_v31 = vld [vmem:[#allocation2 + $0x198] sm:$0xff]  ;;  %v13533_v61 = vadd.f32 %v7977_v53, %v7975_v23 }
 0x251   : > { %v11926_v33 = vpack.c.bf16 %v11060_v32, %v1566_v47  ;;  %v13531_v32 = vld [vmem:[#allocation2 + $0x1b8] sm:$0xff]  ;;  %v13535_v47 = vadd.f32 %v7978_v19, %v7976_v8 }
 0x252   : > { %v11182_v62 = vpop.f32.mrb[20].mxu1 }
 0x253   : > { %7834 = vst.msk [vmem:[#allocation2 + $0xe8] sm:$0xff] %vm379_vm0, %v11182_v62  ;;  %v11063_v34 = vpop.f32.mrb[130].mxu0  ;;  %v2547_v63 = vpop.f32.mrb[21].mxu1  ;;  %11552 = vmatmul.mubr.msk.f32.vlgmr.msra.gmra.mrb[126].mxu1 %vm379_vm0, %v12582_v13  ;;  %11927 = vmatprep.subr.bf16.mxu1 %v11926_v33  ;;  %v8257_v62 = vadd.f32 %v8023_v10, %v8021_v56 }
 0x254   : > { %7833 = vst.msk [vmem:[#allocation2 + $0xe0] sm:$0xff] %vm379_vm0, %v2547_v63  ;;  %v1576_v15 = vpop.f32.mrb[131].mxu0  ;;  %11929 = vmatpush3.bf16.msra.mxu1 %v11926_v33  ;;  %11558 = vmatprep.mubr.msk.f32.mxu1 %vm379_vm0, %v12577_v12  ;;  %v13538_v33 = vadd.f32 %v13519_v57, %v8214_v49  ;;  %v7987_v63 = vld [vmem:[#allocation2 + $0x70] sm:$0xff]  ;;  %v13587_v49 = vld [vmem:[#allocation2 + $0x80] sm:$0xff] }
 0x255   : > { %v11930_v35 = vpack.c.bf16 %v11063_v34, %v1576_v15  ;;  %v7988_v15 = vld [vmem:[#allocation2 + $0x78] sm:$0xff] }
 0x256   : > { %v11189_v0 = vpop.f32.mrb[22].mxu1 }
 0x257   : > { %7836 = vst.msk [vmem:[#allocation2 + $0xf8] sm:$0xff] %vm379_vm0, %v11189_v0  ;;  %v11066_v36 = vpop.f32.mrb[132].mxu0  ;;  %v2622_v1 = vpop.f32.mrb[23].mxu1  ;;  %11559 = vmatmul.mubr.msk.f32.vlgmr.msra.gmra.mrb[128].mxu1 %vm379_vm0, %v12582_v13  ;;  %11931 = vmatprep.subr.bf16.mxu1 %v11930_v35  ;;  %v8064_v0 = vld [vmem:[#allocation2 + $0x2d8] sm:$0xff] }
 0x258   : > { %7835 = vst.msk [vmem:[#allocation2 + $0xf0] sm:$0xff] %vm379_vm0, %v2622_v1  ;;  %v1586_v14 = vpop.f32.mrb[133].mxu0  ;;  %11933 = vmatpush3.bf16.msra.mxu1 %v11930_v35  ;;  %11565 = vmatprep.mubr.msk.f32.mxu1 %vm379_vm0, %v12577_v12  ;;  %v8062_v35 = vld [vmem:[#allocation2 + $0x2c8] sm:$0xff]  ;;  %v13544_v1 = vadd.f32 %v13524_v58, %v8213_v18 }
 0x259   : > { %v11934_v37 = vpack.c.bf16 %v11066_v36, %v1586_v14  ;;  %v8258_v36 = vadd.f32 %v8024_v31, %v8022_v50  ;;  %v13597_v50 = vld [vmem:[#allocation2 + $0x98] sm:$0xff] }
 0x25a   : > { %v11196_v2 = vpop.f32.mrb[24].mxu1 }
 0x25b   : > { %7838 = vst.msk [vmem:[#allocation2 + $0x108] sm:$0xff] %vm379_vm0, %v11196_v2  ;;  %v11069_v38 = vpop.f32.mrb[134].mxu0  ;;  %v2697_v3 = vpop.f32.mrb[25].mxu1  ;;  %11566 = vmatmul.mubr.msk.f32.vlgmr.msra.gmra.mrb[130].mxu1 %vm379_vm0, %v12582_v13  ;;  %11935 = vmatprep.subr.bf16.mxu1 %v11934_v37  ;;  %v13546_v2 = vld [vmem:[#allocation2 + $0x88] sm:$0xff] }
 0x25c   : > { %7837 = vst.msk [vmem:[#allocation2 + $0x100] sm:$0xff] %vm379_vm0, %v2697_v3  ;;  %v1596_v17 = vpop.f32.mrb[135].mxu0  ;;  %11937 = vmatpush3.bf16.msra.mxu1 %v11934_v37  ;;  %11572 = vmatprep.mubr.msk.f32.mxu1 %vm379_vm0, %v12577_v12  ;;  %v7984_v37 = vld [vmem:[#allocation2 + $0x58] sm:$0xff]  ;;  %v13550_v3 = vadd.f32 %v13516_v28, %v13508_v54 }
 0x25d   : > { %v11938_v39 = vpack.c.bf16 %v11069_v38, %v1596_v17  ;;  %v8066_v38 = vld [vmem:[#allocation2 + $0x2e8] sm:$0xff]  ;;  %v13554_v17 = vadd.f32 %v13512_v55, %v13510_v26 }
 0x25e   : > { %v11203_v4 = vpop.f32.mrb[26].mxu1  ;;  %17975 = vst [vmem:[#allocation9_spill] sm:$0xff] %v13550_v3 }
 0x25f   : > { %7840 = vst.msk [vmem:[#allocation2 + $0x118] sm:$0xff] %vm379_vm0, %v11203_v4  ;;  %v11072_v40 = vpop.f32.mrb[136].mxu0  ;;  %v2772_v5 = vpop.f32.mrb[27].mxu1  ;;  %11573 = vmatmul.mubr.msk.f32.vlgmr.msra.gmra.mrb[132].mxu1 %vm379_vm0, %v12582_v13  ;;  %11939 = vmatprep.subr.bf16.mxu1 %v11938_v39  ;;  %17976 = vst [vmem:[#allocation10_spill] sm:$0xff] %v13554_v17  ;;  %v7983_v4 = vld [vmem:[#allocation2 + $0x50] sm:$0xff] }
 0x260   : > { %7839 = vst.msk [vmem:[#allocation2 + $0x110] sm:$0xff] %vm379_vm0, %v2772_v5  ;;  %v1606_v16 = vpop.f32.mrb[137].mxu0  ;;  %11941 = vmatpush3.bf16.msra.mxu1 %v11938_v39  ;;  %11579 = vmatprep.mubr.msk.f32.mxu1 %vm379_vm0, %v12577_v12  ;;  %v13558_v39 = vadd.f32 %v13514_v21, %v13512_v55  ;;  %v13563_v5 = vadd.f32 %v13527_v24, %v8025_v29  ;;  %v13732_v21 = vld [vmem:[#allocation2 + $0xd0] sm:$0xff] }
 0x261   : > { %v11942_v41 = vpack.c.bf16 %v11072_v40, %v1606_v16  ;;  %v13560_v40 = vadd.f32 %v8025_v29, %v8023_v10  ;;  %v13599_v29 = vadd.f32 %v8064_v0, %v8062_v35  ;;  %v8071_v35 = vld [vmem:[#allocation2 + $0x310] sm:$0xff] }
 0x262   : > { %v11210_v6 = vpop.f32.mrb[28].mxu1  ;;  %17977 = vst [vmem:[#allocation11_spill] sm:$0xff] %v13558_v39  ;;  %17979 = vst [vmem:[#allocation12_spill] sm:$0xff] %v13563_v5  ;;  %v13582_v23 = vadd.f32 %v13563_v5, %v8257_v62 }
 0x263   : > { %7842 = vst.msk [vmem:[#allocation2 + $0x128] sm:$0xff] %vm379_vm0, %v11210_v6  ;;  %v11075_v42 = vpop.f32.mrb[138].mxu0  ;;  %v2847_v7 = vpop.f32.mrb[29].mxu1  ;;  %11580 = vmatmul.mubr.msk.f32.vlgmr.msra.gmra.mrb[134].mxu1 %vm379_vm0, %v12582_v13  ;;  %11943 = vmatprep.subr.bf16.mxu1 %v11942_v41  ;;  %17978 = vst [vmem:[#allocation19_spill] sm:$0xff] %v13560_v40  ;;  %v7986_v6 = vld [vmem:[#allocation2 + $0x68] sm:$0xff] }
 0x264   : > { %7841 = vst.msk [vmem:[#allocation2 + $0x120] sm:$0xff] %vm379_vm0, %v2847_v7  ;;  %v1616_v48 = vpop.f32.mrb[139].mxu0  ;;  %11945 = vmatpush3.bf16.msra.mxu1 %v11942_v41  ;;  %11586 = vmatprep.mubr.msk.f32.mxu1 %vm379_vm0, %v12577_v12  ;;  %v7985_v41 = vld [vmem:[#allocation2 + $0x60] sm:$0xff]  ;;  %v13570_v7 = vadd.f32 %v13531_v32, %v8026_v60  ;;  %v13577_v19 = vadd.f32 %v7988_v15, %v7986_v6  ;;  %17983 = vst [vmem:[#allocation15_spill] sm:$0xff] %v13582_v23 }
 0x265   : > { %v11946_v9 = vpack.c.bf16 %v11075_v42, %v1616_v48  ;;  %v13567_v42 = vadd.f32 %v13521_v11, %v13516_v28  ;;  %v13575_v8 = vadd.f32 %v7987_v63, %v7985_v41  ;;  %17985 = vst [vmem:[#allocation23_spill] sm:$0xff] %v13599_v29  ;;  %v8224_v62 = vadd.f32 %v7986_v6, %v7984_v37 }
 0x266   : > { %v11217_v22 = vpop.f32.mrb[30].mxu1  ;;  %17981 = vst [vmem:[#allocation13_spill] sm:$0xff] %v13570_v7  ;;  %v13593_v18 = vadd.f32 %v13570_v7, %v8258_v36  ;;  %v8008_v17 = vld [vmem:[#allocation2 + $0x118] sm:$0xff] }
 0x267   : > { %7844 = vst.msk [vmem:[#allocation2 + $0x138] sm:$0xff] %vm379_vm0, %v11217_v22  ;;  %v11078_v45 = vpop.f32.mrb[140].mxu0  ;;  %v2922_v20 = vpop.f32.mrb[31].mxu1  ;;  %11587 = vmatmul.mubr.msk.f32.vlgmr.msra.gmra.mrb[136].mxu1 %vm379_vm0, %v12582_v13  ;;  %11947 = vmatprep.subr.bf16.mxu1 %v11946_v9  ;;  %17980 = vst [vmem:[#allocation20_spill] sm:$0xff] %v13567_v42  ;;  %v8063_v22 = vld [vmem:[#allocation2 + $0x2d0] sm:$0xff] }
 0x268   : > { %7843 = vst.msk [vmem:[#allocation2 + $0x130] sm:$0xff] %vm379_vm0, %v2922_v20  ;;  %v1626_v25 = vpop.f32.mrb[141].mxu0  ;;  %11949 = vmatpush3.bf16.msra.mxu1 %v11946_v9  ;;  %11593 = vmatprep.mubr.msk.f32.mxu1 %vm379_vm0, %v12577_v12  ;;  %v7982_v9 = vld [vmem:[#allocation2 + $0x48] sm:$0xff]  ;;  %v7981_v20 = vld [vmem:[#allocation2 + $0x40] sm:$0xff]  ;;  %17984 = vst [vmem:[#allocation16_spill] sm:$0xff] %v13593_v18 }
 0x269   : > { %v11950_v27 = vpack.c.bf16 %v11078_v45, %v1626_v25  ;;  %v13579_v45 = vadd.f32 %v8026_v60, %v8024_v31  ;;  %v13590_v25 = vadd.f32 %v13546_v2, %v7988_v15  ;;  %v8222_v10 = vadd.f32 %v7984_v37, %v7982_v9  ;;  %v13601_v31 = vld [vmem:[#allocation2 + $0x90] sm:$0xff] }
 0x26a   : > { %v11224_v51 = vpop.f32.mrb[32].mxu1  ;;  %v8220_v60 = vadd.f32 %v7982_v9, %v13498_v52  ;;  %v13606_v15 = vadd.f32 %v8066_v38, %v8064_v0  ;;  %v13628_v38 = vadd.f32 %v13597_v50, %v13546_v2  ;;  %v13837_v40 = vld [vmem:[#allocation2 + $0x110] sm:$0xff] }
 0x26b   : > { %7846 = vst.msk [vmem:[#allocation2 + $0x1c8] sm:$0xff] %vm379_vm0, %v11224_v51  ;;  %v11081_v30 = vpop.f32.mrb[142].mxu0  ;;  %v2997_v59 = vpop.f32.mrb[33].mxu1  ;;  %11594 = vmatmul.mubr.msk.f32.vlgmr.msra.gmra.mrb[138].mxu1 %vm379_vm0, %v12582_v13  ;;  %11951 = vmatprep.subr.bf16.mxu1 %v11950_v27  ;;  %17982 = vst [vmem:[#allocation14_spill] sm:$0xff] %v13579_v45  ;;  %v8065_v51 = vld [vmem:[#allocation2 + $0x2e0] sm:$0xff]  ;;  %v13621_v0 = vadd.f32 %v13577_v19, %v8222_v10  ;;  %v13633_v6 = vadd.f32 %v13590_v25, %v8224_v62 }
 0x26c   : > { %7845 = vst.msk [vmem:[#allocation2 + $0x1c0] sm:$0xff] %vm379_vm0, %v2997_v59  ;;  %v1636_v34 = vpop.f32.mrb[143].mxu0  ;;  %11953 = vmatpush3.bf16.msra.mxu1 %v11950_v27  ;;  %11600 = vmatprep.mubr.msk.f32.mxu1 %vm379_vm0, %v12577_v12  ;;  %v13595_v27 = vadd.f32 %v7983_v4, %v7981_v20  ;;  %v8069_v59 = vld [vmem:[#allocation2 + $0x300] sm:$0xff]  ;;  %17987 = vst [vmem:[#allocation25_spill] sm:$0xff] %v13606_v15 }
 0x26d   : > { %v11954_v14 = vpack.c.bf16 %v11081_v30, %v1636_v34  ;;  %v13604_v34 = vadd.f32 %v8063_v22, %v8061_v44  ;;  %v13636_v44 = vadd.f32 %v7981_v20, %v13503_v46  ;;  %v8436_v46 = vadd.f32 %v8220_v60, %v13535_v47  ;;  %v8075_v20 = vld [vmem:[#allocation2 + $0x330] sm:$0xff] }
 0x26e   : > { %v11231_v16 = vpop.f32.mrb[34].mxu1  ;;  %v13618_v52 = vadd.f32 %v13575_v8, %v13595_v27 }
 0x26f   : > { %7848 = vst.msk [vmem:[#allocation2 + $0x1d8] sm:$0xff] %vm379_vm0, %v11231_v16  ;;  %v11084_v48 = vpop.f32.mrb[144].mxu0  ;;  %v3072_v43 = vpop.f32.mrb[35].mxu1  ;;  %11601 = vmatmul.mubr.msk.f32.vlgmr.msra.gmra.mrb[140].mxu1 %vm379_vm0, %v12582_v13  ;;  %11955 = vmatprep.subr.bf16.mxu1 %v11954_v14  ;;  %17986 = vst [vmem:[#allocation24_spill] sm:$0xff] %v13604_v34  ;;  %v8073_v16 = vld [vmem:[#allocation2 + $0x320] sm:$0xff] }
 0x270   : > { %7847 = vst.msk [vmem:[#allocation2 + $0x1d0] sm:$0xff] %vm379_vm0, %v3072_v43  ;;  %v1646_v53 = vpop.f32.mrb[145].mxu0  ;;  %11957 = vmatpush3.bf16.msra.mxu1 %v11954_v14  ;;  %11607 = vmatprep.mubr.msk.f32.mxu1 %vm379_vm0, %v12577_v12  ;;  %v13614_v43 = vadd.f32 %v13587_v49, %v7987_v63  ;;  %v13630_v63 = vadd.f32 %v8065_v51, %v8063_v22  ;;  %v13648_v22 = vld [vmem:[#allocation2 + $0xa0] sm:$0xff] }
 0x271   : > { %v11958_v56 = vpack.c.bf16 %v11084_v48, %v1646_v53  ;;  %v13611_v48 = vld [vmem:[#allocation2 + $0xa8] sm:$0xff]  ;;  %v13638_v53 = vadd.f32 %v7985_v41, %v7983_v4  ;;  %v13646_v15 = vadd.f32 %v8073_v16, %v8071_v35 }
 0x272   : > { %v11238_v30 = vpop.f32.mrb[36].mxu1  ;;  %17988 = vst [vmem:[#allocation26_spill] sm:$0xff] %v13630_v63  ;;  %v13652_v51 = vadd.f32 %v13611_v48, %v13597_v50 }
 0x273   : > { %7850 = vst.msk [vmem:[#allocation2 + $0x1e8] sm:$0xff] %vm379_vm0, %v11238_v30  ;;  %v11087_v36 = vpop.f32.mrb[146].mxu0  ;;  %v3147_v14 = vpop.f32.mrb[37].mxu1  ;;  %11608 = vmatmul.mubr.msk.f32.vlgmr.msra.gmra.mrb[142].mxu1 %vm379_vm0, %v12582_v13  ;;  %11959 = vmatprep.subr.bf16.mxu1 %v11958_v56  ;;  %17989 = vst [vmem:[#allocation27_spill] sm:$0xff] %v13646_v15  ;;  %v8636_v15 = vadd.f32 %v13633_v6, %v8436_v46  ;;  %v8438_v46 = vadd.f32 %v8222_v10, %v13519_v57 }
 0x274   : > { %7849 = vst.msk [vmem:[#allocation2 + $0x1e0] sm:$0xff] %vm379_vm0, %v3147_v14  ;;  %v1656_v37 = vpop.f32.mrb[147].mxu0  ;;  %11961 = vmatpush3.bf16.msra.mxu1 %v11958_v56  ;;  %11614 = vmatprep.mubr.msk.f32.mxu1 %vm379_vm0, %v12577_v12  ;;  %v13642_v56 = vadd.f32 %v13601_v31, %v13587_v49  ;;  %v13644_v14 = vadd.f32 %v8071_v35, %v8069_v59 }
 0x275   : > { %v11962_v9 = vpack.c.bf16 %v11087_v36, %v1656_v37  ;;  %v13660_v59 = vadd.f32 %v13614_v43, %v13638_v53  ;;  %v8633_v36 = vadd.f32 %v13618_v52, %v13544_v1  ;;  %v8634_v35 = vadd.f32 %v13621_v0, %v13538_v33  ;;  %v13676_v1 = vld [vmem:[#allocation2 + $0xb8] sm:$0xff] }
 0x276   : > { %v11245_v30 = vpop.f32.mrb[38].mxu1  ;;  %v13669_v37 = vadd.f32 %v8075_v20, %v8073_v16  ;;  %v13680_v33 = vadd.f32 %v13648_v22, %v13601_v31  ;;  %v13686_v16 = vadd.f32 %v13642_v56, %v13575_v8  ;;  %v13693_v20 = vadd.f32 %v13652_v51, %v13590_v25  ;;  %v13700_v8 = vld [vmem:[#allocation2 + $0xc8] sm:$0xff] }
 0x277   : > { %7852 = vst.msk [vmem:[#allocation2 + $0x1f8] sm:$0xff] %vm379_vm0, %v11245_v30  ;;  %v11090_v4 = vpop.f32.mrb[148].mxu0  ;;  %v3222_v41 = vpop.f32.mrb[39].mxu1  ;;  %11615 = vmatmul.mubr.msk.f32.vlgmr.msra.gmra.mrb[144].mxu1 %vm379_vm0, %v12582_v13  ;;  %11963 = vmatprep.subr.bf16.mxu1 %v11962_v9  ;;  %v13673_v30 = vadd.f32 %v13628_v38, %v13577_v19  ;;  %v8437_v19 = vadd.f32 %v13595_v27, %v13524_v58  ;;  %v13702_v58 = vld [vmem:[#allocation2 + $0x328] sm:$0xff] }
 0x278   : > { %7851 = vst.msk [vmem:[#allocation2 + $0x1f0] sm:$0xff] %vm379_vm0, %v3222_v41  ;;  %v1666_v47 = vpop.f32.mrb[149].mxu0  ;;  %11965 = vmatpush3.bf16.msra.mxu1 %v11962_v9  ;;  %11621 = vmatprep.mubr.msk.f32.mxu1 %vm379_vm0, %v12577_v12  ;;  %17990 = vst [vmem:[#allocation28_spill] sm:$0xff] %v13669_v37  ;;  %v8435_v9 = vadd.f32 %v13636_v44, %v13533_v61  ;;  %v13698_v61 = vld [vmem:[#allocation2 + $0xb0] sm:$0xff]  ;;  %v13706_v27 = vadd.f32 %v8633_v36, %v13587_v49 }
 0x279   : > { %v11966_v63 = vpack.c.bf16 %v11090_v4, %v1666_v47  ;;  %v8440_v4 = vadd.f32 %v8224_v62, %v8220_v60  ;;  %v13709_v25 = vadd.f32 %v8634_v35, %v13546_v2  ;;  %v13714_v60 = vld [vmem:[#allocation2 + $0xc0] sm:$0xff]  ;;  %v13716_v62 = vld [vmem:[#allocation2 + $0xd8] sm:$0xff]  ;;  %v8638_v49 = vadd.f32 %v13673_v30, %v8438_v46 }
 0x27a   : > { %v11252_v41 = vpop.f32.mrb[40].mxu1  ;;  %v8635_v57 = vadd.f32 %v13660_v59, %v8435_v9  ;;  %17991 = vst [vmem:[#allocation29_spill] sm:$0xff] %v13706_v27  ;;  %v8234_v9 = vadd.f32 %v13676_v1, %v13611_v48  ;;  %v13722_v2 = vadd.f32 %v8636_v15, %v13597_v50  ;;  %v8637_v35 = vadd.f32 %v13686_v16, %v8437_v19  ;;  %v13744_v19 = vld [vmem:[#allocation2 + $0xe8] sm:$0xff] }
 0x27b   : > { %7854 = vst.msk [vmem:[#allocation2 + $0x208] sm:$0xff] %vm379_vm0, %v11252_v41  ;;  %v11093_v47 = vpop.f32.mrb[150].mxu0  ;;  %v3297_v29 = vpop.f32.mrb[41].mxu1  ;;  %11622 = vmatmul.mubr.msk.f32.vlgmr.msra.gmra.mrb[146].mxu1 %vm379_vm0, %v12582_v13  ;;  %11967 = vmatprep.subr.bf16.mxu1 %v11966_v63  ;;  %17992 = vst [vmem:[#allocation30_spill] sm:$0xff] %v13709_v25  ;;  %v8076_v41 = vld [vmem:[#allocation2 + $0x338] sm:$0xff]  ;;  %v8233_v11 = vadd.f32 %v13698_v61, %v13648_v22  ;;  %v8236_v50 = vadd.f32 %v13700_v8, %v13676_v1 }
 0x27c   : > { %7853 = vst.msk [vmem:[#allocation2 + $0x200] sm:$0xff] %vm379_vm0, %v3297_v29  ;;  %v1676_v10 = vpop.f32.mrb[151].mxu0  ;;  %11969 = vmatpush3.bf16.msra.mxu1 %v11966_v63  ;;  %11628 = vmatprep.mubr.msk.f32.mxu1 %vm379_vm0, %v12577_v12  ;;  %17993 = vst [vmem:[#allocation31_spill] sm:$0xff] %v13722_v2  ;;  %v13725_v29 = vadd.f32 %v8076_v41, %v13702_v58  ;;  %v13729_v63 = vadd.f32 %v13680_v33, %v13614_v43 }
 0x27d   : > { %v11970_v36 = vpack.c.bf16 %v11093_v47, %v1676_v10  ;;  %v8439_v15 = vadd.f32 %v13638_v53, %v13636_v44  ;;  %v8640_v46 = vadd.f32 %v13693_v20, %v8440_v4  ;;  %v8235_v10 = vadd.f32 %v13714_v60, %v13698_v61  ;;  %v13761_v4 = vld [vmem:[#allocation2 + $0xe0] sm:$0xff] }
 0x27e   : > { %17994 = vst [vmem:[#allocation32_spill] sm:$0xff] %v13725_v29  ;;  %v11259_v34 = vpop.f32.mrb[42].mxu1  ;;  %v13750_v41 = vadd.f32 %v13716_v62, %v13700_v8  ;;  %v13753_v44 = vadd.f32 %v8635_v57, %v13601_v31  ;;  %v13764_v18 = vadd.f32 %v8234_v9, %v13628_v38  ;;  %v13767_v23 = vadd.f32 %v8638_v49, %v13611_v48  ;;  %v13785_v49 = vld [vmem:[#allocation2 + $0x108] sm:$0xff] }
 0x27f   : > { %7856 = vst.msk [vmem:[#allocation2 + $0x218] sm:$0xff] %vm379_vm0, %v11259_v34  ;;  %v11096_v43 = vpop.f32.mrb[152].mxu0  ;;  %v3372_v47 = vpop.f32.mrb[43].mxu1  ;;  %11629 = vmatmul.mubr.msk.f32.vlgmr.msra.gmra.mrb[148].mxu1 %vm379_vm0, %v12582_v13  ;;  %11971 = vmatprep.subr.bf16.mxu1 %v11970_v36  ;;  %v13756_v34 = vmul.f32 0.0013717421, %v13709_v25  ;;  %v13775_v25 = vld [vmem:[#allocation2 + $0xf0] sm:$0xff]  ;;  %v8237_v55 = vadd.f32 %v13732_v21, %v13714_v60  ;;  %v8639_v38 = vadd.f32 %v13729_v63, %v8439_v15 }
 0x280   : > { %17995 = vst [vmem:[#allocation33_spill] sm:$0xff] %v13753_v44  ;;  %7855 = vst.msk [vmem:[#allocation2 + $0x210] sm:$0xff] %vm379_vm0, %v3372_v47  ;;  %v1686_v53 = vpop.f32.mrb[153].mxu0  ;;  %11973 = vmatpush3.bf16.msra.mxu1 %v11970_v36  ;;  %11635 = vmatprep.mubr.msk.f32.mxu1 %vm379_vm0, %v12577_v12  ;;  %v13770_v31 = vmul.f32 0.0013717421, %v13706_v27  ;;  %v13777_v36 = vld [vmem:[#allocation2 + $0xf8] sm:$0xff]  ;;  %v13783_v28 = vadd.f32 %v8637_v35, %v13648_v22  ;;  %v13796_v27 = vadd.f32 %v8640_v46, %v13676_v1 }
 0x281   : > { %17996 = vst [vmem:[#allocation34_spill] sm:$0xff] %v13756_v34  ;;  %17997 = vst [vmem:[#allocation35_spill] sm:$0xff] %v13767_v23  ;;  %v13773_v57 = vmul.f32 0.0013717421, %v13722_v2  ;;  %v11974_v47 = vpack.c.bf16 %v11096_v43, %v1686_v53  ;;  %v8240_v2 = vadd.f32 %v13744_v19, %v13716_v62  ;;  %v13790_v43 = vadd.f32 %v8233_v11, %v13642_v56  ;;  %v13801_v35 = vld [vmem:[#allocation2 + $0x100] sm:$0xff] }
 0x282   : > { %17998 = vst [vmem:[#allocation36_spill] sm:$0xff] %v13770_v31  ;;  %18000 = vst [vmem:[#allocation38_spill] sm:$0xff] %v13783_v28  ;;  %v11266_v48 = vpop.f32.mrb[44].mxu1  ;;  %v13793_v53 = vadd.f32 %v8236_v50, %v13652_v51  ;;  %v8239_v56 = vadd.f32 %v13761_v4, %v13732_v21  ;;  %v13806_v7 = vadd.f32 %v8235_v10, %v13680_v33  ;;  %v13812_v1 = vmul.f32 0.0013717421, %v13753_v44 }
 0x283   : > { %17999 = vst [vmem:[#allocation37_spill] sm:$0xff] %v13773_v57  ;;  %18001 = vst [vmem:[#allocation39_spill] sm:$0xff] %v13796_v27  ;;  %v11099_v15 = vpop.f32.mrb[154].mxu0  ;;  %v3447_v22 = vpop.f32.mrb[45].mxu1  ;;  %11636 = vmatmul.mubr.msk.f32.vlgmr.msra.gmra.mrb[150].mxu1 %vm379_vm0, %v12582_v13  ;;  %11975 = vmatprep.subr.bf16.mxu1 %v11974_v47  ;;  %v13809_v51 = vadd.f32 %v13750_v41, %v8234_v9  ;;  %v13821_v33 = vadd.f32 %v13777_v36, %v13744_v19  ;;  %v13826_v44 = vmul.f32 0.0013717421, %v13767_v23 }
 0x284   : > { %7858 = vst.msk [vmem:[#allocation2 + $0x228] sm:$0xff] %vm379_vm0, %v11266_v48  ;;  %18002 = vst [vmem:[#allocation40_spill] sm:$0xff] %v13812_v1  ;;  %v1696_v46 = vpop.f32.mrb[155].mxu0  ;;  %11977 = vmatpush3.bf16.msra.mxu1 %v11974_v47  ;;  %11642 = vmatprep.mubr.msk.f32.mxu1 %vm379_vm0, %v12577_v12  ;;  %v8241_v48 = vadd.f32 %v13775_v25, %v13761_v4  ;;  %v8642_v9 = vadd.f32 %v13764_v18, %v13621_v0 }
 0x285   : > { %7857 = vst.msk [vmem:[#allocation2 + $0x220] sm:$0xff] %vm379_vm0, %v3447_v22  ;;  %18003 = vst [vmem:[#allocation41_spill] sm:$0xff] %v13826_v44  ;;  %v11978_v5 = vpack.c.bf16 %v11099_v15, %v1696_v46  ;;  %v13830_v47 = vadd.f32 %v13785_v49, %v13777_v36  ;;  %v13832_v22 = vadd.f32 %v8237_v55, %v8233_v11 }
 0x286   : > { %v13835_v45 = vadd.f32 %v8639_v38, %v13698_v61  ;;  %v11273_v39 = vpop.f32.mrb[46].mxu1  ;;  %v13841_v42 = vadd.f32 %v13801_v35, %v13775_v25  ;;  %v13843_v0 = vadd.f32 %v8240_v2, %v8236_v50  ;;  %v8641_v15 = vadd.f32 %v13790_v43, %v13618_v52 }
 0x287   : > { %v8644_v46 = vadd.f32 %v13793_v53, %v13633_v6  ;;  %7860 = vst.msk [vmem:[#allocation2 + $0x238] sm:$0xff] %vm379_vm0, %v11273_v39  ;;  %v11102_v11 = vpop.f32.mrb[156].mxu0  ;;  %v3522_v61 = vpop.f32.mrb[47].mxu1  ;;  %11643 = vmatmul.mubr.msk.f32.vlgmr.msra.gmra.mrb[152].mxu1 %vm379_vm0, %v12582_v13  ;;  %11979 = vmatprep.subr.bf16.mxu1 %v11978_v5  ;;  %v13852_v38 = vadd.f32 %v8239_v56, %v8235_v10  ;;  %v13859_v52 = vmul.f32 0.0013717421, %v13783_v28 }
 0x288   : > { %18004 = vst [vmem:[#allocation42_spill] sm:$0xff] %v13835_v45  ;;  %v8643_v50 = vadd.f32 %v13806_v7, %v13660_v59  ;;  %v8646_v23 = vadd.f32 %v13809_v51, %v13673_v30  ;;  %7859 = vst.msk [vmem:[#allocation2 + $0x230] sm:$0xff] %vm379_vm0, %v3522_v61  ;;  %v1706_v39 = vpop.f32.mrb[157].mxu0  ;;  %11981 = vmatpush3.bf16.msra.mxu1 %v11978_v5  ;;  %11649 = vmatprep.mubr.msk.f32.mxu1 %vm379_vm0, %v12577_v12  ;;  %v13874_v30 = vmul.f32 0.0013717421, %v13796_v27 }
 0x289   : > { %18005 = vst [vmem:[#allocation43_spill] sm:$0xff] %v13859_v52  ;;  %v13864_v6 = vadd.f32 %v8241_v48, %v8237_v55  ;;  %v13868_v10 = vadd.f32 %v13821_v33, %v13750_v41  ;;  %v13871_v59 = vadd.f32 %v8642_v9, %v13700_v8  ;;  %v11982_v28 = vpack.c.bf16 %v11102_v11, %v1706_v39 }
 0x28a   : > { %18007 = vst [vmem:[#allocation45_spill] sm:$0xff] %v13874_v30  ;;  %v13878_v5 = vadd.f32 %v13837_v40, %v13801_v35  ;;  %v13881_v61 = vadd.f32 %v13830_v47, %v8240_v2  ;;  %v8645_v55 = vadd.f32 %v13832_v22, %v13686_v16  ;;  %v11280_v41 = vpop.f32.mrb[48].mxu1  ;;  %v13886_v3 = vadd.f32 %v13841_v42, %v8239_v56 }
 0x28b   : > { %18006 = vst [vmem:[#allocation44_spill] sm:$0xff] %v13871_v59  ;;  %v8648_v8 = vadd.f32 %v13843_v0, %v13693_v20  ;;  %v13891_v9 = vadd.f32 %v8641_v15, %v13714_v60  ;;  %v13894_v11 = vadd.f32 %v8644_v46, %v13716_v62  ;;  %7862 = vst.msk [vmem:[#allocation2 + $0x248] sm:$0xff] %vm379_vm0, %v11280_v41  ;;  %v11105_v2 = vpop.f32.mrb[158].mxu0  ;;  %v3597_v39 = vpop.f32.mrb[49].mxu1  ;;  %11650 = vmatmul.mubr.msk.f32.vlgmr.msra.gmra.mrb[154].mxu1 %vm379_vm0, %v12582_v13 }
 0x28c   : > { %11983 = vmatprep.subr.bf16.mxu1 %v11982_v28  ;;  %v8647_v16 = vadd.f32 %v13852_v38, %v13729_v63  ;;  %v13902_v56 = vadd.f32 %v8643_v50, %v13732_v21  ;;  %v13905_v20 = vadd.f32 %v8646_v23, %v13744_v19  ;;  %v13908_v60 = vmul.f32 0.0013717421, %v13835_v45  ;;  %7861 = vst.msk [vmem:[#allocation2 + $0x240] sm:$0xff] %vm379_vm0, %v3597_v39  ;;  %v1716_v62 = vpop.f32.mrb[159].mxu0  ;;  %v13931_v39 = vld [vmem:[#allocation2 + $0x128] sm:$0xff]  ;;  %v8031_v45 = vld [vmem:[#allocation2 + $0x1d0] sm:$0xff] }
 0x28d   : > { %18008 = vst [vmem:[#allocation46_spill] sm:$0xff] %v13891_v9  ;;  %18009 = vst [vmem:[#allocation47_spill] sm:$0xff] %v13894_v11  ;;  %11985 = vmatpush3.bf16.msra.mxu1 %v11982_v28  ;;  %11656 = vmatprep.mubr.msk.f32.mxu1 %vm379_vm0, %v12577_v12  ;;  %v13914_v15 = vadd.f32 %v8008_v17, %v13785_v49  ;;  %v8649_v21 = vadd.f32 %v13864_v6, %v13790_v43  ;;  %v13921_v63 = vmul.f32 0.0013717421, %v13871_v59 }
 0x28e   : > { %18010 = vst [vmem:[#allocation48_spill] sm:$0xff] %v13902_v56  ;;  %18011 = vst [vmem:[#allocation49_spill] sm:$0xff] %v13905_v20  ;;  %v8650_v23 = vadd.f32 %v13868_v10, %v13764_v18  ;;  %v11986_v19 = vpack.c.bf16 %v11105_v2, %v1716_v62  ;;  %v13924_v46 = vadd.f32 %v13878_v5, %v8241_v48  ;;  %v11287_v41 = vpop.f32.mrb[50].mxu1  ;;  %v13939_v2 = vmul.f32 0.0013717421, %v13891_v9  ;;  %v8114_v9 = vld [vmem:[#allocation2 + $0x468] sm:$0xff] }
 0x28f   : > { %18012 = vst [vmem:[#allocation50_spill] sm:$0xff] %v13908_v60  ;;  %18013 = vst [vmem:[#allocation51_spill] sm:$0xff] %v13921_v63  ;;  %v8652_v28 = vadd.f32 %v13881_v61, %v13793_v53  ;;  %v13929_v50 = vadd.f32 %v8645_v55, %v13761_v4  ;;  %v8651_v43 = vadd.f32 %v13886_v3, %v13806_v7  ;;  %v13942_v48 = vmul.f32 0.0013717421, %v13894_v11  ;;  %v3672_v53 = vpop.f32.mrb[51].mxu1  ;;  %v8112_v11 = vld [vmem:[#allocation2 + $0x458] sm:$0xff] }
 0x290   : > { %v13936_v18 = vadd.f32 %v8648_v8, %v13777_v36  ;;  %18016 = vst [vmem:[#allocation54_spill] sm:$0xff] %v13939_v2  ;;  %7864 = vst.msk [vmem:[#allocation2 + $0x258] sm:$0xff] %vm379_vm0, %v11287_v41  ;;  %11657 = vmatmul.mubr.msk.f32.vlgmr.msra.gmra.mrb[156].mxu1 %vm379_vm0, %v12582_v13  ;;  %11987 = vmatprep.subr.bf16.mxu1 %v11986_v19  ;;  %v13948_v4 = vadd.f32 %v8647_v16, %v13775_v25  ;;  %v13951_v7 = vmul.f32 0.0013717421, %v13902_v56  ;;  %v8070_v8 = vld [vmem:[#allocation2 + $0x308] sm:$0xff] }
 0x291   : > { %18014 = vst [vmem:[#allocation52_spill] sm:$0xff] %v13929_v50  ;;  %18017 = vst [vmem:[#allocation55_spill] sm:$0xff] %v13942_v48  ;;  %v13954_v36 = vmul.f32 2.0, %v13770_v31  ;;  %v13957_v55 = vmul.f32 2.0, %v13756_v34  ;;  %11989 = vmatpush3.bf16.msra.mxu1 %v11986_v19  ;;  %11663 = vmatprep.mubr.msk.f32.mxu1 %vm379_vm0, %v12577_v12  ;;  %v13964_v25 = vadd.f32 %v13914_v15, %v13821_v33  ;;  %v13973_v41 = vmul.f32 0.0013717421, %v13905_v20 }
 0x292   : > { %18015 = vst [vmem:[#allocation53_spill] sm:$0xff] %v13936_v18  ;;  %18018 = vst [vmem:[#allocation56_spill] sm:$0xff] %v13948_v4  ;;  %v13967_v16 = vadd.f32 %v8649_v21, %v13801_v35  ;;  %v13970_v62 = vadd.f32 %v8650_v23, %v13785_v49  ;;  %v13976_v19 = vadd.f32 %v13931_v39, %v8008_v17  ;;  %v13983_v33 = vmul.f32 0.0013717421, %v13929_v50  ;;  %v11294_v35 = vpop.f32.mrb[52].mxu1  ;;  %v8009_v21 = vld [vmem:[#allocation2 + $0x120] sm:$0xff] }
 0x293   : > { %18019 = vst [vmem:[#allocation57_spill] sm:$0xff] %v13951_v7  ;;  %18020 = vst [vmem:[#allocation58_spill] sm:$0xff] %v13954_v36  ;;  %v8653_v12 = vadd.f32 %v13924_v46, %v13832_v22  ;;  %v13986_v49 = vadd.f32 %v8651_v43, %v13837_v40  ;;  %v13989_v23 = vmul.f32 0.0013717421, %v13936_v18  ;;  %v13992_v36 = vmul.f32 2.0, %v13812_v1  ;;  %v14000_v22 = vld [vmem:[#allocation2 + $0x138] sm:$0xff] }
 0x294   : > { %18021 = vst [vmem:[#allocation59_spill] sm:$0xff] %v13957_v55  ;;  %7863 = vst.msk [vmem:[#allocation2 + $0x250] sm:$0xff] %vm379_vm0, %v3672_v53  ;;  %v8072_v55 = vld [vmem:[#allocation2 + $0x318] sm:$0xff]  ;;  %v13980_v53 = vadd.f32 %v8652_v28, %v8008_v17  ;;  %v13995_v20 = vmul.f32 2.0, %v13773_v57  ;;  %v3747_v17 = vpop.f32.mrb[53].mxu1  ;;  %11664 = vmatmul.mubr.msk.f32.vlgmr.msra.gmra.mrb[158].mxu1 %vm379_vm0, %v12582_v13  ;;  %v14006_v18 = vmul.f32 2.0, %v13859_v52 }
 0x295   : > { %18022 = vst [vmem:[#allocation60_spill] sm:$0xff] %v13967_v16  ;;  %18023 = vst [vmem:[#allocation61_spill] sm:$0xff] %v13970_v62  ;;  %v8302_v28 = vadd.f32 %v8072_v55, %v8070_v8  ;;  %v14003_v43 = vmul.f32 0.0013717421, %v13948_v4  ;;  %v14017_v13 = vmul.f32 0.0013717421, %v13967_v16  ;;  %v14037_v16 = vadd.f32 %v13669_v37, %v13644_v14 }
 0x296   : > { %18024 = vst [vmem:[#allocation62_spill] sm:$0xff] %v13973_v41  ;;  %18025 = vst [vmem:[#allocation63_spill] sm:$0xff] %v13980_v53  ;;  %v14020_v8 = vmul.f32 0.0013717421, %v13970_v62  ;;  %v14023_v4 = vmul.f32 2.0, %v13874_v30  ;;  %v8109_v62 = vld [vmem:[#allocation2 + $0x440] sm:$0xff] }
 0x297   : > { %18026 = vst [vmem:[#allocation64_spill] sm:$0xff] %v13983_v33  ;;  %18027 = vst [vmem:[#allocation65_spill] sm:$0xff] %v13986_v49  ;;  %v14033_v50 = vmul.f32 0.0013717421, %v13980_v53  ;;  %v8110_v56 = vld [vmem:[#allocation2 + $0x448] sm:$0xff]  ;;  %v8111_v53 = vld [vmem:[#allocation2 + $0x450] sm:$0xff] }
 0x298   : > { %18028 = vst [vmem:[#allocation66_spill] sm:$0xff] %v13989_v23  ;;  %18029 = vst [vmem:[#allocation67_spill] sm:$0xff] %v13992_v36  ;;  %v14009_v36 = vmul.f32 2.0, %v13826_v44  ;;  %v14053_v37 = vmul.f32 2.0, %v13908_v60 }
 0x299   : > { %18030 = vst [vmem:[#allocation68_spill] sm:$0xff] %v13995_v20  ;;  %7866 = vst.msk [vmem:[#allocation2 + $0x268] sm:$0xff] %vm379_vm0, %v11294_v35  ;;  %v14012_v20 = vld [vmem:[#allocation2 + $0x130] sm:$0xff]  ;;  %v8654_v35 = vadd.f32 %v13964_v25, %v13809_v51  ;;  %v11301_v51 = vpop.f32.mrb[54].mxu1 }
 0x29a   : > { %18031 = vst [vmem:[#allocation69_spill] sm:$0xff] %v14003_v43  ;;  %18032 = vst [vmem:[#allocation70_spill] sm:$0xff] %v14006_v18  ;;  %v8247_v18 = vadd.f32 %v8009_v21, %v13837_v40  ;;  %v8250_v40 = vadd.f32 %v14000_v22, %v13931_v39  ;;  %v8249_v14 = vadd.f32 %v14012_v20, %v8009_v21 }
 0x29b   : > { %18033 = vst [vmem:[#allocation71_spill] sm:$0xff] %v14009_v36  ;;  %7865 = vst.msk [vmem:[#allocation2 + $0x260] sm:$0xff] %vm379_vm0, %v3747_v17  ;;  %v14028_v36 = vadd.f32 %v13976_v19, %v13830_v47  ;;  %v14030_v17 = vadd.f32 %v8653_v12, %v8009_v21  ;;  %v14045_v47 = vmul.f32 0.0013717421, %v13986_v49  ;;  %v3822_v12 = vpop.f32.mrb[55].mxu1  ;;  %v8251_v49 = vadd.f32 %v13508_v54, %v14012_v20 }
 0x29c   : > { %18034 = vst [vmem:[#allocation72_spill] sm:$0xff] %v14017_v13  ;;  %18035 = vst [vmem:[#allocation73_spill] sm:$0xff] %v14020_v8  ;;  %v8252_v21 = vadd.f32 %v13510_v26, %v14000_v22  ;;  %v11308_v59 = vpop.f32.mrb[56].mxu1 }
 0x29d   : > { %18036 = vst [vmem:[#allocation74_spill] sm:$0xff] %v14023_v4  ;;  %18037 = vst [vmem:[#allocation75_spill] sm:$0xff] %v14030_v17  ;;  %v14042_v4 = vadd.f32 %v13702_v58, %v8072_v55  ;;  %v14056_v58 = vmul.f32 2.0, %v13921_v63  ;;  %v8030_v55 = vld [vmem:[#allocation2 + $0x1c8] sm:$0xff]  ;;  %v8121_v63 = vld [vmem:[#allocation2 + $0x4a0] sm:$0xff] }
 0x29e   : > { %18038 = vst [vmem:[#allocation76_spill] sm:$0xff] %v14033_v50  ;;  %18039 = vst [vmem:[#allocation77_spill] sm:$0xff] %v14037_v16  ;;  %v8113_v50 = vld [vmem:[#allocation2 + $0x460] sm:$0xff]  ;;  %v14050_v16 = vadd.f32 %v13725_v29, %v8302_v28  ;;  %v14064_v28 = vadd.f32 %v8654_v35, %v13931_v39  ;;  %v14069_v29 = vadd.f32 %v8112_v11, %v8110_v56  ;;  %v14081_v39 = vld [vmem:[#allocation2 + $0x498] sm:$0xff] }
 0x29f   : > { %18040 = vst [vmem:[#allocation78_spill] sm:$0xff] %v14042_v4  ;;  %18041 = vst [vmem:[#allocation79_spill] sm:$0xff] %v14045_v47  ;;  %v8029_v4 = vld [vmem:[#allocation2 + $0x1c0] sm:$0xff]  ;;  %v14079_v47 = vmul.f32 0.0013717421, %v14030_v17  ;;  %v8122_v35 = vld [vmem:[#allocation2 + $0x4a8] sm:$0xff]  ;;  %v14087_v56 = vadd.f32 %v8114_v9, %v8112_v11  ;;  %v14095_v27 = vadd.f32 %v8030_v55, %v13531_v32  ;;  %v8467_v11 = vadd.f32 %v8251_v49, %v8247_v18 }
 0x2a0   : > { %7868 = vst.msk [vmem:[#allocation2 + $0x278] sm:$0xff] %vm379_vm0, %v11301_v51  ;;  %18042 = vst [vmem:[#allocation80_spill] sm:$0xff] %v14050_v16  ;;  %v8117_v51 = vld [vmem:[#allocation2 + $0x480] sm:$0xff]  ;;  %v14067_v16 = vmul.f32 2.0, %v13939_v2  ;;  %v14083_v2 = vadd.f32 %v8111_v53, %v8109_v62  ;;  %v3897_v17 = vpop.f32.mrb[57].mxu1  ;;  %v8465_v62 = vadd.f32 %v8249_v14, %v13878_v5  ;;  %v8123_v9 = vld [vmem:[#allocation2 + $0x4b0] sm:$0xff]  ;;  %v14109_v32 = vadd.f32 %v8122_v35, %v14081_v39 }
 0x2a1   : > { %18043 = vst [vmem:[#allocation81_spill] sm:$0xff] %v14053_v37  ;;  %18044 = vst [vmem:[#allocation82_spill] sm:$0xff] %v14056_v58  ;;  %v8119_v37 = vld [vmem:[#allocation2 + $0x490] sm:$0xff]  ;;  %v14072_v58 = vadd.f32 %v8247_v18, %v13841_v42  ;;  %v8466_v42 = vadd.f32 %v8250_v40, %v13914_v15  ;;  %v8468_v15 = vadd.f32 %v8252_v21, %v13976_v19  ;;  %v14112_v5 = vmul.f32 0.0013717421, %v14064_v28  ;;  %v11315_v18 = vpop.f32.mrb[58].mxu1 }
 0x2a2   : > { %7867 = vst.msk [vmem:[#allocation2 + $0x270] sm:$0xff] %vm379_vm0, %v3822_v12  ;;  %18045 = vst [vmem:[#allocation83_spill] sm:$0xff] %v14064_v28  ;;  %v14076_v12 = vadd.f32 %v14028_v36, %v13843_v0  ;;  %v8032_v0 = vld [vmem:[#allocation2 + $0x1d8] sm:$0xff] }
 0x2a3   : > { %18046 = vst [vmem:[#allocation84_spill] sm:$0xff] %v14067_v16  ;;  %18047 = vst [vmem:[#allocation85_spill] sm:$0xff] %v14069_v29  ;;  %v14085_v16 = vadd.f32 %v8113_v50, %v8111_v53  ;;  %v14091_v29 = vadd.f32 %v8029_v4, %v13527_v24  ;;  %v18052_v50 = vld [vmem:[#allocation9_spill] sm:$0xff]  ;;  %v14102_v53 = vmul.f32 2.0, %v13951_v7  ;;  %v8036_v19 = vld [vmem:[#allocation2 + $0x1f8] sm:$0xff] }
 0x2a4   : > { %18048 = vst [vmem:[#allocation86_spill] sm:$0xff] %v14079_v47  ;;  %18049 = vst [vmem:[#allocation87_spill] sm:$0xff] %v14083_v2  ;;  %v8345_v47 = vadd.f32 %v8119_v37, %v8117_v51  ;;  %v8469_v24 = vadd.f32 %v18052_v50, %v8249_v14  ;;  %v8265_v51 = vadd.f32 %v8031_v45, %v8029_v4  ;;  %v18058_v2 = vld [vmem:[#allocation10_spill] sm:$0xff]  ;;  %v18059_v50 = vld [vmem:[#allocation20_spill] sm:$0xff] }
 0x2a5   : > { %18050 = vst [vmem:[#allocation88_spill] sm:$0xff] %v14085_v16  ;;  %18051 = vst [vmem:[#allocation89_spill] sm:$0xff] %v14087_v56  ;;  %v14104_v56 = vadd.f32 %v8121_v63, %v8119_v37  ;;  %v8035_v16 = vld [vmem:[#allocation2 + $0x1f0] sm:$0xff]  ;;  %v8470_v14 = vadd.f32 %v18058_v2, %v8250_v40  ;;  %v8471_v7 = vadd.f32 %v18059_v50, %v8251_v49  ;;  %v8033_v2 = vld [vmem:[#allocation2 + $0x1e0] sm:$0xff]  ;;  %v14138_v50 = vmul.f32 2.0, %v13942_v48 }
 0x2a6   : > { %7870 = vst.msk [vmem:[#allocation2 + $0x288] sm:$0xff] %vm379_vm0, %v11308_v59  ;;  %7869 = vst.msk [vmem:[#allocation2 + $0x280] sm:$0xff] %vm379_vm0, %v3897_v17  ;;  %v14106_v59 = vadd.f32 %v8123_v9, %v8121_v63  ;;  %v8266_v17 = vadd.f32 %v8032_v0, %v8030_v55  ;;  %v3972_v63 = vpop.f32.mrb[59].mxu1  ;;  %v18062_v55 = vld [vmem:[#allocation11_spill] sm:$0xff]  ;;  %v8034_v49 = vld [vmem:[#allocation2 + $0x1e8] sm:$0xff] }
 0x2a7   : > { %18053 = vst [vmem:[#allocation9_spill] sm:$0xff] %v14102_v53  ;;  %18054 = vst [vmem:[#allocation90_spill] sm:$0xff] %v14104_v56  ;;  %v18060_v53 = vld [vmem:[#allocation19_spill] sm:$0xff]  ;;  %v8472_v4 = vadd.f32 %v18062_v55, %v8252_v21  ;;  %v18063_v56 = vld [vmem:[#allocation14_spill] sm:$0xff]  ;;  %v8270_v55 = vadd.f32 %v8036_v19, %v8034_v49 }
 0x2a8   : > { %18055 = vst [vmem:[#allocation91_spill] sm:$0xff] %v14106_v59  ;;  %18056 = vst [vmem:[#allocation92_spill] sm:$0xff] %v14109_v32  ;;  %v14118_v37 = vadd.f32 %v14091_v29, %v18060_v53  ;;  %v14122_v9 = vadd.f32 %v14106_v59, %v8345_v47  ;;  %v8124_v32 = vld [vmem:[#allocation2 + $0x4b8] sm:$0xff]  ;;  %v14127_v28 = vadd.f32 %v14095_v27, %v18063_v56  ;;  %v14130_v40 = vld [vmem:[#allocation2 + $0x208] sm:$0xff] }
 0x2a9   : > { %18057 = vst [vmem:[#allocation93_spill] sm:$0xff] %v14112_v5  ;;  %7872 = vst.msk [vmem:[#allocation2 + $0x298] sm:$0xff] %vm379_vm0, %v11315_v18  ;;  %v14132_v53 = vadd.f32 %v8124_v32, %v8122_v35  ;;  %v8655_v18 = vadd.f32 %v14072_v58, %v13852_v38  ;;  %v8657_v47 = vadd.f32 %v8465_v62, %v13864_v6  ;;  %v14140_v21 = vld [vmem:[#allocation2 + $0x200] sm:$0xff]  ;;  %v18067_v59 = vld [vmem:[#allocation12_spill] sm:$0xff]  ;;  %v11322_v32 = vpop.f32.mrb[60].mxu1 }
 0x2aa   : > { %18061 = vst [vmem:[#allocation10_spill] sm:$0xff] %v14122_v9  ;;  %7871 = vst.msk [vmem:[#allocation2 + $0x290] sm:$0xff] %vm379_vm0, %v3972_v63  ;;  %v8269_v56 = vadd.f32 %v8035_v16, %v8033_v2  ;;  %v8658_v9 = vadd.f32 %v8466_v42, %v13868_v10  ;;  %v14144_v63 = vmul.f32 2.0, %v13983_v33  ;;  %v14147_v35 = vadd.f32 %v8265_v51, %v18067_v59  ;;  %v18068_v5 = vld [vmem:[#allocation13_spill] sm:$0xff]  ;;  %v14155_v48 = vld [vmem:[#allocation2 + $0x218] sm:$0xff] }
 0x2ab   : > { %18064 = vst [vmem:[#allocation20_spill] sm:$0xff] %v14132_v53  ;;  %18065 = vst [vmem:[#allocation19_spill] sm:$0xff] %v14138_v50  ;;  %v14150_v38 = vadd.f32 %v8266_v17, %v18068_v5  ;;  %v8659_v6 = vadd.f32 %v8467_v11, %v13886_v3  ;;  %v8660_v62 = vadd.f32 %v8468_v15, %v13881_v61  ;;  %v4047_v50 = vpop.f32.mrb[61].mxu1  ;;  %v14162_v5 = vld [vmem:[#allocation2 + $0x210] sm:$0xff] }
 0x2ac   : > { %18066 = vst [vmem:[#allocation11_spill] sm:$0xff] %v14144_v63  ;;  %7874 = vst.msk [vmem:[#allocation2 + $0x2a8] sm:$0xff] %vm379_vm0, %v11322_v32  ;;  %v8268_v10 = vadd.f32 %v8034_v49, %v8032_v0  ;;  %v14158_v42 = vadd.f32 %v14130_v40, %v8036_v19  ;;  %v8661_v59 = vadd.f32 %v8469_v24, %v13924_v46  ;;  %v18081_v32 = vld [vmem:[#allocation22_spill] sm:$0xff] }
 0x2ad   : > { %v8662_v63 = vadd.f32 %v8470_v14, %v13964_v25  ;;  %v8267_v33 = vadd.f32 %v8033_v2, %v8031_v45  ;;  %7873 = vst.msk [vmem:[#allocation2 + $0x2a0] sm:$0xff] %vm379_vm0, %v4047_v50  ;;  %v14166_v3 = vadd.f32 %v14140_v21, %v8035_v16  ;;  %v8663_v61 = vadd.f32 %v8471_v7, %v14072_v58  ;;  %v11329_v25 = vpop.f32.mrb[62].mxu1  ;;  %v8019_v58 = vld [vmem:[#allocation2 + $0x170] sm:$0xff]  ;;  %v18075_v2 = vld [vmem:[#allocation21_spill] sm:$0xff] }
 0x2ae   : > { %v8664_v11 = vadd.f32 %v8472_v4, %v14028_v36  ;;  %v14170_v0 = vadd.f32 %v8269_v56, %v8265_v51  ;;  %v14172_v15 = vadd.f32 %v8270_v55, %v8266_v17  ;;  %v14175_v46 = vadd.f32 %v8655_v18, %v14012_v20  ;;  %7876 = vst.msk [vmem:[#allocation2 + $0x2b8] sm:$0xff] %vm379_vm0, %v11329_v25  ;;  %v4122_v20 = vpop.f32.mrb[63].mxu1  ;;  %v8020_v17 = vld [vmem:[#allocation2 + $0x178] sm:$0xff] }
 0x2af   : > { %v14178_v45 = vmul.f32 2.0, %v13973_v41  ;;  %v14182_v24 = vadd.f32 %v14155_v48, %v14130_v40  ;;  %v14186_v7 = vadd.f32 %v14076_v12, %v14000_v22  ;;  %v14189_v36 = vadd.f32 %v8657_v47, %v13508_v54  ;;  %7875 = vst.msk [vmem:[#allocation2 + $0x2b0] sm:$0xff] %vm379_vm0, %v4122_v20  ;;  %v8042_v12 = vld [vmem:[#allocation2 + $0x228] sm:$0xff]  ;;  %v18079_v47 = vld [vmem:[#allocation15_spill] sm:$0xff]  ;;  %v11336_v20 = vpop.f32.mrb[64].mxu1 }
 0x2b0   : > { %18069 = vst [vmem:[#allocation14_spill] sm:$0xff] %v14175_v46  ;;  %v14192_v16 = vmul.f32 2.0, %v14003_v43  ;;  %v14197_v51 = vadd.f32 %v14162_v5, %v14140_v21  ;;  %v14200_v19 = vadd.f32 %v8268_v10, %v14095_v27  ;;  %v14203_v22 = vadd.f32 %v14158_v42, %v8268_v10  ;;  %v18077_v27 = vld [vmem:[#allocation17_spill] sm:$0xff]  ;;  %7878 = vst.msk [vmem:[#allocation2 + $0x348] sm:$0xff] %vm379_vm0, %v11336_v20 }
 0x2b1   : > { %18070 = vst [vmem:[#allocation12_spill] sm:$0xff] %v14178_v45  ;;  %18071 = vst [vmem:[#allocation13_spill] sm:$0xff] %v14186_v7  ;;  %v14206_v54 = vadd.f32 %v8658_v9, %v13510_v26  ;;  %v14210_v14 = vadd.f32 %v8267_v33, %v14091_v29  ;;  %v14213_v4 = vadd.f32 %v14166_v3, %v8267_v33  ;;  %v18080_v26 = vld [vmem:[#allocation16_spill] sm:$0xff]  ;;  %v18083_v29 = vld [vmem:[#allocation18_spill] sm:$0xff] }
 0x2b2   : > { %18072 = vst [vmem:[#allocation94_spill] sm:$0xff] %v14189_v36  ;;  %18073 = vst [vmem:[#allocation95_spill] sm:$0xff] %v14192_v16  ;;  %v14216_v49 = vadd.f32 %v8659_v6, %v18075_v2  ;;  %v14219_v18 = vadd.f32 %v8660_v62, %v18077_v27  ;;  %v8665_v50 = vadd.f32 %v14170_v0, %v18079_v47  ;;  %v8041_v33 = vld [vmem:[#allocation2 + $0x220] sm:$0xff]  ;;  %v14239_v27 = vmul.f32 0.0013717421, %v14175_v46  ;;  %v4197_v47 = vpop.f32.mrb[65].mxu1 }
 0x2b3   : > { %18074 = vst [vmem:[#allocation96_spill] sm:$0xff] %v14206_v54  ;;  %v8666_v9 = vadd.f32 %v14172_v15, %v18080_v26  ;;  %v14226_v10 = vadd.f32 %v8661_v59, %v18081_v32  ;;  %v14229_v25 = vadd.f32 %v8662_v63, %v18083_v29  ;;  %v14232_v6 = vadd.f32 %v14182_v24, %v8270_v55  ;;  %v8118_v59 = vld [vmem:[#allocation2 + $0x488] sm:$0xff]  ;;  %v8044_v32 = vld [vmem:[#allocation2 + $0x238] sm:$0xff] }
 0x2b4   : > { %18076 = vst [vmem:[#allocation21_spill] sm:$0xff] %v14216_v49  ;;  %18078 = vst [vmem:[#allocation17_spill] sm:$0xff] %v14219_v18  ;;  %v14234_v2 = vadd.f32 %v8663_v61, %v8019_v58  ;;  %v14236_v62 = vadd.f32 %v8664_v11, %v8020_v17  ;;  %v14243_v26 = vadd.f32 %v8042_v12, %v14155_v48  ;;  %v14251_v61 = vmul.f32 0.0013717421, %v14186_v7 }
 0x2b5   : > { %18082 = vst [vmem:[#allocation15_spill] sm:$0xff] %v14226_v10  ;;  %18084 = vst [vmem:[#allocation16_spill] sm:$0xff] %v14229_v25  ;;  %v14246_v63 = vadd.f32 %v14197_v51, %v8269_v56  ;;  %v8668_v55 = vadd.f32 %v14203_v22, %v14127_v28  ;;  %v8667_v11 = vadd.f32 %v14213_v4, %v14118_v37  ;;  %v14257_v58 = vmul.f32 0.0013717421, %v14189_v36 }
 0x2b6   : > { %18085 = vst [vmem:[#allocation22_spill] sm:$0xff] %v14234_v2  ;;  %18086 = vst [vmem:[#allocation18_spill] sm:$0xff] %v14236_v62  ;;  %v14260_v17 = vmul.f32 0.0013717421, %v14206_v54  ;;  %v14263_v56 = vmul.f32 0.0013717421, %v14216_v49  ;;  %v14266_v28 = vadd.f32 %v8041_v33, %v14162_v5  ;;  %v14269_v29 = vadd.f32 %v8665_v50, %v14140_v21 }
 0x2b7   : > { %18087 = vst [vmem:[#allocation97_spill] sm:$0xff] %v14239_v27  ;;  %18088 = vst [vmem:[#allocation98_spill] sm:$0xff] %v14251_v61  ;;  %v14272_v20 = vadd.f32 %v8666_v9, %v14130_v40  ;;  %v14275_v37 = vmul.f32 0.0013717421, %v14219_v18  ;;  %v8346_v16 = vadd.f32 %v14081_v39, %v8118_v59  ;;  %v8670_v45 = vadd.f32 %v14232_v6, %v14150_v38  ;;  %v8043_v40 = vld [vmem:[#allocation2 + $0x230] sm:$0xff]  ;;  %v14337_v18 = vld [vmem:[#allocation2 + $0x240] sm:$0xff] }
 0x2b8   : > { %7877 = vst.msk [vmem:[#allocation2 + $0x340] sm:$0xff] %vm379_vm0, %v4197_v47  ;;  %18089 = vst [vmem:[#allocation99_spill] sm:$0xff] %v14257_v58  ;;  %v11343_v47 = vpop.f32.mrb[66].mxu1  ;;  %v14281_v49 = vmul.f32 0.0013717421, %v14226_v10  ;;  %v14289_v50 = vadd.f32 %v14243_v26, %v14158_v42  ;;  %v8669_v39 = vadd.f32 %v14246_v63, %v14147_v35  ;;  %v14294_v9 = vadd.f32 %v8668_v55, %v14155_v48  ;;  %v14311_v35 = vld [vmem:[#allocation2 + $0x248] sm:$0xff] }
 0x2b9   : > { %18090 = vst [vmem:[#allocation100_spill] sm:$0xff] %v14260_v17  ;;  %18091 = vst [vmem:[#allocation101_spill] sm:$0xff] %v14263_v56  ;;  %v14284_v54 = vmul.f32 0.0013717421, %v14229_v25  ;;  %v4272_v21 = vpop.f32.mrb[67].mxu1  ;;  %v14297_v38 = vmul.f32 2.0, %v13989_v23  ;;  %v14300_v59 = vadd.f32 %v8044_v32, %v8042_v12  ;;  %v14315_v48 = vadd.f32 %v14266_v28, %v14166_v3 }
 0x2ba   : > { %18092 = vst [vmem:[#allocation102_spill] sm:$0xff] %v14269_v29  ;;  %18093 = vst [vmem:[#allocation103_spill] sm:$0xff] %v14272_v20  ;;  %v14306_v25 = vmul.f32 0.0013717421, %v14234_v2  ;;  %v14309_v42 = vmul.f32 0.0013717421, %v14236_v62  ;;  %v14329_v62 = vadd.f32 %v14132_v53, %v8346_v16  ;;  %v14331_v2 = vadd.f32 %v8670_v45, %v8042_v12 }
 0x2bb   : > { %18094 = vst [vmem:[#allocation104_spill] sm:$0xff] %v14275_v37  ;;  %18095 = vst [vmem:[#allocation105_spill] sm:$0xff] %v14281_v49  ;;  %v14318_v55 = vmul.f32 0.0013717421, %v14269_v29  ;;  %v14334_v3 = vmul.f32 2.0, %v14020_v8  ;;  %v8672_v36 = vadd.f32 %v14289_v50, %v14200_v19  ;;  %v14348_v45 = vmul.f32 %v13756_v34, %v14272_v20 }
 0x2bc   : > { %18096 = vst [vmem:[#allocation106_spill] sm:$0xff] %v14284_v54  ;;  %7880 = vst.msk [vmem:[#allocation2 + $0x358] sm:$0xff] %vm379_vm0, %v11343_v47  ;;  %v14303_v47 = vadd.f32 %v8667_v11, %v14162_v5  ;;  %v14324_v5 = vmul.f32 2.0, %v14017_v13  ;;  %v11350_v11 = vpop.f32.mrb[68].mxu1  ;;  %v14344_v7 = vmul.f32 0.0013717421, %v14294_v9  ;;  %v14352_v16 = vadd.f32 %v14311_v35, %v8044_v32 }
 0x2bd   : > { %18097 = vst [vmem:[#allocation107_spill] sm:$0xff] %v14294_v9  ;;  %18098 = vst [vmem:[#allocation108_spill] sm:$0xff] %v14297_v38  ;;  %v14326_v38 = vadd.f32 %v8043_v40, %v8041_v33  ;;  %v4347_v10 = vpop.f32.mrb[69].mxu1  ;;  %v14356_v12 = vadd.f32 %v14300_v59, %v14182_v24 }
 0x2be   : > { %7879 = vst.msk [vmem:[#allocation2 + $0x350] sm:$0xff] %vm379_vm0, %v4272_v21  ;;  %18099 = vst [vmem:[#allocation109_spill] sm:$0xff] %v14303_v47  ;;  %v14321_v21 = vmul.f32 0.0013717421, %v14272_v20  ;;  %v14359_v19 = vmul.f32 0.0013717421, %v14303_v47  ;;  %v14403_v53 = vmul.f32 %v13812_v1, %v14303_v47  ;;  %v14432_v47 = vmul.f32 %v13826_v44, %v14331_v2 }
 0x2bf   : > { %18100 = vst [vmem:[#allocation110_spill] sm:$0xff] %v14306_v25  ;;  %18101 = vst [vmem:[#allocation111_spill] sm:$0xff] %v14309_v42  ;;  %v11357_v20 = vpop.f32.mrb[70].mxu1 }
 0x2c0   : > { %18102 = vst [vmem:[#allocation112_spill] sm:$0xff] %v14318_v55  ;;  %18103 = vst [vmem:[#allocation113_spill] sm:$0xff] %v14321_v21 }
 0x2c1   : > { %18104 = vst [vmem:[#allocation114_spill] sm:$0xff] %v14324_v5  ;;  %18105 = vst [vmem:[#allocation115_spill] sm:$0xff] %v14329_v62  ;;  %v14341_v5 = vadd.f32 %v8669_v39, %v8041_v33  ;;  %v14363_v33 = vmul.f32 %v13770_v31, %v14269_v29  ;;  %v14365_v39 = vld [vmem:[#allocation2 + $0x258] sm:$0xff]  ;;  %v14379_v62 = vmul.f32 %v14318_v55, %v13770_v31  ;;  %v14381_v29 = vld [vmem:[#allocation2 + $0x250] sm:$0xff]  ;;  %v4422_v31 = vpop.f32.mrb[71].mxu1 }
 0x2c2   : > { %18106 = vst [vmem:[#allocation116_spill] sm:$0xff] %v14331_v2  ;;  %18107 = vst [vmem:[#allocation117_spill] sm:$0xff] %v14334_v3 }
 0x2c3   : > { %7882 = vst.msk [vmem:[#allocation2 + $0x368] sm:$0xff] %vm379_vm0, %v11350_v11  ;;  %18108 = vst [vmem:[#allocation118_spill] sm:$0xff] %v14341_v5  ;;  %v8671_v11 = vadd.f32 %v14315_v48, %v14210_v14  ;;  %v14386_v14 = vadd.f32 %v14326_v38, %v14197_v51  ;;  %v18123_v51 = vld [vmem:[#allocation31_spill] sm:$0xff] }
 0x2c4   : > { %18109 = vst [vmem:[#allocation119_spill] sm:$0xff] %v14344_v7  ;;  %18110 = vst [vmem:[#allocation120_spill] sm:$0xff] %v14348_v45  ;;  %v18115_v45 = vld [vmem:[#allocation30_spill] sm:$0xff] }
 0x2c5   : > { %7881 = vst.msk [vmem:[#allocation2 + $0x360] sm:$0xff] %vm379_vm0, %v4347_v10  ;;  %18111 = vst [vmem:[#allocation121_spill] sm:$0xff] %v14359_v19  ;;  %v18113_v10 = vld [vmem:[#allocation29_spill] sm:$0xff]  ;;  %v14375_v24 = vmul.f32 %v14321_v21, %v18115_v45  ;;  %v14393_v45 = vmul.f32 %v13773_v57, %v14294_v9  ;;  %v14410_v9 = vld [vmem:[#allocation2 + $0x268] sm:$0xff] }
 0x2c6   : > { %18112 = vst [vmem:[#allocation122_spill] sm:$0xff] %v14363_v33  ;;  %v14371_v3 = vmul.f32 %v14318_v55, %v18113_v10  ;;  %18117 = vst [vmem:[#allocation125_spill] sm:$0xff] %v14379_v62  ;;  %v8279_v33 = vadd.f32 %v14337_v18, %v8043_v40  ;;  %v14389_v10 = vmul.f32 0.0013717421, %v14331_v2  ;;  %v14407_v55 = vmul.f32 %v14344_v7, %v18123_v51  ;;  %v14424_v51 = vld [vmem:[#allocation2 + $0x260] sm:$0xff]  ;;  %v14438_v62 = vld [vmem:[#allocation2 + $0x278] sm:$0xff] }
 0x2c7   : > { %18116 = vst [vmem:[#allocation124_spill] sm:$0xff] %v14375_v24  ;;  %18119 = vst [vmem:[#allocation127_spill] sm:$0xff] %v14393_v45  ;;  %v14399_v24 = vmul.f32 0.0013717421, %v14341_v5  ;;  %v18125_v45 = vld [vmem:[#allocation33_spill] sm:$0xff]  ;;  %v8284_v2 = vadd.f32 %v14410_v9, %v14365_v39 }
 0x2c8   : > { %18114 = vst [vmem:[#allocation123_spill] sm:$0xff] %v14371_v3  ;;  %18118 = vst [vmem:[#allocation126_spill] sm:$0xff] %v14389_v10  ;;  %v14396_v3 = vadd.f32 %v8672_v36, %v8044_v32  ;;  %v14416_v36 = vadd.f32 %v14352_v16, %v14243_v26  ;;  %v8674_v32 = vadd.f32 %v14356_v12, %v14172_v15  ;;  %v11364_v15 = vpop.f32.mrb[72].mxu1 }
 0x2c9   : > { %7884 = vst.msk [vmem:[#allocation2 + $0x378] sm:$0xff] %vm379_vm0, %v11357_v20  ;;  %18121 = vst [vmem:[#allocation129_spill] sm:$0xff] %v14399_v24  ;;  %v8282_v20 = vadd.f32 %v14365_v39, %v14311_v35  ;;  %v14436_v26 = vmul.f32 %v14321_v21, %v13756_v34  ;;  %v4497_v34 = vpop.f32.mrb[73].mxu1  ;;  %v18134_v21 = vld [vmem:[#allocation38_spill] sm:$0xff] }
 0x2ca   : > { %18120 = vst [vmem:[#allocation128_spill] sm:$0xff] %v14396_v3  ;;  %18122 = vst [vmem:[#allocation130_spill] sm:$0xff] %v14403_v53  ;;  %v14422_v53 = vmul.f32 %v14359_v19, %v18125_v45  ;;  %v14441_v45 = vadd.f32 %v8279_v33, %v14266_v28  ;;  %v14457_v28 = vmul.f32 0.0013717421, %v14396_v3 }
 0x2cb   : > { %18124 = vst [vmem:[#allocation131_spill] sm:$0xff] %v14407_v55  ;;  %7883 = vst.msk [vmem:[#allocation2 + $0x370] sm:$0xff] %vm379_vm0, %v4422_v31  ;;  %v8281_v31 = vadd.f32 %v14381_v29, %v14337_v18  ;;  %v14428_v55 = vadd.f32 %v8671_v11, %v8043_v40  ;;  %v14447_v40 = vmul.f32 %v13859_v52, %v14341_v5  ;;  %v18131_v11 = vld [vmem:[#allocation35_spill] sm:$0xff] }
 0x2cc   : > { %18126 = vst [vmem:[#allocation132_spill] sm:$0xff] %v14422_v53  ;;  %18128 = vst [vmem:[#allocation134_spill] sm:$0xff] %v14432_v47  ;;  %v8673_v53 = vadd.f32 %v14386_v14, %v14170_v0  ;;  %v14451_v47 = vmul.f32 %v14389_v10, %v18131_v11  ;;  %v14461_v0 = vmul.f32 %v14399_v24, %v18134_v21  ;;  %v14468_v11 = vld [vmem:[#allocation2 + $0x270] sm:$0xff] }
 0x2cd   : > { %18127 = vst [vmem:[#allocation133_spill] sm:$0xff] %v14428_v55  ;;  %18129 = vst [vmem:[#allocation135_spill] sm:$0xff] %v14436_v26  ;;  %v8676_v5 = vadd.f32 %v14416_v36, %v14203_v22  ;;  %v14478_v21 = vadd.f32 %v8674_v32, %v14311_v35  ;;  %v8675_v22 = vadd.f32 %v14441_v45, %v14213_v4  ;;  %v18143_v4 = vld [vmem:[#allocation39_spill] sm:$0xff] }
 0x2ce   : > { %18130 = vst [vmem:[#allocation136_spill] sm:$0xff] %v14447_v40  ;;  %18132 = vst [vmem:[#allocation137_spill] sm:$0xff] %v14451_v47  ;;  %v14465_v40 = vmul.f32 %v14359_v19, %v13812_v1  ;;  %v14473_v47 = vadd.f32 %v8282_v20, %v14300_v59  ;;  %v14482_v1 = vadd.f32 %v14438_v62, %v14410_v9  ;;  %v11371_v19 = vpop.f32.mrb[74].mxu1 }
 0x2cf   : > { %7886 = vst.msk [vmem:[#allocation2 + $0x388] sm:$0xff] %vm379_vm0, %v11364_v15  ;;  %18133 = vst [vmem:[#allocation138_spill] sm:$0xff] %v14457_v28  ;;  %v8283_v15 = vadd.f32 %v14424_v51, %v14381_v29  ;;  %v14492_v59 = vmul.f32 %v14344_v7, %v13773_v57  ;;  %v14497_v35 = vadd.f32 %v8673_v53, %v14337_v18  ;;  %v4572_v57 = vpop.f32.mrb[75].mxu1  ;;  %v14508_v7 = vld [vmem:[#allocation2 + $0x280] sm:$0xff] }
 0x2d0   : > { %18135 = vst [vmem:[#allocation139_spill] sm:$0xff] %v14461_v0  ;;  %18136 = vst [vmem:[#allocation140_spill] sm:$0xff] %v14465_v40  ;;  %v14488_v0 = vmul.f32 0.0013717421, %v14428_v55  ;;  %v8054_v40 = vld [vmem:[#allocation2 + $0x288] sm:$0xff]  ;;  %v14501_v32 = vmul.f32 %v13908_v60, %v14428_v55  ;;  %v14515_v53 = vadd.f32 %v8284_v2, %v14352_v16  ;;  %v14519_v18 = vmul.f32 %v14457_v28, %v18143_v4 }
 0x2d1   : > { %7885 = vst.msk [vmem:[#allocation2 + $0x380] sm:$0xff] %vm379_vm0, %v4497_v34  ;;  %18137 = vst [vmem:[#allocation141_spill] sm:$0xff] %v14478_v21  ;;  %v14485_v34 = vadd.f32 %v8281_v31, %v14326_v38  ;;  %v14505_v38 = vmul.f32 %v13874_v30, %v14396_v3  ;;  %v14531_v3 = vadd.f32 %v8676_v5, %v14365_v39  ;;  %v14534_v16 = vmul.f32 0.0013717421, %v14478_v21 }
 0x2d2   : > { %18138 = vst [vmem:[#allocation142_spill] sm:$0xff] %v14488_v0  ;;  %18139 = vst [vmem:[#allocation143_spill] sm:$0xff] %v14492_v59  ;;  %v14512_v59 = vadd.f32 %v14468_v11, %v14424_v51  ;;  %v14537_v4 = vadd.f32 %v8054_v40, %v14438_v62  ;;  %v14550_v5 = vadd.f32 %v14508_v7, %v14468_v11  ;;  %v14556_v55 = vmul.f32 0.0013717421, %v14497_v35 }
 0x2d3   : > { %18140 = vst [vmem:[#allocation144_spill] sm:$0xff] %v14497_v35  ;;  %18141 = vst [vmem:[#allocation145_spill] sm:$0xff] %v14501_v32  ;;  %v14523_v32 = vmul.f32 %v14399_v24, %v13859_v52  ;;  %v14553_v39 = vadd.f32 %v8675_v22, %v14381_v29  ;;  %v18153_v24 = vld [vmem:[#allocation54_spill] sm:$0xff]  ;;  %v18155_v22 = vld [vmem:[#allocation51_spill] sm:$0xff] }
 0x2d4   : > { %18142 = vst [vmem:[#allocation146_spill] sm:$0xff] %v14505_v38  ;;  %7888 = vst.msk [vmem:[#allocation2 + $0x398] sm:$0xff] %vm379_vm0, %v11371_v19  ;;  %v14526_v19 = vadd.f32 %v8283_v15, %v8279_v33  ;;  %v8678_v38 = vadd.f32 %v14473_v47, %v14232_v6  ;;  %v18148_v33 = vld [vmem:[#allocation42_spill] sm:$0xff]  ;;  %v11378_v6 = vpop.f32.mrb[76].mxu1  ;;  %v14570_v29 = vmul.f32 %v18153_v24, %v14497_v35 }
 0x2d5   : > { %18144 = vst [vmem:[#allocation147_spill] sm:$0xff] %v14519_v18  ;;  %18145 = vst [vmem:[#allocation148_spill] sm:$0xff] %v14523_v32  ;;  %v14540_v18 = vadd.f32 %v14482_v1, %v8282_v20  ;;  %v14546_v52 = vmul.f32 %v14488_v0, %v18148_v33  ;;  %v14560_v20 = vmul.f32 %v14389_v10, %v13826_v44  ;;  %v8056_v44 = vld [vmem:[#allocation2 + $0x298] sm:$0xff]  ;;  %v14583_v10 = vmul.f32 0.0013717421, %v14531_v3 }
 0x2d6   : > { %7887 = vst.msk [vmem:[#allocation2 + $0x390] sm:$0xff] %vm379_vm0, %v4572_v57  ;;  %18146 = vst [vmem:[#allocation149_spill] sm:$0xff] %v14531_v3  ;;  %v8677_v57 = vadd.f32 %v14485_v34, %v14246_v63  ;;  %v4647_v63 = vpop.f32.mrb[77].mxu1  ;;  %v14564_v33 = vadd.f32 %v14512_v59, %v8281_v31  ;;  %v14574_v32 = vmul.f32 %v18155_v22, %v14478_v21 }
 0x2d7   : > { %18147 = vst [vmem:[#allocation150_spill] sm:$0xff] %v14534_v16  ;;  %18149 = vst [vmem:[#allocation151_spill] sm:$0xff] %v14546_v52  ;;  %v8680_v52 = vadd.f32 %v14515_v53, %v14289_v50  ;;  %v14580_v31 = vadd.f32 %v8678_v38, %v14410_v9  ;;  %v18159_v50 = vld [vmem:[#allocation44_spill] sm:$0xff]  ;;  %v14599_v9 = vmul.f32 %v14488_v0, %v13908_v60  ;;  %v18168_v0 = vld [vmem:[#allocation55_spill] sm:$0xff] }
 0x2d8   : > { %18150 = vst [vmem:[#allocation152_spill] sm:$0xff] %v14553_v39  ;;  %18151 = vst [vmem:[#allocation153_spill] sm:$0xff] %v14556_v55  ;;  %v14587_v35 = vmul.f32 %v14534_v16, %v18159_v50  ;;  %v14602_v38 = vadd.f32 %v14550_v5, %v8283_v15  ;;  %v14605_v50 = vmul.f32 0.0013717421, %v14553_v39  ;;  %v14616_v60 = vadd.f32 %v8056_v44, %v8054_v40 }
 0x2d9   : > { %18152 = vst [vmem:[#allocation154_spill] sm:$0xff] %v14560_v20  ;;  %7890 = vst.msk [vmem:[#allocation2 + $0x3a8] sm:$0xff] %vm379_vm0, %v11378_v6  ;;  %v8679_v6 = vadd.f32 %v14526_v19, %v14315_v48  ;;  %v11385_v48 = vpop.f32.mrb[78].mxu1  ;;  %v8681_v15 = vadd.f32 %v14564_v33, %v14386_v14  ;;  %v14621_v21 = vadd.f32 %v8680_v52, %v14438_v62  ;;  %v18174_v14 = vld [vmem:[#allocation47_spill] sm:$0xff] }
 0x2da   : > { %18154 = vst [vmem:[#allocation155_spill] sm:$0xff] %v14570_v29  ;;  %18156 = vst [vmem:[#allocation156_spill] sm:$0xff] %v14574_v32  ;;  %v14590_v29 = vadd.f32 %v14537_v4, %v8284_v2  ;;  %v14595_v32 = vadd.f32 %v8677_v57, %v14424_v51  ;;  %v4722_v51 = vpop.f32.mrb[79].mxu1  ;;  %v8055_v57 = vld [vmem:[#allocation2 + $0x290] sm:$0xff]  ;;  %v14640_v52 = vmul.f32 %v14583_v10, %v18174_v14 }
 0x2db   : > { %7889 = vst.msk [vmem:[#allocation2 + $0x3a0] sm:$0xff] %vm379_vm0, %v4647_v63  ;;  %18157 = vst [vmem:[#allocation157_spill] sm:$0xff] %v14580_v31  ;;  %v8682_v63 = vadd.f32 %v14540_v18, %v14356_v12  ;;  %v14613_v12 = vmul.f32 %v14457_v28, %v13874_v30  ;;  %v14629_v30 = vadd.f32 %v8679_v6, %v14468_v11  ;;  %v11392_v6 = vpop.f32.mrb[80].mxu1  ;;  %v18232_v20 = vld [vmem:[#allocation23_spill] sm:$0xff] }
 0x2dc   : > { %18158 = vst [vmem:[#allocation158_spill] sm:$0xff] %v14583_v10  ;;  %18160 = vst [vmem:[#allocation159_spill] sm:$0xff] %v14587_v35  ;;  %v18164_v35 = vld [vmem:[#allocation46_spill] sm:$0xff]  ;;  %v8684_v62 = vadd.f32 %v14590_v29, %v14416_v36  ;;  %v14651_v11 = vmul.f32 %v14556_v55, %v18153_v24  ;;  %v8683_v14 = vadd.f32 %v14602_v38, %v14441_v45  ;;  %v14675_v45 = vmul.f32 0.0013717421, %v14621_v21 }
 0x2dd   : > { %18161 = vst [vmem:[#allocation160_spill] sm:$0xff] %v14595_v32  ;;  %18162 = vst [vmem:[#allocation161_spill] sm:$0xff] %v14599_v9  ;;  %v14609_v2 = vmul.f32 %v14556_v55, %v18164_v35  ;;  %v14625_v35 = vmul.f32 %v18168_v0, %v14531_v3  ;;  %v14654_v3 = vadd.f32 %v8055_v57, %v14508_v7 }
 0x2de   : > { %18163 = vst [vmem:[#allocation162_spill] sm:$0xff] %v14605_v50  ;;  %18166 = vst [vmem:[#allocation164_spill] sm:$0xff] %v14613_v12  ;;  %v14664_v36 = vmul.f32 %v14534_v16, %v18155_v22  ;;  %v14669_v24 = vadd.f32 %v14616_v60, %v14482_v1  ;;  %v18186_v22 = vld [vmem:[#allocation64_spill] sm:$0xff]  ;;  %v18188_v1 = vld [vmem:[#allocation49_spill] sm:$0xff] }
 0x2df   : > { %18165 = vst [vmem:[#allocation163_spill] sm:$0xff] %v14609_v2  ;;  %7892 = vst.msk [vmem:[#allocation2 + $0x3b8] sm:$0xff] %vm379_vm0, %v11385_v48  ;;  %v14632_v48 = vmul.f32 0.0013717421, %v14580_v31  ;;  %v18172_v2 = vld [vmem:[#allocation57_spill] sm:$0xff] }
 0x2e0   : > { %18167 = vst [vmem:[#allocation165_spill] sm:$0xff] %v14621_v21  ;;  %18169 = vst [vmem:[#allocation166_spill] sm:$0xff] %v14625_v35  ;;  %v14636_v28 = vmul.f32 %v18172_v2, %v14553_v39  ;;  %v14644_v35 = vadd.f32 %v8682_v63, %v8054_v40  ;;  %v4797_v40 = vpop.f32.mrb[81].mxu1  ;;  %v8058_v63 = vld [vmem:[#allocation2 + $0x2a8] sm:$0xff]  ;;  %v14672_v39 = vadd.f32 %v8681_v15, %v14508_v7  ;;  %v8057_v16 = vld [vmem:[#allocation2 + $0x2a0] sm:$0xff] }
 0x2e1   : > { %7891 = vst.msk [vmem:[#allocation2 + $0x3b0] sm:$0xff] %vm379_vm0, %v4722_v51  ;;  %18170 = vst [vmem:[#allocation167_spill] sm:$0xff] %v14629_v30  ;;  %v14647_v51 = vmul.f32 0.0013717421, %v14595_v32  ;;  %v14691_v7 = vmul.f32 %v14632_v48, %v18188_v1  ;;  %v14695_v15 = vmul.f32 %v14605_v50, %v18172_v2  ;;  %v11399_v1 = vpop.f32.mrb[82].mxu1  ;;  %v14714_v2 = vadd.f32 %v14654_v3, %v14512_v59  ;;  %v18200_v59 = vld [vmem:[#allocation53_spill] sm:$0xff] }
 0x2e2   : > { %18171 = vst [vmem:[#allocation168_spill] sm:$0xff] %v14632_v48  ;;  %18173 = vst [vmem:[#allocation169_spill] sm:$0xff] %v14636_v28 }
 0x2e3   : > { %18175 = vst [vmem:[#allocation170_spill] sm:$0xff] %v14640_v52  ;;  %18176 = vst [vmem:[#allocation171_spill] sm:$0xff] %v14644_v35  ;;  %v18179_v52 = vld [vmem:[#allocation48_spill] sm:$0xff] }
 0x2e4   : > { %18177 = vst [vmem:[#allocation172_spill] sm:$0xff] %v14647_v51  ;;  %18178 = vst [vmem:[#allocation173_spill] sm:$0xff] %v14651_v11  ;;  %v14660_v28 = vmul.f32 %v14605_v50, %v18179_v52  ;;  %v14679_v52 = vmul.f32 %v13973_v41, %v14580_v31  ;;  %v14697_v31 = vadd.f32 %v8684_v62, %v8056_v44  ;;  %v8080_v11 = vld [vmem:[#allocation2 + $0x358] sm:$0xff] }
 0x2e5   : > { %18181 = vst [vmem:[#allocation175_spill] sm:$0xff] %v14664_v36  ;;  %7894 = vst.msk [vmem:[#allocation2 + $0x3c8] sm:$0xff] %vm379_vm0, %v11392_v6  ;;  %v14683_v6 = vmul.f32 0.0013717421, %v14629_v30  ;;  %v14716_v62 = vadd.f32 %v8683_v14, %v8055_v57  ;;  %v14734_v14 = vmul.f32 %v14675_v45, %v18200_v59  ;;  %v14747_v50 = vmul.f32 %v14647_v51, %v18186_v22  ;;  %v18225_v36 = vld [vmem:[#allocation65_spill] sm:$0xff] }
 0x2e6   : > { %18180 = vst [vmem:[#allocation174_spill] sm:$0xff] %v14660_v28  ;;  %18182 = vst [vmem:[#allocation176_spill] sm:$0xff] %v14672_v39  ;;  %v14687_v28 = vmul.f32 %v18186_v22, %v14595_v32  ;;  %v14720_v32 = vmul.f32 %v13989_v23, %v14621_v21  ;;  %v8291_v21 = vadd.f32 %v8057_v16, %v8055_v57  ;;  %v14754_v59 = vmul.f32 0.0013717421, %v14697_v31 }
 0x2e7   : > { %18183 = vst [vmem:[#allocation177_spill] sm:$0xff] %v14675_v45  ;;  %18184 = vst [vmem:[#allocation178_spill] sm:$0xff] %v14679_v52  ;;  %v18193_v52 = vld [vmem:[#allocation52_spill] sm:$0xff]  ;;  %v14762_v57 = vmul.f32 %v14020_v8, %v14644_v35 }
 0x2e8   : > { %7893 = vst.msk [vmem:[#allocation2 + $0x3c0] sm:$0xff] %vm379_vm0, %v4797_v40  ;;  %18185 = vst [vmem:[#allocation179_spill] sm:$0xff] %v14683_v6  ;;  %v14700_v40 = vmul.f32 0.0013717421, %v14644_v35  ;;  %v14704_v55 = vmul.f32 %v14647_v51, %v18193_v52  ;;  %v4872_v52 = vpop.f32.mrb[83].mxu1  ;;  %v14791_v51 = vld [vmem:[#allocation2 + $0x2c0] sm:$0xff] }
 0x2e9   : > { %18187 = vst [vmem:[#allocation180_spill] sm:$0xff] %v14687_v28  ;;  %18189 = vst [vmem:[#allocation181_spill] sm:$0xff] %v14691_v7  ;;  %v14708_v28 = vmul.f32 %v14583_v10, %v18168_v0  ;;  %v14710_v7 = vadd.f32 %v8058_v63, %v8056_v44  ;;  %v8686_v0 = vadd.f32 %v14669_v24, %v14473_v47  ;;  %v18202_v10 = vld [vmem:[#allocation56_spill] sm:$0xff]  ;;  %v11406_v22 = vpop.f32.mrb[84].mxu1 }
 0x2ea   : > { %18190 = vst [vmem:[#allocation182_spill] sm:$0xff] %v14695_v15  ;;  %18191 = vst [vmem:[#allocation183_spill] sm:$0xff] %v14697_v31  ;;  %v14730_v44 = vmul.f32 %v14003_v43, %v14629_v30  ;;  %v14743_v47 = vmul.f32 %v14683_v6, %v18202_v10  ;;  %v18209_v10 = vld [vmem:[#allocation61_spill] sm:$0xff]  ;;  %v14775_v30 = vmul.f32 0.0013717421, %v14716_v62 }
 0x2eb   : > { %18192 = vst [vmem:[#allocation184_spill] sm:$0xff] %v14700_v40  ;;  %18194 = vst [vmem:[#allocation185_spill] sm:$0xff] %v14704_v55  ;;  %v14726_v55 = vmul.f32 0.0013717421, %v14672_v39  ;;  %v14784_v35 = vadd.f32 %v8686_v0, %v8058_v63  ;;  %v14800_v0 = vadd.f32 %v8291_v21, %v14550_v5  ;;  %v8077_v15 = vld [vmem:[#allocation2 + $0x340] sm:$0xff] }
 0x2ec   : > { %18195 = vst [vmem:[#allocation186_spill] sm:$0xff] %v14708_v28  ;;  %18196 = vst [vmem:[#allocation187_spill] sm:$0xff] %v14716_v62 }
 0x2ed   : > { %18197 = vst [vmem:[#allocation188_spill] sm:$0xff] %v14720_v32  ;;  %7896 = vst.msk [vmem:[#allocation2 + $0x3d8] sm:$0xff] %vm379_vm0, %v11399_v1  ;;  %v14737_v32 = vld [vmem:[#allocation2 + $0x2b0] sm:$0xff]  ;;  %v14739_v1 = vld [vmem:[#allocation2 + $0x2b8] sm:$0xff]  ;;  %v14820_v5 = vmul.f32 %v14726_v55, %v14017_v13 }
 0x2ee   : > { %18198 = vst [vmem:[#allocation189_spill] sm:$0xff] %v14726_v55  ;;  %18199 = vst [vmem:[#allocation190_spill] sm:$0xff] %v14730_v44  ;;  %v14751_v44 = vmul.f32 %v14632_v48, %v13973_v41  ;;  %v14770_v41 = vadd.f32 %v14710_v7, %v14537_v4  ;;  %v18214_v4 = vld [vmem:[#allocation60_spill] sm:$0xff] }
 0x2ef   : > { %18201 = vst [vmem:[#allocation191_spill] sm:$0xff] %v14734_v14  ;;  %7895 = vst.msk [vmem:[#allocation2 + $0x3d0] sm:$0xff] %vm379_vm0, %v4872_v52  ;;  %v14758_v52 = vmul.f32 %v14017_v13, %v14672_v39  ;;  %v8685_v14 = vadd.f32 %v14714_v2, %v14485_v34  ;;  %v14788_v39 = vmul.f32 %v14726_v55, %v18214_v4  ;;  %v8158_v34 = vld [vmem:[#allocation2 + $0x5c8] sm:$0xff]  ;;  %v8160_v48 = vld [vmem:[#allocation2 + $0x5d8] sm:$0xff] }
 0x2f0   : > { %18203 = vst [vmem:[#allocation192_spill] sm:$0xff] %v14743_v47  ;;  %18204 = vst [vmem:[#allocation193_spill] sm:$0xff] %v14747_v50  ;;  %v14766_v47 = vmul.f32 %v14700_v40, %v18209_v10  ;;  %v8293_v10 = vadd.f32 %v14737_v32, %v8057_v16  ;;  %v18217_v4 = vld [vmem:[#allocation79_spill] sm:$0xff]  ;;  %v14835_v55 = vld [vmem:[#allocation2 + $0x618] sm:$0xff] }
 0x2f1   : > { %18205 = vst [vmem:[#allocation194_spill] sm:$0xff] %v14751_v44  ;;  %18206 = vst [vmem:[#allocation195_spill] sm:$0xff] %v14754_v59  ;;  %v18221_v50 = vld [vmem:[#allocation63_spill] sm:$0xff] }
 0x2f2   : > { %18207 = vst [vmem:[#allocation196_spill] sm:$0xff] %v14758_v52  ;;  %18208 = vst [vmem:[#allocation197_spill] sm:$0xff] %v14762_v57  ;;  %v14779_v52 = vmul.f32 %v14683_v6, %v14003_v43  ;;  %v4947_v57 = vpop.f32.mrb[85].mxu1  ;;  %v14795_v43 = vld [vmem:[#allocation2 + $0x2c8] sm:$0xff]  ;;  %v14816_v28 = vmul.f32 %v14754_v59, %v18221_v50  ;;  %v14832_v50 = vmul.f32 %v14700_v40, %v14020_v8  ;;  %v14845_v8 = vld [vmem:[#allocation2 + $0x610] sm:$0xff] }
 0x2f3   : > { %18210 = vst [vmem:[#allocation198_spill] sm:$0xff] %v14766_v47  ;;  %18211 = vst [vmem:[#allocation199_spill] sm:$0xff] %v14775_v30  ;;  %v8294_v47 = vadd.f32 %v14739_v1, %v8058_v63  ;;  %v8296_v6 = vadd.f32 %v14795_v43, %v14739_v1  ;;  %v14804_v63 = vmul.f32 %v14675_v45, %v13989_v23  ;;  %v11413_v23 = vpop.f32.mrb[86].mxu1  ;;  %v8157_v45 = vld [vmem:[#allocation2 + $0x5c0] sm:$0xff]  ;;  %v8079_v59 = vld [vmem:[#allocation2 + $0x350] sm:$0xff] }
 0x2f4   : > { %18212 = vst [vmem:[#allocation200_spill] sm:$0xff] %v14779_v52  ;;  %7898 = vst.msk [vmem:[#allocation2 + $0x3e8] sm:$0xff] %vm379_vm0, %v11406_v22  ;;  %v8295_v22 = vadd.f32 %v14791_v51, %v14737_v32  ;;  %v18219_v52 = vld [vmem:[#allocation76_spill] sm:$0xff]  ;;  %v5022_v13 = vpop.f32.mrb[87].mxu1 }
 0x2f5   : > { %18213 = vst [vmem:[#allocation201_spill] sm:$0xff] %v14784_v35  ;;  %18215 = vst [vmem:[#allocation202_spill] sm:$0xff] %v14788_v39  ;;  %v14808_v39 = vmul.f32 %v18217_v4, %v14716_v62  ;;  %v14812_v44 = vmul.f32 %v18219_v52, %v14697_v31  ;;  %v8688_v62 = vadd.f32 %v14770_v41, %v14515_v53  ;;  %v8162_v31 = vld [vmem:[#allocation2 + $0x5e8] sm:$0xff]  ;;  %v11420_v52 = vpop.f32.mrb[88].mxu1  ;;  %v18236_v4 = vld [vmem:[#allocation25_spill] sm:$0xff] }
 0x2f6   : > { %7897 = vst.msk [vmem:[#allocation2 + $0x3e0] sm:$0xff] %vm379_vm0, %v4947_v57  ;;  %18216 = vst [vmem:[#allocation203_spill] sm:$0xff] %v14804_v63  ;;  %v8078_v57 = vld [vmem:[#allocation2 + $0x348] sm:$0xff]  ;;  %v8159_v63 = vld [vmem:[#allocation2 + $0x5d0] sm:$0xff]  ;;  %v8505_v53 = vadd.f32 %v8293_v10, %v14654_v3  ;;  %v8687_v3 = vadd.f32 %v14800_v0, %v14526_v19  ;;  %v8510_v26 = vadd.f32 %v18232_v20, %v8294_v47 }
 0x2f7   : > { %18218 = vst [vmem:[#allocation204_spill] sm:$0xff] %v14808_v39  ;;  %18220 = vst [vmem:[#allocation205_spill] sm:$0xff] %v14812_v44  ;;  %v14824_v39 = vadd.f32 %v8685_v14, %v8057_v16  ;;  %v14828_v44 = vmul.f32 %v14775_v30, %v18225_v36  ;;  %v8506_v16 = vadd.f32 %v8294_v47, %v14616_v60  ;;  %v14842_v14 = vmul.f32 0.0013717421, %v14784_v35  ;;  %v8169_v36 = vld [vmem:[#allocation2 + $0x620] sm:$0xff] }
 0x2f8   : > { %18222 = vst [vmem:[#allocation206_spill] sm:$0xff] %v14816_v28  ;;  %18223 = vst [vmem:[#allocation207_spill] sm:$0xff] %v14820_v5  ;;  %v8161_v28 = vld [vmem:[#allocation2 + $0x5e0] sm:$0xff]  ;;  %v14837_v5 = vadd.f32 %v8160_v48, %v8158_v34  ;;  %v8508_v34 = vadd.f32 %v8296_v6, %v14710_v7  ;;  %v14854_v12 = vadd.f32 %v8159_v63, %v8157_v45  ;;  %v18235_v7 = vld [vmem:[#allocation26_spill] sm:$0xff] }
 0x2f9   : > { %18224 = vst [vmem:[#allocation208_spill] sm:$0xff] %v14824_v39  ;;  %18226 = vst [vmem:[#allocation209_spill] sm:$0xff] %v14828_v44  ;;  %v12106_v44 = vld [vmem:[#allocation2 + $0x338] sm:$0xff]  ;;  %v8511_v30 = vadd.f32 %v18235_v7, %v8295_v22  ;;  %v8512_v19 = vadd.f32 %v18236_v4, %v8296_v6  ;;  %v14866_v45 = vadd.f32 %v8169_v36, %v14845_v8  ;;  %v18240_v4 = vld [vmem:[#allocation27_spill] sm:$0xff] }
 0x2fa   : > { %18227 = vst [vmem:[#allocation210_spill] sm:$0xff] %v14832_v50  ;;  %7900 = vst.msk [vmem:[#allocation2 + $0x3f8] sm:$0xff] %vm379_vm0, %v11413_v23  ;;  %v8170_v23 = vld [vmem:[#allocation2 + $0x628] sm:$0xff]  ;;  %v14847_v40 = vadd.f32 %v12106_v44, %v8078_v57  ;;  %v8507_v50 = vadd.f32 %v8295_v22, %v8291_v21  ;;  %v14858_v44 = vadd.f32 %v8161_v28, %v8159_v63  ;;  %v8172_v7 = vld [vmem:[#allocation2 + $0x638] sm:$0xff] }
 0x2fb   : > { %18228 = vst [vmem:[#allocation211_spill] sm:$0xff] %v14837_v5  ;;  %18229 = vst [vmem:[#allocation212_spill] sm:$0xff] %v14842_v14  ;;  %v12107_v5 = vld [vmem:[#allocation2 + $0x330] sm:$0xff]  ;;  %v14860_v21 = vadd.f32 %v8162_v31, %v8160_v48  ;;  %v8689_v20 = vadd.f32 %v8505_v53, %v14564_v33  ;;  %v8690_v28 = vadd.f32 %v8506_v16, %v14540_v18  ;;  %v18239_v31 = vld [vmem:[#allocation78_spill] sm:$0xff] }
 0x2fc   : > { %7899 = vst.msk [vmem:[#allocation2 + $0x3f0] sm:$0xff] %vm379_vm0, %v5022_v13  ;;  %v14852_v60 = vadd.f32 %v12107_v5, %v8077_v15  ;;  %18230 = vst [vmem:[#allocation213_spill] sm:$0xff] %v14854_v12  ;;  %v18231_v13 = vld [vmem:[#allocation24_spill] sm:$0xff]  ;;  %v5097_v5 = vpop.f32.mrb[89].mxu1  ;;  %v8310_v47 = vadd.f32 %v8080_v11, %v8078_v57  ;;  %v14876_v48 = vadd.f32 %v14847_v40, %v18239_v31  ;;  %v8082_v16 = vld [vmem:[#allocation2 + $0x368] sm:$0xff] }
 0x2fd   : > { %v8509_v9 = vadd.f32 %v18231_v13, %v8293_v10  ;;  %18233 = vst [vmem:[#allocation24_spill] sm:$0xff] %v14858_v44  ;;  %18234 = vst [vmem:[#allocation23_spill] sm:$0xff] %v14860_v21  ;;  %v14869_v10 = vadd.f32 %v8170_v23, %v14835_v55  ;;  %v8691_v6 = vadd.f32 %v8507_v50, %v14602_v38  ;;  %v8084_v33 = vld [vmem:[#allocation2 + $0x378] sm:$0xff]  ;;  %v11427_v53 = vpop.f32.mrb[90].mxu1  ;;  %v8171_v13 = vld [vmem:[#allocation2 + $0x630] sm:$0xff] }
 0x2fe   : > { %7902 = vst.msk [vmem:[#allocation2 + $0x408] sm:$0xff] %vm379_vm0, %v11420_v52  ;;  %18237 = vst [vmem:[#allocation26_spill] sm:$0xff] %v14866_v45  ;;  %v8692_v52 = vadd.f32 %v8508_v34, %v14590_v29  ;;  %v14882_v22 = vadd.f32 %v14852_v60, %v18240_v4  ;;  %v14884_v63 = vadd.f32 %v8079_v59, %v8077_v15  ;;  %v8081_v15 = vld [vmem:[#allocation2 + $0x360] sm:$0xff]  ;;  %v12111_v4 = vld [vmem:[#allocation2 + $0x2e8] sm:$0xff] }
 0x2ff   : > { %18238 = vst [vmem:[#allocation25_spill] sm:$0xff] %v14869_v10  ;;  %7901 = vst.msk [vmem:[#allocation2 + $0x400] sm:$0xff] %vm379_vm0, %v5097_v5  ;;  %v8693_v18 = vadd.f32 %v8509_v9, %v14714_v2  ;;  %v8694_v57 = vadd.f32 %v8510_v26, %v14669_v24  ;;  %v8695_v5 = vadd.f32 %v8511_v30, %v14800_v0  ;;  %v5172_v9 = vpop.f32.mrb[91].mxu1  ;;  %v8067_v2 = vld [vmem:[#allocation2 + $0x2f0] sm:$0xff] }
 0x300   : > { %v8696_v50 = vadd.f32 %v8512_v19, %v14770_v41  ;;  %v14891_v29 = vadd.f32 %v8687_v3, %v14737_v32  ;;  %v14894_v38 = vadd.f32 %v8688_v62, %v14739_v1  ;;  %7904 = vst.msk [vmem:[#allocation2 + $0x418] sm:$0xff] %vm379_vm0, %v11427_v53  ;;  %v14897_v24 = vadd.f32 %v8171_v13, %v8169_v36  ;;  %v8068_v41 = vld [vmem:[#allocation2 + $0x2f8] sm:$0xff]  ;;  %v8083_v32 = vld [vmem:[#allocation2 + $0x370] sm:$0xff] }
 0x301   : > { %v14899_v26 = vadd.f32 %v8172_v7, %v8170_v23  ;;  %v14902_v34 = vadd.f32 %v14791_v51, %v8689_v20  ;;  %v14905_v30 = vadd.f32 %v14795_v43, %v8690_v28  ;;  %7903 = vst.msk [vmem:[#allocation2 + $0x410] sm:$0xff] %vm379_vm0, %v5172_v9  ;;  %v14908_v62 = vadd.f32 %v8084_v33, %v8082_v16  ;;  %v18247_v1 = vld [vmem:[#allocation32_spill] sm:$0xff]  ;;  %v12108_v3 = vld [vmem:[#allocation2 + $0x2d0] sm:$0xff]  ;;  %v12110_v28 = vld [vmem:[#allocation2 + $0x2e0] sm:$0xff]  ;;  %v11434_v7 = vpop.f32.mrb[92].mxu1 }
 0x302   : > { %18241 = vst [vmem:[#allocation78_spill] sm:$0xff] %v14891_v29  ;;  %18242 = vst [vmem:[#allocation27_spill] sm:$0xff] %v14894_v38  ;;  %v14911_v0 = vadd.f32 %v8310_v47, %v18247_v1  ;;  %v14913_v36 = vadd.f32 %v12108_v3, %v8691_v6  ;;  %v12109_v23 = vld [vmem:[#allocation2 + $0x2d8] sm:$0xff]  ;;  %v8312_v43 = vadd.f32 %v8082_v16, %v8080_v11  ;;  %v8086_v9 = vld [vmem:[#allocation2 + $0x388] sm:$0xff]  ;;  %v14928_v6 = vmul.f32 0.0013717421, %v14824_v39 }
 0x303   : > { %18243 = vst [vmem:[#allocation214_spill] sm:$0xff] %v14897_v24  ;;  %18244 = vst [vmem:[#allocation215_spill] sm:$0xff] %v14899_v26  ;;  %v14915_v19 = vadd.f32 %v12109_v23, %v8692_v52  ;;  %v18250_v51 = vld [vmem:[#allocation28_spill] sm:$0xff]  ;;  %v14921_v31 = vadd.f32 %v12110_v28, %v8693_v18  ;;  %v14923_v53 = vadd.f32 %v12111_v4, %v8694_v57  ;;  %v14931_v52 = vmul.f32 0.0013717421, %v14891_v29  ;;  %v14933_v3 = vld [vmem:[#allocation2 + $0x380] sm:$0xff] }
 0x304   : > { %18245 = vst [vmem:[#allocation216_spill] sm:$0xff] %v14902_v34  ;;  %18246 = vst [vmem:[#allocation217_spill] sm:$0xff] %v14905_v30  ;;  %v14919_v20 = vadd.f32 %v14884_v63, %v18250_v51  ;;  %v8311_v13 = vadd.f32 %v8081_v15, %v8079_v59  ;;  %v14925_v1 = vadd.f32 %v8695_v5, %v8067_v2  ;;  %v5247_v11 = vpop.f32.mrb[93].mxu1  ;;  %v14941_v59 = vmul.f32 0.0013717421, %v14894_v38 }
 0x305   : > { %18248 = vst [vmem:[#allocation32_spill] sm:$0xff] %v14913_v36  ;;  %18249 = vst [vmem:[#allocation218_spill] sm:$0xff] %v14915_v19  ;;  %v14936_v18 = vadd.f32 %v8083_v32, %v8081_v15  ;;  %v14938_v57 = vadd.f32 %v8696_v50, %v8068_v41  ;;  %v14944_v16 = vmul.f32 0.0013717421, %v14902_v34  ;;  %v14948_v5 = vadd.f32 %v14908_v62, %v8310_v47  ;;  %v8166_v15 = vld [vmem:[#allocation2 + $0x608] sm:$0xff]  ;;  %v11441_v4 = vpop.f32.mrb[94].mxu1 }
 0x306   : > { %18251 = vst [vmem:[#allocation28_spill] sm:$0xff] %v14921_v31  ;;  %18252 = vst [vmem:[#allocation219_spill] sm:$0xff] %v14923_v53  ;;  %v14951_v2 = vmul.f32 0.0013717421, %v14905_v30  ;;  %v14954_v23 = vmul.f32 0.0013717421, %v14913_v36  ;;  %v14959_v41 = vadd.f32 %v8086_v9, %v8084_v33  ;;  %v14962_v51 = vadd.f32 %v8312_v43, %v14847_v40 }
 0x307   : > { %18253 = vst [vmem:[#allocation220_spill] sm:$0xff] %v14925_v1  ;;  %18254 = vst [vmem:[#allocation221_spill] sm:$0xff] %v14928_v6  ;;  %v14957_v50 = vmul.f32 0.0013717421, %v14915_v19  ;;  %v14965_v28 = vmul.f32 0.0013717421, %v14921_v31  ;;  %v14973_v45 = vadd.f32 %v14933_v3, %v8083_v32  ;;  %v14976_v10 = vadd.f32 %v8311_v13, %v14852_v60 }
 0x308   : > { %18255 = vst [vmem:[#allocation222_spill] sm:$0xff] %v14931_v52  ;;  %7906 = vst.msk [vmem:[#allocation2 + $0x428] sm:$0xff] %vm379_vm0, %v11434_v7  ;;  %v14968_v47 = vmul.f32 0.0013717421, %v14923_v53  ;;  %v14970_v7 = vld [vmem:[#allocation2 + $0x398] sm:$0xff]  ;;  %v18264_v40 = vld [vmem:[#allocation86_spill] sm:$0xff]  ;;  %v14988_v12 = vadd.f32 %v14936_v18, %v14884_v63 }
 0x309   : > { %18256 = vst [vmem:[#allocation223_spill] sm:$0xff] %v14938_v57  ;;  %18257 = vst [vmem:[#allocation224_spill] sm:$0xff] %v14941_v59  ;;  %v14979_v33 = vmul.f32 0.0013717421, %v14925_v1  ;;  %v14983_v21 = vmul.f32 %v18264_v40, %v14824_v39  ;;  %v5322_v44 = vpop.f32.mrb[95].mxu1  ;;  %v18267_v60 = vld [vmem:[#allocation93_spill] sm:$0xff]  ;;  %v15007_v40 = vmul.f32 %v14251_v61, %v14894_v38 }
 0x30a   : > { %18258 = vst [vmem:[#allocation225_spill] sm:$0xff] %v14944_v16  ;;  %7905 = vst.msk [vmem:[#allocation2 + $0x420] sm:$0xff] %vm379_vm0, %v5247_v11  ;;  %v8165_v11 = vld [vmem:[#allocation2 + $0x600] sm:$0xff]  ;;  %v14991_v32 = vmul.f32 0.0013717421, %v14938_v57  ;;  %v8087_v39 = vld [vmem:[#allocation2 + $0x390] sm:$0xff] }
 0x30b   : > { %18259 = vst [vmem:[#allocation226_spill] sm:$0xff] %v14951_v2  ;;  %18260 = vst [vmem:[#allocation227_spill] sm:$0xff] %v14954_v23  ;;  %v18333_v38 = vld [vmem:[#allocation154_spill] sm:$0xff] }
 0x30c   : > { %18261 = vst [vmem:[#allocation228_spill] sm:$0xff] %v14957_v50  ;;  %18262 = vst [vmem:[#allocation229_spill] sm:$0xff] %v14962_v51  ;;  %v14999_v51 = vmul.f32 %v14239_v27, %v14891_v29  ;;  %v15016_v29 = vadd.f32 %v14959_v41, %v8312_v43  ;;  %v15037_v43 = vmul.f32 %v14281_v49, %v14921_v31  ;;  %v18282_v31 = vld [vmem:[#allocation75_spill] sm:$0xff] }
 0x30d   : > { %18263 = vst [vmem:[#allocation230_spill] sm:$0xff] %v14976_v10  ;;  %18265 = vst [vmem:[#allocation231_spill] sm:$0xff] %v14983_v21  ;;  %v14995_v10 = vmul.f32 %v18267_v60, %v14784_v35  ;;  %v18270_v21 = vld [vmem:[#allocation80_spill] sm:$0xff]  ;;  %v15011_v35 = vmul.f32 %v14257_v58, %v14902_v34 }
 0x30e   : > { %7908 = vst.msk [vmem:[#allocation2 + $0x438] sm:$0xff] %vm379_vm0, %v11441_v4  ;;  %18266 = vst [vmem:[#allocation232_spill] sm:$0xff] %v14991_v32  ;;  %v8390_v4 = vadd.f32 %v14835_v55, %v8166_v15  ;;  %v8698_v63 = vadd.f32 %v14948_v5, %v18270_v21  ;;  %v15020_v55 = vmul.f32 %v14260_v17, %v14905_v30  ;;  %v15022_v21 = vld [vmem:[#allocation2 + $0x3a8] sm:$0xff] }
 0x30f   : > { %18268 = vst [vmem:[#allocation233_spill] sm:$0xff] %v14995_v10  ;;  %18269 = vst [vmem:[#allocation234_spill] sm:$0xff] %v14999_v51  ;;  %v8318_v10 = vadd.f32 %v14970_v7, %v8086_v9  ;;  %v8389_v51 = vadd.f32 %v14845_v8, %v8165_v11  ;;  %v15025_v15 = vadd.f32 %v14973_v45, %v8311_v13  ;;  %v15039_v11 = vld [vmem:[#allocation2 + $0x3a0] sm:$0xff] }
 0x310   : > { %7907 = vst.msk [vmem:[#allocation2 + $0x430] sm:$0xff] %vm379_vm0, %v5322_v44  ;;  %18271 = vst [vmem:[#allocation80_spill] sm:$0xff] %v15007_v40  ;;  %v11448_v44 = vpop.f32.mrb[96].mxu1  ;;  %v15033_v8 = vmul.f32 %v14275_v37, %v14915_v19  ;;  %v8317_v13 = vadd.f32 %v8087_v39, %v14933_v3  ;;  %v18277_v40 = vld [vmem:[#allocation77_spill] sm:$0xff]  ;;  %v15062_v19 = vmul.f32 %v14928_v6, %v18282_v31 }
 0x311   : > { %18272 = vst [vmem:[#allocation235_spill] sm:$0xff] %v15011_v35  ;;  %18273 = vst [vmem:[#allocation236_spill] sm:$0xff] %v15020_v55  ;;  %v15029_v35 = vmul.f32 %v14263_v56, %v14913_v36  ;;  %v5397_v55 = vpop.f32.mrb[97].mxu1  ;;  %v8697_v30 = vadd.f32 %v14988_v12, %v18277_v40  ;;  %v18284_v40 = vld [vmem:[#allocation83_spill] sm:$0xff]  ;;  %v15087_v31 = vadd.f32 %v14899_v26, %v8390_v4 }
 0x312   : > { %18275 = vst [vmem:[#allocation238_spill] sm:$0xff] %v15033_v8  ;;  %18276 = vst [vmem:[#allocation239_spill] sm:$0xff] %v15037_v43  ;;  %v15051_v8 = vmul.f32 %v14306_v25, %v14925_v1  ;;  %v15054_v43 = vadd.f32 %v8698_v63, %v8086_v9  ;;  %v15075_v9 = vadd.f32 %v8318_v10, %v14908_v62  ;;  %v18324_v36 = vld [vmem:[#allocation135_spill] sm:$0xff] }
 0x313   : > { %18274 = vst [vmem:[#allocation237_spill] sm:$0xff] %v15029_v35  ;;  %7910 = vst.msk [vmem:[#allocation2 + $0x4c8] sm:$0xff] %vm379_vm0, %v11448_v44  ;;  %v15047_v35 = vmul.f32 %v14284_v54, %v14923_v53  ;;  %v15058_v44 = vmul.f32 %v14309_v42, %v14938_v57  ;;  %v15066_v53 = vmul.f32 %v14842_v14, %v18284_v40  ;;  %v15276_v34 = vmul.f32 729.0, %v18324_v36 }
 0x314   : > { %18279 = vst [vmem:[#allocation240_spill] sm:$0xff] %v15051_v8  ;;  %7909 = vst.msk [vmem:[#allocation2 + $0x4c0] sm:$0xff] %vm379_vm0, %v5397_v55  ;;  %v15072_v8 = vadd.f32 %v15022_v21, %v14970_v7  ;;  %v8700_v63 = vadd.f32 %v15016_v29, %v14876_v48  ;;  %v15081_v55 = vmul.f32 %v14931_v52, %v14175_v46  ;;  %v18317_v57 = vld [vmem:[#allocation230_spill] sm:$0xff] }
 0x315   : > { %18278 = vst [vmem:[#allocation77_spill] sm:$0xff] %v15047_v35  ;;  %18280 = vst [vmem:[#allocation241_spill] sm:$0xff] %v15054_v43  ;;  %v15068_v35 = vld [vmem:[#allocation2 + $0x3b8] sm:$0xff]  ;;  %v11455_v43 = vpop.f32.mrb[98].mxu1  ;;  %v15084_v40 = vadd.f32 %v15039_v11, %v8087_v39  ;;  %v15097_v46 = vadd.f32 %v8317_v13, %v14936_v18  ;;  %v15103_v4 = vadd.f32 %v8697_v30, %v14933_v3  ;;  %v18298_v30 = vld [vmem:[#allocation17_spill] sm:$0xff] }
 0x316   : > { %18281 = vst [vmem:[#allocation242_spill] sm:$0xff] %v15058_v44  ;;  %18283 = vst [vmem:[#allocation243_spill] sm:$0xff] %v15062_v19  ;;  %v8699_v44 = vadd.f32 %v15025_v15, %v14882_v22  ;;  %v5472_v48 = vpop.f32.mrb[99].mxu1  ;;  %v8091_v19 = vld [vmem:[#allocation2 + $0x3b0] sm:$0xff]  ;;  %v15124_v3 = vmul.f32 %v14957_v50, %v18298_v30 }
 0x317   : > { %18285 = vst [vmem:[#allocation244_spill] sm:$0xff] %v15066_v53  ;;  %18286 = vst [vmem:[#allocation245_spill] sm:$0xff] %v15081_v55  ;;  %v18288_v53 = vld [vmem:[#allocation13_spill] sm:$0xff]  ;;  %v15100_v55 = vadd.f32 %v14897_v24, %v8389_v51  ;;  %v15144_v30 = vadd.f32 %v15084_v40, %v14973_v45  ;;  %v18308_v45 = vld [vmem:[#allocation18_spill] sm:$0xff] }
 0x318   : > { %18287 = vst [vmem:[#allocation246_spill] sm:$0xff] %v15087_v31  ;;  %v15093_v62 = vmul.f32 %v14941_v59, %v18288_v53  ;;  %7912 = vst.msk [vmem:[#allocation2 + $0x4d8] sm:$0xff] %vm379_vm0, %v11455_v43  ;;  %v18292_v31 = vld [vmem:[#allocation94_spill] sm:$0xff]  ;;  %v15112_v43 = vadd.f32 %v15068_v35, %v15022_v21  ;;  %v18294_v53 = vld [vmem:[#allocation96_spill] sm:$0xff] }
 0x319   : > { %18290 = vst [vmem:[#allocation248_spill] sm:$0xff] %v15100_v55  ;;  %18291 = vst [vmem:[#allocation249_spill] sm:$0xff] %v15103_v4  ;;  %v15107_v22 = vmul.f32 %v14944_v16, %v18292_v31  ;;  %v15116_v18 = vmul.f32 %v14951_v2, %v18294_v53  ;;  %v15128_v4 = vadd.f32 %v15072_v8, %v14959_v41  ;;  %v18301_v53 = vld [vmem:[#allocation15_spill] sm:$0xff]  ;;  %v18314_v24 = vld [vmem:[#allocation86_spill] sm:$0xff] }
 0x31a   : > { %18289 = vst [vmem:[#allocation247_spill] sm:$0xff] %v15093_v62  ;;  %7911 = vst.msk [vmem:[#allocation2 + $0x4d0] sm:$0xff] %vm379_vm0, %v5472_v48  ;;  %v18296_v62 = vld [vmem:[#allocation21_spill] sm:$0xff]  ;;  %v8702_v48 = vadd.f32 %v15075_v9, %v14911_v0  ;;  %v15133_v31 = vadd.f32 %v8700_v63, %v14970_v7  ;;  %v15146_v41 = vadd.f32 %v8699_v44, %v8087_v39  ;;  %v18310_v44 = vld [vmem:[#allocation79_spill] sm:$0xff] }
 0x31b   : > { %18293 = vst [vmem:[#allocation250_spill] sm:$0xff] %v15107_v22  ;;  %18295 = vst [vmem:[#allocation251_spill] sm:$0xff] %v15116_v18  ;;  %v15120_v51 = vmul.f32 %v14954_v23, %v18296_v62  ;;  %v15137_v18 = vmul.f32 %v14965_v28, %v18301_v53  ;;  %v11462_v62 = vpop.f32.mrb[100].mxu1  ;;  %v15140_v22 = vadd.f32 %v8091_v19, %v15039_v11  ;;  %v15153_v63 = vld [vmem:[#allocation2 + $0x3c0] sm:$0xff]  ;;  %v18306_v53 = vld [vmem:[#allocation22_spill] sm:$0xff] }
 0x31c   : > { %18299 = vst [vmem:[#allocation253_spill] sm:$0xff] %v15124_v3  ;;  %18300 = vst [vmem:[#allocation254_spill] sm:$0xff] %v15133_v31  ;;  %v18304_v3 = vld [vmem:[#allocation16_spill] sm:$0xff]  ;;  %v5547_v7 = vpop.f32.mrb[101].mxu1  ;;  %v8701_v31 = vadd.f32 %v15097_v46, %v14919_v20  ;;  %v15163_v39 = vmul.f32 %v14991_v32, %v18308_v45  ;;  %v18313_v55 = vld [vmem:[#allocation195_spill] sm:$0xff]  ;;  %v15200_v26 = vadd.f32 %v15153_v63, %v8091_v19 }
 0x31d   : > { %18297 = vst [vmem:[#allocation252_spill] sm:$0xff] %v15120_v51  ;;  %18302 = vst [vmem:[#allocation255_spill] sm:$0xff] %v15137_v18  ;;  %v8094_v51 = vld [vmem:[#allocation2 + $0x3c8] sm:$0xff]  ;;  %v15150_v0 = vmul.f32 %v14968_v47, %v18304_v3  ;;  %v15159_v18 = vmul.f32 %v14979_v33, %v18306_v53  ;;  %v18315_v53 = vld [vmem:[#allocation229_spill] sm:$0xff]  ;;  %v8703_v1 = vadd.f32 %v15144_v30, %v18317_v57 }
 0x31e   : > { %18303 = vst [vmem:[#allocation256_spill] sm:$0xff] %v15146_v41  ;;  %7914 = vst.msk [vmem:[#allocation2 + $0x4e8] sm:$0xff] %vm379_vm0, %v11462_v62  ;;  %v18311_v41 = vld [vmem:[#allocation199_spill] sm:$0xff]  ;;  %v15171_v62 = vadd.f32 %v15112_v43, %v8318_v10  ;;  %v15186_v45 = vadd.f32 %v8094_v51, %v15068_v35  ;;  %v15191_v10 = vadd.f32 %v8702_v48, %v15022_v21 }
 0x31f   : > { %18305 = vst [vmem:[#allocation257_spill] sm:$0xff] %v15150_v0  ;;  %18307 = vst [vmem:[#allocation258_spill] sm:$0xff] %v15159_v18  ;;  %v15167_v3 = vmul.f32 %v18311_v41, %v18310_v44  ;;  %v18312_v0 = vld [vmem:[#allocation76_spill] sm:$0xff]  ;;  %v15179_v18 = vmul.f32 %v14928_v6, %v18314_v24  ;;  %v11469_v44 = vpop.f32.mrb[102].mxu1  ;;  %v15213_v48 = vadd.f32 %v8701_v31, %v15039_v11 }
 0x320   : > { %18309 = vst [vmem:[#allocation259_spill] sm:$0xff] %v15163_v39  ;;  %7913 = vst.msk [vmem:[#allocation2 + $0x4e0] sm:$0xff] %vm379_vm0, %v5547_v7  ;;  %v15175_v20 = vmul.f32 %v18313_v55, %v18312_v0  ;;  %v15183_v39 = vmul.f32 %v14842_v14, %v18267_v60  ;;  %v8704_v7 = vadd.f32 %v15128_v4, %v18315_v53  ;;  %v15197_v24 = vld [vmem:[#allocation2 + $0x3d8] sm:$0xff]  ;;  %v5622_v21 = vpop.f32.mrb[103].mxu1 }
 0x321   : > { %18316 = vst [vmem:[#allocation229_spill] sm:$0xff] %v15191_v10  ;;  %v15195_v0 = vmul.f32 %v14931_v52, %v14239_v27  ;;  %v15203_v60 = vadd.f32 %v15140_v22, %v8317_v13  ;;  %v15209_v53 = vmul.f32 %v14941_v59, %v14251_v61  ;;  %7916 = vst.msk [vmem:[#allocation2 + $0x4f8] sm:$0xff] %vm379_vm0, %v11469_v44  ;;  %v8095_v61 = vld [vmem:[#allocation2 + $0x3d0] sm:$0xff]  ;;  %v18322_v27 = vld [vmem:[#allocation125_spill] sm:$0xff] }
 0x322   : > { %18318 = vst [vmem:[#allocation230_spill] sm:$0xff] %v15213_v48  ;;  %v15217_v10 = vmul.f32 %v14944_v16, %v14257_v58  ;;  %v15221_v13 = vmul.f32 %v14951_v2, %v14260_v17  ;;  %v15225_v57 = vmul.f32 %v14954_v23, %v14263_v56  ;;  %7915 = vst.msk [vmem:[#allocation2 + $0x4f0] sm:$0xff] %vm379_vm0, %v5622_v21 }
 0x323   : > { %v8706_v44 = vadd.f32 %v15171_v62, %v14948_v5  ;;  %v15232_v31 = vmul.f32 %v14957_v50, %v14275_v37  ;;  %v15236_v11 = vmul.f32 %v14965_v28, %v14281_v49  ;;  %v15240_v48 = vmul.f32 %v14968_v47, %v14284_v54  ;;  %v11476_v49 = vpop.f32.mrb[104].mxu1  ;;  %18325 = vst [vmem:[#allocation135_spill] sm:$0xff] %v15276_v34 }
 0x324   : > { %v15243_v56 = vadd.f32 %v15197_v24, %v8094_v51  ;;  %v15247_v21 = vadd.f32 %v15186_v45, %v15072_v8  ;;  %v15250_v5 = vadd.f32 %v8704_v7, %v15068_v35  ;;  %v15254_v37 = vmul.f32 %v14979_v33, %v14306_v25  ;;  %7918 = vst.msk [vmem:[#allocation2 + $0x508] sm:$0xff] %vm379_vm0, %v11476_v49  ;;  %v5697_v35 = vpop.f32.mrb[105].mxu1  ;;  %v15269_v7 = vld [vmem:[#allocation2 + $0x3e0] sm:$0xff]  ;;  %v18329_v49 = vld [vmem:[#allocation143_spill] sm:$0xff] }
 0x325   : > { %v15258_v17 = vadd.f32 %v15200_v26, %v15084_v40  ;;  %v8705_v54 = vadd.f32 %v15203_v60, %v14988_v12  ;;  %v15262_v58 = vadd.f32 %v8703_v1, %v8091_v19  ;;  %v15266_v8 = vmul.f32 %v14991_v32, %v14309_v42  ;;  %v18326_v12 = vld [vmem:[#allocation140_spill] sm:$0xff]  ;;  %7917 = vst.msk [vmem:[#allocation2 + $0x500] sm:$0xff] %vm379_vm0, %v5697_v35 }
 0x326   : > { %18319 = vst [vmem:[#allocation260_spill] sm:$0xff] %v15250_v5  ;;  %v8098_v5 = vld [vmem:[#allocation2 + $0x3e8] sm:$0xff]  ;;  %v8325_v25 = vadd.f32 %v8095_v61, %v15153_v63  ;;  %v15273_v40 = vmul.f32 729.0, %v18322_v27  ;;  %v15279_v19 = vmul.f32 729.0, %v18326_v12  ;;  %v15282_v1 = vadd.f32 %v8706_v44, %v8094_v51  ;;  %v15293_v27 = vld [vmem:[#allocation2 + $0x3f8] sm:$0xff]  ;;  %v18335_v51 = vld [vmem:[#allocation161_spill] sm:$0xff] }
 0x327   : > { %18320 = vst [vmem:[#allocation261_spill] sm:$0xff] %v15262_v58  ;;  %18321 = vst [vmem:[#allocation262_spill] sm:$0xff] %v15266_v8  ;;  %v15285_v8 = vmul.f32 729.0, %v18329_v49  ;;  %v18331_v58 = vld [vmem:[#allocation148_spill] sm:$0xff]  ;;  %v15291_v32 = vmul.f32 729.0, %v18333_v38  ;;  %v15297_v36 = vadd.f32 %v15243_v56, %v15112_v43  ;;  %v8708_v35 = vadd.f32 %v15247_v21, %v15016_v29 }
 0x328   : > { %18323 = vst [vmem:[#allocation125_spill] sm:$0xff] %v15273_v40  ;;  %18327 = vst [vmem:[#allocation140_spill] sm:$0xff] %v15279_v19  ;;  %v15288_v42 = vmul.f32 729.0, %v18331_v58  ;;  %v15302_v44 = vmul.f32 729.0, %v18335_v51  ;;  %v18337_v12 = vld [vmem:[#allocation164_spill] sm:$0xff]  ;;  %v11483_v58 = vpop.f32.mrb[106].mxu1  ;;  %v8328_v38 = vadd.f32 %v8098_v5, %v15197_v24  ;;  %v15312_v43 = vadd.f32 %v8705_v54, %v15153_v63 }
 0x329   : > { %18328 = vst [vmem:[#allocation263_spill] sm:$0xff] %v15282_v1  ;;  %18330 = vst [vmem:[#allocation143_spill] sm:$0xff] %v15285_v8  ;;  %v15305_v49 = vmul.f32 729.0, %v18337_v12  ;;  %v8327_v1 = vadd.f32 %v15269_v7, %v8095_v61  ;;  %v5772_v29 = vpop.f32.mrb[107].mxu1  ;;  %v15316_v51 = vadd.f32 %v8325_v25, %v15140_v22  ;;  %v18340_v12 = vld [vmem:[#allocation173_spill] sm:$0xff]  ;;  %v18344_v8 = vld [vmem:[#allocation182_spill] sm:$0xff]  ;;  %v15329_v54 = vadd.f32 %v15293_v27, %v8098_v5 }
 0x32a   : > { %18332 = vst [vmem:[#allocation148_spill] sm:$0xff] %v15288_v42  ;;  %18334 = vst [vmem:[#allocation154_spill] sm:$0xff] %v15291_v32  ;;  %v8707_v32 = vadd.f32 %v15258_v17, %v15025_v15  ;;  %v8099_v42 = vld [vmem:[#allocation2 + $0x3f0] sm:$0xff]  ;;  %v15325_v40 = vmul.f32 729.0, %v18344_v8  ;;  %v18346_v15 = vld [vmem:[#allocation186_spill] sm:$0xff]  ;;  %v15343_v8 = vadd.f32 %v8708_v35, %v15197_v24 }
 0x32b   : > { %18336 = vst [vmem:[#allocation161_spill] sm:$0xff] %v15302_v44  ;;  %18338 = vst [vmem:[#allocation164_spill] sm:$0xff] %v15305_v49  ;;  %v15319_v44 = vmul.f32 729.0, %v18340_v12  ;;  %v18342_v49 = vld [vmem:[#allocation175_spill] sm:$0xff]  ;;  %v15332_v63 = vmul.f32 729.0, %v18346_v15  ;;  %v11490_v15 = vpop.f32.mrb[108].mxu1 }
 0x32c   : > { %18339 = vst [vmem:[#allocation264_spill] sm:$0xff] %v15312_v43  ;;  %7920 = vst.msk [vmem:[#allocation2 + $0x518] sm:$0xff] %vm379_vm0, %v11483_v58  ;;  %v15322_v19 = vmul.f32 729.0, %v18342_v49  ;;  %v18348_v58 = vld [vmem:[#allocation193_spill] sm:$0xff]  ;;  %v18350_v43 = vld [vmem:[#allocation194_spill] sm:$0xff]  ;;  %v8710_v49 = vadd.f32 %v15297_v36, %v15075_v9  ;;  %v15360_v9 = vadd.f32 %v8707_v32, %v8095_v61  ;;  %v5847_v24 = vpop.f32.mrb[109].mxu1  ;;  %v15380_v32 = vadd.f32 %v15329_v54, %v15243_v56 }
 0x32d   : > { %18341 = vst [vmem:[#allocation173_spill] sm:$0xff] %v15319_v44  ;;  %18345 = vst [vmem:[#allocation182_spill] sm:$0xff] %v15325_v40  ;;  %v15335_v22 = vmul.f32 729.0, %v18348_v58  ;;  %v15338_v12 = vmul.f32 729.0, %v18350_v43  ;;  %v8102_v44 = vld [vmem:[#allocation2 + $0x408] sm:$0xff]  ;;  %v8329_v58 = vadd.f32 %v8099_v42, %v15269_v7  ;;  %v15355_v43 = vadd.f32 %v8327_v1, %v15200_v26  ;;  %v18358_v35 = vld [vmem:[#allocation207_spill] sm:$0xff] }
 0x32e   : > { %18343 = vst [vmem:[#allocation175_spill] sm:$0xff] %v15322_v19  ;;  %7919 = vst.msk [vmem:[#allocation2 + $0x510] sm:$0xff] %vm379_vm0, %v5772_v29  ;;  %v18353_v29 = vld [vmem:[#allocation200_spill] sm:$0xff]  ;;  %v18355_v19 = vld [vmem:[#allocation203_spill] sm:$0xff]  ;;  %v15372_v26 = vmul.f32 729.0, %v15167_v3  ;;  %v15376_v61 = vadd.f32 %v8102_v44, %v15293_v27  ;;  %v15391_v3 = vadd.f32 %v8710_v49, %v8098_v5  ;;  %v15408_v5 = vmul.f32 729.0, %v15209_v53 }
 0x32f   : > { %18347 = vst [vmem:[#allocation186_spill] sm:$0xff] %v15332_v63  ;;  %18349 = vst [vmem:[#allocation193_spill] sm:$0xff] %v15335_v22  ;;  %v15346_v40 = vmul.f32 729.0, %v18353_v29  ;;  %v15349_v34 = vmul.f32 729.0, %v18355_v19  ;;  %v15351_v63 = vld [vmem:[#allocation2 + $0x400] sm:$0xff]  ;;  %v15358_v22 = vadd.f32 %v8328_v38, %v15186_v45  ;;  %v8709_v19 = vadd.f32 %v15316_v51, %v15097_v46  ;;  %v15399_v56 = vld [vmem:[#allocation2 + $0x410] sm:$0xff] }
 0x330   : > { %18351 = vst [vmem:[#allocation194_spill] sm:$0xff] %v15338_v12  ;;  %18352 = vst [vmem:[#allocation265_spill] sm:$0xff] %v15343_v8  ;;  %v15366_v29 = vmul.f32 729.0, %v18358_v35  ;;  %v18360_v8 = vld [vmem:[#allocation210_spill] sm:$0xff]  ;;  %v15383_v46 = vmul.f32 729.0, %v15175_v20  ;;  %v15386_v45 = vmul.f32 729.0, %v15179_v18  ;;  %v15401_v20 = vadd.f32 %v8329_v58, %v8325_v25 }
 0x331   : > { %18354 = vst [vmem:[#allocation200_spill] sm:$0xff] %v15346_v40  ;;  %18356 = vst [vmem:[#allocation203_spill] sm:$0xff] %v15349_v34  ;;  %v15369_v40 = vmul.f32 729.0, %v18360_v8  ;;  %v15389_v8 = vadd.f32 %v15351_v63, %v8099_v42  ;;  %v11497_v35 = vpop.f32.mrb[110].mxu1  ;;  %v8711_v18 = vadd.f32 %v15355_v43, %v15144_v30  ;;  %v15415_v49 = vmul.f32 729.0, %v15217_v10  ;;  %v18393_v34 = vld [vmem:[#allocation172_spill] sm:$0xff] }
 0x332   : > { %18357 = vst [vmem:[#allocation266_spill] sm:$0xff] %v15360_v9  ;;  %7922 = vst.msk [vmem:[#allocation2 + $0x528] sm:$0xff] %vm379_vm0, %v11490_v15  ;;  %v15394_v15 = vmul.f32 729.0, %v15183_v39  ;;  %v8104_v9 = vld [vmem:[#allocation2 + $0x418] sm:$0xff]  ;;  %v5922_v39 = vpop.f32.mrb[111].mxu1  ;;  %v15418_v25 = vmul.f32 729.0, %v15221_v13  ;;  %v8714_v53 = vadd.f32 %v15380_v32, %v15171_v62  ;;  %v15437_v13 = vadd.f32 %v15399_v56, %v15351_v63 }
 0x333   : > { %18359 = vst [vmem:[#allocation207_spill] sm:$0xff] %v15366_v29  ;;  %18361 = vst [vmem:[#allocation210_spill] sm:$0xff] %v15369_v40  ;;  %v15421_v30 = vmul.f32 729.0, %v15225_v57  ;;  %v15433_v10 = vmul.f32 729.0, %v15236_v11  ;;  %v15439_v57 = vadd.f32 %v8104_v9, %v8102_v44  ;;  %v8713_v62 = vadd.f32 %v15401_v20, %v15203_v60  ;;  %v18391_v29 = vld [vmem:[#allocation162_spill] sm:$0xff] }
 0x334   : > { %18362 = vst [vmem:[#allocation267_spill] sm:$0xff] %v15372_v26  ;;  %7921 = vst.msk [vmem:[#allocation2 + $0x520] sm:$0xff] %vm379_vm0, %v5847_v24  ;;  %v15397_v24 = vmul.f32 729.0, %v15195_v0  ;;  %v15412_v0 = vadd.f32 %v8709_v19, %v15269_v7  ;;  %v15430_v7 = vmul.f32 729.0, %v15232_v31  ;;  %v15442_v19 = vadd.f32 %v15389_v8, %v8327_v1  ;;  %v18379_v1 = vld [vmem:[#allocation112_spill] sm:$0xff] }
 0x335   : > { %18363 = vst [vmem:[#allocation268_spill] sm:$0xff] %v15383_v46  ;;  %18364 = vst [vmem:[#allocation269_spill] sm:$0xff] %v15386_v45  ;;  %v8712_v45 = vadd.f32 %v15358_v22, %v15128_v4  ;;  %v15425_v4 = vadd.f32 %v15376_v61, %v8328_v38  ;;  %v15445_v38 = vmul.f32 729.0, %v15240_v48  ;;  %v15449_v31 = vadd.f32 %v8711_v18, %v8099_v42  ;;  %v18380_v48 = vld [vmem:[#allocation113_spill] sm:$0xff]  ;;  %v18382_v42 = vld [vmem:[#allocation119_spill] sm:$0xff] }
 0x336   : > { %18365 = vst [vmem:[#allocation270_spill] sm:$0xff] %v15391_v3  ;;  %18366 = vst [vmem:[#allocation271_spill] sm:$0xff] %v15394_v15  ;;  %v15468_v60 = vmul.f32 2.0, %v18382_v42  ;;  %v18384_v18 = vld [vmem:[#allocation129_spill] sm:$0xff]  ;;  %v15482_v3 = vadd.f32 %v15437_v13, %v8329_v58  ;;  %v18390_v15 = vld [vmem:[#allocation150_spill] sm:$0xff]  ;;  %v15517_v12 = vmul.f32 2.0, %v18393_v34 }
 0x337   : > { %18367 = vst [vmem:[#allocation272_spill] sm:$0xff] %v15397_v24  ;;  %18368 = vst [vmem:[#allocation273_spill] sm:$0xff] %v15408_v5  ;;  %v15452_v11 = vadd.f32 %v8712_v45, %v15293_v27  ;;  %v8106_v27 = vld [vmem:[#allocation2 + $0x428] sm:$0xff]  ;;  %v15473_v45 = vadd.f32 %v8714_v53, %v8102_v44  ;;  %v18389_v24 = vld [vmem:[#allocation153_spill] sm:$0xff]  ;;  %v15503_v46 = vmul.f32 2.0, %v18390_v15 }
 0x338   : > { %7924 = vst.msk [vmem:[#allocation2 + $0x538] sm:$0xff] %vm379_vm0, %v11497_v35  ;;  %18369 = vst [vmem:[#allocation274_spill] sm:$0xff] %v15412_v0  ;;  %v11504_v35 = vpop.f32.mrb[112].mxu1  ;;  %v15486_v0 = vadd.f32 %v15439_v57, %v15329_v54  ;;  %v15500_v58 = vmul.f32 2.0, %v18389_v24  ;;  %v15508_v26 = vld [vmem:[#allocation2 + $0x438] sm:$0xff]  ;;  %v8336_v40 = vadd.f32 %v8106_v27, %v8104_v9 }
 0x339   : > { %18370 = vst [vmem:[#allocation275_spill] sm:$0xff] %v15415_v49  ;;  %18371 = vst [vmem:[#allocation276_spill] sm:$0xff] %v15418_v25  ;;  %v18388_v49 = vld [vmem:[#allocation138_spill] sm:$0xff]  ;;  %v18395_v24 = vld [vmem:[#allocation168_spill] sm:$0xff] }
 0x33a   : > { %18372 = vst [vmem:[#allocation277_spill] sm:$0xff] %v15421_v30  ;;  %7923 = vst.msk [vmem:[#allocation2 + $0x530] sm:$0xff] %vm379_vm0, %v5922_v39  ;;  %v15455_v39 = vmul.f32 729.0, %v15254_v37  ;;  %v18381_v30 = vld [vmem:[#allocation121_spill] sm:$0xff]  ;;  %v8716_v37 = vadd.f32 %v15425_v4, %v15247_v21  ;;  %v18386_v21 = vld [vmem:[#allocation142_spill] sm:$0xff]  ;;  %v15497_v5 = vmul.f32 2.0, %v18388_v49 }
 0x33b   : > { %18373 = vst [vmem:[#allocation278_spill] sm:$0xff] %v15430_v7  ;;  %18374 = vst [vmem:[#allocation279_spill] sm:$0xff] %v15433_v10  ;;  %v5997_v10 = vpop.f32.mrb[113].mxu1  ;;  %v15459_v7 = vmul.f32 2.0, %v18379_v1  ;;  %v15465_v25 = vmul.f32 2.0, %v18381_v30  ;;  %v15491_v44 = vmul.f32 2.0, %v18386_v21 }
 0x33c   : > { %18375 = vst [vmem:[#allocation280_spill] sm:$0xff] %v15445_v38  ;;  %18376 = vst [vmem:[#allocation281_spill] sm:$0xff] %v15449_v31  ;;  %v15462_v38 = vmul.f32 2.0, %v18380_v48  ;;  %v8105_v31 = vld [vmem:[#allocation2 + $0x420] sm:$0xff]  ;;  %v11511_v53 = vpop.f32.mrb[114].mxu1  ;;  %v15524_v49 = vmul.f32 2.0, %v18395_v24 }
 0x33d   : > { %18377 = vst [vmem:[#allocation282_spill] sm:$0xff] %v15452_v11  ;;  %18378 = vst [vmem:[#allocation283_spill] sm:$0xff] %v15455_v39  ;;  %v18385_v39 = vld [vmem:[#allocation126_spill] sm:$0xff]  ;;  %v6072_v54 = vpop.f32.mrb[115].mxu1  ;;  %v8335_v15 = vadd.f32 %v8105_v31, %v15399_v56  ;;  %v18396_v21 = vld [vmem:[#allocation179_spill] sm:$0xff]  ;;  %v15568_v48 = vmul.f32 2.0, %v14928_v6 }
 0x33e   : > { %7926 = vst.msk [vmem:[#allocation2 + $0x548] sm:$0xff] %vm379_vm0, %v11504_v35  ;;  %7925 = vst.msk [vmem:[#allocation2 + $0x540] sm:$0xff] %vm379_vm0, %v5997_v10  ;;  %v15476_v35 = vmul.f32 2.0, %v18384_v18  ;;  %v15479_v11 = vmul.f32 2.0, %v18385_v39  ;;  %v8715_v10 = vadd.f32 %v15442_v19, %v15258_v17  ;;  %v15506_v17 = vld [vmem:[#allocation2 + $0x430] sm:$0xff]  ;;  %v15527_v39 = vmul.f32 2.0, %v18396_v21 }
 0x33f   : > { %18383 = vst [vmem:[#allocation284_spill] sm:$0xff] %v15473_v45  ;;  %v15494_v45 = vadd.f32 %v8713_v62, %v15351_v63  ;;  %7928 = vst.msk [vmem:[#allocation2 + $0x558] sm:$0xff] %vm379_vm0, %v11511_v53  ;;  %v15511_v63 = vmul.f32 2.0, %v18391_v29  ;;  %v18392_v62 = vld [vmem:[#allocation158_spill] sm:$0xff]  ;;  %v15521_v53 = vadd.f32 %v8716_v37, %v8104_v9  ;;  %v8717_v29 = vadd.f32 %v15482_v3, %v15316_v51  ;;  %v11518_v9 = vpop.f32.mrb[116].mxu1  ;;  %v18400_v24 = vld [vmem:[#allocation189_spill] sm:$0xff] }
 0x340   : > { %7927 = vst.msk [vmem:[#allocation2 + $0x550] sm:$0xff] %vm379_vm0, %v6072_v54  ;;  %v15534_v34 = vadd.f32 %v8715_v10, %v15399_v56  ;;  %v18398_v54 = vld [vmem:[#allocation177_spill] sm:$0xff]  ;;  %v8337_v37 = vadd.f32 %v15506_v17, %v8105_v31  ;;  %v15542_v21 = vmul.f32 2.0, %v18400_v24  ;;  %v18402_v42 = vld [vmem:[#allocation184_spill] sm:$0xff]  ;;  %7930 = vst.msk [vmem:[#allocation2 + $0x568] sm:$0xff] %vm379_vm0, %v11518_v9  ;;  %v15560_v24 = vmul.f32 2.0, %v18311_v41 }
 0x341   : > { %18387 = vst [vmem:[#allocation285_spill] sm:$0xff] %v15494_v45  ;;  %v15514_v45 = vmul.f32 2.0, %v18392_v62  ;;  %18394 = vst [vmem:[#allocation286_spill] sm:$0xff] %v15521_v53  ;;  %v8718_v62 = vadd.f32 %v15486_v0, %v15297_v36  ;;  %v15537_v18 = vmul.f32 2.0, %v18398_v54  ;;  %v8338_v53 = vadd.f32 %v15508_v26, %v8106_v27  ;;  %v6147_v36 = vpop.f32.mrb[117].mxu1  ;;  %v15548_v51 = vld [vmem:[#allocation2 + $0x440] sm:$0xff] }
 0x342   : > { %18397 = vst [vmem:[#allocation287_spill] sm:$0xff] %v15534_v34  ;;  %18401 = vst [vmem:[#allocation289_spill] sm:$0xff] %v15542_v21  ;;  %v15545_v30 = vmul.f32 2.0, %v18402_v42  ;;  %v8339_v56 = vadd.f32 %v15548_v51, %v15506_v17  ;;  %v15552_v10 = vld [vmem:[#allocation2 + $0x448] sm:$0xff]  ;;  %v15557_v54 = vadd.f32 %v8336_v40, %v15376_v61  ;;  %v8543_v9 = vadd.f32 %v8335_v15, %v15389_v8 }
 0x343   : > { %18399 = vst [vmem:[#allocation288_spill] sm:$0xff] %v15537_v18  ;;  %v8340_v34 = vadd.f32 %v15552_v10, %v15508_v26  ;;  %18404 = vst [vmem:[#allocation291_spill] sm:$0xff] %v15560_v24  ;;  %v15565_v42 = vmul.f32 2.0, %v18313_v55  ;;  %v15571_v1 = vmul.f32 2.0, %v14842_v14  ;;  %v15575_v61 = vadd.f32 %v8718_v62, %v8106_v27  ;;  %v8126_v8 = vld [vmem:[#allocation2 + $0x4c8] sm:$0xff]  ;;  %v8125_v24 = vld [vmem:[#allocation2 + $0x4c0] sm:$0xff] }
 0x344   : > { %18403 = vst [vmem:[#allocation290_spill] sm:$0xff] %v15545_v30  ;;  %7929 = vst.msk [vmem:[#allocation2 + $0x560] sm:$0xff] %vm379_vm0, %v6147_v36  ;;  %v15573_v30 = vadd.f32 %v8717_v29, %v8105_v31  ;;  %v15578_v41 = vmul.f32 2.0, %v14931_v52  ;;  %v15581_v36 = vmul.f32 2.0, %v14941_v59  ;;  %v11525_v55 = vpop.f32.mrb[118].mxu1  ;;  %v8545_v6 = vadd.f32 %v8337_v37, %v15437_v13  ;;  %v8206_v27 = vld [vmem:[#allocation2 + $0x748] sm:$0xff] }
 0x345   : > { %18405 = vst [vmem:[#allocation292_spill] sm:$0xff] %v15565_v42  ;;  %18406 = vst [vmem:[#allocation293_spill] sm:$0xff] %v15568_v48  ;;  %v8205_v42 = vld [vmem:[#allocation2 + $0x740] sm:$0xff]  ;;  %v8546_v48 = vadd.f32 %v8338_v53, %v15439_v57  ;;  %v15586_v14 = vmul.f32 2.0, %v14944_v16  ;;  %v15589_v29 = vmul.f32 2.0, %v14951_v2  ;;  %v6222_v31 = vpop.f32.mrb[119].mxu1  ;;  %v8548_v59 = vadd.f32 %v8340_v34, %v8336_v40 }
 0x346   : > { %18407 = vst [vmem:[#allocation294_spill] sm:$0xff] %v15571_v1  ;;  %18408 = vst [vmem:[#allocation295_spill] sm:$0xff] %v15573_v30  ;;  %v8207_v62 = vld [vmem:[#allocation2 + $0x750] sm:$0xff]  ;;  %v8547_v30 = vadd.f32 %v8339_v56, %v8335_v15  ;;  %v8720_v13 = vadd.f32 %v15557_v54, %v15358_v22  ;;  %v8128_v57 = vld [vmem:[#allocation2 + $0x4d8] sm:$0xff] }
 0x347   : > { %18409 = vst [vmem:[#allocation296_spill] sm:$0xff] %v15575_v61  ;;  %18410 = vst [vmem:[#allocation297_spill] sm:$0xff] %v15578_v41  ;;  %v8208_v61 = vld [vmem:[#allocation2 + $0x758] sm:$0xff]  ;;  %v18414_v52 = vld [vmem:[#allocation87_spill] sm:$0xff]  ;;  %v15600_v41 = vmul.f32 2.0, %v14954_v23  ;;  %v15616_v23 = vadd.f32 %v8128_v57, %v8126_v8 }
 0x348   : > { %18411 = vst [vmem:[#allocation298_spill] sm:$0xff] %v15581_v36  ;;  %18412 = vst [vmem:[#allocation299_spill] sm:$0xff] %v15586_v14  ;;  %v8549_v36 = vadd.f32 %v18414_v52, %v8337_v37  ;;  %v18415_v16 = vld [vmem:[#allocation85_spill] sm:$0xff]  ;;  %v18416_v2 = vld [vmem:[#allocation88_spill] sm:$0xff] }
 0x349   : > { %18413 = vst [vmem:[#allocation300_spill] sm:$0xff] %v15589_v29  ;;  %7932 = vst.msk [vmem:[#allocation2 + $0x578] sm:$0xff] %vm379_vm0, %v11525_v55  ;;  %v8550_v14 = vadd.f32 %v18415_v16, %v8338_v53  ;;  %v8551_v29 = vadd.f32 %v18416_v2, %v8339_v56  ;;  %v8719_v55 = vadd.f32 %v8543_v9, %v15355_v43  ;;  %v12114_v1 = vld [vmem:[#allocation2 + $0x4b0] sm:$0xff]  ;;  %v8209_v52 = vld [vmem:[#allocation2 + $0x760] sm:$0xff]  ;;  %v11532_v16 = vpop.f32.mrb[120].mxu1 }
 0x34a   : > { %7931 = vst.msk [vmem:[#allocation2 + $0x570] sm:$0xff] %vm379_vm0, %v6222_v31  ;;  %v15602_v15 = vadd.f32 %v12114_v1, %v8125_v24  ;;  %v8127_v40 = vld [vmem:[#allocation2 + $0x4d0] sm:$0xff]  ;;  %v12115_v37 = vld [vmem:[#allocation2 + $0x4b8] sm:$0xff]  ;;  %v18417_v22 = vld [vmem:[#allocation89_spill] sm:$0xff]  ;;  %v15608_v31 = vmul.f32 2.0, %v14957_v50  ;;  %v15610_v53 = vadd.f32 %v8207_v62, %v8205_v42  ;;  %v15612_v43 = vadd.f32 %v8208_v61, %v8206_v27 }
 0x34b   : > { %v15604_v21 = vadd.f32 %v12115_v37, %v8126_v8  ;;  %v8552_v18 = vadd.f32 %v18417_v22, %v8340_v34  ;;  %v8210_v2 = vld [vmem:[#allocation2 + $0x768] sm:$0xff]  ;;  %v8721_v56 = vadd.f32 %v8545_v6, %v15401_v20  ;;  %v8722_v1 = vadd.f32 %v8546_v48, %v15380_v32  ;;  %7934 = vst.msk [vmem:[#allocation2 + $0x588] sm:$0xff] %vm379_vm0, %v11532_v16  ;;  %v6297_v37 = vpop.f32.mrb[121].mxu1  ;;  %v8115_v8 = vld [vmem:[#allocation2 + $0x470] sm:$0xff] }
 0x34c   : > { %18418 = vst [vmem:[#allocation87_spill] sm:$0xff] %v15608_v31  ;;  %18419 = vst [vmem:[#allocation85_spill] sm:$0xff] %v15610_v53  ;;  %v8723_v34 = vadd.f32 %v8547_v30, %v15442_v19  ;;  %v8724_v22 = vadd.f32 %v8548_v59, %v15425_v4  ;;  %v8725_v50 = vadd.f32 %v8549_v36, %v15482_v3  ;;  %v18422_v20 = vld [vmem:[#allocation90_spill] sm:$0xff]  ;;  %v18424_v59 = vld [vmem:[#allocation92_spill] sm:$0xff]  ;;  %v11539_v19 = vpop.f32.mrb[122].mxu1 }
 0x34d   : > { %18420 = vst [vmem:[#allocation88_spill] sm:$0xff] %v15612_v43  ;;  %v15622_v31 = vadd.f32 %v8127_v40, %v8125_v24  ;;  %7933 = vst.msk [vmem:[#allocation2 + $0x580] sm:$0xff] %vm379_vm0, %v6297_v37  ;;  %v15625_v42 = vadd.f32 %v8209_v52, %v8207_v62  ;;  %v8726_v6 = vadd.f32 %v8550_v14, %v15486_v0  ;;  %v8130_v27 = vld [vmem:[#allocation2 + $0x4e8] sm:$0xff]  ;;  %v8129_v4 = vld [vmem:[#allocation2 + $0x4e0] sm:$0xff] }
 0x34e   : > { %v8727_v32 = vadd.f32 %v8551_v29, %v8543_v9  ;;  %v15630_v48 = vadd.f32 %v15602_v15, %v18422_v20  ;;  %v15632_v30 = vadd.f32 %v8210_v2, %v8208_v61  ;;  %v15636_v3 = vadd.f32 %v15604_v21, %v18424_v59  ;;  %v8116_v36 = vld [vmem:[#allocation2 + $0x478] sm:$0xff]  ;;  %7936 = vst.msk [vmem:[#allocation2 + $0x598] sm:$0xff] %vm379_vm0, %v11539_v19  ;;  %v6372_v29 = vpop.f32.mrb[123].mxu1  ;;  %v8131_v62 = vld [vmem:[#allocation2 + $0x4f0] sm:$0xff]  ;;  %v15671_v59 = vld [vmem:[#allocation2 + $0x508] sm:$0xff] }
 0x34f   : > { %18421 = vst [vmem:[#allocation89_spill] sm:$0xff] %v15625_v42  ;;  %v8728_v24 = vadd.f32 %v8552_v18, %v15557_v54  ;;  %v15640_v14 = vadd.f32 %v8719_v55, %v15506_v17  ;;  %v15643_v0 = vadd.f32 %v8720_v13, %v15508_v26  ;;  %v15646_v9 = vadd.f32 %v15548_v51, %v8721_v56  ;;  %v8132_v18 = vld [vmem:[#allocation2 + $0x4f8] sm:$0xff]  ;;  %v12116_v17 = vld [vmem:[#allocation2 + $0x450] sm:$0xff]  ;;  %v12118_v51 = vld [vmem:[#allocation2 + $0x460] sm:$0xff] }
 0x350   : > { %18423 = vst [vmem:[#allocation90_spill] sm:$0xff] %v15632_v30  ;;  %v15649_v61 = vadd.f32 %v15552_v10, %v8722_v1  ;;  %v18429_v54 = vld [vmem:[#allocation20_spill] sm:$0xff]  ;;  %v15656_v55 = vadd.f32 %v12116_v17, %v8723_v34  ;;  %v15660_v16 = vadd.f32 %v12118_v51, %v8725_v50  ;;  %v18433_v10 = vld [vmem:[#allocation91_spill] sm:$0xff]  ;;  %7935 = vst.msk [vmem:[#allocation2 + $0x590] sm:$0xff] %vm379_vm0, %v6372_v29  ;;  %v15676_v50 = vmul.f32 2.0, %v14965_v28  ;;  %v11546_v29 = vpop.f32.mrb[124].mxu1 }
 0x351   : > { %18425 = vst [vmem:[#allocation92_spill] sm:$0xff] %v15640_v14  ;;  %18426 = vst [vmem:[#allocation301_spill] sm:$0xff] %v15643_v0  ;;  %v15654_v52 = vadd.f32 %v15616_v23, %v18429_v54  ;;  %v12117_v26 = vld [vmem:[#allocation2 + $0x458] sm:$0xff]  ;;  %v15664_v2 = vadd.f32 %v15622_v31, %v18433_v10  ;;  %v8356_v56 = vadd.f32 %v8130_v27, %v8128_v57  ;;  %v12119_v1 = vld [vmem:[#allocation2 + $0x468] sm:$0xff]  ;;  %v15679_v19 = vmul.f32 2.0, %v14968_v47 }
 0x352   : > { %18427 = vst [vmem:[#allocation302_spill] sm:$0xff] %v15646_v9  ;;  %18428 = vst [vmem:[#allocation303_spill] sm:$0xff] %v15649_v61  ;;  %v15658_v13 = vadd.f32 %v12117_v26, %v8724_v22  ;;  %v15667_v37 = vadd.f32 %v12119_v1, %v8726_v6  ;;  %v15669_v20 = vadd.f32 %v8727_v32, %v8115_v8  ;;  %v15681_v54 = vld [vmem:[#allocation2 + $0x500] sm:$0xff]  ;;  %v15684_v6 = vmul.f32 2.0, %v14979_v33  ;;  %v18437_v32 = vld [vmem:[#allocation232_spill] sm:$0xff]  ;;  %v6447_v8 = vpop.f32.mrb[125].mxu1 }
 0x353   : > { %18430 = vst [vmem:[#allocation20_spill] sm:$0xff] %v15656_v55  ;;  %18432 = vst [vmem:[#allocation305_spill] sm:$0xff] %v15660_v16  ;;  %v8355_v34 = vadd.f32 %v8129_v4, %v8127_v40  ;;  %v15673_v22 = vadd.f32 %v8728_v24, %v8116_v36  ;;  %v8357_v57 = vadd.f32 %v8131_v62, %v8129_v4  ;;  %v15687_v40 = vmul.f32 2.0, %v18437_v32  ;;  %v18438_v24 = vld [vmem:[#allocation102_spill] sm:$0xff]  ;;  %v18440_v26 = vld [vmem:[#allocation103_spill] sm:$0xff] }
 0x354   : > { %18431 = vst [vmem:[#allocation304_spill] sm:$0xff] %v15658_v13  ;;  %18434 = vst [vmem:[#allocation91_spill] sm:$0xff] %v15667_v37  ;;  %v8358_v17 = vadd.f32 %v8132_v18, %v8130_v27  ;;  %v15692_v36 = vmul.f32 %v15459_v7, %v18438_v24  ;;  %v15696_v51 = vmul.f32 %v15462_v38, %v18440_v26  ;;  %v18442_v10 = vld [vmem:[#allocation109_spill] sm:$0xff]  ;;  %v18444_v4 = vld [vmem:[#allocation107_spill] sm:$0xff] }
 0x355   : > { %18435 = vst [vmem:[#allocation306_spill] sm:$0xff] %v15669_v20  ;;  %18436 = vst [vmem:[#allocation307_spill] sm:$0xff] %v15673_v22  ;;  %v15700_v27 = vmul.f32 %v15465_v25, %v18442_v10  ;;  %v15704_v1 = vmul.f32 %v15468_v60, %v18444_v4  ;;  %v8360_v22 = vadd.f32 %v15671_v59, %v8132_v18  ;;  %v18446_v24 = vld [vmem:[#allocation118_spill] sm:$0xff]  ;;  %v18448_v26 = vld [vmem:[#allocation116_spill] sm:$0xff] }
 0x356   : > { %7938 = vst.msk [vmem:[#allocation2 + $0x5a8] sm:$0xff] %vm379_vm0, %v11546_v29  ;;  %18439 = vst [vmem:[#allocation232_spill] sm:$0xff] %v15692_v36  ;;  %v15707_v29 = vld [vmem:[#allocation2 + $0x518] sm:$0xff]  ;;  %v15711_v7 = vadd.f32 %v8356_v56, %v15604_v21  ;;  %v15715_v38 = vmul.f32 %v15476_v35, %v18446_v24  ;;  %v15719_v25 = vmul.f32 %v15479_v11, %v18448_v26  ;;  %v15733_v20 = vld [vmem:[#allocation2 + $0x510] sm:$0xff]  ;;  %v11553_v35 = vpop.f32.mrb[126].mxu1 }
 0x357   : > { %18441 = vst [vmem:[#allocation102_spill] sm:$0xff] %v15696_v51  ;;  %18443 = vst [vmem:[#allocation103_spill] sm:$0xff] %v15700_v27  ;;  %v8359_v60 = vadd.f32 %v15681_v54, %v8131_v62  ;;  %v15723_v10 = vadd.f32 %v8355_v34, %v15602_v15  ;;  %v18452_v18 = vld [vmem:[#allocation128_spill] sm:$0xff]  ;;  %v15736_v24 = vadd.f32 %v8357_v57, %v15622_v31  ;;  %v18456_v26 = vld [vmem:[#allocation141_spill] sm:$0xff] }
 0x358   : > { %18445 = vst [vmem:[#allocation109_spill] sm:$0xff] %v15704_v1  ;;  %7937 = vst.msk [vmem:[#allocation2 + $0x5a0] sm:$0xff] %vm379_vm0, %v6447_v8  ;;  %v18450_v8 = vld [vmem:[#allocation133_spill] sm:$0xff]  ;;  %v15731_v21 = vmul.f32 %v15497_v5, %v18452_v18  ;;  %v15739_v11 = vadd.f32 %v8358_v17, %v15616_v23  ;;  %v18454_v62 = vld [vmem:[#allocation144_spill] sm:$0xff]  ;;  %v6522_v5 = vpop.f32.mrb[127].mxu1 }
 0x359   : > { %18447 = vst [vmem:[#allocation107_spill] sm:$0xff] %v15715_v38  ;;  %18449 = vst [vmem:[#allocation118_spill] sm:$0xff] %v15719_v25  ;;  %v15727_v4 = vmul.f32 %v15491_v44, %v18450_v8  ;;  %v15743_v15 = vmul.f32 %v15500_v58, %v18454_v62  ;;  %v15747_v44 = vmul.f32 %v15503_v46, %v18456_v26  ;;  %v18458_v31 = vld [vmem:[#allocation152_spill] sm:$0xff]  ;;  %v18459_v23 = vld [vmem:[#allocation149_spill] sm:$0xff] }
 0x35a   : > { %18453 = vst [vmem:[#allocation133_spill] sm:$0xff] %v15731_v21  ;;  %7940 = vst.msk [vmem:[#allocation2 + $0x5b8] sm:$0xff] %vm379_vm0, %v11553_v35  ;;  %v15752_v8 = vadd.f32 %v15707_v29, %v15671_v59  ;;  %v15756_v18 = vmul.f32 %v15511_v63, %v18458_v31  ;;  %v15760_v37 = vmul.f32 %v15514_v45, %v18459_v23  ;;  %v18461_v58 = vld [vmem:[#allocation160_spill] sm:$0xff]  ;;  %v8138_v46 = vld [vmem:[#allocation2 + $0x528] sm:$0xff] }
 0x35b   : > { %18451 = vst [vmem:[#allocation116_spill] sm:$0xff] %v15727_v4  ;;  %18455 = vst [vmem:[#allocation128_spill] sm:$0xff] %v15743_v15  ;;  %v15764_v62 = vmul.f32 %v15517_v12, %v18461_v58  ;;  %v15767_v35 = vadd.f32 %v8360_v22, %v8356_v56  ;;  %v18463_v26 = vld [vmem:[#allocation157_spill] sm:$0xff]  ;;  %v18465_v13 = vld [vmem:[#allocation167_spill] sm:$0xff]  ;;  %v15785_v12 = vadd.f32 %v15733_v20, %v15681_v54 }
 0x35c   : > { %18457 = vst [vmem:[#allocation144_spill] sm:$0xff] %v15747_v44  ;;  %18460 = vst [vmem:[#allocation141_spill] sm:$0xff] %v15760_v37  ;;  %v15771_v16 = vmul.f32 %v15524_v49, %v18463_v26  ;;  %v15775_v63 = vmul.f32 %v15527_v39, %v18465_v13  ;;  %v18467_v31 = vld [vmem:[#allocation165_spill] sm:$0xff]  ;;  %v18468_v45 = vld [vmem:[#allocation288_spill] sm:$0xff]  ;;  %v15787_v56 = vadd.f32 %v8359_v60, %v8355_v34  ;;  %v11560_v13 = vpop.f32.mrb[128].mxu1 }
 0x35d   : > { %18462 = vst [vmem:[#allocation152_spill] sm:$0xff] %v15764_v62  ;;  %7939 = vst.msk [vmem:[#allocation2 + $0x5b0] sm:$0xff] %vm379_vm0, %v6522_v5  ;;  %v15779_v23 = vmul.f32 %v18468_v45, %v18467_v31  ;;  %v15781_v55 = vld [vmem:[#allocation2 + $0x520] sm:$0xff]  ;;  %v18470_v5 = vld [vmem:[#allocation176_spill] sm:$0xff] }
 0x35e   : > { %18464 = vst [vmem:[#allocation149_spill] sm:$0xff] %v15771_v16  ;;  %18466 = vst [vmem:[#allocation160_spill] sm:$0xff] %v15775_v63  ;;  %v18471_v58 = vld [vmem:[#allocation289_spill] sm:$0xff]  ;;  %v18473_v26 = vld [vmem:[#allocation171_spill] sm:$0xff] }
 0x35f   : > { %18469 = vst [vmem:[#allocation157_spill] sm:$0xff] %v15779_v23  ;;  %v15791_v49 = vmul.f32 %v18471_v58, %v18470_v5  ;;  %v18474_v61 = vld [vmem:[#allocation290_spill] sm:$0xff]  ;;  %v18477_v45 = vld [vmem:[#allocation115_spill] sm:$0xff]  ;;  %v18482_v43 = vld [vmem:[#allocation292_spill] sm:$0xff]  ;;  %v6597_v5 = vpop.f32.mrb[129].mxu1  ;;  %v15814_v58 = vadd.f32 %v15752_v8, %v8358_v17 }
 0x360   : > { %v15795_v39 = vmul.f32 %v18474_v61, %v18473_v26  ;;  %v18476_v9 = vld [vmem:[#allocation10_spill] sm:$0xff]  ;;  %v8730_v0 = vadd.f32 %v15739_v11, %v18477_v45  ;;  %v18478_v14 = vld [vmem:[#allocation187_spill] sm:$0xff]  ;;  %7942 = vst.msk [vmem:[#allocation2 + $0x648] sm:$0xff] %vm379_vm0, %v11560_v13  ;;  %v15811_v61 = vadd.f32 %v8138_v46, %v15707_v29  ;;  %v18485_v26 = vld [vmem:[#allocation293_spill] sm:$0xff]  ;;  %v8732_v13 = vadd.f32 %v15767_v35, %v15636_v3 }
 0x361   : > { %18472 = vst [vmem:[#allocation167_spill] sm:$0xff] %v15791_v49  ;;  %v8729_v31 = vadd.f32 %v15736_v24, %v18476_v9  ;;  %v18479_v30 = vld [vmem:[#allocation291_spill] sm:$0xff]  ;;  %v18484_v9 = vld [vmem:[#allocation208_spill] sm:$0xff]  ;;  %v18487_v49 = vld [vmem:[#allocation201_spill] sm:$0xff] }
 0x362   : > { %18475 = vst [vmem:[#allocation165_spill] sm:$0xff] %v15795_v39  ;;  %v15803_v42 = vmul.f32 %v18479_v30, %v18478_v14  ;;  %v18481_v34 = vld [vmem:[#allocation183_spill] sm:$0xff]  ;;  %v15818_v45 = vmul.f32 %v18485_v26, %v18484_v9  ;;  %v18488_v30 = vld [vmem:[#allocation294_spill] sm:$0xff]  ;;  %7941 = vst.msk [vmem:[#allocation2 + $0x640] sm:$0xff] %vm379_vm0, %v6597_v5  ;;  %v8731_v5 = vadd.f32 %v15787_v56, %v15630_v48 }
 0x363   : > { %v15807_v53 = vmul.f32 %v18482_v43, %v18481_v34  ;;  %v15822_v14 = vmul.f32 %v18488_v30, %v18487_v49  ;;  %v15827_v43 = vadd.f32 %v15781_v55, %v15733_v20  ;;  %v18490_v34 = vld [vmem:[#allocation78_spill] sm:$0xff]  ;;  %v18491_v17 = vld [vmem:[#allocation297_spill] sm:$0xff]  ;;  %v15840_v49 = vadd.f32 %v15785_v12, %v8357_v57  ;;  %v18496_v30 = vld [vmem:[#allocation216_spill] sm:$0xff] }
 0x364   : > { %18480 = vst [vmem:[#allocation288_spill] sm:$0xff] %v15803_v42  ;;  %18486 = vst [vmem:[#allocation289_spill] sm:$0xff] %v15818_v45  ;;  %v15833_v42 = vmul.f32 %v18491_v17, %v18490_v34  ;;  %v18494_v9 = vld [vmem:[#allocation298_spill] sm:$0xff]  ;;  %v8140_v45 = vld [vmem:[#allocation2 + $0x538] sm:$0xff]  ;;  %v11567_v34 = vpop.f32.mrb[130].mxu1 }
 0x365   : > { %18483 = vst [vmem:[#allocation176_spill] sm:$0xff] %v15807_v53  ;;  %18489 = vst [vmem:[#allocation171_spill] sm:$0xff] %v15822_v14  ;;  %v18493_v53 = vld [vmem:[#allocation27_spill] sm:$0xff]  ;;  %v18499_v3 = vld [vmem:[#allocation217_spill] sm:$0xff] }
 0x366   : > { %18492 = vst [vmem:[#allocation290_spill] sm:$0xff] %v15833_v42  ;;  %v15837_v26 = vmul.f32 %v18494_v9, %v18493_v53  ;;  %v18497_v14 = vld [vmem:[#allocation299_spill] sm:$0xff]  ;;  %v18500_v63 = vld [vmem:[#allocation300_spill] sm:$0xff]  ;;  %v15853_v53 = vadd.f32 %v8729_v31, %v15681_v54  ;;  %v15856_v9 = vadd.f32 %v8730_v0, %v15671_v59  ;;  %v18506_v48 = vld [vmem:[#allocation218_spill] sm:$0xff]  ;;  %v8734_v54 = vadd.f32 %v15814_v58, %v15654_v52 }
 0x367   : > { %v15846_v39 = vmul.f32 %v18497_v14, %v18496_v30  ;;  %v15850_v23 = vmul.f32 %v18500_v63, %v18499_v3  ;;  %v8139_v17 = vld [vmem:[#allocation2 + $0x530] sm:$0xff]  ;;  %v18504_v57 = vld [vmem:[#allocation32_spill] sm:$0xff]  ;;  %7944 = vst.msk [vmem:[#allocation2 + $0x658] sm:$0xff] %vm379_vm0, %v11567_v34  ;;  %v6672_v63 = vpop.f32.mrb[131].mxu1  ;;  %v15868_v30 = vadd.f32 %v15811_v61, %v8360_v22  ;;  %v15884_v3 = vadd.f32 %v15827_v43, %v8359_v60  ;;  %v18526_v1 = vld [vmem:[#allocation126_spill] sm:$0xff] }
 0x368   : > { %18495 = vst [vmem:[#allocation10_spill] sm:$0xff] %v15837_v26  ;;  %18502 = vst [vmem:[#allocation291_spill] sm:$0xff] %v15853_v53  ;;  %v15860_v26 = vmul.f32 %v15600_v41, %v18504_v57  ;;  %v18507_v42 = vld [vmem:[#allocation87_spill] sm:$0xff]  ;;  %v18509_v31 = vld [vmem:[#allocation28_spill] sm:$0xff]  ;;  %v15887_v22 = vadd.f32 %v8732_v13, %v15707_v29  ;;  %v15899_v57 = vadd.f32 %v8731_v5, %v15733_v20 }
 0x369   : > { %18498 = vst [vmem:[#allocation115_spill] sm:$0xff] %v15846_v39  ;;  %18501 = vst [vmem:[#allocation187_spill] sm:$0xff] %v15850_v23  ;;  %v15864_v14 = vmul.f32 %v18507_v42, %v18506_v48  ;;  %v15874_v0 = vmul.f32 %v15676_v50, %v18509_v31  ;;  %v18511_v59 = vld [vmem:[#allocation219_spill] sm:$0xff]  ;;  %v15881_v42 = vadd.f32 %v8140_v45, %v8138_v46  ;;  %v18514_v34 = vld [vmem:[#allocation220_spill] sm:$0xff] }
 0x36a   : > { %18503 = vst [vmem:[#allocation183_spill] sm:$0xff] %v15856_v9  ;;  %18505 = vst [vmem:[#allocation292_spill] sm:$0xff] %v15860_v26  ;;  %v15878_v41 = vmul.f32 %v15679_v19, %v18511_v59  ;;  %v15891_v52 = vmul.f32 %v15684_v6, %v18514_v34  ;;  %v15894_v50 = vadd.f32 %v8139_v17, %v15781_v55  ;;  %v18517_v48 = vld [vmem:[#allocation223_spill] sm:$0xff]  ;;  %v8142_v29 = vld [vmem:[#allocation2 + $0x548] sm:$0xff] }
 0x36b   : > { %18508 = vst [vmem:[#allocation208_spill] sm:$0xff] %v15864_v14  ;;  %18510 = vst [vmem:[#allocation293_spill] sm:$0xff] %v15874_v0  ;;  %v8733_v19 = vadd.f32 %v15840_v49, %v15664_v2  ;;  %v15903_v60 = vmul.f32 %v15687_v40, %v18517_v48  ;;  %v18519_v31 = vld [vmem:[#allocation112_spill] sm:$0xff]  ;;  %v18520_v2 = vld [vmem:[#allocation113_spill] sm:$0xff]  ;;  %v8736_v34 = vadd.f32 %v15868_v30, %v15711_v7 }
 0x36c   : > { %18512 = vst [vmem:[#allocation201_spill] sm:$0xff] %v15878_v41  ;;  %7943 = vst.msk [vmem:[#allocation2 + $0x650] sm:$0xff] %vm379_vm0, %v6672_v63  ;;  %v11574_v63 = vpop.f32.mrb[132].mxu1  ;;  %v15911_v59 = vmul.f32 %v18519_v31, %v18519_v31  ;;  %v15915_v20 = vmul.f32 %v18520_v2, %v18520_v2  ;;  %v8141_v5 = vld [vmem:[#allocation2 + $0x540] sm:$0xff]  ;;  %v15920_v48 = vadd.f32 %v8734_v54, %v8138_v46  ;;  %v18523_v51 = vld [vmem:[#allocation119_spill] sm:$0xff] }
 0x36d   : > { %18513 = vst [vmem:[#allocation294_spill] sm:$0xff] %v15887_v22  ;;  %18515 = vst [vmem:[#allocation78_spill] sm:$0xff] %v15891_v52  ;;  %v6747_v40 = vpop.f32.mrb[133].mxu1  ;;  %v18522_v13 = vld [vmem:[#allocation121_spill] sm:$0xff]  ;;  %v15928_v31 = vmul.f32 %v18523_v51, %v18523_v51  ;;  %v8735_v2 = vadd.f32 %v15884_v3, %v15723_v10  ;;  %v8368_v51 = vadd.f32 %v8142_v29, %v8140_v45  ;;  %v15954_v36 = vld [vmem:[#allocation2 + $0x550] sm:$0xff] }
 0x36e   : > { %18516 = vst [vmem:[#allocation297_spill] sm:$0xff] %v15899_v57  ;;  %18518 = vst [vmem:[#allocation27_spill] sm:$0xff] %v15903_v60  ;;  %v15924_v6 = vmul.f32 %v18522_v13, %v18522_v13  ;;  %v18524_v46 = vld [vmem:[#allocation129_spill] sm:$0xff]  ;;  %v15943_v13 = vld [vmem:[#allocation2 + $0x558] sm:$0xff]  ;;  %v11581_v9 = vpop.f32.mrb[134].mxu1  ;;  %v8367_v7 = vadd.f32 %v8141_v5, %v8139_v17 }
 0x36f   : > { %7946 = vst.msk [vmem:[#allocation2 + $0x668] sm:$0xff] %vm379_vm0, %v11574_v63  ;;  %18521 = vst [vmem:[#allocation298_spill] sm:$0xff] %v15920_v48  ;;  %v15933_v63 = vadd.f32 %v15881_v42, %v15752_v8  ;;  %v15941_v54 = vmul.f32 %v18524_v46, %v18524_v46  ;;  %v15950_v8 = vadd.f32 %v8733_v19, %v15781_v55  ;;  %v18527_v22 = vld [vmem:[#allocation142_spill] sm:$0xff]  ;;  %v6822_v55 = vpop.f32.mrb[135].mxu1  ;;  %v18530_v27 = vld [vmem:[#allocation153_spill] sm:$0xff] }
 0x370   : > { %7945 = vst.msk [vmem:[#allocation2 + $0x660] sm:$0xff] %vm379_vm0, %v6747_v40  ;;  %v15947_v40 = vadd.f32 %v15894_v50, %v15785_v12  ;;  %v15958_v46 = vmul.f32 %v18526_v1, %v18526_v1  ;;  %v15962_v53 = vmul.f32 %v18527_v22, %v18527_v22  ;;  %v18528_v12 = vld [vmem:[#allocation138_spill] sm:$0xff]  ;;  %7948 = vst.msk [vmem:[#allocation2 + $0x678] sm:$0xff] %vm379_vm0, %v11581_v9  ;;  %v18535_v41 = vld [vmem:[#allocation172_spill] sm:$0xff] }
 0x371   : > { %18525 = vst [vmem:[#allocation216_spill] sm:$0xff] %v15950_v8  ;;  %v15966_v60 = vmul.f32 %v18528_v12, %v18528_v12  ;;  %v15969_v19 = vadd.f32 %v8736_v34, %v8140_v45  ;;  %v15975_v1 = vmul.f32 %v18530_v27, %v18530_v27  ;;  %v18531_v57 = vld [vmem:[#allocation150_spill] sm:$0xff]  ;;  %7947 = vst.msk [vmem:[#allocation2 + $0x670] sm:$0xff] %vm379_vm0, %v6822_v55  ;;  %v16017_v48 = vld [vmem:[#allocation2 + $0x578] sm:$0xff] }
 0x372   : > { %v15979_v22 = vmul.f32 %v18531_v57, %v18531_v57  ;;  %v8370_v12 = vadd.f32 %v15943_v13, %v8142_v29  ;;  %v8738_v9 = vadd.f32 %v15933_v63, %v15739_v11  ;;  %v15985_v45 = vadd.f32 %v8735_v2, %v8139_v17  ;;  %v18533_v34 = vld [vmem:[#allocation162_spill] sm:$0xff]  ;;  %v11588_v11 = vpop.f32.mrb[136].mxu1  ;;  %v8145_v17 = vld [vmem:[#allocation2 + $0x560] sm:$0xff]  ;;  %v18537_v38 = vld [vmem:[#allocation179_spill] sm:$0xff] }
 0x373   : > { %18529 = vst [vmem:[#allocation299_spill] sm:$0xff] %v15969_v19  ;;  %v15989_v10 = vmul.f32 %v18533_v34, %v18533_v34  ;;  %v15991_v25 = vld [vmem:[#allocation2 + $0x568] sm:$0xff]  ;;  %v8369_v27 = vadd.f32 %v15954_v36, %v8141_v5  ;;  %v15995_v57 = vadd.f32 %v8368_v51, %v15811_v61  ;;  %v8737_v55 = vadd.f32 %v15947_v40, %v15736_v24  ;;  %v18536_v61 = vld [vmem:[#allocation168_spill] sm:$0xff]  ;;  %v6897_v24 = vpop.f32.mrb[137].mxu1  ;;  %v18538_v8 = vld [vmem:[#allocation177_spill] sm:$0xff] }
 0x374   : > { %18532 = vst [vmem:[#allocation217_spill] sm:$0xff] %v15985_v45  ;;  %v16002_v2 = vadd.f32 %v8367_v7, %v15827_v43  ;;  %v18534_v34 = vld [vmem:[#allocation158_spill] sm:$0xff]  ;;  %v16010_v0 = vmul.f32 %v18535_v41, %v18535_v41  ;;  %v16014_v14 = vmul.f32 %v18536_v61, %v18536_v61  ;;  %7950 = vst.msk [vmem:[#allocation2 + $0x688] sm:$0xff] %vm379_vm0, %v11588_v11  ;;  %v18540_v26 = vld [vmem:[#allocation189_spill] sm:$0xff]  ;;  %v11595_v39 = vpop.f32.mrb[138].mxu1 }
 0x375   : > { %v16006_v52 = vmul.f32 %v18534_v34, %v18534_v34  ;;  %v16023_v34 = vmul.f32 %v18537_v38, %v18537_v38  ;;  %v16027_v41 = vmul.f32 %v18538_v8, %v18538_v8  ;;  %v16031_v61 = vmul.f32 %v18540_v26, %v18540_v26  ;;  %7949 = vst.msk [vmem:[#allocation2 + $0x680] sm:$0xff] %vm379_vm0, %v6897_v24  ;;  %v16034_v11 = vld [vmem:[#allocation2 + $0x570] sm:$0xff]  ;;  %v18557_v44 = vld [vmem:[#allocation225_spill] sm:$0xff] }
 0x376   : > { %v8372_v23 = vadd.f32 %v15991_v25, %v15943_v13  ;;  %v16039_v43 = vadd.f32 %v8370_v12, %v15881_v42  ;;  %v16041_v38 = vadd.f32 %v8738_v9, %v8142_v29  ;;  %v8371_v21 = vadd.f32 %v8145_v17, %v15954_v36  ;;  %v18544_v9 = vld [vmem:[#allocation184_spill] sm:$0xff]  ;;  %v18546_v4 = vld [vmem:[#allocation199_spill] sm:$0xff]  ;;  %7952 = vst.msk [vmem:[#allocation2 + $0x698] sm:$0xff] %vm379_vm0, %v11595_v39 }
 0x377   : > { %18539 = vst [vmem:[#allocation300_spill] sm:$0xff] %v16027_v41  ;;  %18541 = vst [vmem:[#allocation32_spill] sm:$0xff] %v16031_v61  ;;  %v16047_v26 = vadd.f32 %v8369_v27, %v15894_v50  ;;  %v8740_v24 = vadd.f32 %v15995_v57, %v15767_v35  ;;  %v16051_v19 = vadd.f32 %v8737_v55, %v8141_v5  ;;  %v6972_v35 = vpop.f32.mrb[139].mxu1  ;;  %v18548_v55 = vld [vmem:[#allocation195_spill] sm:$0xff]  ;;  %v18550_v61 = vld [vmem:[#allocation221_spill] sm:$0xff] }
 0x378   : > { %18542 = vst [vmem:[#allocation218_spill] sm:$0xff] %v16041_v38  ;;  %v16055_v42 = vadd.f32 %v16017_v48, %v15991_v25  ;;  %v8739_v29 = vadd.f32 %v16002_v2, %v15787_v56  ;;  %v16061_v8 = vmul.f32 %v18544_v9, %v18544_v9  ;;  %v16065_v50 = vmul.f32 %v18546_v4, %v18546_v4  ;;  %v18552_v9 = vld [vmem:[#allocation212_spill] sm:$0xff]  ;;  %v8150_v4 = vld [vmem:[#allocation2 + $0x588] sm:$0xff] }
 0x379   : > { %18543 = vst [vmem:[#allocation87_spill] sm:$0xff] %v16051_v19  ;;  %v16069_v5 = vadd.f32 %v16034_v11, %v8145_v17  ;;  %v16073_v45 = vmul.f32 %v18548_v55, %v18548_v55  ;;  %v16077_v56 = vmul.f32 %v18550_v61, %v18550_v61  ;;  %7951 = vst.msk [vmem:[#allocation2 + $0x690] sm:$0xff] %vm379_vm0, %v6972_v35  ;;  %v8149_v61 = vld [vmem:[#allocation2 + $0x580] sm:$0xff] }
 0x37a   : > { %18545 = vst [vmem:[#allocation28_spill] sm:$0xff] %v16061_v8  ;;  %18547 = vst [vmem:[#allocation219_spill] sm:$0xff] %v16065_v50  ;;  %v16081_v8 = vmul.f32 %v18552_v9, %v18552_v9  ;;  %v16084_v39 = vadd.f32 %v8372_v23, %v8368_v51  ;;  %v8742_v50 = vadd.f32 %v16039_v43, %v15814_v58  ;;  %v11602_v58 = vpop.f32.mrb[140].mxu1  ;;  %v18558_v51 = vld [vmem:[#allocation226_spill] sm:$0xff] }
 0x37b   : > { %18549 = vst [vmem:[#allocation220_spill] sm:$0xff] %v16073_v45  ;;  %18551 = vst [vmem:[#allocation223_spill] sm:$0xff] %v16077_v56  ;;  %v18554_v45 = vld [vmem:[#allocation222_spill] sm:$0xff]  ;;  %v16094_v56 = vadd.f32 %v8371_v21, %v8367_v7  ;;  %v8741_v9 = vadd.f32 %v16047_v26, %v15840_v49  ;;  %v16099_v35 = vadd.f32 %v8740_v24, %v15943_v13  ;;  %v7047_v13 = vpop.f32.mrb[141].mxu1 }
 0x37c   : > { %18553 = vst [vmem:[#allocation112_spill] sm:$0xff] %v16081_v8  ;;  %v16092_v41 = vmul.f32 %v18554_v45, %v18554_v45  ;;  %v16104_v8 = vadd.f32 %v16055_v42, %v8370_v12  ;;  %v16107_v55 = vadd.f32 %v8739_v29, %v15954_v36  ;;  %v18556_v45 = vld [vmem:[#allocation224_spill] sm:$0xff]  ;;  %v16115_v49 = vmul.f32 %v18557_v44, %v18557_v44  ;;  %v18559_v29 = vld [vmem:[#allocation227_spill] sm:$0xff] }
 0x37d   : > { %18555 = vst [vmem:[#allocation113_spill] sm:$0xff] %v16099_v35  ;;  %v16111_v7 = vmul.f32 %v18556_v45, %v18556_v45  ;;  %7954 = vst.msk [vmem:[#allocation2 + $0x6a8] sm:$0xff] %vm379_vm0, %v11602_v58  ;;  %v16119_v24 = vadd.f32 %v8150_v4, %v16017_v48  ;;  %v16122_v12 = vadd.f32 %v16069_v5, %v8369_v27  ;;  %v18562_v27 = vld [vmem:[#allocation228_spill] sm:$0xff]  ;;  %v8174_v35 = vld [vmem:[#allocation2 + $0x648] sm:$0xff] }
 0x37e   : > { %v16126_v36 = vmul.f32 %v18558_v51, %v18558_v51  ;;  %v16130_v45 = vmul.f32 %v18559_v29, %v18559_v29  ;;  %7953 = vst.msk [vmem:[#allocation2 + $0x6a0] sm:$0xff] %vm379_vm0, %v7047_v13  ;;  %v16134_v44 = vadd.f32 %v8149_v61, %v16034_v11  ;;  %v8744_v58 = vadd.f32 %v16084_v39, %v15868_v30  ;;  %v11609_v30 = vpop.f32.mrb[142].mxu1  ;;  %v18580_v16 = vld [vmem:[#allocation32_spill] sm:$0xff] }
 0x37f   : > { %v16139_v38 = vadd.f32 %v8742_v50, %v15991_v25  ;;  %v16143_v15 = vmul.f32 %v18562_v27, %v18562_v27  ;;  %v8743_v51 = vadd.f32 %v16094_v56, %v15884_v3  ;;  %v16147_v29 = vadd.f32 %v8741_v9, %v8145_v17  ;;  %7956 = vst.msk [vmem:[#allocation2 + $0x6b8] sm:$0xff] %vm379_vm0, %v11609_v30 }
 0x380   : > { %18560 = vst [vmem:[#allocation121_spill] sm:$0xff] %v16130_v45  ;;  %v16153_v19 = vmul.f32 %v14965_v28, %v14965_v28  ;;  %v8152_v45 = vld [vmem:[#allocation2 + $0x598] sm:$0xff]  ;;  %v8746_v25 = vadd.f32 %v16104_v8, %v15933_v63  ;;  %v16161_v3 = vmul.f32 %v14968_v47, %v14968_v47  ;;  %v16165_v17 = vmul.f32 %v14979_v33, %v14979_v33  ;;  %v7122_v28 = vpop.f32.mrb[143].mxu1  ;;  %v8151_v33 = vld [vmem:[#allocation2 + $0x590] sm:$0xff] }
 0x381   : > { %18561 = vst [vmem:[#allocation119_spill] sm:$0xff] %v16139_v38  ;;  %18563 = vst [vmem:[#allocation129_spill] sm:$0xff] %v16147_v29  ;;  %v16169_v9 = vadd.f32 %v16119_v24, %v8372_v23  ;;  %v8745_v63 = vadd.f32 %v16122_v12, %v15947_v40  ;;  %v16175_v27 = vmul.f32 %v18437_v32, %v18437_v32  ;;  %v16178_v47 = vmul.f32 729.0, %v15911_v59  ;;  %v11616_v50 = vpop.f32.mrb[144].mxu1 }
 0x382   : > { %7955 = vst.msk [vmem:[#allocation2 + $0x6b0] sm:$0xff] %vm379_vm0, %v7122_v28  ;;  %v16182_v13 = vadd.f32 %v16134_v44, %v8371_v21  ;;  %v16185_v30 = vadd.f32 %v8744_v58, %v16017_v48  ;;  %v16190_v40 = vmul.f32 729.0, %v15915_v20  ;;  %v16192_v32 = vadd.f32 %v8152_v45, %v8150_v4  ;;  %7958 = vst.msk [vmem:[#allocation2 + $0x6c8] sm:$0xff] %vm379_vm0, %v11616_v50  ;;  %v18587_v62 = vld [vmem:[#allocation220_spill] sm:$0xff] }
 0x383   : > { %v16195_v59 = vadd.f32 %v8743_v51, %v16034_v11  ;;  %v16200_v21 = vmul.f32 729.0, %v15924_v6  ;;  %v16202_v48 = vadd.f32 %v8746_v25, %v8150_v4  ;;  %v16205_v58 = vmul.f32 729.0, %v15928_v31  ;;  %v7197_v11 = vpop.f32.mrb[145].mxu1 }
 0x384   : > { %18564 = vst [vmem:[#allocation126_spill] sm:$0xff] %v16185_v30  ;;  %v16208_v20 = vmul.f32 729.0, %v15941_v54  ;;  %v16211_v23 = vmul.f32 729.0, %v15958_v46  ;;  %v8377_v51 = vadd.f32 %v8151_v33, %v8149_v61  ;;  %v8748_v6 = vadd.f32 %v16169_v9, %v15995_v57  ;;  %7957 = vst.msk [vmem:[#allocation2 + $0x6c0] sm:$0xff] %vm379_vm0, %v7197_v11  ;;  %v8153_v57 = vld [vmem:[#allocation2 + $0x5a0] sm:$0xff]  ;;  %v16244_v54 = vld [vmem:[#allocation2 + $0x5b0] sm:$0xff] }
 0x385   : > { %18565 = vst [vmem:[#allocation142_spill] sm:$0xff] %v16195_v59  ;;  %18566 = vst [vmem:[#allocation138_spill] sm:$0xff] %v16202_v48  ;;  %v16216_v28 = vadd.f32 %v8745_v63, %v8149_v61  ;;  %v16219_v4 = vmul.f32 729.0, %v15962_v53  ;;  %v8747_v31 = vadd.f32 %v16182_v13, %v16002_v2  ;;  %v16227_v25 = vmul.f32 729.0, %v15966_v60  ;;  %v8154_v61 = vld [vmem:[#allocation2 + $0x5a8] sm:$0xff]  ;;  %v11623_v60 = vpop.f32.mrb[146].mxu1 }
 0x386   : > { %v16230_v50 = vmul.f32 729.0, %v15975_v1  ;;  %v16234_v53 = vadd.f32 %v16192_v32, %v16055_v42  ;;  %v16239_v2 = vmul.f32 729.0, %v15979_v22  ;;  %v16242_v46 = vmul.f32 729.0, %v15989_v10  ;;  %v16246_v1 = vld [vmem:[#allocation2 + $0x5b8] sm:$0xff]  ;;  %7960 = vst.msk [vmem:[#allocation2 + $0x6d8] sm:$0xff] %vm379_vm0, %v11623_v60  ;;  %v7272_v10 = vpop.f32.mrb[147].mxu1 }
 0x387   : > { %18567 = vst [vmem:[#allocation153_spill] sm:$0xff] %v16216_v28  ;;  %v16251_v42 = vmul.f32 729.0, %v16006_v52  ;;  %v16254_v38 = vmul.f32 729.0, %v16010_v0  ;;  %v16257_v22 = vmul.f32 729.0, %v16014_v14  ;;  %v16261_v11 = vadd.f32 %v8377_v51, %v16069_v5  ;;  %7959 = vst.msk [vmem:[#allocation2 + $0x6d0] sm:$0xff] %vm379_vm0, %v7272_v10  ;;  %v18578_v48 = vld [vmem:[#allocation300_spill] sm:$0xff] }
 0x388   : > { %18570 = vst [vmem:[#allocation150_spill] sm:$0xff] %v16242_v46  ;;  %v16263_v63 = vadd.f32 %v8748_v6, %v8152_v45  ;;  %v16268_v52 = vmul.f32 729.0, %v16023_v34  ;;  %v8379_v0 = vadd.f32 %v8153_v57, %v8151_v33  ;;  %v8380_v30 = vadd.f32 %v8154_v61, %v8152_v45  ;;  %v11630_v34 = vpop.f32.mrb[148].mxu1  ;;  %v16283_v28 = vld [vmem:[#allocation2 + $0x5c0] sm:$0xff]  ;;  %v18595_v46 = vld [vmem:[#allocation211_spill] sm:$0xff] }
 0x389   : > { %18572 = vst [vmem:[#allocation162_spill] sm:$0xff] %v16251_v42  ;;  %18573 = vst [vmem:[#allocation158_spill] sm:$0xff] %v16254_v38  ;;  %v16271_v14 = vadd.f32 %v8747_v31, %v8151_v33  ;;  %v16274_v60 = vmul.f32 729.0, %v18578_v48  ;;  %v8381_v5 = vadd.f32 %v16244_v54, %v8153_v57  ;;  %v8382_v6 = vadd.f32 %v16246_v1, %v8154_v61  ;;  %v16287_v33 = vld [vmem:[#allocation2 + $0x5c8] sm:$0xff]  ;;  %v18582_v31 = vld [vmem:[#allocation28_spill] sm:$0xff] }
 0x38a   : > { %18574 = vst [vmem:[#allocation172_spill] sm:$0xff] %v16257_v22  ;;  %18575 = vst [vmem:[#allocation168_spill] sm:$0xff] %v16263_v63  ;;  %v8750_v22 = vadd.f32 %v16234_v53, %v16039_v43  ;;  %v16281_v59 = vmul.f32 729.0, %v18580_v16  ;;  %v8383_v45 = vadd.f32 %v16283_v28, %v16244_v54  ;;  %v8384_v48 = vadd.f32 %v16287_v33, %v16246_v1  ;;  %v7347_v16 = vpop.f32.mrb[149].mxu1  ;;  %v18589_v42 = vld [vmem:[#allocation223_spill] sm:$0xff] }
 0x38b   : > { %18577 = vst [vmem:[#allocation179_spill] sm:$0xff] %v16268_v52  ;;  %18579 = vst [vmem:[#allocation177_spill] sm:$0xff] %v16274_v60  ;;  %v16292_v10 = vmul.f32 729.0, %v18582_v31  ;;  %v18584_v60 = vld [vmem:[#allocation219_spill] sm:$0xff]  ;;  %v8749_v43 = vadd.f32 %v16261_v11, %v16047_v26  ;;  %v16303_v29 = vmul.f32 729.0, %v18587_v62  ;;  %v16306_v37 = vmul.f32 729.0, %v18589_v42 }
 0x38c   : > { %18581 = vst [vmem:[#allocation189_spill] sm:$0xff] %v16281_v59  ;;  %v16295_v52 = vmul.f32 729.0, %v18584_v60  ;;  %7962 = vst.msk [vmem:[#allocation2 + $0x6e8] sm:$0xff] %vm379_vm0, %v11630_v34  ;;  %v8583_v60 = vadd.f32 %v8379_v0, %v16134_v44  ;;  %v8584_v31 = vadd.f32 %v8380_v30, %v16119_v24  ;;  %v8585_v38 = vadd.f32 %v8381_v5, %v8377_v51  ;;  %v18594_v24 = vld [vmem:[#allocation213_spill] sm:$0xff]  ;;  %v18597_v34 = vld [vmem:[#allocation23_spill] sm:$0xff] }
 0x38d   : > { %18583 = vst [vmem:[#allocation184_spill] sm:$0xff] %v16292_v10  ;;  %18588 = vst [vmem:[#allocation195_spill] sm:$0xff] %v16303_v29  ;;  %v18592_v10 = vld [vmem:[#allocation112_spill] sm:$0xff]  ;;  %v8586_v62 = vadd.f32 %v8382_v6, %v16192_v32  ;;  %v16317_v29 = vadd.f32 %v8750_v22, %v8154_v61  ;;  %v16320_v42 = vmul.f32 729.0, %v16092_v41  ;;  %v8587_v44 = vadd.f32 %v8383_v45, %v8379_v0 }
 0x38e   : > { %18585 = vst [vmem:[#allocation199_spill] sm:$0xff] %v16295_v52  ;;  %18590 = vst [vmem:[#allocation221_spill] sm:$0xff] %v16306_v37  ;;  %v16314_v26 = vmul.f32 729.0, %v18592_v10  ;;  %v8173_v37 = vld [vmem:[#allocation2 + $0x640] sm:$0xff]  ;;  %v8588_v59 = vadd.f32 %v8384_v48, %v8380_v30  ;;  %v8589_v63 = vadd.f32 %v18594_v24, %v8381_v5  ;;  %v8590_v52 = vadd.f32 %v18595_v46, %v8382_v6  ;;  %v8176_v22 = vld [vmem:[#allocation2 + $0x658] sm:$0xff] }
 0x38f   : > { %7961 = vst.msk [vmem:[#allocation2 + $0x6e0] sm:$0xff] %vm379_vm0, %v7347_v16  ;;  %v11637_v16 = vpop.f32.mrb[150].mxu1  ;;  %v8592_v32 = vadd.f32 %v18597_v34, %v8384_v48  ;;  %v16327_v61 = vadd.f32 %v8749_v43, %v8153_v57  ;;  %v16330_v41 = vmul.f32 729.0, %v16111_v7  ;;  %v12122_v30 = vld [vmem:[#allocation2 + $0x638] sm:$0xff]  ;;  %v8751_v46 = vadd.f32 %v8583_v60, %v16094_v56 }
 0x390   : > { %18593 = vst [vmem:[#allocation212_spill] sm:$0xff] %v16314_v26  ;;  %7964 = vst.msk [vmem:[#allocation2 + $0x6f8] sm:$0xff] %vm379_vm0, %v11637_v16  ;;  %v7422_v10 = vpop.f32.mrb[151].mxu1  ;;  %v18596_v26 = vld [vmem:[#allocation24_spill] sm:$0xff]  ;;  %v16333_v0 = vadd.f32 %v12122_v30, %v8174_v35  ;;  %v8752_v5 = vadd.f32 %v8584_v31, %v16084_v39  ;;  %v16338_v6 = vmul.f32 729.0, %v16115_v49  ;;  %v8753_v57 = vadd.f32 %v8585_v38, %v16122_v12 }
 0x391   : > { %v8591_v51 = vadd.f32 %v18596_v26, %v8383_v45  ;;  %18598 = vst [vmem:[#allocation222_spill] sm:$0xff] %v16330_v41  ;;  %7963 = vst.msk [vmem:[#allocation2 + $0x6f0] sm:$0xff] %vm379_vm0, %v7422_v10  ;;  %v12123_v45 = vld [vmem:[#allocation2 + $0x630] sm:$0xff]  ;;  %v8754_v7 = vadd.f32 %v8586_v62, %v16104_v8  ;;  %v16345_v43 = vmul.f32 729.0, %v16126_v36  ;;  %v11644_v34 = vpop.f32.mrb[152].mxu1  ;;  %v8755_v16 = vadd.f32 %v8587_v44, %v16182_v13  ;;  %v8164_v30 = vld [vmem:[#allocation2 + $0x5f8] sm:$0xff] }
 0x392   : > { %18599 = vst [vmem:[#allocation224_spill] sm:$0xff] %v16338_v6  ;;  %v16340_v48 = vadd.f32 %v12123_v45, %v8173_v37  ;;  %v8175_v26 = vld [vmem:[#allocation2 + $0x650] sm:$0xff]  ;;  %v8756_v56 = vadd.f32 %v8588_v59, %v16169_v9  ;;  %v8757_v39 = vadd.f32 %v8589_v63, %v16261_v11  ;;  %v8758_v49 = vadd.f32 %v8590_v52, %v16234_v53  ;;  %v7497_v24 = vpop.f32.mrb[153].mxu1  ;;  %v8180_v13 = vld [vmem:[#allocation2 + $0x678] sm:$0xff]  ;;  %v18602_v44 = vld [vmem:[#allocation25_spill] sm:$0xff] }
 0x393   : > { %18600 = vst [vmem:[#allocation225_spill] sm:$0xff] %v16345_v43  ;;  %7966 = vst.msk [vmem:[#allocation2 + $0x708] sm:$0xff] %vm379_vm0, %v11644_v34  ;;  %v8398_v10 = vadd.f32 %v8176_v22, %v8174_v35  ;;  %v8759_v38 = vadd.f32 %v8591_v51, %v8583_v60  ;;  %v8760_v12 = vadd.f32 %v8592_v32, %v8584_v31  ;;  %v18601_v8 = vld [vmem:[#allocation171_spill] sm:$0xff]  ;;  %v18603_v35 = vld [vmem:[#allocation289_spill] sm:$0xff] }
 0x394   : > { %7965 = vst.msk [vmem:[#allocation2 + $0x700] sm:$0xff] %vm379_vm0, %v7497_v24  ;;  %v8163_v62 = vld [vmem:[#allocation2 + $0x5f0] sm:$0xff]  ;;  %v16357_v9 = vadd.f32 %v16333_v0, %v18602_v44  ;;  %v16360_v59 = vadd.f32 %v8751_v46, %v16244_v54  ;;  %v16363_v53 = vadd.f32 %v8752_v5, %v16246_v1  ;;  %v8178_v11 = vld [vmem:[#allocation2 + $0x668] sm:$0xff]  ;;  %v8397_v60 = vadd.f32 %v8175_v26, %v8173_v37  ;;  %v11651_v54 = vpop.f32.mrb[154].mxu1  ;;  %v8177_v46 = vld [vmem:[#allocation2 + $0x660] sm:$0xff] }
 0x395   : > { %v8179_v52 = vld [vmem:[#allocation2 + $0x670] sm:$0xff]  ;;  %v18604_v31 = vld [vmem:[#allocation26_spill] sm:$0xff]  ;;  %v16372_v32 = vadd.f32 %v16283_v28, %v8753_v57  ;;  %v16375_v45 = vadd.f32 %v16287_v33, %v8754_v7  ;;  %v12125_v34 = vld [vmem:[#allocation2 + $0x5d8] sm:$0xff]  ;;  %7968 = vst.msk [vmem:[#allocation2 + $0x718] sm:$0xff] %vm379_vm0, %v11651_v54  ;;  %v7572_v28 = vpop.f32.mrb[155].mxu1  ;;  %v16386_v57 = vadd.f32 %v8180_v13, %v8178_v11  ;;  %v16391_v63 = vadd.f32 %v8759_v38, %v8163_v62 }
 0x396   : > { %v16369_v51 = vadd.f32 %v16340_v48, %v18604_v31  ;;  %v12124_v1 = vld [vmem:[#allocation2 + $0x5d0] sm:$0xff]  ;;  %v16379_v24 = vadd.f32 %v12125_v34, %v8756_v56  ;;  %v12126_v44 = vld [vmem:[#allocation2 + $0x5e0] sm:$0xff]  ;;  %v12127_v36 = vld [vmem:[#allocation2 + $0x5e8] sm:$0xff]  ;;  %7967 = vst.msk [vmem:[#allocation2 + $0x710] sm:$0xff] %vm379_vm0, %v7572_v28  ;;  %v8400_v56 = vadd.f32 %v8178_v11, %v8176_v22  ;;  %v11658_v22 = vpop.f32.mrb[156].mxu1  ;;  %v16442_v11 = vmul.f32 729.0, %v16153_v19 }
 0x397   : > { %v16377_v5 = vadd.f32 %v12124_v1, %v8755_v16  ;;  %v16381_v37 = vadd.f32 %v12126_v44, %v8757_v39  ;;  %v16383_v31 = vadd.f32 %v12127_v36, %v8758_v49  ;;  %v18605_v33 = vld [vmem:[#allocation215_spill] sm:$0xff]  ;;  %18606 = vst [vmem:[#allocation226_spill] sm:$0xff] %v16391_v63  ;;  %v16393_v16 = vadd.f32 %v8760_v12, %v8164_v30  ;;  %v18608_v1 = vld [vmem:[#allocation290_spill] sm:$0xff]  ;;  %v18615_v41 = vld [vmem:[#allocation293_spill] sm:$0xff] }
 0x398   : > { %v16389_v7 = vadd.f32 %v8398_v10, %v18605_v33  ;;  %v16396_v39 = vadd.f32 %v8179_v52, %v8177_v46  ;;  %v18609_v36 = vld [vmem:[#allocation10_spill] sm:$0xff]  ;;  %v8399_v44 = vadd.f32 %v8177_v46, %v8175_v26  ;;  %7970 = vst.msk [vmem:[#allocation2 + $0x728] sm:$0xff] %vm379_vm0, %v11658_v22  ;;  %v7647_v46 = vpop.f32.mrb[157].mxu1  ;;  %v8181_v12 = vld [vmem:[#allocation2 + $0x680] sm:$0xff]  ;;  %v16419_v38 = vadd.f32 %v16386_v57, %v8398_v10  ;;  %v18623_v28 = vld [vmem:[#allocation291_spill] sm:$0xff] }
 0x399   : > { %18607 = vst [vmem:[#allocation227_spill] sm:$0xff] %v16393_v16  ;;  %v8182_v34 = vld [vmem:[#allocation2 + $0x688] sm:$0xff]  ;;  %v18619_v49 = vld [vmem:[#allocation121_spill] sm:$0xff]  ;;  %7969 = vst.msk [vmem:[#allocation2 + $0x720] sm:$0xff] %vm379_vm0, %v7647_v46  ;;  %v16436_v10 = vmul.f32 729.0, %v16143_v15  ;;  %v8403_v46 = vadd.f32 %v8181_v12, %v8179_v52 }
 0x39a   : > { %v18610_v43 = vld [vmem:[#allocation214_spill] sm:$0xff]  ;;  %v16426_v6 = vmul.f32 729.0, %v18619_v49  ;;  %v8404_v54 = vadd.f32 %v8182_v34, %v8180_v13  ;;  %v16433_v22 = vadd.f32 %v16396_v39, %v8397_v60  ;;  %v16439_v62 = vadd.f32 %v8399_v44, %v16340_v48  ;;  %v18624_v15 = vld [vmem:[#allocation232_spill] sm:$0xff]  ;;  %v18627_v30 = vld [vmem:[#allocation183_spill] sm:$0xff] }
 0x39b   : > { %v16403_v33 = vadd.f32 %v8397_v60, %v18610_v43  ;;  %v16430_v43 = vadd.f32 %v8400_v56, %v16333_v0  ;;  %v16445_v49 = vmul.f32 729.0, %v16161_v3  ;;  %v16448_v13 = vmul.f32 729.0, %v16165_v17  ;;  %v11665_v0 = vpop.f32.mrb[158].mxu1  ;;  %v18628_v19 = vld [vmem:[#allocation102_spill] sm:$0xff]  ;;  %v8184_v52 = vld [vmem:[#allocation2 + $0x698] sm:$0xff]  ;;  %v18633_v26 = vld [vmem:[#allocation103_spill] sm:$0xff] }
 0x39c   : > { %v16451_v60 = vmul.f32 729.0, %v16175_v27  ;;  %v18625_v16 = vsub.f32 %v18623_v28, %v18624_v15  ;;  %v18629_v63 = vsub.f32 %v18627_v30, %v18628_v19  ;;  %7972 = vst.msk [vmem:[#allocation2 + $0x738] sm:$0xff] %vm379_vm0, %v11665_v0  ;;  %v7722_v17 = vpop.f32.mrb[159].mxu1  ;;  %v18637_v15 = vld [vmem:[#allocation109_spill] sm:$0xff]  ;;  %v18641_v0 = vld [vmem:[#allocation107_spill] sm:$0xff] }
 0x39d   : > { %18620 = vst [vmem:[#allocation228_spill] sm:$0xff] %v16445_v49  ;;  %18621 = vst [vmem:[#allocation300_spill] sm:$0xff] %v16448_v13  ;;  %v8183_v13 = vld [vmem:[#allocation2 + $0x690] sm:$0xff]  ;;  %v18631_v49 = vld [vmem:[#allocation246_spill] sm:$0xff] }
 0x39e   : > { %18622 = vst [vmem:[#allocation32_spill] sm:$0xff] %v16451_v60  ;;  %v16457_v48 = vadd.f32 %v16178_v47, %v18625_v16  ;;  %v16463_v3 = vadd.f32 %v16190_v40, %v18629_v63  ;;  %v8762_v27 = vadd.f32 %v16419_v38, %v18631_v49  ;;  %v18632_v60 = vld [vmem:[#allocation297_spill] sm:$0xff]  ;;  %v18636_v16 = vld [vmem:[#allocation294_spill] sm:$0xff]  ;;  %v18640_v63 = vld [vmem:[#allocation216_spill] sm:$0xff]  ;;  %v16487_v49 = vadd.f32 %v8404_v54, %v8400_v56 }
 0x39f   : > { %v18634_v28 = vsub.f32 %v18632_v60, %v18633_v26  ;;  %v18638_v30 = vsub.f32 %v18636_v16, %v18637_v15  ;;  %v18642_v19 = vsub.f32 %v18640_v63, %v18641_v0  ;;  %7971 = vst.msk [vmem:[#allocation2 + $0x730] sm:$0xff] %vm379_vm0, %v7722_v17  ;;  %v18644_v26 = vld [vmem:[#allocation248_spill] sm:$0xff]  ;;  %v18645_v60 = vld [vmem:[#allocation298_spill] sm:$0xff]  ;;  %v18653_v17 = vld [vmem:[#allocation299_spill] sm:$0xff] }
 0x3a0   : > { %18626 = vst [vmem:[#allocation28_spill] sm:$0xff] %v16457_v48  ;;  %18630 = vst [vmem:[#allocation219_spill] sm:$0xff] %v16463_v3  ;;  %v18650_v15 = vld [vmem:[#allocation116_spill] sm:$0xff]  ;;  %v18654_v56 = vld [vmem:[#allocation133_spill] sm:$0xff] }
 0x3a1   : > { %v16472_v47 = vadd.f32 %v16200_v21, %v18634_v28  ;;  %v16478_v40 = vadd.f32 %v16205_v58, %v18638_v30  ;;  %v16484_v3 = vadd.f32 %v16208_v20, %v18642_v19  ;;  %v8761_v21 = vadd.f32 %v16433_v22, %v18644_v26  ;;  %v18646_v28 = vld [vmem:[#allocation118_spill] sm:$0xff]  ;;  %v18649_v58 = vld [vmem:[#allocation217_spill] sm:$0xff]  ;;  %v18657_v26 = vld [vmem:[#allocation87_spill] sm:$0xff] }
 0x3a2   : > { %v18651_v30 = vsub.f32 %v18649_v58, %v18650_v15  ;;  %v16503_v20 = vld [vmem:[#allocation2 + $0x6a8] sm:$0xff]  ;;  %v18655_v0 = vsub.f32 %v18653_v17, %v18654_v56  ;;  %v18665_v15 = vsub.f32 %v16107_v55, %v15756_v18  ;;  %v8405_v56 = vadd.f32 %v8183_v13, %v8181_v12  ;;  %v18678_v55 = vld [vmem:[#allocation119_spill] sm:$0xff] }
 0x3a3   : > { %18635 = vst [vmem:[#allocation220_spill] sm:$0xff] %v16472_v47  ;;  %18639 = vst [vmem:[#allocation223_spill] sm:$0xff] %v16478_v40  ;;  %v18647_v47 = vsub.f32 %v18645_v60, %v18646_v28  ;;  %v18662_v28 = vld [vmem:[#allocation144_spill] sm:$0xff] }
 0x3a4   : > { %18643 = vst [vmem:[#allocation112_spill] sm:$0xff] %v16484_v3  ;;  %v16501_v63 = vadd.f32 %v16219_v4, %v18651_v30  ;;  %v16509_v19 = vadd.f32 %v16227_v25, %v18655_v0  ;;  %v18658_v3 = vld [vmem:[#allocation128_spill] sm:$0xff]  ;;  %v18666_v30 = vld [vmem:[#allocation150_spill] sm:$0xff]  ;;  %v8185_v25 = vld [vmem:[#allocation2 + $0x6a0] sm:$0xff]  ;;  %v8406_v0 = vadd.f32 %v8184_v52, %v8182_v34 }
 0x3a5   : > { %v16495_v16 = vadd.f32 %v16211_v23, %v18647_v47  ;;  %v18659_v60 = vsub.f32 %v18657_v26, %v18658_v3  ;;  %v18661_v47 = vld [vmem:[#allocation218_spill] sm:$0xff]  ;;  %v16527_v17 = vadd.f32 %v18666_v30, %v18665_v15  ;;  %v18668_v3 = vld [vmem:[#allocation113_spill] sm:$0xff] }
 0x3a6   : > { %18652 = vst [vmem:[#allocation211_spill] sm:$0xff] %v16501_v63  ;;  %18656 = vst [vmem:[#allocation24_spill] sm:$0xff] %v16509_v19  ;;  %v18663_v58 = vsub.f32 %v18661_v47, %v18662_v28  ;;  %v16529_v19 = vadd.f32 %v8403_v46, %v8399_v44  ;;  %v8922_v47 = vadd.f32 %v8762_v27, %v8182_v34  ;;  %v18674_v28 = vld [vmem:[#allocation152_spill] sm:$0xff]  ;;  %v18679_v15 = vld [vmem:[#allocation149_spill] sm:$0xff] }
 0x3a7   : > { %18648 = vst [vmem:[#allocation213_spill] sm:$0xff] %v16495_v16  ;;  %v16515_v23 = vadd.f32 %v16230_v50, %v18659_v60  ;;  %18667 = vst [vmem:[#allocation25_spill] sm:$0xff] %v16527_v17  ;;  %v18669_v50 = vld [vmem:[#allocation141_spill] sm:$0xff]  ;;  %v18671_v60 = vld [vmem:[#allocation162_spill] sm:$0xff]  ;;  %v18680_v30 = vsub.f32 %v18678_v55, %v18679_v15  ;;  %v8408_v27 = vadd.f32 %v16503_v20, %v8184_v52 }
 0x3a8   : > { %v16521_v4 = vadd.f32 %v16239_v2, %v18663_v58  ;;  %v18670_v26 = vsub.f32 %v18668_v3, %v18669_v50  ;;  %v18673_v2 = vld [vmem:[#allocation129_spill] sm:$0xff]  ;;  %v18681_v17 = vld [vmem:[#allocation172_spill] sm:$0xff]  ;;  %v18683_v44 = vld [vmem:[#allocation142_spill] sm:$0xff] }
 0x3a9   : > { %18660 = vst [vmem:[#allocation23_spill] sm:$0xff] %v16515_v23  ;;  %v18675_v58 = vsub.f32 %v18673_v2, %v18674_v28  ;;  %v16547_v63 = vadd.f32 %v18681_v17, %v18680_v30  ;;  %v18684_v16 = vld [vmem:[#allocation160_spill] sm:$0xff]  ;;  %v18686_v3 = vld [vmem:[#allocation179_spill] sm:$0xff]  ;;  %v18688_v2 = vld [vmem:[#allocation126_spill] sm:$0xff] }
 0x3aa   : > { %18664 = vst [vmem:[#allocation171_spill] sm:$0xff] %v16521_v4  ;;  %v16535_v23 = vadd.f32 %v18671_v60, %v18670_v26  ;;  %v18676_v4 = vld [vmem:[#allocation158_spill] sm:$0xff]  ;;  %v18685_v40 = vsub.f32 %v18683_v44, %v18684_v16  ;;  %v16555_v26 = vld [vmem:[#allocation2 + $0x6b0] sm:$0xff]  ;;  %v8188_v34 = vld [vmem:[#allocation2 + $0x6b8] sm:$0xff]  ;;  %v8921_v60 = vadd.f32 %v8761_v21, %v8181_v12  ;;  %v8407_v16 = vadd.f32 %v8185_v25, %v8183_v13 }
 0x3ab   : > { %v16541_v18 = vadd.f32 %v18676_v4, %v18675_v58  ;;  %18682 = vst [vmem:[#allocation215_spill] sm:$0xff] %v16547_v63  ;;  %v8764_v4 = vadd.f32 %v16487_v49, %v16357_v9  ;;  %v18689_v28 = vld [vmem:[#allocation157_spill] sm:$0xff]  ;;  %v16566_v15 = vld [vmem:[#allocation2 + $0x6c8] sm:$0xff]  ;;  %v18694_v30 = vld [vmem:[#allocation167_spill] sm:$0xff] }
 0x3ac   : > { %18672 = vst [vmem:[#allocation289_spill] sm:$0xff] %v16535_v23  ;;  %v16553_v50 = vadd.f32 %v18686_v3, %v18685_v40  ;;  %v18690_v58 = vsub.f32 %v18688_v2, %v18689_v28  ;;  %v18691_v17 = vld [vmem:[#allocation177_spill] sm:$0xff]  ;;  %v18698_v63 = vld [vmem:[#allocation138_spill] sm:$0xff]  ;;  %v18701_v9 = vld [vmem:[#allocation184_spill] sm:$0xff] }
 0x3ad   : > { %18677 = vst [vmem:[#allocation26_spill] sm:$0xff] %v16541_v18  ;;  %v18693_v40 = vld [vmem:[#allocation153_spill] sm:$0xff]  ;;  %v18703_v21 = vld [vmem:[#allocation288_spill] sm:$0xff]  ;;  %v18705_v28 = vld [vmem:[#allocation199_spill] sm:$0xff] }
 0x3ae   : > { %18687 = vst [vmem:[#allocation290_spill] sm:$0xff] %v16553_v50  ;;  %v16564_v55 = vadd.f32 %v18691_v17, %v18690_v58  ;;  %v18695_v44 = vsub.f32 %v18693_v40, %v18694_v30  ;;  %v18696_v3 = vld [vmem:[#allocation189_spill] sm:$0xff]  ;;  %v18704_v2 = vsub.f32 %v16271_v14, %v18703_v21  ;;  %v8606_v40 = vadd.f32 %v8406_v0, %v16386_v57 }
 0x3af   : > { %v18699_v18 = vld [vmem:[#allocation165_spill] sm:$0xff]  ;;  %v8763_v30 = vadd.f32 %v16529_v19, %v16369_v51  ;;  %v8409_v14 = vadd.f32 %v16555_v26, %v8185_v25  ;;  %v8410_v21 = vadd.f32 %v8188_v34, %v16503_v20  ;;  %v8412_v51 = vadd.f32 %v16566_v15, %v8188_v34 }
 0x3b0   : > { %18692 = vst [vmem:[#allocation10_spill] sm:$0xff] %v16564_v55  ;;  %v16572_v50 = vadd.f32 %v18696_v3, %v18695_v44  ;;  %v18700_v23 = vsub.f32 %v18698_v63, %v18699_v18  ;;  %v16584_v58 = vadd.f32 %v18705_v28, %v18704_v2  ;;  %v8189_v17 = vld [vmem:[#allocation2 + $0x6c0] sm:$0xff]  ;;  %v16587_v55 = vadd.f32 %v8405_v56, %v16396_v39  ;;  %v18707_v44 = vld [vmem:[#allocation168_spill] sm:$0xff] }
 0x3b1   : > { %v18708_v63 = vld [vmem:[#allocation176_spill] sm:$0xff]  ;;  %v18713_v39 = vsub.f32 %v16327_v61, %v18603_v35  ;;  %v18714_v57 = vld [vmem:[#allocation221_spill] sm:$0xff]  ;;  %v18720_v61 = vsub.f32 %v16360_v59, %v18608_v1  ;;  %v18724_v59 = vld [vmem:[#allocation222_spill] sm:$0xff] }
 0x3b2   : > { %18697 = vst [vmem:[#allocation214_spill] sm:$0xff] %v16572_v50  ;;  %v16578_v12 = vadd.f32 %v18701_v9, %v18700_v23  ;;  %18706 = vst [vmem:[#allocation121_spill] sm:$0xff] %v16584_v58  ;;  %v18709_v18 = vsub.f32 %v18707_v44, %v18708_v63  ;;  %v18710_v23 = vld [vmem:[#allocation195_spill] sm:$0xff]  ;;  %v8192_v9 = vld [vmem:[#allocation2 + $0x6d8] sm:$0xff]  ;;  %v8924_v44 = vadd.f32 %v8764_v4, %v8184_v52 }
 0x3b3   : > { %v18712_v2 = vld [vmem:[#allocation120_spill] sm:$0xff]  ;;  %v16605_v58 = vadd.f32 %v18714_v57, %v18713_v39  ;;  %v18716_v63 = vld [vmem:[#allocation122_spill] sm:$0xff]  ;;  %v16624_v35 = vadd.f32 %v16320_v42, %v18720_v61  ;;  %v16627_v52 = vadd.f32 %v8192_v9, %v16566_v15  ;;  %v8766_v4 = vadd.f32 %v8606_v40, %v16389_v7 }
 0x3b4   : > { %18702 = vst [vmem:[#allocation293_spill] sm:$0xff] %v16578_v12  ;;  %v16596_v3 = vadd.f32 %v18710_v23, %v18709_v18  ;;  %v9050_v28 = vsub.f32 %v8922_v47, %v18712_v2  ;;  %v16608_v12 = vadd.f32 %v8408_v27, %v8404_v54  ;;  %v9049_v18 = vsub.f32 %v8921_v60, %v18716_v63  ;;  %v18718_v2 = vld [vmem:[#allocation212_spill] sm:$0xff]  ;;  %v8191_v54 = vld [vmem:[#allocation2 + $0x6d0] sm:$0xff]  ;;  %v8194_v61 = vld [vmem:[#allocation2 + $0x6e8] sm:$0xff] }
 0x3b5   : > { %18715 = vst [vmem:[#allocation232_spill] sm:$0xff] %v16605_v58  ;;  %v8411_v23 = vadd.f32 %v8189_v17, %v16555_v26  ;;  %v18717_v47 = vsub.f32 %v16317_v29, %v18601_v8  ;;  %18721 = vst [vmem:[#allocation102_spill] sm:$0xff] %v16624_v35  ;;  %v8923_v60 = vadd.f32 %v8763_v30, %v8183_v13  ;;  %v18722_v39 = vld [vmem:[#allocation124_spill] sm:$0xff]  ;;  %v18727_v13 = vld [vmem:[#allocation123_spill] sm:$0xff] }
 0x3b6   : > { %18711 = vst [vmem:[#allocation291_spill] sm:$0xff] %v16596_v3  ;;  %v16612_v3 = vadd.f32 %v8407_v16, %v8403_v46  ;;  %v8765_v46 = vadd.f32 %v16587_v55, %v16403_v33  ;;  %v16632_v29 = vadd.f32 %v8409_v14, %v8405_v56  ;;  %v16634_v8 = vadd.f32 %v8410_v21, %v8406_v0  ;;  %v18821_v58 = vld [vmem:[#allocation203_spill] sm:$0xff] }
 0x3b7   : > { %v16618_v50 = vadd.f32 %v18718_v2, %v18717_v47  ;;  %v9114_v57 = vsub.f32 %v9050_v28, %v18722_v39  ;;  %v18723_v42 = vsub.f32 %v16363_v53, %v18609_v36  ;;  %v16643_v63 = vadd.f32 %v8412_v51, %v8408_v27  ;;  %v18726_v47 = vld [vmem:[#allocation127_spill] sm:$0xff]  ;;  %v18730_v2 = vld [vmem:[#allocation224_spill] sm:$0xff]  ;;  %v18732_v39 = vld [vmem:[#allocation130_spill] sm:$0xff] }
 0x3b8   : > { %v8768_v33 = vadd.f32 %v16608_v12, %v16430_v43  ;;  %v9052_v7 = vsub.f32 %v8924_v44, %v18726_v47  ;;  %v9113_v56 = vsub.f32 %v9049_v18, %v18727_v13  ;;  %v16649_v30 = vadd.f32 %v8191_v54, %v8189_v17  ;;  %v18728_v53 = vld [vmem:[#allocation115_spill] sm:$0xff] }
 0x3b9   : > { %18719 = vst [vmem:[#allocation183_spill] sm:$0xff] %v16618_v50  ;;  %v16641_v1 = vadd.f32 %v18724_v59, %v18723_v42  ;;  %v16651_v0 = vadd.f32 %v8411_v23, %v8407_v16  ;;  %v8767_v28 = vadd.f32 %v16612_v3, %v16439_v62  ;;  %v18729_v36 = vsub.f32 %v16372_v32, %v18728_v53  ;;  %v18733_v59 = vld [vmem:[#allocation135_spill] sm:$0xff]  ;;  %v18737_v53 = vld [vmem:[#allocation225_spill] sm:$0xff] }
 0x3ba   : > { %v16662_v43 = vadd.f32 %v16627_v52, %v8410_v21  ;;  %v8925_v44 = vadd.f32 %v8765_v46, %v8185_v25  ;;  %v8926_v18 = vadd.f32 %v8766_v4, %v16503_v20  ;;  %v9051_v42 = vsub.f32 %v8923_v60, %v18732_v39  ;;  %v18735_v47 = vld [vmem:[#allocation187_spill] sm:$0xff]  ;;  %v8193_v25 = vld [vmem:[#allocation2 + $0x6e0] sm:$0xff] }
 0x3bb   : > { %18725 = vst [vmem:[#allocation246_spill] sm:$0xff] %v16641_v1  ;;  %v16659_v27 = vadd.f32 %v18730_v2, %v18729_v36  ;;  %v8769_v16 = vadd.f32 %v16632_v29, %v16433_v22  ;;  %v8770_v62 = vadd.f32 %v16634_v8, %v16419_v38  ;;  %v16671_v32 = vadd.f32 %v18733_v59, %v9114_v57  ;;  %v18739_v4 = vld [vmem:[#allocation131_spill] sm:$0xff]  ;;  %v18740_v22 = vld [vmem:[#allocation125_spill] sm:$0xff]  ;;  %v18742_v59 = vld [vmem:[#allocation136_spill] sm:$0xff] }
 0x3bc   : > { %v18736_v13 = vsub.f32 %v16375_v45, %v18735_v47  ;;  %v8772_v20 = vadd.f32 %v16643_v63, %v16487_v49  ;;  %v8928_v46 = vadd.f32 %v8768_v33, %v8188_v34  ;;  %v9116_v60 = vsub.f32 %v9052_v7, %v18739_v4  ;;  %v18743_v34 = vld [vmem:[#allocation134_spill] sm:$0xff]  ;;  %v18744_v7 = vld [vmem:[#allocation132_spill] sm:$0xff] }
 0x3bd   : > { %18731 = vst [vmem:[#allocation297_spill] sm:$0xff] %v16659_v27  ;;  %18734 = vst [vmem:[#allocation103_spill] sm:$0xff] %v16671_v32  ;;  %v16683_v36 = vadd.f32 %v18740_v22, %v9113_v56  ;;  %v16685_v38 = vadd.f32 %v8194_v61, %v8192_v9  ;;  %v16688_v57 = vadd.f32 %v16649_v30, %v8409_v14  ;;  %v18745_v14 = vld [vmem:[#allocation292_spill] sm:$0xff]  ;;  %v18749_v22 = vld [vmem:[#allocation143_spill] sm:$0xff] }
 0x3be   : > { %v16677_v21 = vadd.f32 %v18737_v53, %v18736_v13  ;;  %v8771_v45 = vadd.f32 %v16651_v0, %v16529_v19  ;;  %v8927_v2 = vadd.f32 %v8767_v28, %v16555_v26  ;;  %v8774_v39 = vadd.f32 %v16662_v43, %v8606_v40  ;;  %v18748_v28 = vld [vmem:[#allocation146_spill] sm:$0xff] }
 0x3bf   : > { %18741 = vst [vmem:[#allocation109_spill] sm:$0xff] %v16683_v36  ;;  %v9053_v49 = vsub.f32 %v8925_v44, %v18742_v59  ;;  %v9054_v33 = vsub.f32 %v8926_v18, %v18743_v34  ;;  %v9115_v47 = vsub.f32 %v9051_v42, %v18744_v7  ;;  %v16697_v56 = vadd.f32 %v8193_v25, %v8191_v54  ;;  %v18751_v18 = vld [vmem:[#allocation208_spill] sm:$0xff]  ;;  %v18813_v32 = vld [vmem:[#allocation98_spill] sm:$0xff] }
 0x3c0   : > { %18738 = vst [vmem:[#allocation294_spill] sm:$0xff] %v16677_v21  ;;  %v8929_v13 = vadd.f32 %v8769_v16, %v8189_v17  ;;  %v8930_v53 = vadd.f32 %v8770_v62, %v16566_v15  ;;  %v18746_v4 = vsub.f32 %v16377_v5, %v18745_v14  ;;  %v8932_v26 = vadd.f32 %v8772_v20, %v8192_v9  ;;  %v8196_v17 = vld [vmem:[#allocation2 + $0x6f8] sm:$0xff]  ;;  %v18754_v9 = vld [vmem:[#allocation145_spill] sm:$0xff]  ;;  %v18755_v20 = vld [vmem:[#allocation139_spill] sm:$0xff] }
 0x3c1   : > { %v9056_v40 = vsub.f32 %v8928_v46, %v18748_v28  ;;  %v16708_v44 = vadd.f32 %v18749_v22, %v9116_v60  ;;  %v18752_v42 = vsub.f32 %v16379_v24, %v18751_v18  ;;  %v16717_v15 = vadd.f32 %v16685_v38, %v8412_v51  ;;  %v18756_v60 = vld [vmem:[#allocation137_spill] sm:$0xff]  ;;  %v18757_v7 = vld [vmem:[#allocation140_spill] sm:$0xff]  ;;  %v18759_v51 = vld [vmem:[#allocation155_spill] sm:$0xff] }
 0x3c2   : > { %v16704_v19 = vadd.f32 %v16426_v6, %v18746_v4  ;;  %v8773_v6 = vadd.f32 %v16688_v57, %v16587_v55  ;;  %v8931_v5 = vadd.f32 %v8771_v45, %v8191_v54  ;;  %v9055_v16 = vsub.f32 %v8927_v2, %v18754_v9  ;;  %v18760_v28 = vld [vmem:[#allocation156_spill] sm:$0xff]  ;;  %v18763_v2 = vld [vmem:[#allocation166_spill] sm:$0xff] }
 0x3c3   : > { %18750 = vst [vmem:[#allocation107_spill] sm:$0xff] %v16708_v44  ;;  %v16714_v59 = vadd.f32 %v16436_v10, %v18752_v42  ;;  %v8934_v62 = vadd.f32 %v8774_v39, %v8194_v61  ;;  %v9117_v46 = vsub.f32 %v9053_v49, %v18755_v20  ;;  %v9118_v34 = vsub.f32 %v9054_v33, %v18756_v60  ;;  %v8195_v10 = vld [vmem:[#allocation2 + $0x6f0] sm:$0xff]  ;;  %v18767_v18 = vld [vmem:[#allocation228_spill] sm:$0xff]  ;;  %v18771_v20 = vld [vmem:[#allocation178_spill] sm:$0xff] }
 0x3c4   : > { %18747 = vst [vmem:[#allocation216_spill] sm:$0xff] %v16704_v19  ;;  %v16725_v24 = vadd.f32 %v18757_v7, %v9115_v47  ;;  %v16728_v14 = vadd.f32 %v16697_v56, %v8411_v23  ;;  %v9057_v4 = vsub.f32 %v8929_v13, %v18759_v51  ;;  %v9058_v22 = vsub.f32 %v8930_v53, %v18760_v28  ;;  %v18764_v49 = vld [vmem:[#allocation147_spill] sm:$0xff]  ;;  %v18765_v47 = vld [vmem:[#allocation201_spill] sm:$0xff]  ;;  %v12129_v19 = vld [vmem:[#allocation2 + $0x748] sm:$0xff] }
 0x3c5   : > { %18753 = vst [vmem:[#allocation248_spill] sm:$0xff] %v16714_v59  ;;  %v18761_v55 = vsub.f32 %v16381_v37, %v18615_v41  ;;  %v16738_v45 = vadd.f32 %v8196_v17, %v8194_v61  ;;  %v9060_v39 = vsub.f32 %v8932_v26, %v18763_v2  ;;  %v9120_v33 = vsub.f32 %v9056_v40, %v18764_v49  ;;  %v18769_v41 = vld [vmem:[#allocation169_spill] sm:$0xff]  ;;  %v18772_v26 = vld [vmem:[#allocation148_spill] sm:$0xff]  ;;  %v18774_v40 = vld [vmem:[#allocation154_spill] sm:$0xff] }
 0x3c6   : > { %18758 = vst [vmem:[#allocation298_spill] sm:$0xff] %v16725_v24  ;;  %v18766_v23 = vsub.f32 %v16383_v31, %v18765_v47  ;;  %v8776_v13 = vadd.f32 %v16717_v15, %v16608_v12  ;;  %v8933_v53 = vadd.f32 %v8773_v6, %v8193_v25  ;;  %v9059_v37 = vsub.f32 %v8931_v5, %v18769_v41  ;;  %v18776_v28 = vld [vmem:[#allocation163_spill] sm:$0xff]  ;;  %v18778_v2 = vld [vmem:[#allocation226_spill] sm:$0xff]  ;;  %v18784_v47 = vld [vmem:[#allocation164_spill] sm:$0xff] }
 0x3c7   : > { %v16736_v54 = vadd.f32 %v16442_v11, %v18761_v55  ;;  %v18770_v11 = vld [vmem:[#allocation151_spill] sm:$0xff]  ;;  %v8417_v61 = vadd.f32 %v8195_v10, %v8193_v25  ;;  %v9062_v60 = vsub.f32 %v8934_v62, %v18771_v20  ;;  %v16754_v7 = vadd.f32 %v18772_v26, %v9117_v46  ;;  %v18779_v5 = vld [vmem:[#allocation78_spill] sm:$0xff]  ;;  %v18789_v41 = vld [vmem:[#allocation32_spill] sm:$0xff] }
 0x3c8   : > { %v16746_v42 = vadd.f32 %v18767_v18, %v18766_v23  ;;  %v9119_v9 = vsub.f32 %v9055_v16, %v18770_v11  ;;  %v16757_v51 = vadd.f32 %v18774_v40, %v9118_v34  ;;  %v8775_v31 = vadd.f32 %v16728_v14, %v16612_v3  ;;  %v18777_v12 = vld [vmem:[#allocation159_spill] sm:$0xff]  ;;  %v18781_v16 = vld [vmem:[#allocation300_spill] sm:$0xff]  ;;  %v18783_v46 = vld [vmem:[#allocation170_spill] sm:$0xff] }
 0x3c9   : > { %18762 = vst [vmem:[#allocation118_spill] sm:$0xff] %v16736_v54  ;;  %18773 = vst [vmem:[#allocation116_spill] sm:$0xff] %v16754_v7  ;;  %v9121_v55 = vsub.f32 %v9057_v4, %v18776_v28  ;;  %v9122_v6 = vsub.f32 %v9058_v22, %v18777_v12  ;;  %v18780_v49 = vsub.f32 %v18778_v2, %v18779_v5  ;;  %v18786_v3 = vld [vmem:[#allocation227_spill] sm:$0xff]  ;;  %v8198_v11 = vld [vmem:[#allocation2 + $0x708] sm:$0xff]  ;;  %v16833_v36 = vmul.f32 2.0, %v18813_v32 }
 0x3ca   : > { %18768 = vst [vmem:[#allocation217_spill] sm:$0xff] %v16746_v42  ;;  %18775 = vst [vmem:[#allocation299_spill] sm:$0xff] %v16757_v51  ;;  %v16771_v62 = vadd.f32 %v16738_v45, %v16627_v52  ;;  %v9124_v34 = vsub.f32 %v9060_v39, %v18783_v46  ;;  %v16775_v23 = vadd.f32 %v18784_v47, %v9120_v33  ;;  %v18787_v18 = vld [vmem:[#allocation27_spill] sm:$0xff]  ;;  %v18791_v26 = vld [vmem:[#allocation180_spill] sm:$0xff] }
 0x3cb   : > { %v16767_v25 = vadd.f32 %v18781_v16, %v18780_v49  ;;  %v18788_v4 = vsub.f32 %v18786_v3, %v18787_v18  ;;  %v8936_v20 = vadd.f32 %v8776_v13, %v8196_v17  ;;  %v9061_v40 = vsub.f32 %v8933_v53, %v18791_v26  ;;  %v18792_v28 = vld [vmem:[#allocation174_spill] sm:$0xff]  ;;  %v18793_v2 = vld [vmem:[#allocation161_spill] sm:$0xff]  ;;  %v18796_v16 = vld [vmem:[#allocation79_spill] sm:$0xff] }
 0x3cc   : > { %18785 = vst [vmem:[#allocation87_spill] sm:$0xff] %v16775_v23  ;;  %v9123_v12 = vsub.f32 %v9059_v37, %v18792_v28  ;;  %v16786_v52 = vadd.f32 %v18793_v2, %v9119_v9  ;;  %v8197_v5 = vld [vmem:[#allocation2 + $0x700] sm:$0xff]  ;;  %v16789_v39 = vadd.f32 %v8417_v61, %v16649_v30  ;;  %v16793_v46 = vmul.f32 2.0, %v18796_v16  ;;  %v18797_v47 = vld [vmem:[#allocation76_spill] sm:$0xff]  ;;  %v18800_v37 = vld [vmem:[#allocation175_spill] sm:$0xff] }
 0x3cd   : > { %18782 = vst [vmem:[#allocation133_spill] sm:$0xff] %v16767_v25  ;;  %v16781_v22 = vadd.f32 %v18789_v41, %v18788_v4  ;;  %v18795_v33 = vld [vmem:[#allocation181_spill] sm:$0xff]  ;;  %v16796_v3 = vmul.f32 2.0, %v18797_v47  ;;  %v8935_v13 = vadd.f32 %v8775_v31, %v8195_v10  ;;  %v16802_v4 = vadd.f32 %v18800_v37, %v9122_v6  ;;  %v18802_v9 = vld [vmem:[#allocation86_spill] sm:$0xff]  ;;  %v16807_v30 = vld [vmem:[#allocation2 + $0x710] sm:$0xff] }
 0x3ce   : > { %18794 = vst [vmem:[#allocation218_spill] sm:$0xff] %v16786_v52  ;;  %v9126_v49 = vsub.f32 %v9062_v60, %v18795_v33  ;;  %v18798_v18 = vld [vmem:[#allocation173_spill] sm:$0xff]  ;;  %v16805_v41 = vmul.f32 2.0, %v18802_v9  ;;  %v8200_v26 = vld [vmem:[#allocation2 + $0x718] sm:$0xff]  ;;  %v8420_v28 = vadd.f32 %v8198_v11, %v8196_v17  ;;  %v8778_v2 = vadd.f32 %v16771_v62, %v16634_v8  ;;  %v18803_v33 = vld [vmem:[#allocation186_spill] sm:$0xff] }
 0x3cf   : > { %18790 = vst [vmem:[#allocation128_spill] sm:$0xff] %v16781_v22  ;;  %v16799_v53 = vadd.f32 %v18798_v18, %v9121_v55  ;;  %18801 = vst [vmem:[#allocation150_spill] sm:$0xff] %v16802_v4  ;;  %v16809_v60 = vld [vmem:[#allocation2 + $0x720] sm:$0xff]  ;;  %v16814_v31 = vadd.f32 %v18803_v33, %v9124_v34  ;;  %v8202_v6 = vld [vmem:[#allocation2 + $0x728] sm:$0xff]  ;;  %v8419_v4 = vadd.f32 %v8197_v5, %v8195_v10 }
 0x3d0   : > { %v18805_v55 = vld [vmem:[#allocation93_spill] sm:$0xff]  ;;  %v8203_v37 = vld [vmem:[#allocation2 + $0x730] sm:$0xff]  ;;  %v18808_v7 = vld [vmem:[#allocation182_spill] sm:$0xff]  ;;  %v8777_v8 = vadd.f32 %v16789_v39, %v16632_v29  ;;  %v8421_v10 = vadd.f32 %v16807_v30, %v8197_v5 }
 0x3d1   : > { %18799 = vst [vmem:[#allocation144_spill] sm:$0xff] %v16799_v53  ;;  %18804 = vst [vmem:[#allocation113_spill] sm:$0xff] %v16814_v31  ;;  %v16817_v18 = vmul.f32 2.0, %v18805_v55  ;;  %v18806_v53 = vld [vmem:[#allocation188_spill] sm:$0xff]  ;;  %v18807_v52 = vld [vmem:[#allocation185_spill] sm:$0xff]  ;;  %v16822_v44 = vadd.f32 %v18808_v7, %v9123_v12  ;;  %v8423_v7 = vadd.f32 %v16809_v60, %v16807_v30  ;;  %v8425_v29 = vadd.f32 %v8203_v37, %v16809_v60 }
 0x3d2   : > { %v9064_v23 = vsub.f32 %v8936_v20, %v18806_v53  ;;  %v9125_v51 = vsub.f32 %v9061_v40, %v18807_v52  ;;  %v8204_v17 = vld [vmem:[#allocation2 + $0x738] sm:$0xff]  ;;  %v18810_v24 = vld [vmem:[#allocation194_spill] sm:$0xff]  ;;  %v18812_v33 = vld [vmem:[#allocation97_spill] sm:$0xff]  ;;  %v8422_v20 = vadd.f32 %v8200_v26, %v8198_v11  ;;  %v8424_v52 = vadd.f32 %v8202_v6, %v8200_v26 }
 0x3d3   : > { %18809 = vst [vmem:[#allocation141_spill] sm:$0xff] %v16822_v44  ;;  %v16827_v34 = vadd.f32 %v18810_v24, %v9126_v49  ;;  %v16830_v31 = vmul.f32 2.0, %v18812_v33  ;;  %v18814_v40 = vld [vmem:[#allocation190_spill] sm:$0xff]  ;;  %v8620_v24 = vadd.f32 %v8420_v28, %v16685_v38  ;;  %v8938_v49 = vadd.f32 %v8778_v2, %v8198_v11  ;;  %v18815_v44 = vld [vmem:[#allocation191_spill] sm:$0xff]  ;;  %v18816_v25 = vld [vmem:[#allocation193_spill] sm:$0xff] }
 0x3d4   : > { %v9063_v12 = vsub.f32 %v8935_v13, %v18814_v40  ;;  %v8426_v53 = vadd.f32 %v8204_v17, %v8202_v6  ;;  %v9128_v22 = vsub.f32 %v9064_v23, %v18815_v44  ;;  %v16844_v42 = vadd.f32 %v18816_v25, %v9125_v51  ;;  %v12128_v54 = vld [vmem:[#allocation2 + $0x740] sm:$0xff]  ;;  %v18818_v13 = vld [vmem:[#allocation99_spill] sm:$0xff]  ;;  %v18819_v2 = vld [vmem:[#allocation192_spill] sm:$0xff] }
 0x3d5   : > { %18811 = vst [vmem:[#allocation162_spill] sm:$0xff] %v16827_v34  ;;  %v8619_v34 = vadd.f32 %v8419_v4, %v16697_v56  ;;  %v8427_v59 = vadd.f32 %v12128_v54, %v8203_v37  ;;  %v8428_v21 = vadd.f32 %v12129_v19, %v8204_v17  ;;  %v8937_v27 = vadd.f32 %v8777_v8, %v8197_v5  ;;  %v18820_v51 = vld [vmem:[#allocation197_spill] sm:$0xff]  ;;  %v18823_v8 = vld [vmem:[#allocation100_spill] sm:$0xff] }
 0x3d6   : > { %18817 = vst [vmem:[#allocation129_spill] sm:$0xff] %v16844_v42  ;;  %v16847_v40 = vmul.f32 2.0, %v18818_v13  ;;  %v8621_v1 = vadd.f32 %v8421_v10, %v8417_v61  ;;  %v8622_v38 = vadd.f32 %v8422_v20, %v16738_v45  ;;  %v8623_v11 = vadd.f32 %v8423_v7, %v8419_v4  ;;  %v18824_v4 = vld [vmem:[#allocation85_spill] sm:$0xff] }
 0x3d7   : > { %v9127_v35 = vsub.f32 %v9063_v12, %v18819_v2  ;;  %v8624_v56 = vadd.f32 %v8424_v52, %v8420_v28  ;;  %v8625_v50 = vadd.f32 %v8425_v29, %v8421_v10  ;;  %v8780_v44 = vadd.f32 %v8620_v24, %v16643_v63  ;;  %v18825_v12 = vld [vmem:[#allocation196_spill] sm:$0xff] }
 0x3d8   : > { %v9066_v25 = vsub.f32 %v8938_v49, %v18820_v51  ;;  %v8626_v23 = vadd.f32 %v8426_v53, %v8422_v20  ;;  %v8779_v42 = vadd.f32 %v8619_v34, %v16651_v0  ;;  %v16855_v5 = vadd.f32 %v18821_v58, %v9128_v22  ;;  %v18826_v49 = vld [vmem:[#allocation200_spill] sm:$0xff] }
 0x3d9   : > { %v16858_v48 = vmul.f32 2.0, %v18823_v8  ;;  %v8627_v61 = vadd.f32 %v8427_v59, %v8423_v7  ;;  %v8628_v45 = vadd.f32 %v8428_v21, %v8424_v52  ;;  %v8629_v13 = vadd.f32 %v18824_v4, %v8425_v29  ;;  %v18828_v7 = vld [vmem:[#allocation198_spill] sm:$0xff]  ;;  %v18829_v51 = vld [vmem:[#allocation88_spill] sm:$0xff]  ;;  %v18830_v4 = vld [vmem:[#allocation89_spill] sm:$0xff] }
 0x3da   : > { %18822 = vst [vmem:[#allocation152_spill] sm:$0xff] %v16855_v5  ;;  %v9065_v28 = vsub.f32 %v8937_v27, %v18825_v12  ;;  %v8781_v10 = vadd.f32 %v8621_v1, %v16688_v57  ;;  %v8782_v63 = vadd.f32 %v8622_v38, %v16662_v43  ;;  %v8783_v20 = vadd.f32 %v8623_v11, %v16728_v14  ;;  %v18831_v12 = vld [vmem:[#allocation90_spill] sm:$0xff] }
 0x3db   : > { %v16866_v0 = vadd.f32 %v18826_v49, %v9127_v35  ;;  %v8784_v58 = vadd.f32 %v8624_v56, %v16717_v15  ;;  %v8785_v22 = vadd.f32 %v8625_v50, %v16789_v39  ;;  %v8940_v2 = vadd.f32 %v8780_v44, %v8200_v26  ;;  %v18832_v39 = vld [vmem:[#allocation101_spill] sm:$0xff] }
 0x3dc   : > { %v9130_v52 = vsub.f32 %v9066_v25, %v18828_v7  ;;  %v8630_v29 = vadd.f32 %v18829_v51, %v8426_v53  ;;  %v8631_v27 = vadd.f32 %v18830_v4, %v8427_v59  ;;  %v8632_v57 = vadd.f32 %v18831_v12, %v8428_v21  ;;  %v18833_v25 = vld [vmem:[#allocation202_spill] sm:$0xff]  ;;  %v18834_v7 = vld [vmem:[#allocation104_spill] sm:$0xff] }
 0x3dd   : > { %18827 = vst [vmem:[#allocation158_spill] sm:$0xff] %v16866_v0  ;;  %v8786_v43 = vadd.f32 %v8626_v23, %v16771_v62  ;;  %v8787_v5 = vadd.f32 %v8627_v61, %v8619_v34  ;;  %v8788_v14 = vadd.f32 %v8628_v45, %v8620_v24  ;;  %v8789_v8 = vadd.f32 %v8629_v13, %v8621_v1  ;;  %v8211_v13 = vld [vmem:[#allocation2 + $0x770] sm:$0xff]  ;;  %v12132_v23 = vld [vmem:[#allocation2 + $0x760] sm:$0xff]  ;;  %v18835_v45 = vld [vmem:[#allocation204_spill] sm:$0xff] }
 0x3de   : > { %v8939_v35 = vadd.f32 %v8779_v42, %v16807_v30  ;;  %v8941_v15 = vadd.f32 %v8781_v10, %v16809_v60  ;;  %v8942_v49 = vadd.f32 %v8782_v63, %v8202_v6  ;;  %v8943_v50 = vadd.f32 %v8783_v20, %v8203_v37  ;;  %v8212_v42 = vld [vmem:[#allocation2 + $0x778] sm:$0xff]  ;;  %v12130_v30 = vld [vmem:[#allocation2 + $0x750] sm:$0xff]  ;;  %v18838_v20 = vld [vmem:[#allocation233_spill] sm:$0xff] }
 0x3df   : > { %v16878_v26 = vmul.f32 2.0, %v18832_v39  ;;  %v8944_v44 = vadd.f32 %v8784_v58, %v8204_v17  ;;  %v8945_v53 = vadd.f32 %v12128_v54, %v8785_v22  ;;  %v9129_v59 = vsub.f32 %v9065_v28, %v18833_v25  ;;  %v12131_v6 = vld [vmem:[#allocation2 + $0x758] sm:$0xff]  ;;  %v18836_v54 = vld [vmem:[#allocation205_spill] sm:$0xff]  ;;  %v18837_v28 = vld [vmem:[#allocation231_spill] sm:$0xff] }
 0x3e0   : > { %v16882_v21 = vmul.f32 2.0, %v18834_v7  ;;  %v8790_v62 = vadd.f32 %v8630_v29, %v8622_v38  ;;  %v8791_v34 = vadd.f32 %v8631_v27, %v8623_v11  ;;  %v8792_v24 = vadd.f32 %v8632_v57, %v8624_v56  ;;  %v18839_v38 = vld [vmem:[#allocation234_spill] sm:$0xff]  ;;  %v18840_v56 = vld [vmem:[#allocation80_spill] sm:$0xff]  ;;  %v18841_v22 = vld [vmem:[#allocation235_spill] sm:$0xff] }
 0x3e1   : > { %v8946_v1 = vadd.f32 %v12129_v19, %v8786_v43  ;;  %v8947_v60 = vadd.f32 %v12130_v30, %v8787_v5  ;;  %v8948_v37 = vadd.f32 %v12131_v6, %v8788_v14  ;;  %v8949_v61 = vadd.f32 %v12132_v23, %v8789_v8  ;;  %v18842_v29 = vld [vmem:[#allocation207_spill] sm:$0xff]  ;;  %v18844_v4 = vld [vmem:[#allocation210_spill] sm:$0xff]  ;;  %v18849_v43 = vld [vmem:[#allocation236_spill] sm:$0xff] }
 0x3e2   : > { %v9067_v17 = vsub.f32 %v8939_v35, %v18835_v45  ;;  %v9068_v10 = vsub.f32 %v8940_v2, %v18836_v54  ;;  %v9069_v63 = vsub.f32 %v8941_v15, %v18837_v28  ;;  %v9070_v58 = vsub.f32 %v8942_v49, %v18838_v20  ;;  %v12133_v8 = vld [vmem:[#allocation2 + $0x768] sm:$0xff]  ;;  %v18850_v35 = vld [vmem:[#allocation237_spill] sm:$0xff]  ;;  %v18855_v6 = vld [vmem:[#allocation243_spill] sm:$0xff] }
 0x3e3   : > { %v9071_v11 = vsub.f32 %v8943_v50, %v18839_v38  ;;  %v9072_v19 = vsub.f32 %v8944_v44, %v18840_v56  ;;  %v9073_v51 = vsub.f32 %v8945_v53, %v18841_v22  ;;  %v16892_v5 = vadd.f32 %v18842_v29, %v9129_v59  ;;  %v18851_v49 = vld [vmem:[#allocation238_spill] sm:$0xff]  ;;  %v18852_v44 = vld [vmem:[#allocation239_spill] sm:$0xff]  ;;  %v18853_v25 = vld [vmem:[#allocation209_spill] sm:$0xff] }
 0x3e4   : > { %v16895_v27 = vadd.f32 %v18844_v4, %v9130_v52  ;;  %v16897_v12 = vadd.f32 %v12133_v8, %v8790_v62  ;;  %v16899_v2 = vadd.f32 %v8791_v34, %v8211_v13  ;;  %v16901_v57 = vadd.f32 %v8792_v24, %v8212_v42  ;;  %v18854_v30 = vld [vmem:[#allocation206_spill] sm:$0xff]  ;;  %v18856_v62 = vld [vmem:[#allocation244_spill] sm:$0xff]  ;;  %v18857_v34 = vld [vmem:[#allocation245_spill] sm:$0xff] }
 0x3e5   : > { %18843 = vst [vmem:[#allocation119_spill] sm:$0xff] %v16892_v5  ;;  %v9074_v14 = vsub.f32 %v8946_v1, %v18849_v43  ;;  %v9075_v15 = vsub.f32 %v8947_v60, %v18850_v35  ;;  %v9076_v50 = vsub.f32 %v8948_v37, %v18851_v49  ;;  %v9077_v53 = vsub.f32 %v8949_v61, %v18852_v44  ;;  %v18858_v24 = vld [vmem:[#allocation247_spill] sm:$0xff]  ;;  %v18859_v54 = vld [vmem:[#allocation250_spill] sm:$0xff]  ;;  %v18860_v28 = vld [vmem:[#allocation105_spill] sm:$0xff] }
 0x3e6   : > { %18845 = vst [vmem:[#allocation149_spill] sm:$0xff] %v16895_v27  ;;  %18846 = vst [vmem:[#allocation172_spill] sm:$0xff] %v16897_v12  ;;  %v9131_v59 = vsub.f32 %v9067_v17, %v18853_v25  ;;  %v9132_v52 = vsub.f32 %v9068_v10, %v18854_v30  ;;  %v9133_v23 = vsub.f32 %v9069_v63, %v18855_v6  ;;  %v9461_v60 = vmul.f32 2.0, %v18860_v28  ;;  %v18861_v20 = vld [vmem:[#allocation106_spill] sm:$0xff]  ;;  %v18871_v4 = vld [vmem:[#allocation255_spill] sm:$0xff] }
 0x3e7   : > { %18847 = vst [vmem:[#allocation142_spill] sm:$0xff] %v16899_v2  ;;  %18848 = vst [vmem:[#allocation160_spill] sm:$0xff] %v16901_v57  ;;  %v9134_v45 = vsub.f32 %v9070_v58, %v18856_v62  ;;  %v9135_v13 = vsub.f32 %v9071_v11, %v18857_v34  ;;  %v9136_v42 = vsub.f32 %v9072_v19, %v18858_v24  ;;  %v9462_v37 = vmul.f32 2.0, %v18861_v20  ;;  %v18865_v58 = vld [vmem:[#allocation251_spill] sm:$0xff]  ;;  %v18867_v11 = vld [vmem:[#allocation252_spill] sm:$0xff] }
 0x3e8   : > { %v9137_v1 = vsub.f32 %v9073_v51, %v18859_v54  ;;  %v16923_v22 = vsub.f32 %v9074_v14, %v18865_v58  ;;  %v16926_v19 = vsub.f32 %v9075_v15, %v18867_v11  ;;  %v18869_v51 = vld [vmem:[#allocation253_spill] sm:$0xff]  ;;  %v16932_v8 = vsub.f32 %v9077_v53, %v18871_v4  ;;  %v18873_v43 = vld [vmem:[#allocation267_spill] sm:$0xff]  ;;  %v18875_v49 = vld [vmem:[#allocation268_spill] sm:$0xff] }
 0x3e9   : > { %v16929_v29 = vsub.f32 %v9076_v50, %v18869_v51  ;;  %v16935_v35 = vadd.f32 %v18873_v43, %v9131_v59  ;;  %v16938_v44 = vadd.f32 %v18875_v49, %v9132_v52  ;;  %v18877_v25 = vld [vmem:[#allocation269_spill] sm:$0xff]  ;;  %v18879_v14 = vld [vmem:[#allocation271_spill] sm:$0xff]  ;;  %v18881_v15 = vld [vmem:[#allocation272_spill] sm:$0xff] }
 0x3ea   : > { %18866 = vst [vmem:[#allocation179_spill] sm:$0xff] %v16923_v22  ;;  %18868 = vst [vmem:[#allocation126_spill] sm:$0xff] %v16926_v19  ;;  %v16941_v30 = vadd.f32 %v18877_v25, %v9133_v23  ;;  %v16944_v6 = vadd.f32 %v18879_v14, %v9134_v45  ;;  %v16947_v62 = vadd.f32 %v18881_v15, %v9135_v13  ;;  %v18883_v50 = vld [vmem:[#allocation273_spill] sm:$0xff]  ;;  %v18885_v53 = vld [vmem:[#allocation275_spill] sm:$0xff] }
 0x3eb   : > { %18870 = vst [vmem:[#allocation157_spill] sm:$0xff] %v16929_v29  ;;  %18872 = vst [vmem:[#allocation177_spill] sm:$0xff] %v16932_v8  ;;  %v16950_v34 = vadd.f32 %v18883_v50, %v9136_v42  ;;  %v16953_v24 = vadd.f32 %v18885_v53, %v9137_v1  ;;  %v18887_v59 = vld [vmem:[#allocation110_spill] sm:$0xff]  ;;  %v18888_v58 = vld [vmem:[#allocation111_spill] sm:$0xff] }
 0x3ec   : > { %18874 = vst [vmem:[#allocation153_spill] sm:$0xff] %v16935_v35  ;;  %18876 = vst [vmem:[#allocation167_spill] sm:$0xff] %v16938_v44  ;;  %v9463_v54 = vmul.f32 2.0, %v18887_v59  ;;  %v9464_v52 = vmul.f32 2.0, %v18888_v58  ;;  %v18889_v11 = vld [vmem:[#allocation29_spill] sm:$0xff]  ;;  %v18890_v51 = vld [vmem:[#allocation58_spill] sm:$0xff] }
 0x3ed   : > { %18878 = vst [vmem:[#allocation189_spill] sm:$0xff] %v16941_v30  ;;  %18880 = vst [vmem:[#allocation138_spill] sm:$0xff] %v16944_v6  ;;  %v16959_v23 = vmul.f32 %v18890_v51, %v18889_v11  ;;  %v18891_v4 = vld [vmem:[#allocation30_spill] sm:$0xff]  ;;  %v18892_v45 = vld [vmem:[#allocation59_spill] sm:$0xff] }
 0x3ee   : > { %18882 = vst [vmem:[#allocation165_spill] sm:$0xff] %v16947_v62  ;;  %18884 = vst [vmem:[#allocation184_spill] sm:$0xff] %v16950_v34  ;;  %v16963_v43 = vmul.f32 %v18892_v45, %v18891_v4  ;;  %v18893_v13 = vld [vmem:[#allocation33_spill] sm:$0xff]  ;;  %v18894_v49 = vld [vmem:[#allocation67_spill] sm:$0xff] }
 0x3ef   : > { %18886 = vst [vmem:[#allocation288_spill] sm:$0xff] %v16953_v24  ;;  %v16967_v25 = vmul.f32 %v18894_v49, %v18893_v13  ;;  %v18895_v42 = vld [vmem:[#allocation31_spill] sm:$0xff]  ;;  %v18896_v14 = vld [vmem:[#allocation68_spill] sm:$0xff]  ;;  %v18897_v15 = vld [vmem:[#allocation38_spill] sm:$0xff] }
 0x3f0   : > { %v16971_v1 = vmul.f32 %v18896_v14, %v18895_v42  ;;  %v18898_v50 = vld [vmem:[#allocation70_spill] sm:$0xff]  ;;  %v18899_v63 = vld [vmem:[#allocation35_spill] sm:$0xff]  ;;  %v18902_v61 = vld [vmem:[#allocation81_spill] sm:$0xff] }
 0x3f1   : > { %v16975_v53 = vmul.f32 %v18898_v50, %v18897_v15  ;;  %v18900_v10 = vld [vmem:[#allocation71_spill] sm:$0xff]  ;;  %v18901_v51 = vld [vmem:[#allocation42_spill] sm:$0xff]  ;;  %v18908_v56 = vld [vmem:[#allocation84_spill] sm:$0xff] }
 0x3f2   : > { %v16979_v11 = vmul.f32 %v18900_v10, %v18899_v63  ;;  %v16983_v4 = vmul.f32 %v18902_v61, %v18901_v51  ;;  %v18904_v45 = vld [vmem:[#allocation39_spill] sm:$0xff]  ;;  %v18905_v8 = vld [vmem:[#allocation74_spill] sm:$0xff]  ;;  %v18910_v14 = vld [vmem:[#allocation44_spill] sm:$0xff] }
 0x3f3   : > { %v16987_v13 = vmul.f32 %v18905_v8, %v18904_v45  ;;  %v18907_v49 = vld [vmem:[#allocation46_spill] sm:$0xff]  ;;  %v18913_v50 = vld [vmem:[#allocation48_spill] sm:$0xff]  ;;  %v18914_v29 = vld [vmem:[#allocation9_spill] sm:$0xff] }
 0x3f4   : > { %18903 = vst [vmem:[#allocation199_spill] sm:$0xff] %v16983_v4  ;;  %v16991_v42 = vmul.f32 %v18908_v56, %v18907_v49  ;;  %v18911_v57 = vld [vmem:[#allocation82_spill] sm:$0xff]  ;;  %v16999_v10 = vmul.f32 %v18914_v29, %v18913_v50  ;;  %v18916_v63 = vld [vmem:[#allocation47_spill] sm:$0xff]  ;;  %v18919_v51 = vld [vmem:[#allocation52_spill] sm:$0xff] }
 0x3f5   : > { %18906 = vst [vmem:[#allocation168_spill] sm:$0xff] %v16987_v13  ;;  %v16995_v15 = vmul.f32 %v18911_v57, %v18910_v14  ;;  %v18917_v19 = vld [vmem:[#allocation19_spill] sm:$0xff]  ;;  %v18922_v45 = vld [vmem:[#allocation49_spill] sm:$0xff]  ;;  %v18923_v2 = vld [vmem:[#allocation12_spill] sm:$0xff] }
 0x3f6   : > { %18909 = vst [vmem:[#allocation176_spill] sm:$0xff] %v16991_v42  ;;  %18915 = vst [vmem:[#allocation120_spill] sm:$0xff] %v16999_v10  ;;  %v17003_v61 = vmul.f32 %v18917_v19, %v18916_v63  ;;  %v18920_v17 = vld [vmem:[#allocation11_spill] sm:$0xff]  ;;  %v17011_v56 = vmul.f32 %v18923_v2, %v18922_v45  ;;  %v18925_v49 = vld [vmem:[#allocation56_spill] sm:$0xff] }
 0x3f7   : > { %18912 = vst [vmem:[#allocation195_spill] sm:$0xff] %v16995_v15  ;;  %v17007_v8 = vmul.f32 %v18920_v17, %v18919_v51  ;;  %v18926_v24 = vld [vmem:[#allocation95_spill] sm:$0xff]  ;;  %v18928_v14 = vld [vmem:[#allocation53_spill] sm:$0xff]  ;;  %v18929_v34 = vld [vmem:[#allocation108_spill] sm:$0xff] }
 0x3f8   : > { %18918 = vst [vmem:[#allocation221_spill] sm:$0xff] %v17003_v61  ;;  %18924 = vst [vmem:[#allocation212_spill] sm:$0xff] %v17011_v56  ;;  %v17015_v57 = vmul.f32 %v18926_v24, %v18925_v49  ;;  %v17019_v29 = vmul.f32 %v18929_v34, %v18928_v14  ;;  %v18931_v50 = vld [vmem:[#allocation60_spill] sm:$0xff]  ;;  %v18932_v22 = vld [vmem:[#allocation114_spill] sm:$0xff] }
 0x3f9   : > { %18921 = vst [vmem:[#allocation122_spill] sm:$0xff] %v17007_v8  ;;  %v17023_v19 = vmul.f32 %v18932_v22, %v18931_v50  ;;  %v18934_v63 = vld [vmem:[#allocation61_spill] sm:$0xff]  ;;  %v18939_v45 = vld [vmem:[#allocation63_spill] sm:$0xff]  ;;  %v18945_v50 = vld [vmem:[#allocation14_spill] sm:$0xff] }
 0x3fa   : > { %18927 = vst [vmem:[#allocation124_spill] sm:$0xff] %v17015_v57  ;;  %18930 = vst [vmem:[#allocation222_spill] sm:$0xff] %v17019_v29  ;;  %v18935_v38 = vld [vmem:[#allocation117_spill] sm:$0xff]  ;;  %v17035_v24 = vmul.f32 %v16796_v3, %v18939_v45  ;;  %v18941_v49 = vld [vmem:[#allocation75_spill] sm:$0xff] }
 0x3fb   : > { %18933 = vst [vmem:[#allocation127_spill] sm:$0xff] %v17023_v19  ;;  %v17027_v17 = vmul.f32 %v18935_v38, %v18934_v63  ;;  %v18937_v51 = vld [vmem:[#allocation65_spill] sm:$0xff]  ;;  %v17039_v34 = vmul.f32 %v16805_v41, %v18941_v49  ;;  %v18943_v14 = vld [vmem:[#allocation83_spill] sm:$0xff]  ;;  %v17047_v38 = vmul.f32 %v16830_v31, %v18945_v50  ;;  %v18951_v45 = vld [vmem:[#allocation96_spill] sm:$0xff] }
 0x3fc   : > { %v17031_v2 = vmul.f32 %v16793_v46, %v18937_v51  ;;  %18940 = vst [vmem:[#allocation224_spill] sm:$0xff] %v17035_v24  ;;  %v17043_v22 = vmul.f32 %v16817_v18, %v18943_v14  ;;  %v18947_v63 = vld [vmem:[#allocation13_spill] sm:$0xff]  ;;  %v18949_v51 = vld [vmem:[#allocation94_spill] sm:$0xff]  ;;  %v17059_v41 = vmul.f32 %v16858_v48, %v18951_v45  ;;  %v18957_v50 = vld [vmem:[#allocation15_spill] sm:$0xff] }
 0x3fd   : > { %18936 = vst [vmem:[#allocation123_spill] sm:$0xff] %v17027_v17  ;;  %18942 = vst [vmem:[#allocation130_spill] sm:$0xff] %v17039_v34  ;;  %v17051_v46 = vmul.f32 %v16833_v36, %v18947_v63  ;;  %v17055_v3 = vmul.f32 %v16847_v40, %v18949_v51  ;;  %v18953_v49 = vld [vmem:[#allocation21_spill] sm:$0xff]  ;;  %v17070_v12 = vmul.f32 %v9461_v60, %v18957_v50  ;;  %v18959_v36 = vld [vmem:[#allocation16_spill] sm:$0xff] }
 0x3fe   : > { %18938 = vst [vmem:[#allocation115_spill] sm:$0xff] %v17031_v2  ;;  %18944 = vst [vmem:[#allocation135_spill] sm:$0xff] %v17043_v22  ;;  %v17063_v18 = vmul.f32 %v16878_v26, %v18953_v49  ;;  %v18955_v14 = vld [vmem:[#allocation17_spill] sm:$0xff]  ;;  %v17073_v63 = vmul.f32 %v9462_v37, %v18959_v36  ;;  %v18961_v40 = vld [vmem:[#allocation22_spill] sm:$0xff] }
 0x3ff   : > { %18946 = vst [vmem:[#allocation187_spill] sm:$0xff] %v17047_v38  ;;  %18948 = vst [vmem:[#allocation225_spill] sm:$0xff] %v17051_v46  ;;  %v17067_v31 = vmul.f32 %v16882_v21, %v18955_v14  ;;  %v17076_v51 = vmul.f32 %v9463_v54, %v18961_v40  ;;  %v18963_v62 = vld [vmem:[#allocation18_spill] sm:$0xff]  ;;  %v18965_v45 = vld [vmem:[#allocation249_spill] sm:$0xff] }
 0x400   : > { %18950 = vst [vmem:[#allocation131_spill] sm:$0xff] %v17055_v3  ;;  %18952 = vst [vmem:[#allocation125_spill] sm:$0xff] %v17059_v41  ;;  %v17079_v48 = vmul.f32 %v9464_v52, %v18963_v62  ;;  %v18966_v49 = vld [vmem:[#allocation241_spill] sm:$0xff]  ;;  %v18967_v21 = vld [vmem:[#allocation256_spill] sm:$0xff] }
 0x401   : > { %18954 = vst [vmem:[#allocation136_spill] sm:$0xff] %v17063_v18  ;;  %18956 = vst [vmem:[#allocation134_spill] sm:$0xff] %v17067_v31  ;;  %v18968_v60 = vld [vmem:[#allocation254_spill] sm:$0xff]  ;;  %v18970_v54 = vld [vmem:[#allocation229_spill] sm:$0xff] }
 0x402   : > { %18958 = vst [vmem:[#allocation132_spill] sm:$0xff] %v17070_v12  ;;  %18960 = vst [vmem:[#allocation292_spill] sm:$0xff] %v17073_v63  ;;  %v18969_v37 = vld [vmem:[#allocation230_spill] sm:$0xff]  ;;  %v18997_v10 = vld [vmem:[#allocation36_spill] sm:$0xff] }
 0x403   : > { %18962 = vst [vmem:[#allocation146_spill] sm:$0xff] %v17076_v51  ;;  %18964 = vst [vmem:[#allocation143_spill] sm:$0xff] %v17079_v48  ;;  %v9529_v2 = vmul.f32 %v18997_v10, %v18997_v10  ;;  %v18998_v41 = vld [vmem:[#allocation34_spill] sm:$0xff]  ;;  %v18999_v18 = vld [vmem:[#allocation40_spill] sm:$0xff] }
 0x404   : > { %v9530_v24 = vmul.f32 %v18998_v41, %v18998_v41  ;;  %v9531_v34 = vmul.f32 %v18999_v18, %v18999_v18  ;;  %v19000_v31 = vld [vmem:[#allocation37_spill] sm:$0xff]  ;;  %v19001_v12 = vld [vmem:[#allocation43_spill] sm:$0xff]  ;;  %v19003_v51 = vld [vmem:[#allocation50_spill] sm:$0xff] }
 0x405   : > { %v9532_v22 = vmul.f32 %v19000_v31, %v19000_v31  ;;  %v9533_v38 = vmul.f32 %v19001_v12, %v19001_v12  ;;  %v19002_v63 = vld [vmem:[#allocation41_spill] sm:$0xff]  ;;  %v9535_v3 = vmul.f32 %v19003_v51, %v19003_v51  ;;  %v19005_v17 = vld [vmem:[#allocation54_spill] sm:$0xff]  ;;  %v19006_v19 = vld [vmem:[#allocation51_spill] sm:$0xff]  ;;  %v9561_v5 = vmul.f32 729.0, %v9529_v2 }
 0x406   : > { %v9534_v46 = vmul.f32 %v19002_v63, %v19002_v63  ;;  %v19004_v48 = vld [vmem:[#allocation45_spill] sm:$0xff]  ;;  %v9537_v41 = vmul.f32 %v19005_v17, %v19005_v17  ;;  %v9538_v18 = vmul.f32 %v19006_v19, %v19006_v19  ;;  %v19008_v57 = vld [vmem:[#allocation55_spill] sm:$0xff]  ;;  %v19009_v56 = vld [vmem:[#allocation64_spill] sm:$0xff]  ;;  %v9563_v27 = vmul.f32 729.0, %v9531_v34 }
 0x407   : > { %v9536_v10 = vmul.f32 %v19004_v48, %v19004_v48  ;;  %v19007_v29 = vld [vmem:[#allocation57_spill] sm:$0xff]  ;;  %v9540_v12 = vmul.f32 %v19008_v57, %v19008_v57  ;;  %v9541_v63 = vmul.f32 %v19009_v56, %v19009_v56  ;;  %v19010_v8 = vld [vmem:[#allocation62_spill] sm:$0xff]  ;;  %v19013_v42 = vld [vmem:[#allocation72_spill] sm:$0xff]  ;;  %v9547_v57 = vmul.f32 %v18796_v16, %v18796_v16 }
 0x408   : > { %v9539_v31 = vmul.f32 %v19007_v29, %v19007_v29  ;;  %v9542_v51 = vmul.f32 %v19010_v8, %v19010_v8  ;;  %v19011_v61 = vld [vmem:[#allocation69_spill] sm:$0xff]  ;;  %v19012_v15 = vld [vmem:[#allocation66_spill] sm:$0xff]  ;;  %v9545_v19 = vmul.f32 %v19013_v42, %v19013_v42  ;;  %v9548_v56 = vmul.f32 %v18797_v47, %v18797_v47  ;;  %v19015_v4 = vld [vmem:[#allocation99_spill] sm:$0xff] }
 0x409   : > { %v9543_v48 = vmul.f32 %v19011_v61, %v19011_v61  ;;  %v9544_v17 = vmul.f32 %v19012_v15, %v19012_v15  ;;  %v19014_v13 = vld [vmem:[#allocation73_spill] sm:$0xff]  ;;  %v9549_v8 = vmul.f32 %v18802_v9, %v18802_v9  ;;  %v9550_v61 = vmul.f32 %v18805_v55, %v18805_v55  ;;  %v19016_v0 = vld [vmem:[#allocation100_spill] sm:$0xff] }
 0x40a   : > { %v9546_v29 = vmul.f32 %v19014_v13, %v19014_v13  ;;  %v9551_v15 = vmul.f32 %v18812_v33, %v18812_v33  ;;  %v9552_v42 = vmul.f32 %v18813_v32, %v18813_v32  ;;  %v9553_v13 = vmul.f32 %v19015_v4, %v19015_v4 }
 0x40b   : > { %v9554_v16 = vmul.f32 %v19016_v0, %v19016_v0  ;;  %v9555_v47 = vmul.f32 %v18832_v39, %v18832_v39  ;;  %v9556_v9 = vmul.f32 %v18834_v7, %v18834_v7  ;;  %v9557_v55 = vmul.f32 %v18860_v28, %v18860_v28 }
 0x40c   : > { %v9558_v33 = vmul.f32 %v18861_v20, %v18861_v20  ;;  %v9559_v32 = vmul.f32 %v18887_v59, %v18887_v59  ;;  %v9560_v4 = vmul.f32 %v18888_v58, %v18888_v58  ;;  %v9562_v0 = vmul.f32 729.0, %v9530_v24 }
 0x40d   : > { %v9564_v35 = vmul.f32 729.0, %v9532_v22  ;;  %v9565_v39 = vmul.f32 729.0, %v9533_v38  ;;  %v9566_v44 = vmul.f32 729.0, %v9534_v46  ;;  %v9567_v30 = vmul.f32 729.0, %v9535_v3 }
 0x40e   : > { %v9568_v7 = vmul.f32 729.0, %v9536_v10  ;;  %v9569_v52 = vmul.f32 729.0, %v9537_v41  ;;  %v9570_v40 = vmul.f32 729.0, %v9538_v18  ;;  %v9571_v28 = vmul.f32 729.0, %v9539_v31 }
 0x40f   : > { %v9572_v36 = vmul.f32 729.0, %v9540_v12  ;;  %v9573_v50 = vmul.f32 729.0, %v9541_v63  ;;  %v9574_v20 = vmul.f32 729.0, %v9542_v51  ;;  %v9575_v14 = vmul.f32 729.0, %v9543_v48  ;;  %v19020_v48 = vld [vmem:[#allocation28_spill] sm:$0xff] }
 0x410   : > { %v9576_v6 = vmul.f32 729.0, %v9544_v17  ;;  %v9577_v59 = vmul.f32 729.0, %v9545_v19  ;;  %v9578_v26 = vmul.f32 729.0, %v9546_v29  ;;  %v9579_v62 = vmul.f32 729.0, %v9547_v57 }
 0x411   : > { %v9580_v58 = vmul.f32 729.0, %v9548_v56  ;;  %v9581_v2 = vmul.f32 729.0, %v9549_v8  ;;  %v9582_v24 = vmul.f32 729.0, %v9550_v61  ;;  %v9583_v34 = vmul.f32 729.0, %v9551_v15  ;;  %v19024_v61 = vld [vmem:[#allocation220_spill] sm:$0xff] }
 0x412   : > { %v19017_v22 = vsub.f32 %v18965_v45, %v16959_v23  ;;  %v9584_v46 = vmul.f32 729.0, %v9552_v42  ;;  %v9585_v3 = vmul.f32 729.0, %v9553_v13  ;;  %v9586_v10 = vmul.f32 729.0, %v9554_v16  ;;  %v19021_v23 = vld [vmem:[#allocation219_spill] sm:$0xff] }
 0x413   : > { %v19018_v41 = vsub.f32 %v18966_v49, %v16963_v43  ;;  %v9587_v31 = vmul.f32 729.0, %v9555_v47  ;;  %v9588_v12 = vmul.f32 729.0, %v9556_v9  ;;  %v19019_v63 = vsub.f32 %v18967_v21, %v16967_v25  ;;  %v19026_v21 = vld [vmem:[#allocation261_spill] sm:$0xff]  ;;  %v19027_v42 = vld [vmem:[#allocation199_spill] sm:$0xff]  ;;  %v19029_v47 = vld [vmem:[#allocation260_spill] sm:$0xff] }
 0x414   : > { %v9593_v38 = vadd.f32 %v9561_v5, %v19017_v22  ;;  %v9589_v19 = vmul.f32 729.0, %v9557_v55  ;;  %v9590_v29 = vmul.f32 729.0, %v9558_v33  ;;  %v9591_v57 = vmul.f32 729.0, %v9559_v32  ;;  %v19030_v9 = vld [vmem:[#allocation168_spill] sm:$0xff] }
 0x415   : > { %v9594_v18 = vadd.f32 %v9562_v0, %v19018_v41  ;;  %v9595_v51 = vadd.f32 %v9563_v27, %v19019_v63  ;;  %v9592_v45 = vmul.f32 729.0, %v9560_v4  ;;  %v19022_v56 = vsub.f32 %v18968_v60, %v16971_v1  ;;  %v19032_v1 = vld [vmem:[#allocation264_spill] sm:$0xff]  ;;  %v19044_v63 = vld [vmem:[#allocation274_spill] sm:$0xff] }
 0x416   : > { %v9625_v17 = vmul.f32 %v9593_v38, %v19020_v48  ;;  %v19023_v43 = vsub.f32 %v18969_v37, %v16975_v53  ;;  %v19025_v27 = vsub.f32 %v18970_v54, %v16979_v11  ;;  %v19028_v13 = vsub.f32 %v19026_v21, %v19027_v42  ;;  %v19035_v53 = vld [vmem:[#allocation263_spill] sm:$0xff]  ;;  %v19039_v22 = vld [vmem:[#allocation120_spill] sm:$0xff]  ;;  %v19041_v54 = vld [vmem:[#allocation265_spill] sm:$0xff] }
 0x417   : > { %v9626_v5 = vmul.f32 %v9594_v18, %v19021_v23  ;;  %v9596_v8 = vadd.f32 %v9564_v35, %v19022_v56  ;;  %v9627_v15 = vmul.f32 %v9595_v51, %v19024_v61  ;;  %v19031_v55 = vsub.f32 %v19029_v47, %v19030_v9  ;;  %v19033_v35 = vld [vmem:[#allocation176_spill] sm:$0xff]  ;;  %v19036_v37 = vld [vmem:[#allocation195_spill] sm:$0xff]  ;;  %v19042_v38 = vld [vmem:[#allocation221_spill] sm:$0xff] }
 0x418   : > { %v9597_v49 = vadd.f32 %v9565_v39, %v19023_v43  ;;  %v9598_v25 = vadd.f32 %v9566_v44, %v19025_v27  ;;  %v9599_v16 = vadd.f32 %v9567_v30, %v19028_v13  ;;  %v19034_v60 = vsub.f32 %v19032_v1, %v19033_v35  ;;  %v19038_v39 = vld [vmem:[#allocation266_spill] sm:$0xff]  ;;  %v19050_v61 = vld [vmem:[#allocation223_spill] sm:$0xff]  ;;  %v19051_v21 = vld [vmem:[#allocation281_spill] sm:$0xff] }
 0x419   : > { %v9600_v33 = vadd.f32 %v9568_v7, %v19031_v55  ;;  %v19037_v4 = vsub.f32 %v19035_v53, %v19036_v37  ;;  %v19040_v11 = vsub.f32 %v19038_v39, %v19039_v22  ;;  %v19043_v41 = vsub.f32 %v19041_v54, %v19042_v38  ;;  %v19045_v7 = vld [vmem:[#allocation122_spill] sm:$0xff]  ;;  %v19057_v55 = vld [vmem:[#allocation112_spill] sm:$0xff]  ;;  %v19064_v39 = vld [vmem:[#allocation287_spill] sm:$0xff] }
 0x41a   : > { %v9601_v32 = vadd.f32 %v9569_v52, %v19034_v60  ;;  %v17248_v18 = vadd.f32 1e-05, %v9625_v17  ;;  %v19046_v51 = vsub.f32 %v19044_v63, %v19045_v7  ;;  %v19047_v23 = vld [vmem:[#allocation270_spill] sm:$0xff]  ;;  %v19048_v52 = vld [vmem:[#allocation212_spill] sm:$0xff]  ;;  %v17257_v27 = vadd.f32 1e-05, %v9626_v5 }
 0x41b   : > { %v9602_v0 = vadd.f32 %v9570_v40, %v19037_v4  ;;  %v9603_v44 = vadd.f32 %v9571_v28, %v19040_v11  ;;  %v9604_v30 = vadd.f32 %v9572_v36, %v19043_v41  ;;  %v19049_v56 = vsub.f32 %v19047_v23, %v19048_v52  ;;  %v19052_v28 = vld [vmem:[#allocation124_spill] sm:$0xff]  ;;  %v19054_v47 = vld [vmem:[#allocation282_spill] sm:$0xff]  ;;  %v19059_v60 = vld [vmem:[#allocation127_spill] sm:$0xff] }
 0x41c   : > { %v9605_v48 = vadd.f32 %v9573_v50, %v19046_v51  ;;  %v9628_v40 = vmul.f32 %v9596_v8, %v19050_v61  ;;  %v19053_v42 = vsub.f32 %v19051_v21, %v19052_v28  ;;  %v19055_v36 = vld [vmem:[#allocation222_spill] sm:$0xff]  ;;  %v9629_v1 = vmul.f32 %v9597_v49, %v19057_v55  ;;  %v19058_v50 = vld [vmem:[#allocation285_spill] sm:$0xff]  ;;  %v19061_v37 = vld [vmem:[#allocation284_spill] sm:$0xff] }
 0x41d   : > { %v9606_v43 = vadd.f32 %v9574_v20, %v19049_v56  ;;  %v19056_v17 = vsub.f32 %v19054_v47, %v19055_v36  ;;  %v17266_v35 = vadd.f32 1e-05, %v9627_v15  ;;  %v19060_v53 = vsub.f32 %v19058_v50, %v19059_v60  ;;  %v19062_v8 = vld [vmem:[#allocation123_spill] sm:$0xff]  ;;  %v19067_v54 = vld [vmem:[#allocation286_spill] sm:$0xff]  ;;  %v19068_v38 = vld [vmem:[#allocation224_spill] sm:$0xff] }
 0x41e   : > { %v9607_v13 = vadd.f32 %v9575_v14, %v19053_v42  ;;  %v19063_v5 = vsub.f32 %v19061_v37, %v19062_v8  ;;  %v19065_v22 = vld [vmem:[#allocation115_spill] sm:$0xff]  ;;  %v19069_v41 = vsub.f32 %v19067_v54, %v19068_v38  ;;  %v19071_v49 = vld [vmem:[#allocation130_spill] sm:$0xff]  ;;  %v19073_v51 = vld [vmem:[#allocation296_spill] sm:$0xff]  ;;  %12040 = vrcp.f32 %v17248_v18 }
 0x41f   : > { %v9608_v9 = vadd.f32 %v9576_v6, %v19056_v17  ;;  %v9609_v20 = vadd.f32 %v9577_v59, %v19060_v53  ;;  %v19066_v11 = vsub.f32 %v19064_v39, %v19065_v22  ;;  %v19070_v63 = vld [vmem:[#allocation295_spill] sm:$0xff]  ;;  %v19076_v56 = vld [vmem:[#allocation92_spill] sm:$0xff]  ;;  %v19079_v28 = vld [vmem:[#allocation301_spill] sm:$0xff]  ;;  %v17294_v17 = vadd.f32 1e-05, %v9628_v40 }
 0x420   : > { %v9610_v4 = vadd.f32 %v9578_v26, %v19063_v5  ;;  %v9612_v6 = vadd.f32 %v9580_v58, %v19069_v41  ;;  %v19072_v15 = vsub.f32 %v19070_v63, %v19071_v49  ;;  %v19074_v23 = vld [vmem:[#allocation135_spill] sm:$0xff]  ;;  %v19082_v36 = vld [vmem:[#allocation213_spill] sm:$0xff]  ;;  %12042 = vrcp.f32 %v17257_v27  ;;  %v19090_v39 = vld [vmem:[#allocation20_spill] sm:$0xff] }
 0x421   : > { %v9611_v14 = vadd.f32 %v9579_v62, %v19066_v11  ;;  %v19075_v52 = vsub.f32 %v19073_v51, %v19074_v23  ;;  %v19077_v61 = vld [vmem:[#allocation187_spill] sm:$0xff]  ;;  %v19080_v62 = vld [vmem:[#allocation225_spill] sm:$0xff]  ;;  %v9630_v58 = vmul.f32 %v9598_v25, %v19082_v36  ;;  %v17301_v37 = vadd.f32 1e-05, %v9629_v1  ;;  %v19091_v25 = vld [vmem:[#allocation136_spill] sm:$0xff] }
 0x422   : > { %v9613_v7 = vadd.f32 %v9581_v2, %v19072_v15  ;;  %v19078_v21 = vsub.f32 %v19076_v56, %v19077_v61  ;;  %v19081_v42 = vsub.f32 %v19079_v28, %v19080_v62  ;;  %v19083_v2 = vld [vmem:[#allocation302_spill] sm:$0xff]  ;;  %v19084_v55 = vld [vmem:[#allocation131_spill] sm:$0xff]  ;;  %12044 = vrcp.f32 %v17266_v35  ;;  %v19088_v8 = vld [vmem:[#allocation125_spill] sm:$0xff] }
 0x423   : > { %v9614_v59 = vadd.f32 %v9582_v24, %v19075_v52  ;;  %v19085_v50 = vsub.f32 %v19083_v2, %v19084_v55  ;;  %v19086_v60 = vld [vmem:[#allocation211_spill] sm:$0xff]  ;;  %v19092_v40 = vsub.f32 %v19090_v39, %v19091_v25  ;;  %v19093_v11 = vld [vmem:[#allocation304_spill] sm:$0xff]  ;;  %v19094_v54 = vld [vmem:[#allocation134_spill] sm:$0xff]  ;;  %12046 = vrcp.f32 %v17294_v17 }
 0x424   : > { %v9615_v26 = vadd.f32 %v9583_v34, %v19078_v21  ;;  %v9616_v47 = vadd.f32 %v9584_v46, %v19081_v42  ;;  %v9631_v53 = vmul.f32 %v9599_v16, %v19086_v60  ;;  %v19087_v34 = vld [vmem:[#allocation303_spill] sm:$0xff]  ;;  %v19095_v38 = vsub.f32 %v19093_v11, %v19094_v54  ;;  %v19096_v63 = vld [vmem:[#allocation305_spill] sm:$0xff]  ;;  %v19100_v15 = vld [vmem:[#allocation292_spill] sm:$0xff] }
 0x425   : > { %v9617_v24 = vadd.f32 %v9585_v3, %v19085_v50  ;;  %v19089_v5 = vsub.f32 %v19087_v34, %v19088_v8  ;;  %v9619_v22 = vadd.f32 %v9587_v31, %v19092_v40  ;;  %v19097_v3 = vld [vmem:[#allocation132_spill] sm:$0xff]  ;;  %v19099_v1 = vld [vmem:[#allocation91_spill] sm:$0xff]  ;;  %v19102_v52 = vld [vmem:[#allocation306_spill] sm:$0xff]  ;;  %v17328_v60 = vadd.f32 1e-05, %v9630_v58 }
 0x426   : > { %v9620_v41 = vadd.f32 %v9588_v12, %v19095_v38  ;;  %v19098_v49 = vsub.f32 %v19096_v63, %v19097_v3  ;;  %v19101_v51 = vsub.f32 %v19099_v1, %v19100_v15  ;;  %v19103_v56 = vld [vmem:[#allocation146_spill] sm:$0xff]  ;;  %v19105_v21 = vld [vmem:[#allocation307_spill] sm:$0xff]  ;;  %v19108_v42 = vld [vmem:[#allocation24_spill] sm:$0xff]  ;;  %12048 = vrcp.f32 %v17301_v37 }
 0x427   : > { %v9618_v46 = vadd.f32 %v9586_v10, %v19089_v5  ;;  %v19104_v61 = vsub.f32 %v19102_v52, %v19103_v56  ;;  %v19106_v28 = vld [vmem:[#allocation143_spill] sm:$0xff]  ;;  %v9632_v36 = vmul.f32 %v9600_v33, %v19108_v42  ;;  %v19112_v34 = vld [vmem:[#allocation289_spill] sm:$0xff]  ;;  %v17333_v5 = vadd.f32 1e-05, %v9631_v53  ;;  %v19115_v25 = vld [vmem:[#allocation290_spill] sm:$0xff] }
 0x428   : > { %v9621_v16 = vadd.f32 %v9589_v19, %v19098_v49  ;;  %v9622_v23 = vadd.f32 %v9590_v29, %v19101_v51  ;;  %v19107_v62 = vsub.f32 %v19105_v21, %v19106_v28  ;;  %v19109_v2 = vld [vmem:[#allocation23_spill] sm:$0xff]  ;;  %v19111_v19 = vld [vmem:[#allocation25_spill] sm:$0xff]  ;;  %v9636_v8 = vmul.f32 %v9604_v30, %v19112_v34  ;;  %v19116_v40 = vld [vmem:[#allocation10_spill] sm:$0xff] }
 0x429   : > { %v9623_v10 = vadd.f32 %v9591_v57, %v19104_v61  ;;  %v9633_v12 = vmul.f32 %v9601_v32, %v19109_v2  ;;  %v19110_v55 = vld [vmem:[#allocation171_spill] sm:$0xff]  ;;  %v9635_v29 = vmul.f32 %v9603_v44, %v19111_v19  ;;  %v19113_v57 = vld [vmem:[#allocation26_spill] sm:$0xff]  ;;  %v9639_v32 = vmul.f32 %v9607_v13, %v19115_v25  ;;  %v19118_v54 = vld [vmem:[#allocation293_spill] sm:$0xff] }
 0x42a   : > { %v9624_v31 = vadd.f32 %v9592_v45, %v19107_v62  ;;  %v9634_v50 = vmul.f32 %v9602_v0, %v19110_v55  ;;  %v9637_v45 = vmul.f32 %v9605_v48, %v19113_v57  ;;  %v19114_v39 = vld [vmem:[#allocation215_spill] sm:$0xff]  ;;  %v9640_v0 = vmul.f32 %v9608_v9, %v19116_v40  ;;  %v19117_v58 = vld [vmem:[#allocation214_spill] sm:$0xff]  ;;  %v19119_v63 = vld [vmem:[#allocation121_spill] sm:$0xff]  ;;  %v12041_v48 = vpop.eup %12040 }
 0x42b   : > { %v9638_v33 = vmul.f32 %v9606_v43, %v19114_v39  ;;  %v9641_v11 = vmul.f32 %v9609_v20, %v19117_v58  ;;  %v9642_v38 = vmul.f32 %v9610_v4, %v19118_v54  ;;  %v9643_v44 = vmul.f32 %v9611_v14, %v19119_v63  ;;  %v19120_v3 = vld [vmem:[#allocation291_spill] sm:$0xff]  ;;  %v19121_v53 = vld [vmem:[#allocation232_spill] sm:$0xff]  ;;  %v19123_v43 = vld [vmem:[#allocation102_spill] sm:$0xff]  ;;  %v12043_v4 = vpop.eup %12042 }
 0x42c   : > { %v9644_v30 = vmul.f32 %v9612_v6, %v19120_v3  ;;  %v9645_v49 = vmul.f32 %v9613_v7, %v19121_v53  ;;  %v19122_v1 = vld [vmem:[#allocation183_spill] sm:$0xff]  ;;  %v17346_v51 = vadd.f32 1e-05, %v9632_v36  ;;  %12050 = vrcp.f32 %v17328_v60  ;;  %v19124_v9 = vld [vmem:[#allocation246_spill] sm:$0xff]  ;;  %v19125_v14 = vld [vmem:[#allocation297_spill] sm:$0xff]  ;;  %v12045_v62 = vpop.eup %12044 }
 0x42d   : > { %v9646_v15 = vmul.f32 %v9614_v59, %v19122_v1  ;;  %v9647_v13 = vmul.f32 %v9615_v26, %v19123_v43  ;;  %v9648_v52 = vmul.f32 %v9616_v47, %v19124_v9  ;;  %v17351_v20 = vadd.f32 1e-05, %v9633_v12  ;;  %v19126_v56 = vld [vmem:[#allocation294_spill] sm:$0xff]  ;;  %v19127_v61 = vld [vmem:[#allocation216_spill] sm:$0xff]  ;;  %v19130_v2 = vld [vmem:[#allocation217_spill] sm:$0xff] }
 0x42e   : > { %12052 = vrcp.f32 %v17333_v5  ;;  %v9649_v6 = vmul.f32 %v9617_v24, %v19125_v14  ;;  %v9650_v7 = vmul.f32 %v9618_v46, %v19126_v56  ;;  %v9651_v59 = vmul.f32 %v9619_v22, %v19127_v61  ;;  %v19128_v21 = vld [vmem:[#allocation248_spill] sm:$0xff]  ;;  %v19129_v42 = vld [vmem:[#allocation118_spill] sm:$0xff]  ;;  %v19131_v55 = vld [vmem:[#allocation133_spill] sm:$0xff] }
 0x42f   : > { %v9652_v28 = vmul.f32 %v9620_v41, %v19128_v21  ;;  %v9653_v36 = vmul.f32 %v9621_v16, %v19129_v42  ;;  %v9654_v26 = vmul.f32 %v9622_v23, %v19130_v2  ;;  %v9655_v47 = vmul.f32 %v9623_v10, %v19131_v55  ;;  %v19132_v12 = vld [vmem:[#allocation128_spill] sm:$0xff]  ;;  %v12047_v16 = vpop.eup %12046  ;;  %v19135_v43 = vld [vmem:[#allocation298_spill] sm:$0xff]  ;;  %v19136_v42 = vld [vmem:[#allocation107_spill] sm:$0xff] }
 0x430   : > { %v9656_v19 = vmul.f32 %v9624_v31, %v19132_v12  ;;  %v17362_v34 = vadd.f32 1e-05, %v9634_v50  ;;  %v17364_v57 = vadd.f32 1e-05, %v9635_v29  ;;  %v17366_v24 = vadd.f32 1e-05, %v9636_v8  ;;  %v12049_v29 = vpop.eup %12048 }
 0x431   : > { %12054 = vrcp.f32 %v17346_v51  ;;  %v17369_v46 = vadd.f32 1e-05, %v9637_v45  ;;  %v17371_v22 = vadd.f32 1e-05, %v9638_v33  ;;  %v9721_v41 = vmul.f32 %v12041_v48, %v17248_v18  ;;  %v19133_v33 = vld [vmem:[#allocation109_spill] sm:$0xff]  ;;  %v19137_v2 = vld [vmem:[#allocation116_spill] sm:$0xff] }
 0x432   : > { %12056 = vrcp.f32 %v17351_v20  ;;  %v17375_v23 = vadd.f32 1e-05, %v9639_v32  ;;  %v17377_v10 = vadd.f32 1e-05, %v9640_v0  ;;  %v9722_v31 = vmul.f32 %v12043_v4, %v17257_v27 }
 0x433   : > { %v9723_v50 = vmul.f32 %v12045_v62, %v17266_v35  ;;  %v17381_v8 = vadd.f32 1e-05, %v9641_v11  ;;  %v17383_v45 = vadd.f32 1e-05, %v9642_v38  ;;  %v17385_v39 = vadd.f32 1e-05, %v9643_v44 }
 0x434   : > { %v9817_v25 = vmul.f32 %v19133_v33, %v19133_v33  ;;  %v17389_v18 = vadd.f32 1e-05, %v9644_v30  ;;  %v17391_v32 = vadd.f32 1e-05, %v9645_v49  ;;  %v17393_v40 = vadd.f32 1e-05, %v9646_v15 }
 0x435   : > { %12058 = vrcp.f32 %v17362_v34  ;;  %v17396_v27 = vadd.f32 1e-05, %v9647_v13  ;;  %v9724_v35 = vmul.f32 %v12047_v16, %v17294_v17  ;;  %v9753_v0 = vsub.f32 2.0, %v9721_v41  ;;  %v19134_v49 = vld [vmem:[#allocation103_spill] sm:$0xff] }
 0x436   : > { %12060 = vrcp.f32 %v17364_v57  ;;  %v12051_v58 = vpop.eup %12050  ;;  %v17400_v11 = vadd.f32 1e-05, %v9648_v52  ;;  %v9725_v54 = vmul.f32 %v12049_v29, %v17301_v37  ;;  %v9754_v38 = vsub.f32 2.0, %v9722_v31 }
 0x437   : > { %v9755_v63 = vsub.f32 2.0, %v9723_v50  ;;  %v17403_v3 = vadd.f32 1e-05, %v9649_v6  ;;  %v17405_v30 = vadd.f32 1e-05, %v9650_v7  ;;  %v9818_v1 = vmul.f32 %v19134_v49, %v19134_v49 }
 0x438   : > { %v12053_v44 = vpop.eup %12052  ;;  %v17407_v53 = vadd.f32 1e-05, %v9651_v59  ;;  %v17411_v15 = vadd.f32 1e-05, %v9652_v28  ;;  %v17413_v17 = vadd.f32 1e-05, %v9653_v36  ;;  %12062 = vrcp.f32 %v17366_v24 }
 0x439   : > { %v9819_v37 = vmul.f32 %v19135_v43, %v19135_v43  ;;  %12064 = vrcp.f32 %v17369_v46  ;;  %v9726_v13 = vmul.f32 %v12051_v58, %v17328_v60  ;;  %v9756_v9 = vsub.f32 2.0, %v9724_v35  ;;  %v19138_v35 = vld [vmem:[#allocation299_spill] sm:$0xff] }
 0x43a   : > { %v9785_v52 = vmul.f32 %v12041_v48, %v9753_v0  ;;  %v9727_v6 = vmul.f32 %v12053_v44, %v17333_v5  ;;  %v9757_v56 = vsub.f32 2.0, %v9725_v54  ;;  %v9786_v7 = vmul.f32 %v12043_v4, %v9754_v38  ;;  %v19139_v0 = vld [vmem:[#allocation218_spill] sm:$0xff] }
 0x43b   : > { %v12055_v14 = vpop.eup %12054  ;;  %v9787_v61 = vmul.f32 %v12045_v62, %v9755_v63  ;;  %v17421_v21 = vadd.f32 1e-05, %v9654_v26  ;;  %v17423_v28 = vadd.f32 1e-05, %v9655_v47  ;;  %v9820_v36 = vmul.f32 %v19136_v42, %v19136_v42 }
 0x43c   : > { %v12057_v59 = vpop.eup %12056  ;;  %v9821_v55 = vmul.f32 %v19137_v2, %v19137_v2  ;;  %12066 = vrcp.f32 %v17371_v22  ;;  %v9849_v60 = vmul.f32 %v9817_v25, %v9785_v52  ;;  %v9850_v48 = vmul.f32 %v9818_v1, %v9786_v7  ;;  %v19141_v7 = vld [vmem:[#allocation144_spill] sm:$0xff] }
 0x43d   : > { %v9851_v12 = vmul.f32 %v9819_v37, %v9787_v61  ;;  %v17430_v5 = vadd.f32 1e-05, %v9656_v19  ;;  %12068 = vrcp.f32 %v17375_v23  ;;  %v9728_v4 = vmul.f32 %v12055_v14, %v17346_v51 }
 0x43e   : > { %v9788_v62 = vmul.f32 %v12047_v16, %v9756_v9  ;;  %v9729_v47 = vmul.f32 %v12057_v59, %v17351_v20  ;;  %v9758_v41 = vsub.f32 2.0, %v9726_v13  ;;  %v9759_v31 = vsub.f32 2.0, %v9727_v6  ;;  %v19140_v6 = vld [vmem:[#allocation87_spill] sm:$0xff] }
 0x43f   : > { %v12059_v26 = vpop.eup %12058  ;;  %v9789_v50 = vmul.f32 %v12049_v29, %v9757_v56  ;;  %12070 = vrcp.f32 %v17377_v10  ;;  %v9822_v25 = vmul.f32 %v19138_v35, %v19138_v35  ;;  %v9823_v19 = vmul.f32 %v19139_v0, %v19139_v0 }
 0x440   : > { %v12061_v33 = vpop.eup %12060  ;;  %v9852_v54 = vmul.f32 %v9820_v36, %v9788_v62  ;;  %v9881_v51 = vsel %vm379_vm0, %v9849_v60, 0.0  ;;  %v9882_v16 = vsel %vm379_vm0, %v9850_v48, 0.0  ;;  %v9884_v20 = vsel %vm379_vm0, %v9851_v12, 0.0 }
 0x441   : > { %v9853_v38 = vmul.f32 %v9821_v55, %v9789_v50  ;;  %12072 = vrcp.f32 %v17381_v8  ;;  %v9730_v29 = vmul.f32 %v12059_v26, %v17362_v34  ;;  %v9760_v63 = vsub.f32 2.0, %v9728_v4  ;;  %v19143_v50 = vld [vmem:[#allocation141_spill] sm:$0xff] }
 0x442   : > { %v9883_v49 = vadd.f32 %v9882_v16, %v9881_v51  ;;  %v12063_v1 = vpop.eup %12062  ;;  %v9731_v43 = vmul.f32 %v12061_v33, %v17364_v57  ;;  %v9761_v37 = vsub.f32 2.0, %v9729_v47  ;;  %v9790_v13 = vmul.f32 %v12051_v58, %v9758_v41  ;;  %v19142_v41 = vld [vmem:[#allocation150_spill] sm:$0xff] }
 0x443   : > { %v9791_v9 = vmul.f32 %v12053_v44, %v9759_v31  ;;  %v12065_v52 = vpop.eup %12064  ;;  %12074 = vrcp.f32 %v17383_v45  ;;  %v9824_v56 = vmul.f32 %v19140_v6, %v19140_v6  ;;  %v9825_v61 = vmul.f32 %v19141_v7, %v19141_v7 }
 0x444   : > { %v9885_v42 = vadd.f32 %v9884_v20, %v9883_v49  ;;  %v9854_v36 = vmul.f32 %v9822_v25, %v9790_v13  ;;  %v9886_v2 = vsel %vm379_vm0, %v9852_v54, 0.0  ;;  %v9888_v55 = vsel %vm379_vm0, %v9853_v38, 0.0  ;;  %v19144_v49 = vld [vmem:[#allocation113_spill] sm:$0xff] }
 0x445   : > { %v9855_v34 = vmul.f32 %v9823_v19, %v9791_v9  ;;  %12076 = vrcp.f32 %v17385_v39  ;;  %v9732_v57 = vmul.f32 %v12063_v1, %v17366_v24  ;;  %v9762_v58 = vsub.f32 2.0, %v9730_v29 }
 0x446   : > { %v9887_v44 = vadd.f32 %v9886_v2, %v9885_v42  ;;  %v12067_v60 = vpop.eup %12066  ;;  %v9733_v48 = vmul.f32 %v12065_v52, %v17369_v46  ;;  %v9763_v12 = vsub.f32 2.0, %v9731_v43  ;;  %v9792_v4 = vmul.f32 %v12055_v14, %v9760_v63 }
 0x447   : > { %v9793_v62 = vmul.f32 %v12057_v59, %v9761_v37  ;;  %v12069_v47 = vpop.eup %12068  ;;  %12078 = vrcp.f32 %v17389_v18  ;;  %v9826_v31 = vmul.f32 %v19142_v41, %v19142_v41  ;;  %v9827_v35 = vmul.f32 %v19143_v50, %v19143_v50  ;;  %v19145_v37 = vld [vmem:[#allocation129_spill] sm:$0xff] }
 0x448   : > { %v9889_v25 = vadd.f32 %v9888_v55, %v9887_v44  ;;  %v9856_v0 = vmul.f32 %v9824_v56, %v9792_v4  ;;  %v9890_v19 = vsel %vm379_vm0, %v9854_v36, 0.0  ;;  %v9892_v54 = vsel %vm379_vm0, %v9855_v34, 0.0  ;;  %v19147_v44 = vld [vmem:[#allocation158_spill] sm:$0xff] }
 0x449   : > { %v9857_v24 = vmul.f32 %v9825_v61, %v9793_v62  ;;  %v12071_v46 = vpop.eup %12070  ;;  %12080 = vrcp.f32 %v17391_v32  ;;  %v9734_v14 = vmul.f32 %v12067_v60, %v17371_v22  ;;  %v9764_v59 = vsub.f32 2.0, %v9732_v57  ;;  %v19146_v57 = vld [vmem:[#allocation162_spill] sm:$0xff] }
 0x44a   : > { %v9891_v38 = vadd.f32 %v9890_v19, %v9889_v25  ;;  %v9735_v51 = vmul.f32 %v12069_v47, %v17375_v23  ;;  %v9765_v16 = vsub.f32 2.0, %v9733_v48  ;;  %v9794_v20 = vmul.f32 %v12059_v26, %v9762_v58  ;;  %v19148_v19 = vld [vmem:[#allocation152_spill] sm:$0xff] }
 0x44b   : > { %v9795_v29 = vmul.f32 %v12061_v33, %v9763_v12  ;;  %v12073_v63 = vpop.eup %12072  ;;  %12082 = vrcp.f32 %v17393_v40  ;;  %v9828_v43 = vmul.f32 %v19144_v49, %v19144_v49  ;;  %v9829_v13 = vmul.f32 %v19145_v37, %v19145_v37 }
 0x44c   : > { %v9893_v9 = vadd.f32 %v9892_v54, %v9891_v38  ;;  %v9858_v6 = vmul.f32 %v9826_v31, %v9794_v20  ;;  %v9894_v22 = vsel %vm379_vm0, %v9856_v0, 0.0  ;;  %v9896_v7 = vsel %vm379_vm0, %v9857_v24, 0.0 }
 0x44d   : > { %v9859_v56 = vmul.f32 %v9827_v35, %v9795_v29  ;;  %v12075_v23 = vpop.eup %12074  ;;  %12084 = vrcp.f32 %v17396_v27  ;;  %v9736_v26 = vmul.f32 %v12071_v46, %v17377_v10  ;;  %v9766_v33 = vsub.f32 2.0, %v9734_v14  ;;  %v19149_v14 = vld [vmem:[#allocation119_spill] sm:$0xff] }
 0x44e   : > { %v9895_v61 = vadd.f32 %v9894_v22, %v9893_v9  ;;  %v9737_v42 = vmul.f32 %v12073_v63, %v17381_v8  ;;  %v9767_v36 = vsub.f32 2.0, %v9735_v51  ;;  %v9796_v34 = vmul.f32 %v12063_v1, %v9764_v59  ;;  %v19151_v22 = vld [vmem:[#allocation153_spill] sm:$0xff] }
 0x44f   : > { %v9797_v2 = vmul.f32 %v12065_v52, %v9765_v16  ;;  %v12077_v55 = vpop.eup %12076  ;;  %12086 = vrcp.f32 %v17400_v11  ;;  %v9830_v58 = vmul.f32 %v19146_v57, %v19146_v57  ;;  %v9831_v48 = vmul.f32 %v19147_v44, %v19147_v44 }
 0x450   : > { %v9897_v12 = vadd.f32 %v9896_v7, %v9895_v61  ;;  %v9860_v4 = vmul.f32 %v9828_v43, %v9796_v34  ;;  %v9898_v10 = vsel %vm379_vm0, %v9858_v6, 0.0  ;;  %v9900_v41 = vsel %vm379_vm0, %v9859_v56, 0.0  ;;  %v19150_v6 = vld [vmem:[#allocation149_spill] sm:$0xff] }
 0x451   : > { %v9861_v62 = vmul.f32 %v9829_v13, %v9797_v2  ;;  %v12079_v8 = vpop.eup %12078  ;;  %12088 = vrcp.f32 %v17403_v3  ;;  %v9738_v1 = vmul.f32 %v12075_v23, %v17383_v45  ;;  %v9768_v52 = vsub.f32 2.0, %v9736_v26 }
 0x452   : > { %v9899_v31 = vadd.f32 %v9898_v10, %v9897_v12  ;;  %v9739_v50 = vmul.f32 %v12077_v55, %v17385_v39  ;;  %v9769_v35 = vsub.f32 2.0, %v9737_v42  ;;  %v9798_v25 = vmul.f32 %v12067_v60, %v9766_v33 }
 0x453   : > { %v9799_v0 = vmul.f32 %v12069_v47, %v9767_v36  ;;  %v12081_v24 = vpop.eup %12080  ;;  %12090 = vrcp.f32 %v17405_v30  ;;  %v9832_v54 = vmul.f32 %v19148_v19, %v19148_v19  ;;  %v9833_v59 = vmul.f32 %v19149_v14, %v19149_v14 }
 0x454   : > { %v9901_v38 = vadd.f32 %v9900_v41, %v9899_v31  ;;  %v9862_v51 = vmul.f32 %v9830_v58, %v9798_v25  ;;  %v9902_v45 = vsel %vm379_vm0, %v9860_v4, 0.0  ;;  %v9904_v20 = vsel %vm379_vm0, %v9861_v62, 0.0  ;;  %v19153_v4 = vld [vmem:[#allocation189_spill] sm:$0xff] }
 0x455   : > { %v9863_v16 = vmul.f32 %v9831_v48, %v9799_v0  ;;  %v12083_v39 = vpop.eup %12082  ;;  %12092 = vrcp.f32 %v17407_v53  ;;  %v9740_v60 = vmul.f32 %v12079_v8, %v17389_v18  ;;  %v9770_v47 = vsub.f32 2.0, %v9738_v1  ;;  %v19152_v48 = vld [vmem:[#allocation167_spill] sm:$0xff] }
 0x456   : > { %v9903_v29 = vadd.f32 %v9902_v45, %v9901_v38  ;;  %v9741_v49 = vmul.f32 %v12081_v24, %v17391_v32  ;;  %v9771_v43 = vsub.f32 2.0, %v9739_v50  ;;  %v9800_v37 = vmul.f32 %v12071_v46, %v9768_v52 }
 0x457   : > { %v9801_v13 = vmul.f32 %v12073_v63, %v9769_v35  ;;  %v12085_v9 = vpop.eup %12084  ;;  %12094 = vrcp.f32 %v17411_v15  ;;  %v9834_v56 = vmul.f32 %v19150_v6, %v19150_v6  ;;  %v9835_v7 = vmul.f32 %v19151_v22, %v19151_v22 }
 0x458   : > { %v9905_v26 = vadd.f32 %v9904_v20, %v9903_v29  ;;  %v9864_v33 = vmul.f32 %v9832_v54, %v9800_v37  ;;  %v9906_v18 = vsel %vm379_vm0, %v9862_v51, 0.0  ;;  %v9908_v42 = vsel %vm379_vm0, %v9863_v16, 0.0  ;;  %v19154_v54 = vld [vmem:[#allocation138_spill] sm:$0xff] }
 0x459   : > { %v9865_v61 = vmul.f32 %v9833_v59, %v9801_v13  ;;  %v12087_v32 = vpop.eup %12086  ;;  %12096 = vrcp.f32 %v17413_v17  ;;  %v9742_v46 = vmul.f32 %v12083_v39, %v17393_v40  ;;  %v9772_v63 = vsub.f32 2.0, %v9740_v60  ;;  %v19155_v59 = vld [vmem:[#allocation165_spill] sm:$0xff] }
 0x45a   : > { %v9907_v36 = vadd.f32 %v9906_v18, %v9905_v26  ;;  %v9743_v34 = vmul.f32 %v12085_v9, %v17396_v27  ;;  %v9773_v2 = vsub.f32 2.0, %v9741_v49  ;;  %v9802_v57 = vmul.f32 %v12075_v23, %v9770_v47  ;;  %v19156_v60 = vld [vmem:[#allocation257_spill] sm:$0xff]  ;;  %v19160_v49 = vld [vmem:[#allocation179_spill] sm:$0xff]  ;;  %v19162_v18 = vld [vmem:[#allocation184_spill] sm:$0xff] }
 0x45b   : > { %v9803_v58 = vmul.f32 %v12077_v55, %v9771_v43  ;;  %v12089_v44 = vpop.eup %12088  ;;  %12098 = vrcp.f32 %v17421_v21  ;;  %v9836_v12 = vmul.f32 %v19152_v48, %v19152_v48  ;;  %v9837_v62 = vmul.f32 %v19153_v4, %v19153_v4  ;;  %v19161_v43 = vld [vmem:[#allocation276_spill] sm:$0xff]  ;;  %v19164_v48 = vld [vmem:[#allocation258_spill] sm:$0xff] }
 0x45c   : > { %v9909_v10 = vadd.f32 %v9908_v42, %v9907_v36  ;;  %v9866_v41 = vmul.f32 %v9834_v56, %v9802_v57  ;;  %v9910_v40 = vsel %vm379_vm0, %v9864_v33, 0.0  ;;  %v9912_v52 = vsel %vm379_vm0, %v9865_v61, 0.0 }
 0x45d   : > { %v9867_v1 = vmul.f32 %v9835_v7, %v9803_v58  ;;  %v12091_v27 = vpop.eup %12090  ;;  %12100 = vrcp.f32 %v17423_v28  ;;  %v9744_v23 = vmul.f32 %v12087_v32, %v17400_v11  ;;  %v9774_v55 = vsub.f32 2.0, %v9742_v46  ;;  %v19163_v46 = vld [vmem:[#allocation288_spill] sm:$0xff] }
 0x45e   : > { %v9911_v31 = vadd.f32 %v9910_v40, %v9909_v10  ;;  %v9745_v50 = vmul.f32 %v12089_v44, %v17403_v3  ;;  %v9775_v35 = vsub.f32 2.0, %v9743_v34  ;;  %v9804_v25 = vmul.f32 %v12079_v8, %v9772_v63  ;;  %v19157_v8 = vld [vmem:[#allocation172_spill] sm:$0xff] }
 0x45f   : > { %v9805_v0 = vmul.f32 %v12081_v24, %v9773_v2  ;;  %v12093_v19 = vpop.eup %12092  ;;  %12102 = vrcp.f32 %v17430_v5  ;;  %v9838_v14 = vmul.f32 %v19154_v54, %v19154_v54  ;;  %v9839_v38 = vmul.f32 %v19155_v59, %v19155_v59  ;;  %v19158_v24 = vld [vmem:[#allocation77_spill] sm:$0xff] }
 0x460   : > { %v9913_v51 = vadd.f32 %v9912_v52, %v9911_v31  ;;  %v9868_v16 = vmul.f32 %v9836_v12, %v9804_v25  ;;  %v9914_v11 = vsel %vm379_vm0, %v9866_v41, 0.0  ;;  %v9916_v20 = vsel %vm379_vm0, %v9867_v1, 0.0  ;;  %v19170_v41 = vld [vmem:[#allocation157_spill] sm:$0xff]  ;;  %v19171_v1 = vld [vmem:[#allocation278_spill] sm:$0xff] }
 0x461   : > { %v9869_v45 = vmul.f32 %v9837_v62, %v9805_v0  ;;  %v12095_v3 = vpop.eup %12094  ;;  %v19159_v47 = vsub.f32 %v19157_v8, %v19158_v24  ;;  %v9234_v37 = vadd.f32 %v19161_v43, %v19160_v49  ;;  %v9746_v13 = vmul.f32 %v12091_v27, %v17405_v30  ;;  %v19169_v62 = vld [vmem:[#allocation277_spill] sm:$0xff] }
 0x462   : > { %v9915_v6 = vadd.f32 %v9914_v11, %v9913_v51  ;;  %v9776_v56 = vsub.f32 2.0, %v9744_v23  ;;  %v9777_v22 = vsub.f32 2.0, %v9745_v50  ;;  %v9806_v7 = vmul.f32 %v12083_v39, %v9774_v55  ;;  %v19165_v39 = vld [vmem:[#allocation142_spill] sm:$0xff]  ;;  %v19172_v11 = vld [vmem:[#allocation259_spill] sm:$0xff] }
 0x463   : > { %v9142_v29 = vsub.f32 %v19159_v47, %v19156_v60  ;;  %v9807_v26 = vmul.f32 %v12085_v9, %v9775_v35  ;;  %v12097_v33 = vpop.eup %12096  ;;  %v9747_v61 = vmul.f32 %v12093_v19, %v17407_v53  ;;  %v9840_v42 = vmul.f32 %v19162_v18, %v19162_v18  ;;  %v19166_v9 = vld [vmem:[#allocation240_spill] sm:$0xff]  ;;  %v19168_v53 = vld [vmem:[#allocation126_spill] sm:$0xff] }
 0x464   : > { %v9841_v63 = vmul.f32 %v19163_v46, %v19163_v46  ;;  %v9917_v36 = vadd.f32 %v9916_v20, %v9915_v6  ;;  %v9870_v34 = vmul.f32 %v9838_v14, %v9806_v7  ;;  %v9918_v57 = vsel %vm379_vm0, %v9868_v16, 0.0  ;;  %v19173_v20 = vld [vmem:[#allocation160_spill] sm:$0xff]  ;;  %v19174_v60 = vld [vmem:[#allocation242_spill] sm:$0xff] }
 0x465   : > { %v9871_v2 = vmul.f32 %v9839_v38, %v9807_v26  ;;  %v9920_v30 = vsel %vm379_vm0, %v9869_v45, 0.0  ;;  %v12099_v58 = vpop.eup %12098  ;;  %v19167_v12 = vsub.f32 %v19165_v39, %v19166_v9  ;;  %v9235_v10 = vadd.f32 %v19169_v62, %v19168_v53  ;;  %v19178_v47 = vld [vmem:[#allocation280_spill] sm:$0xff] }
 0x466   : > { %v9236_v40 = vadd.f32 %v19171_v1, %v19170_v41  ;;  %v9919_v52 = vadd.f32 %v9918_v57, %v9917_v36  ;;  %v9748_v23 = vmul.f32 %v12095_v3, %v17411_v15  ;;  %v9778_v55 = vsub.f32 2.0, %v9746_v13 }
 0x467   : > { %v9143_v4 = vsub.f32 %v19167_v12, %v19164_v48  ;;  %v9808_v31 = vmul.f32 %v12087_v32, %v9776_v56  ;;  %v9809_v50 = vmul.f32 %v12089_v44, %v9777_v22  ;;  %v12101_v35 = vpop.eup %12100  ;;  %v9749_v25 = vmul.f32 %v12097_v33, %v17413_v17  ;;  %v19176_v32 = vld [vmem:[#allocation177_spill] sm:$0xff]  ;;  %v19177_v44 = vld [vmem:[#allocation279_spill] sm:$0xff] }
 0x468   : > { %v9779_v0 = vsub.f32 2.0, %v9747_v61  ;;  %v9842_v54 = vmul.f32 %v9234_v37, %v9234_v37  ;;  %v9921_v14 = vadd.f32 %v9920_v30, %v9919_v52  ;;  %v9922_v51 = vsel %vm379_vm0, %v9870_v34, 0.0 }
 0x469   : > { %v9872_v59 = vmul.f32 %v9840_v42, %v9808_v31  ;;  %v9873_v38 = vmul.f32 %v9841_v63, %v9809_v50  ;;  %v9924_v16 = vsel %vm379_vm0, %v9871_v2, 0.0  ;;  %v12103_v45 = vpop.eup %12102  ;;  %v19175_v15 = vsub.f32 %v19173_v20, %v19174_v60  ;;  %v19179_v63 = vld [vmem:[#allocation262_spill] sm:$0xff] }
 0x46a   : > { %v9237_v24 = vadd.f32 %v19177_v44, %v19176_v32  ;;  %v9238_v17 = vadd.f32 %v19178_v47, %v9142_v29  ;;  %v9923_v49 = vadd.f32 %v9922_v51, %v9921_v14  ;;  %v9750_v43 = vmul.f32 %v12099_v58, %v17421_v21  ;;  %v19180_v29 = vld [vmem:[#allocation283_spill] sm:$0xff] }
 0x46b   : > { %v9144_v8 = vsub.f32 %v19175_v15, %v19172_v11  ;;  %v9780_v37 = vsub.f32 2.0, %v9748_v23  ;;  %v9810_v13 = vmul.f32 %v12091_v27, %v9778_v55  ;;  %v9843_v6 = vmul.f32 %v9235_v10, %v9235_v10 }
 0x46c   : > { %v9751_v56 = vmul.f32 %v12101_v35, %v17423_v28  ;;  %v9781_v22 = vsub.f32 2.0, %v9749_v25  ;;  %v9811_v7 = vmul.f32 %v12093_v19, %v9779_v0  ;;  %v9925_v26 = vadd.f32 %v9924_v16, %v9923_v49 }
 0x46d   : > { %v9844_v61 = vmul.f32 %v9236_v40, %v9236_v40  ;;  %v9874_v18 = vmul.f32 %v9842_v54, %v9810_v13  ;;  %v9926_v42 = vsel %vm379_vm0, %v9872_v59, 0.0  ;;  %v9928_v46 = vsel %vm379_vm0, %v9873_v38, 0.0 }
 0x46e   : > { %v9208_v36 = vmul.f32 729.0, %v19179_v63  ;;  %v9239_v34 = vadd.f32 %v19180_v29, %v9143_v4  ;;  %v9752_v21 = vmul.f32 %v12103_v45, %v17430_v5  ;;  %v9927_v2 = vadd.f32 %v9926_v42, %v9925_v26 }
 0x46f   : > { %v9782_v27 = vsub.f32 2.0, %v9750_v43  ;;  %v9812_v57 = vmul.f32 %v12095_v3, %v9780_v37  ;;  %v9845_v30 = vmul.f32 %v9237_v24, %v9237_v24  ;;  %v9875_v28 = vmul.f32 %v9843_v6, %v9811_v7 }
 0x470   : > { %v9240_v48 = vadd.f32 %v9208_v36, %v9144_v8  ;;  %v9783_v19 = vsub.f32 2.0, %v9751_v56  ;;  %v9929_v39 = vadd.f32 %v9928_v46, %v9927_v2  ;;  %v9813_v9 = vmul.f32 %v12097_v33, %v9781_v22 }
 0x471   : > { %v9846_v12 = vmul.f32 %v9238_v17, %v9238_v17  ;;  %v9876_v53 = vmul.f32 %v9844_v61, %v9812_v57  ;;  %v9930_v62 = vsel %vm379_vm0, %v9874_v18, 0.0  ;;  %v9784_v10 = vsub.f32 2.0, %v9752_v21 }
 0x472   : > { %v9931_v41 = vadd.f32 %v9930_v62, %v9929_v39  ;;  %v9814_v1 = vmul.f32 %v12099_v58, %v9782_v27  ;;  %v9847_v40 = vmul.f32 %v9239_v34, %v9239_v34  ;;  %v9877_v4 = vmul.f32 %v9845_v30, %v9813_v9 }
 0x473   : > { %v9932_v5 = vsel %vm379_vm0, %v9875_v28, 0.0  ;;  %v9815_v23 = vmul.f32 %v12101_v35, %v9783_v19  ;;  %v9848_v3 = vmul.f32 %v9240_v48, %v9240_v48  ;;  %v9934_v31 = vsel %vm379_vm0, %v9876_v53, 0.0 }
 0x474   : > { %v9933_v52 = vadd.f32 %v9932_v5, %v9931_v41  ;;  %v9878_v55 = vmul.f32 %v9846_v12, %v9814_v1  ;;  %v9816_v25 = vmul.f32 %v12103_v45, %v9784_v10  ;;  %v9936_v0 = vsel %vm379_vm0, %v9877_v4, 0.0 }
 0x475   : > { %v9879_v33 = vmul.f32 %v9847_v40, %v9815_v23 }
 0x476   : > { %v9935_v50 = vadd.f32 %v9934_v31, %v9933_v52  ;;  %v9880_v14 = vmul.f32 %v9848_v3, %v9816_v25  ;;  %v9938_v58 = vsel %vm379_vm0, %v9878_v55, 0.0 }
 0x477   : > { %v9940_v38 = vsel %vm379_vm0, %v9879_v33, 0.0 }
 0x478   : > { %v9937_v54 = vadd.f32 %v9936_v0, %v9935_v50  ;;  %v9942_v35 = vsel %vm379_vm0, %v9880_v14, 0.0 }
 0x47a   : > { %v9939_v59 = vadd.f32 %v9938_v58, %v9937_v54 }
 0x47c   : > { %v9941_v51 = vadd.f32 %v9940_v38, %v9939_v59 }
 0x47e   : > { %v9943_v16 = vadd.f32 %v9942_v35, %v9941_v51 }
 0x480   : > { %9944 = vadd.xlane.f32.xlu0 %v9943_v16 }
 0x50d   : > { %v9945_v11 = vpop.xlane.xlu0 %9944 }
 0x50e   : > { %v9946_v20 = vrot.slane %v9945_v11, 4 }
 0x510   : > { %v9947_v45 = vadd.f32 %v9946_v20, %v9945_v11 }
 0x512   : > { %v9948_v60 = vrot.slane %v9947_v45, 2 }
 0x514   : > { %v9949_v15 = vadd.f32 %v9948_v60, %v9947_v45 }
 0x516   : > { %v9950_v8 = vrot.slane %v9949_v15, 1 }
 0x518   : > { %v9951_v32 = vadd.f32 %v9950_v8, %v9949_v15 }
 0x51a   : > { %11990 = vpush %v9951_v32 }
 0x54b   : > { %s11991_s29 = spop %11990 }
 0x54c   : > { %v9953_v44 = vstv %s11991_s29 }
 0x54d   : > { %9955 = vst.msk [vmem:[%s199_s22] sm:$0x1] %vm9954_vm4, %v9953_v44 }
 0x54e PF: > { %p15_p11 = scmp.ge.s32.totalorder %s12277_s14, 4   ;;  %s19181_s9 = smov %s12224_s10 }
 0x54f   : > { %s19182_s10 = smov %s12228_s11  ;;  %s19183_s11 = smov %s12287_s17 }
 0x550   : > { %s19184_s12 = smov %s12277_s14  ;;  %17 = sbr.rel (!%p15_p11) target bundleno = 5 (0x5), region = 83 }
 0x557   :  { %9973 = vsyncpa [#allocation4], 1 }
 0x558   :  { %9975 = vsyncpa [#allocation4 + $0x1], 1 }
 0x559   :  { %9976 = vsyncpa [#allocation6], 1 }
 0x55a   :  { %9978 = vsyncpa [#allocation6 + $0x1], 1 }

</bundles_post_ra>
